<compile_context>
chip_gen: v6e
topology: v6e:2x2x1
jax: 0.10.0
libtpu: 0.0.40
codegen_flags: <defaults>
</compile_context>

<pallas_src>
import jax
import jax.numpy as jnp
from jax.experimental import pallas as pl
from jax.experimental.pallas import tpu as pltpu


_LEAKY_SLOPE = 0.01          # nn.LeakyReLU() default negative_slope
_CHANNELS = [(256, 256), (256, 128), (128, 64), (64, 32)]   # conv1..conv4 (3x3)
_CONV5 = (32, 1)                                            # conv5 (1x1)


# ----------------------------------------------------------------------------
# In-kernel helpers (operate on values; everything stays in VMEM/vregs)
# ----------------------------------------------------------------------------
def _reflect_pad1(x):
    """ReflectionPad2d(1) on an NHWC value (corners match PyTorch)."""
    x = jnp.concatenate([x[:, 1:2], x, x[:, -2:-1]], axis=1)
    x = jnp.concatenate([x[:, :, 1:2], x, x[:, :, -2:-1]], axis=2)
    return x


def _conv3x3_reflect_leaky(x, w_flat_bf16, b):
    """reflect-pad(1) + 3x3 conv (one im2col MXU matmul) + LeakyReLU(0.01).

    x:            (N, H, W, Cin)   f32 value
    w_flat_bf16:  (9*Cin, Cout)    bf16 (HWIO flattened, tap-major / Cin-minor)
    b:            (1, Cout)        f32
    returns       (N, H, W, Cout)  f32
    """
    N, H, W, Cin = x.shape
    Cout = w_flat_bf16.shape[1]
    xp = _reflect_pad1(x)                                   # (N, H+2, W+2, Cin)
    cols = []
    for dy in range(3):
        for dx in range(3):
            cols.append(xp[:, dy:dy + H, dx:dx + W, :].reshape(N * H * W, Cin))
    # im2col patch matrix: M = N*H*W rows, K = 9*Cin — one matmul on the MXU.
    patches = jnp.concatenate(cols, axis=-1).astype(jnp.bfloat16)
    acc = jnp.dot(patches, w_flat_bf16, preferred_element_type=jnp.float32)
    acc = acc + b                                           # (N*H*W, Cout)
    acc = jnp.where(acc > 0, acc, _LEAKY_SLOPE * acc)       # LeakyReLU, f32 VPU
    return acc.reshape(N, H, W, Cout)


# ----------------------------------------------------------------------------
# Fused decoder kernel
# ----------------------------------------------------------------------------
def _decoder_kernel(x_ref,
                    w1_ref, b1_ref, w2_ref, b2_ref,
                    w3_ref, b3_ref, w4_ref, b4_ref,
                    w5_ref, b5_ref, o_ref):
    """x_ref: (N, H, W, 256) f32 NHWC.  o_ref: (N, H*W) f32 (lane-dense)."""
    N, H, W, _ = x_ref.shape
    a = x_ref[...]
    a = _conv3x3_reflect_leaky(a, w1_ref[...], b1_ref[...])   # -> 256
    a = _conv3x3_reflect_leaky(a, w2_ref[...], b2_ref[...])   # -> 128
    a = _conv3x3_reflect_leaky(a, w3_ref[...], b3_ref[...])   # -> 64
    a = _conv3x3_reflect_leaky(a, w4_ref[...], b4_ref[...])   # -> 32

    # conv5: 1x1, Cout=1  ==>  VPU multiply + lane reduction (MXU skipped),
    # then tanh/2 + 0.5, stored as a lane-dense (N, H*W) slab.
    w5 = w5_ref[0]                          # (32,)  f32
    b5 = b5_ref[0]                          # scalar from SMEM
    y = jnp.sum(a * w5, axis=-1) + b5       # (N, H, W)
    y = jnp.tanh(y) * 0.5 + 0.5
    o_ref[...] = y.reshape(N, H * W).astype(o_ref.dtype)


# ----------------------------------------------------------------------------
# Wrapper: NCHW in / NCHW out, weights flattened + cast to bf16 at trace time
# ----------------------------------------------------------------------------
def decoder_forward(x_nchw, params):
    N, C0, H, W = x_nchw.shape
    x = jnp.transpose(x_nchw, (0, 2, 3, 1))                 # NHWC

    flat_ws, flat_bs = [], []
    for i in range(4):
        w, b = params[f"conv{i + 1}"]                       # (3,3,Cin,Cout), (Cout,)
        cin, cout = w.shape[2], w.shape[3]
        flat_ws.append(w.reshape(9 * cin, cout).astype(jnp.bfloat16))
        flat_bs.append(b.reshape(1, cout).astype(jnp.float32))
    w5, b5 = params["conv5"]                                # (32, 1), (1,)
    w5v = w5.reshape(1, -1).astype(jnp.float32)             # (1, 32)
    b5v = b5.reshape(1).astype(jnp.float32)                 # (1,) scalar -> SMEM

    vmem = pltpu.MemorySpace.VMEM
    smem = pltpu.MemorySpace.SMEM
    out = pl.pallas_call(
        _decoder_kernel,
        out_shape=jax.ShapeDtypeStruct((N, H * W), jnp.float32),
        in_specs=[pl.BlockSpec(memory_space=vmem)] * 10
                 + [pl.BlockSpec(memory_space=smem)],
        out_specs=pl.BlockSpec(memory_space=vmem),
    )(x,
      flat_ws[0], flat_bs[0], flat_ws[1], flat_bs[1],
      flat_ws[2], flat_bs[2], flat_ws[3], flat_bs[3],
      w5v, b5v)
    return out.reshape(N, 1, H, W)                          # back to NCHW


decoder_forward_jit = jax.jit(decoder_forward)


# ----------------------------------------------------------------------------
# Parameter init (shapes match the PyTorch module; values differ from PyTorch
# defaults — load a checkpoint for exact parity)
# ----------------------------------------------------------------------------
def init_decoder_params(key):
    params = {}
    keys = jax.random.split(key, 10)
    ki = 0
    for i, (cin, cout) in enumerate(_CHANNELS):
        fan_in = cin * 9
        w = jax.random.normal(keys[ki], (3, 3, cin, cout), jnp.float32) / jnp.sqrt(fan_in)
        ki += 1
        b = 0.01 * jax.random.normal(keys[ki], (cout,), jnp.float32)
        ki += 1
        params[f"conv{i + 1}"] = (w, b)
    cin, cout = _CONV5
    w = jax.random.normal(keys[ki], (cin, cout), jnp.float32) / jnp.sqrt(cin)
    ki += 1
    b = 0.01 * jax.random.normal(keys[ki], (cout,), jnp.float32)
    params["conv5"] = (w, b)
    return params


# ----------------------------------------------------------------------------
if __name__ == "__main__":
    key = jax.random.PRNGKey(0)
    k_params, k_x = jax.random.split(key)
    params = init_decoder_params(k_params)
    # Decoder expects 256 input channels (fixed by the module); small spatial.
    x = jax.random.normal(k_x, (2, 256, 8, 8), jnp.float32)
    y = decoder_forward_jit(x, params)
    y = jax.block_until_ready(y)
    assert y.shape == (2, 1, 8, 8), y.shape
    assert bool(jnp.all(jnp.isfinite(y)))
    assert bool(jnp.all((y >= 0.0) & (y <= 1.0)))   # tanh/2 + 0.5 range
    print("KERNEL_OK")
</pallas_src>

<mosaic_0001>
module attributes {stable_mosaic.version = 11 : i64} {
  func.func @_decoder_kernel(%arg0: memref<2x8x8x256xf32, #tpu.memory_space<vmem>>, %arg1: memref<2304x256xbf16, #tpu.memory_space<vmem>>, %arg2: memref<1x256xf32, #tpu.memory_space<vmem>>, %arg3: memref<2304x128xbf16, #tpu.memory_space<vmem>>, %arg4: memref<1x128xf32, #tpu.memory_space<vmem>>, %arg5: memref<1152x64xbf16, #tpu.memory_space<vmem>>, %arg6: memref<1x64xf32, #tpu.memory_space<vmem>>, %arg7: memref<576x32xbf16, #tpu.memory_space<vmem>>, %arg8: memref<1x32xf32, #tpu.memory_space<vmem>>, %arg9: memref<1x32xf32, #tpu.memory_space<vmem>>, %arg10: memref<1xf32, #tpu.memory_space<smem>>, %arg11: memref<2x64xf32, #tpu.memory_space<vmem>>) attributes {dimension_semantics = [], scalar_prefetch = 0 : i64, scratch_operands = 0 : i64, tpu.core_type = #tpu.core_type<tc>} {
    %c0 = arith.constant 0 : index
    %c0_0 = arith.constant 0 : index
    %c0_1 = arith.constant 0 : index
    %c0_2 = arith.constant 0 : index
    %0 = vector.load %arg0[%c0, %c0_0, %c0_1, %c0_2] : memref<2x8x8x256xf32, #tpu.memory_space<vmem>>, vector<2x8x8x256xf32>
    %c0_3 = arith.constant 0 : index
    %c0_4 = arith.constant 0 : index
    %1 = vector.load %arg1[%c0_3, %c0_4] : memref<2304x256xbf16, #tpu.memory_space<vmem>>, vector<2304x256xbf16>
    %c0_5 = arith.constant 0 : index
    %c0_6 = arith.constant 0 : index
    %2 = vector.load %arg2[%c0_5, %c0_6] : memref<1x256xf32, #tpu.memory_space<vmem>>, vector<1x256xf32>
    %3 = vector.extract_strided_slice %0 {offsets = [0, 1, 0, 0], sizes = [2, 1, 8, 256], strides = [1, 1, 1, 1]} : vector<2x8x8x256xf32> to vector<2x1x8x256xf32>
    %4 = vector.extract_strided_slice %0 {offsets = [0, 6, 0, 0], sizes = [2, 1, 8, 256], strides = [1, 1, 1, 1]} : vector<2x8x8x256xf32> to vector<2x1x8x256xf32>
    %5 = tpu.concatenate %3, %0, %4 in 1 : vector<2x1x8x256xf32>, vector<2x8x8x256xf32>, vector<2x1x8x256xf32> -> vector<2x10x8x256xf32>
    %6 = vector.extract_strided_slice %5 {offsets = [0, 0, 1, 0], sizes = [2, 10, 1, 256], strides = [1, 1, 1, 1]} : vector<2x10x8x256xf32> to vector<2x10x1x256xf32>
    %7 = vector.extract_strided_slice %5 {offsets = [0, 0, 6, 0], sizes = [2, 10, 1, 256], strides = [1, 1, 1, 1]} : vector<2x10x8x256xf32> to vector<2x10x1x256xf32>
    %8 = tpu.concatenate %6, %5, %7 in 2 : vector<2x10x1x256xf32>, vector<2x10x8x256xf32>, vector<2x10x1x256xf32> -> vector<2x10x10x256xf32>
    %9 = vector.extract_strided_slice %8 {offsets = [0, 0, 0, 0], sizes = [2, 8, 8, 256], strides = [1, 1, 1, 1]} : vector<2x10x10x256xf32> to vector<2x8x8x256xf32>
    %10 = vector.shape_cast %9 : vector<2x8x8x256xf32> to vector<128x256xf32>
    %11 = vector.extract_strided_slice %8 {offsets = [0, 0, 1, 0], sizes = [2, 8, 8, 256], strides = [1, 1, 1, 1]} : vector<2x10x10x256xf32> to vector<2x8x8x256xf32>
    %12 = vector.shape_cast %11 : vector<2x8x8x256xf32> to vector<128x256xf32>
    %13 = vector.extract_strided_slice %8 {offsets = [0, 0, 2, 0], sizes = [2, 8, 8, 256], strides = [1, 1, 1, 1]} : vector<2x10x10x256xf32> to vector<2x8x8x256xf32>
    %14 = vector.shape_cast %13 : vector<2x8x8x256xf32> to vector<128x256xf32>
    %15 = vector.extract_strided_slice %8 {offsets = [0, 1, 0, 0], sizes = [2, 8, 8, 256], strides = [1, 1, 1, 1]} : vector<2x10x10x256xf32> to vector<2x8x8x256xf32>
    %16 = vector.shape_cast %15 : vector<2x8x8x256xf32> to vector<128x256xf32>
    %17 = vector.extract_strided_slice %8 {offsets = [0, 1, 1, 0], sizes = [2, 8, 8, 256], strides = [1, 1, 1, 1]} : vector<2x10x10x256xf32> to vector<2x8x8x256xf32>
    %18 = vector.shape_cast %17 : vector<2x8x8x256xf32> to vector<128x256xf32>
    %19 = vector.extract_strided_slice %8 {offsets = [0, 1, 2, 0], sizes = [2, 8, 8, 256], strides = [1, 1, 1, 1]} : vector<2x10x10x256xf32> to vector<2x8x8x256xf32>
    %20 = vector.shape_cast %19 : vector<2x8x8x256xf32> to vector<128x256xf32>
    %21 = vector.extract_strided_slice %8 {offsets = [0, 2, 0, 0], sizes = [2, 8, 8, 256], strides = [1, 1, 1, 1]} : vector<2x10x10x256xf32> to vector<2x8x8x256xf32>
    %22 = vector.shape_cast %21 : vector<2x8x8x256xf32> to vector<128x256xf32>
    %23 = vector.extract_strided_slice %8 {offsets = [0, 2, 1, 0], sizes = [2, 8, 8, 256], strides = [1, 1, 1, 1]} : vector<2x10x10x256xf32> to vector<2x8x8x256xf32>
    %24 = vector.shape_cast %23 : vector<2x8x8x256xf32> to vector<128x256xf32>
    %25 = vector.extract_strided_slice %8 {offsets = [0, 2, 2, 0], sizes = [2, 8, 8, 256], strides = [1, 1, 1, 1]} : vector<2x10x10x256xf32> to vector<2x8x8x256xf32>
    %26 = vector.shape_cast %25 : vector<2x8x8x256xf32> to vector<128x256xf32>
    %27 = tpu.concatenate %10, %12, %14, %16, %18, %20, %22, %24, %26 in 1 : vector<128x256xf32>, vector<128x256xf32>, vector<128x256xf32>, vector<128x256xf32>, vector<128x256xf32>, vector<128x256xf32>, vector<128x256xf32>, vector<128x256xf32>, vector<128x256xf32> -> vector<128x2304xf32>
    %28 = arith.truncf %27 : vector<128x2304xf32> to vector<128x2304xbf16>
    %cst = arith.constant dense<0.000000e+00> : vector<128x256xf32>
    %29 = tpu.matmul %28, %1, %cst {dimension_numbers = #tpu.dot_dimension_numbers<[1], [0], [0], [1], [0, 0, 1, 1], [], []>} : vector<128x2304xbf16>, vector<2304x256xbf16>, vector<128x256xf32> -> vector<128x256xf32>
    %30 = vector.broadcast %2 : vector<1x256xf32> to vector<128x256xf32>
    %31 = arith.addf %29, %30 : vector<128x256xf32>
    %cst_7 = arith.constant 0.000000e+00 : f32
    %32 = vector.broadcast %cst_7 : f32 to vector<128x256xf32>
    %33 = arith.cmpf ogt, %31, %32 : vector<128x256xf32>
    %cst_8 = arith.constant 0.00999999977 : f32
    %34 = vector.broadcast %cst_8 : f32 to vector<128x256xf32>
    %35 = arith.mulf %34, %31 : vector<128x256xf32>
    %36 = arith.select %33, %31, %35 : vector<128x256xi1>, vector<128x256xf32>
    %37 = vector.shape_cast %36 : vector<128x256xf32> to vector<2x8x8x256xf32>
    %c0_9 = arith.constant 0 : index
    %c0_10 = arith.constant 0 : index
    %38 = vector.load %arg3[%c0_9, %c0_10] : memref<2304x128xbf16, #tpu.memory_space<vmem>>, vector<2304x128xbf16>
    %c0_11 = arith.constant 0 : index
    %c0_12 = arith.constant 0 : index
    %39 = vector.load %arg4[%c0_11, %c0_12] : memref<1x128xf32, #tpu.memory_space<vmem>>, vector<1x128xf32>
    %40 = vector.extract_strided_slice %37 {offsets = [0, 1, 0, 0], sizes = [2, 1, 8, 256], strides = [1, 1, 1, 1]} : vector<2x8x8x256xf32> to vector<2x1x8x256xf32>
    %41 = vector.extract_strided_slice %37 {offsets = [0, 6, 0, 0], sizes = [2, 1, 8, 256], strides = [1, 1, 1, 1]} : vector<2x8x8x256xf32> to vector<2x1x8x256xf32>
    %42 = tpu.concatenate %40, %37, %41 in 1 : vector<2x1x8x256xf32>, vector<2x8x8x256xf32>, vector<2x1x8x256xf32> -> vector<2x10x8x256xf32>
    %43 = vector.extract_strided_slice %42 {offsets = [0, 0, 1, 0], sizes = [2, 10, 1, 256], strides = [1, 1, 1, 1]} : vector<2x10x8x256xf32> to vector<2x10x1x256xf32>
    %44 = vector.extract_strided_slice %42 {offsets = [0, 0, 6, 0], sizes = [2, 10, 1, 256], strides = [1, 1, 1, 1]} : vector<2x10x8x256xf32> to vector<2x10x1x256xf32>
    %45 = tpu.concatenate %43, %42, %44 in 2 : vector<2x10x1x256xf32>, vector<2x10x8x256xf32>, vector<2x10x1x256xf32> -> vector<2x10x10x256xf32>
    %46 = vector.extract_strided_slice %45 {offsets = [0, 0, 0, 0], sizes = [2, 8, 8, 256], strides = [1, 1, 1, 1]} : vector<2x10x10x256xf32> to vector<2x8x8x256xf32>
    %47 = vector.shape_cast %46 : vector<2x8x8x256xf32> to vector<128x256xf32>
    %48 = vector.extract_strided_slice %45 {offsets = [0, 0, 1, 0], sizes = [2, 8, 8, 256], strides = [1, 1, 1, 1]} : vector<2x10x10x256xf32> to vector<2x8x8x256xf32>
    %49 = vector.shape_cast %48 : vector<2x8x8x256xf32> to vector<128x256xf32>
    %50 = vector.extract_strided_slice %45 {offsets = [0, 0, 2, 0], sizes = [2, 8, 8, 256], strides = [1, 1, 1, 1]} : vector<2x10x10x256xf32> to vector<2x8x8x256xf32>
    %51 = vector.shape_cast %50 : vector<2x8x8x256xf32> to vector<128x256xf32>
    %52 = vector.extract_strided_slice %45 {offsets = [0, 1, 0, 0], sizes = [2, 8, 8, 256], strides = [1, 1, 1, 1]} : vector<2x10x10x256xf32> to vector<2x8x8x256xf32>
    %53 = vector.shape_cast %52 : vector<2x8x8x256xf32> to vector<128x256xf32>
    %54 = vector.extract_strided_slice %45 {offsets = [0, 1, 1, 0], sizes = [2, 8, 8, 256], strides = [1, 1, 1, 1]} : vector<2x10x10x256xf32> to vector<2x8x8x256xf32>
    %55 = vector.shape_cast %54 : vector<2x8x8x256xf32> to vector<128x256xf32>
    %56 = vector.extract_strided_slice %45 {offsets = [0, 1, 2, 0], sizes = [2, 8, 8, 256], strides = [1, 1, 1, 1]} : vector<2x10x10x256xf32> to vector<2x8x8x256xf32>
    %57 = vector.shape_cast %56 : vector<2x8x8x256xf32> to vector<128x256xf32>
    %58 = vector.extract_strided_slice %45 {offsets = [0, 2, 0, 0], sizes = [2, 8, 8, 256], strides = [1, 1, 1, 1]} : vector<2x10x10x256xf32> to vector<2x8x8x256xf32>
    %59 = vector.shape_cast %58 : vector<2x8x8x256xf32> to vector<128x256xf32>
    %60 = vector.extract_strided_slice %45 {offsets = [0, 2, 1, 0], sizes = [2, 8, 8, 256], strides = [1, 1, 1, 1]} : vector<2x10x10x256xf32> to vector<2x8x8x256xf32>
    %61 = vector.shape_cast %60 : vector<2x8x8x256xf32> to vector<128x256xf32>
    %62 = vector.extract_strided_slice %45 {offsets = [0, 2, 2, 0], sizes = [2, 8, 8, 256], strides = [1, 1, 1, 1]} : vector<2x10x10x256xf32> to vector<2x8x8x256xf32>
    %63 = vector.shape_cast %62 : vector<2x8x8x256xf32> to vector<128x256xf32>
    %64 = tpu.concatenate %47, %49, %51, %53, %55, %57, %59, %61, %63 in 1 : vector<128x256xf32>, vector<128x256xf32>, vector<128x256xf32>, vector<128x256xf32>, vector<128x256xf32>, vector<128x256xf32>, vector<128x256xf32>, vector<128x256xf32>, vector<128x256xf32> -> vector<128x2304xf32>
    %65 = arith.truncf %64 : vector<128x2304xf32> to vector<128x2304xbf16>
    %cst_13 = arith.constant dense<0.000000e+00> : vector<128x128xf32>
    %66 = tpu.matmul %65, %38, %cst_13 {dimension_numbers = #tpu.dot_dimension_numbers<[1], [0], [0], [1], [0, 0, 1, 1], [], []>} : vector<128x2304xbf16>, vector<2304x128xbf16>, vector<128x128xf32> -> vector<128x128xf32>
    %67 = vector.broadcast %39 : vector<1x128xf32> to vector<128x128xf32>
    %68 = arith.addf %66, %67 : vector<128x128xf32>
    %cst_14 = arith.constant 0.000000e+00 : f32
    %69 = vector.broadcast %cst_14 : f32 to vector<128x128xf32>
    %70 = arith.cmpf ogt, %68, %69 : vector<128x128xf32>
    %cst_15 = arith.constant 0.00999999977 : f32
    %71 = vector.broadcast %cst_15 : f32 to vector<128x128xf32>
    %72 = arith.mulf %71, %68 : vector<128x128xf32>
    %73 = arith.select %70, %68, %72 : vector<128x128xi1>, vector<128x128xf32>
    %74 = vector.shape_cast %73 : vector<128x128xf32> to vector<2x8x8x128xf32>
    %c0_16 = arith.constant 0 : index
    %c0_17 = arith.constant 0 : index
    %75 = vector.load %arg5[%c0_16, %c0_17] : memref<1152x64xbf16, #tpu.memory_space<vmem>>, vector<1152x64xbf16>
    %c0_18 = arith.constant 0 : index
    %c0_19 = arith.constant 0 : index
    %76 = vector.load %arg6[%c0_18, %c0_19] : memref<1x64xf32, #tpu.memory_space<vmem>>, vector<1x64xf32>
    %77 = vector.extract_strided_slice %74 {offsets = [0, 1, 0, 0], sizes = [2, 1, 8, 128], strides = [1, 1, 1, 1]} : vector<2x8x8x128xf32> to vector<2x1x8x128xf32>
    %78 = vector.extract_strided_slice %74 {offsets = [0, 6, 0, 0], sizes = [2, 1, 8, 128], strides = [1, 1, 1, 1]} : vector<2x8x8x128xf32> to vector<2x1x8x128xf32>
    %79 = tpu.concatenate %77, %74, %78 in 1 : vector<2x1x8x128xf32>, vector<2x8x8x128xf32>, vector<2x1x8x128xf32> -> vector<2x10x8x128xf32>
    %80 = vector.extract_strided_slice %79 {offsets = [0, 0, 1, 0], sizes = [2, 10, 1, 128], strides = [1, 1, 1, 1]} : vector<2x10x8x128xf32> to vector<2x10x1x128xf32>
    %81 = vector.extract_strided_slice %79 {offsets = [0, 0, 6, 0], sizes = [2, 10, 1, 128], strides = [1, 1, 1, 1]} : vector<2x10x8x128xf32> to vector<2x10x1x128xf32>
    %82 = tpu.concatenate %80, %79, %81 in 2 : vector<2x10x1x128xf32>, vector<2x10x8x128xf32>, vector<2x10x1x128xf32> -> vector<2x10x10x128xf32>
    %83 = vector.extract_strided_slice %82 {offsets = [0, 0, 0, 0], sizes = [2, 8, 8, 128], strides = [1, 1, 1, 1]} : vector<2x10x10x128xf32> to vector<2x8x8x128xf32>
    %84 = vector.shape_cast %83 : vector<2x8x8x128xf32> to vector<128x128xf32>
    %85 = vector.extract_strided_slice %82 {offsets = [0, 0, 1, 0], sizes = [2, 8, 8, 128], strides = [1, 1, 1, 1]} : vector<2x10x10x128xf32> to vector<2x8x8x128xf32>
    %86 = vector.shape_cast %85 : vector<2x8x8x128xf32> to vector<128x128xf32>
    %87 = vector.extract_strided_slice %82 {offsets = [0, 0, 2, 0], sizes = [2, 8, 8, 128], strides = [1, 1, 1, 1]} : vector<2x10x10x128xf32> to vector<2x8x8x128xf32>
    %88 = vector.shape_cast %87 : vector<2x8x8x128xf32> to vector<128x128xf32>
    %89 = vector.extract_strided_slice %82 {offsets = [0, 1, 0, 0], sizes = [2, 8, 8, 128], strides = [1, 1, 1, 1]} : vector<2x10x10x128xf32> to vector<2x8x8x128xf32>
    %90 = vector.shape_cast %89 : vector<2x8x8x128xf32> to vector<128x128xf32>
    %91 = vector.extract_strided_slice %82 {offsets = [0, 1, 1, 0], sizes = [2, 8, 8, 128], strides = [1, 1, 1, 1]} : vector<2x10x10x128xf32> to vector<2x8x8x128xf32>
    %92 = vector.shape_cast %91 : vector<2x8x8x128xf32> to vector<128x128xf32>
    %93 = vector.extract_strided_slice %82 {offsets = [0, 1, 2, 0], sizes = [2, 8, 8, 128], strides = [1, 1, 1, 1]} : vector<2x10x10x128xf32> to vector<2x8x8x128xf32>
    %94 = vector.shape_cast %93 : vector<2x8x8x128xf32> to vector<128x128xf32>
    %95 = vector.extract_strided_slice %82 {offsets = [0, 2, 0, 0], sizes = [2, 8, 8, 128], strides = [1, 1, 1, 1]} : vector<2x10x10x128xf32> to vector<2x8x8x128xf32>
    %96 = vector.shape_cast %95 : vector<2x8x8x128xf32> to vector<128x128xf32>
    %97 = vector.extract_strided_slice %82 {offsets = [0, 2, 1, 0], sizes = [2, 8, 8, 128], strides = [1, 1, 1, 1]} : vector<2x10x10x128xf32> to vector<2x8x8x128xf32>
    %98 = vector.shape_cast %97 : vector<2x8x8x128xf32> to vector<128x128xf32>
    %99 = vector.extract_strided_slice %82 {offsets = [0, 2, 2, 0], sizes = [2, 8, 8, 128], strides = [1, 1, 1, 1]} : vector<2x10x10x128xf32> to vector<2x8x8x128xf32>
    %100 = vector.shape_cast %99 : vector<2x8x8x128xf32> to vector<128x128xf32>
    %101 = tpu.concatenate %84, %86, %88, %90, %92, %94, %96, %98, %100 in 1 : vector<128x128xf32>, vector<128x128xf32>, vector<128x128xf32>, vector<128x128xf32>, vector<128x128xf32>, vector<128x128xf32>, vector<128x128xf32>, vector<128x128xf32>, vector<128x128xf32> -> vector<128x1152xf32>
    %102 = arith.truncf %101 : vector<128x1152xf32> to vector<128x1152xbf16>
    %cst_20 = arith.constant dense<0.000000e+00> : vector<128x64xf32>
    %103 = tpu.matmul %102, %75, %cst_20 {dimension_numbers = #tpu.dot_dimension_numbers<[1], [0], [0], [1], [0, 0, 1, 1], [], []>} : vector<128x1152xbf16>, vector<1152x64xbf16>, vector<128x64xf32> -> vector<128x64xf32>
    %104 = vector.broadcast %76 : vector<1x64xf32> to vector<128x64xf32>
    %105 = arith.addf %103, %104 : vector<128x64xf32>
    %cst_21 = arith.constant 0.000000e+00 : f32
    %106 = vector.broadcast %cst_21 : f32 to vector<128x64xf32>
    %107 = arith.cmpf ogt, %105, %106 : vector<128x64xf32>
    %cst_22 = arith.constant 0.00999999977 : f32
    %108 = vector.broadcast %cst_22 : f32 to vector<128x64xf32>
    %109 = arith.mulf %108, %105 : vector<128x64xf32>
    %110 = arith.select %107, %105, %109 : vector<128x64xi1>, vector<128x64xf32>
    %111 = vector.shape_cast %110 : vector<128x64xf32> to vector<2x8x8x64xf32>
    %c0_23 = arith.constant 0 : index
    %c0_24 = arith.constant 0 : index
    %112 = vector.load %arg7[%c0_23, %c0_24] : memref<576x32xbf16, #tpu.memory_space<vmem>>, vector<576x32xbf16>
    %c0_25 = arith.constant 0 : index
    %c0_26 = arith.constant 0 : index
    %113 = vector.load %arg8[%c0_25, %c0_26] : memref<1x32xf32, #tpu.memory_space<vmem>>, vector<1x32xf32>
    %114 = vector.extract_strided_slice %111 {offsets = [0, 1, 0, 0], sizes = [2, 1, 8, 64], strides = [1, 1, 1, 1]} : vector<2x8x8x64xf32> to vector<2x1x8x64xf32>
    %115 = vector.extract_strided_slice %111 {offsets = [0, 6, 0, 0], sizes = [2, 1, 8, 64], strides = [1, 1, 1, 1]} : vector<2x8x8x64xf32> to vector<2x1x8x64xf32>
    %116 = tpu.concatenate %114, %111, %115 in 1 : vector<2x1x8x64xf32>, vector<2x8x8x64xf32>, vector<2x1x8x64xf32> -> vector<2x10x8x64xf32>
    %117 = vector.extract_strided_slice %116 {offsets = [0, 0, 1, 0], sizes = [2, 10, 1, 64], strides = [1, 1, 1, 1]} : vector<2x10x8x64xf32> to vector<2x10x1x64xf32>
    %118 = vector.extract_strided_slice %116 {offsets = [0, 0, 6, 0], sizes = [2, 10, 1, 64], strides = [1, 1, 1, 1]} : vector<2x10x8x64xf32> to vector<2x10x1x64xf32>
    %119 = tpu.concatenate %117, %116, %118 in 2 : vector<2x10x1x64xf32>, vector<2x10x8x64xf32>, vector<2x10x1x64xf32> -> vector<2x10x10x64xf32>
    %120 = vector.extract_strided_slice %119 {offsets = [0, 0, 0, 0], sizes = [2, 8, 8, 64], strides = [1, 1, 1, 1]} : vector<2x10x10x64xf32> to vector<2x8x8x64xf32>
    %121 = vector.shape_cast %120 : vector<2x8x8x64xf32> to vector<128x64xf32>
    %122 = vector.extract_strided_slice %119 {offsets = [0, 0, 1, 0], sizes = [2, 8, 8, 64], strides = [1, 1, 1, 1]} : vector<2x10x10x64xf32> to vector<2x8x8x64xf32>
    %123 = vector.shape_cast %122 : vector<2x8x8x64xf32> to vector<128x64xf32>
    %124 = vector.extract_strided_slice %119 {offsets = [0, 0, 2, 0], sizes = [2, 8, 8, 64], strides = [1, 1, 1, 1]} : vector<2x10x10x64xf32> to vector<2x8x8x64xf32>
    %125 = vector.shape_cast %124 : vector<2x8x8x64xf32> to vector<128x64xf32>
    %126 = vector.extract_strided_slice %119 {offsets = [0, 1, 0, 0], sizes = [2, 8, 8, 64], strides = [1, 1, 1, 1]} : vector<2x10x10x64xf32> to vector<2x8x8x64xf32>
    %127 = vector.shape_cast %126 : vector<2x8x8x64xf32> to vector<128x64xf32>
    %128 = vector.extract_strided_slice %119 {offsets = [0, 1, 1, 0], sizes = [2, 8, 8, 64], strides = [1, 1, 1, 1]} : vector<2x10x10x64xf32> to vector<2x8x8x64xf32>
    %129 = vector.shape_cast %128 : vector<2x8x8x64xf32> to vector<128x64xf32>
    %130 = vector.extract_strided_slice %119 {offsets = [0, 1, 2, 0], sizes = [2, 8, 8, 64], strides = [1, 1, 1, 1]} : vector<2x10x10x64xf32> to vector<2x8x8x64xf32>
    %131 = vector.shape_cast %130 : vector<2x8x8x64xf32> to vector<128x64xf32>
    %132 = vector.extract_strided_slice %119 {offsets = [0, 2, 0, 0], sizes = [2, 8, 8, 64], strides = [1, 1, 1, 1]} : vector<2x10x10x64xf32> to vector<2x8x8x64xf32>
    %133 = vector.shape_cast %132 : vector<2x8x8x64xf32> to vector<128x64xf32>
    %134 = vector.extract_strided_slice %119 {offsets = [0, 2, 1, 0], sizes = [2, 8, 8, 64], strides = [1, 1, 1, 1]} : vector<2x10x10x64xf32> to vector<2x8x8x64xf32>
    %135 = vector.shape_cast %134 : vector<2x8x8x64xf32> to vector<128x64xf32>
    %136 = vector.extract_strided_slice %119 {offsets = [0, 2, 2, 0], sizes = [2, 8, 8, 64], strides = [1, 1, 1, 1]} : vector<2x10x10x64xf32> to vector<2x8x8x64xf32>
    %137 = vector.shape_cast %136 : vector<2x8x8x64xf32> to vector<128x64xf32>
    %138 = tpu.concatenate %121, %123, %125, %127, %129, %131, %133, %135, %137 in 1 : vector<128x64xf32>, vector<128x64xf32>, vector<128x64xf32>, vector<128x64xf32>, vector<128x64xf32>, vector<128x64xf32>, vector<128x64xf32>, vector<128x64xf32>, vector<128x64xf32> -> vector<128x576xf32>
    %139 = arith.truncf %138 : vector<128x576xf32> to vector<128x576xbf16>
    %cst_27 = arith.constant dense<0.000000e+00> : vector<128x32xf32>
    %140 = tpu.matmul %139, %112, %cst_27 {dimension_numbers = #tpu.dot_dimension_numbers<[1], [0], [0], [1], [0, 0, 1, 1], [], []>} : vector<128x576xbf16>, vector<576x32xbf16>, vector<128x32xf32> -> vector<128x32xf32>
    %141 = vector.broadcast %113 : vector<1x32xf32> to vector<128x32xf32>
    %142 = arith.addf %140, %141 : vector<128x32xf32>
    %cst_28 = arith.constant 0.000000e+00 : f32
    %143 = vector.broadcast %cst_28 : f32 to vector<128x32xf32>
    %144 = arith.cmpf ogt, %142, %143 : vector<128x32xf32>
    %cst_29 = arith.constant 0.00999999977 : f32
    %145 = vector.broadcast %cst_29 : f32 to vector<128x32xf32>
    %146 = arith.mulf %145, %142 : vector<128x32xf32>
    %147 = arith.select %144, %142, %146 : vector<128x32xi1>, vector<128x32xf32>
    %148 = vector.shape_cast %147 : vector<128x32xf32> to vector<2x8x8x32xf32>
    %c0_30 = arith.constant 0 : index
    %c0_31 = arith.constant 0 : index
    %149 = vector.load %arg9[%c0_30, %c0_31] : memref<1x32xf32, #tpu.memory_space<vmem>>, vector<1x32xf32>
    %150 = vector.shape_cast %149 : vector<1x32xf32> to vector<32xf32>
    %c0_32 = arith.constant 0 : index
    %151 = memref.load %arg10[%c0_32] : memref<1xf32, #tpu.memory_space<smem>>
    %152 = vector.shape_cast %150 : vector<32xf32> to vector<1x1x1x32xf32>
    %153 = vector.broadcast %152 : vector<1x1x1x32xf32> to vector<2x8x8x32xf32>
    %154 = arith.mulf %148, %153 : vector<2x8x8x32xf32>
    %cst_33 = arith.constant dense<0.000000e+00> : vector<2x8x8xf32>
    %155 = vector.multi_reduction <add>, %154, %cst_33 [3] : vector<2x8x8x32xf32> to vector<2x8x8xf32>
    %156 = vector.broadcast %151 : f32 to vector<2x8x8xf32>
    %157 = arith.addf %155, %156 : vector<2x8x8xf32>
    %158 = math.tanh %157 : vector<2x8x8xf32>
    %cst_34 = arith.constant 5.000000e-01 : f32
    %159 = vector.broadcast %cst_34 : f32 to vector<2x8x8xf32>
    %160 = arith.mulf %158, %159 : vector<2x8x8xf32>
    %cst_35 = arith.constant 5.000000e-01 : f32
    %161 = vector.broadcast %cst_35 : f32 to vector<2x8x8xf32>
    %162 = arith.addf %160, %161 : vector<2x8x8xf32>
    %163 = vector.shape_cast %162 : vector<2x8x8xf32> to vector<2x64xf32>
    %c0_36 = arith.constant 0 : index
    %c0_37 = arith.constant 0 : index
    %164 = vector.load %arg11[%c0_36, %c0_37] : memref<2x64xf32, #tpu.memory_space<vmem>>, vector<2x64xf32>
    tpu.vector_store %arg11[%c0_36, %c0_37], %163 {strides = array<i32>} : memref<2x64xf32, #tpu.memory_space<vmem>>, vector<2x64xf32>,
    return
  }
}

</mosaic_0001>

<bundles_post_ra>
// kernel: decoder_forward.1
= control target key start
LH: loop header
LB: loop body
LE: loop exit
PB: predicated region body
PF: predicated region fallthrough
CT: control target
= control target key end

     0   :  { %vm585_vm0 = vcmask 1040384   ;;  %vm706_vm1 = vcmask 1046528   ;;  %vm819_vm2 = vcmask 1045504   ;;  %s11905_s18 = smov 40   ;;  %s11906_s19 = smov 48   ;;  %s18334_s1 = inlined_call_operand.vmem [shape: bf16[2304,256], index: 1, kind: input, shape index: {}]   ;;  %s18335_s0 = inlined_call_operand.vmem [shape: f32[2,8,8,256], index: 0, kind: input, shape index: {}]   ;;  %s18336_s2 = inlined_call_operand.vmem [shape: f32[1,256], index: 2, kind: input, shape index: {}]   ;;  %s18337_s3 = inlined_call_operand.vmem [shape: bf16[2304,128], index: 3, kind: input, shape index: {}]   ;;  %s18338_s4 = inlined_call_operand.vmem [shape: f32[1,128], index: 4, kind: input, shape index: {}]   ;;  %s18339_s5 = inlined_call_operand.vmem [shape: bf16[1152,64], index: 5, kind: input, shape index: {}]   ;;  %s18340_s6 = inlined_call_operand.vmem [shape: f32[1,64], index: 6, kind: input, shape index: {}]   ;;  %s18341_s7 = inlined_call_operand.vmem [shape: bf16[576,32], index: 7, kind: input, shape index: {}]   ;;  %s18342_s8 = inlined_call_operand.vmem [shape: f32[1,32], index: 8, kind: input, shape index: {}]   ;;  %s18343_s9 = inlined_call_operand.vmem [shape: f32[1,32], index: 9, kind: input, shape index: {}]   ;;  %s18344_s10 = inlined_call_operand.<no memory space> [shape: f32[1], index: 10, kind: input, shape index: {}]   ;;  %s18345_s11 = inlined_call_operand.vmem [shape: f32[2,64], index: 11, kind: output, shape index: {}]  }
   0x1   :  { %v11181_v0 = vld [vmem:[%s18334_s1 + $0x74] ss:$8 sps:$4 sm:$0xff]   ;;  %v11183_v1 = vld [vmem:[%s18334_s1 + $0x70] ss:$8 sps:$4 sm:$0xff]   ;;  %v11187_v4 = vld [vmem:[%s18334_s1 + $0x64] ss:$8 sps:$4 sm:$0xff]  }
   0x2   :  { %2531 = vmatprep.subr.bf16.mxu0 %v11181_v0  ;;  %v11184_v2 = vld [vmem:[%s18334_s1 + $0x174] ss:$8 sps:$4 sm:$0xff]   ;;  %v11186_v3 = vld [vmem:[%s18334_s1 + $0x170] ss:$8 sps:$4 sm:$0xff]   ;;  %v11189_v5 = vld [vmem:[%s18334_s1 + $0x60] ss:$8 sps:$4 sm:$0xff]  }
   0x3   :  { %2532 = vmatpush1.bf16.msra.mxu0 %v11183_v1  ;;  %2644 = vmatprep.subr.bf16.mxu1 %v11184_v2  ;;  %v11190_v6 = vld [vmem:[%s18334_s1 + $0x164] ss:$8 sps:$4 sm:$0xff]   ;;  %v11192_v7 = vld [vmem:[%s18334_s1 + $0x160] ss:$8 sps:$4 sm:$0xff]   ;;  %v11193_v8 = vld [vmem:[%s18334_s1 + $0x54] ss:$8 sps:$4 sm:$0xff]  }
   0x4   :  { %2645 = vmatpush1.bf16.msra.mxu1 %v11186_v3  ;;  %2533 = vmatprep.subr.bf16.mxu0 %v11187_v4  ;;  %v11195_v9 = vld [vmem:[%s18334_s1 + $0x50] ss:$8 sps:$4 sm:$0xff]   ;;  %v11196_v10 = vld [vmem:[%s18334_s1 + $0x154] ss:$8 sps:$4 sm:$0xff]   ;;  %v11199_v11 = vld [vmem:[%s18334_s1 + $0x44] ss:$8 sps:$4 sm:$0xff]  }
   0x5   :  { %2646 = vmatprep.subr.bf16.mxu1 %v11190_v6  ;;  %v11198_v12 = vld [vmem:[%s18334_s1 + $0x150] ss:$8 sps:$4 sm:$0xff]   ;;  %v11202_v13 = vld [vmem:[%s18334_s1 + $0x144] ss:$8 sps:$4 sm:$0xff]   ;;  %v11201_v14 = vld [vmem:[%s18334_s1 + $0x40] ss:$8 sps:$4 sm:$0xff]  }
   0x6   :  { %v11205_v15 = vld [vmem:[%s18334_s1 + $0x34] ss:$8 sps:$4 sm:$0xff]   ;;  %v11204_v16 = vld [vmem:[%s18334_s1 + $0x140] ss:$8 sps:$4 sm:$0xff]   ;;  %v11207_v18 = vld [vmem:[%s18334_s1 + $0x30] ss:$8 sps:$4 sm:$0xff]  }
   0x7   :  { %2534 = vmatpush1.bf16.msra.mxu0 %v11189_v5  ;;  %v11208_v17 = vld [vmem:[%s18334_s1 + $0x134] ss:$8 sps:$4 sm:$0xff]   ;;  %v11211_v19 = vld [vmem:[%s18334_s1 + $0x24] ss:$8 sps:$4 sm:$0xff]   ;;  %v11210_v20 = vld [vmem:[%s18334_s1 + $0x130] ss:$8 sps:$4 sm:$0xff]  }
   0x8   :  { %2535 = vmatprep.subr.bf16.mxu0 %v11193_v8  ;;  %2647 = vmatpush1.bf16.msra.mxu1 %v11192_v7  ;;  %v11214_v21 = vld [vmem:[%s18334_s1 + $0x124] ss:$8 sps:$4 sm:$0xff]   ;;  %v11213_v22 = vld [vmem:[%s18334_s1 + $0x20] ss:$8 sps:$4 sm:$0xff]   ;;  %v11217_v23 = vld [vmem:[%s18334_s1 + $0x14] ss:$8 sps:$4 sm:$0xff]  }
   0x9   :  { %2648 = vmatprep.subr.bf16.mxu1 %v11196_v10  ;;  %v11216_v24 = vld [vmem:[%s18334_s1 + $0x120] ss:$8 sps:$4 sm:$0xff]   ;;  %v11220_v25 = vld [vmem:[%s18334_s1 + $0x114] ss:$8 sps:$4 sm:$0xff]   ;;  %v11219_v26 = vld [vmem:[%s18334_s1 + $0x10] ss:$8 sps:$4 sm:$0xff]  }
   0xa   :  { %v11223_v27 = vld [vmem:[%s18334_s1 + $0x4] ss:$8 sps:$4 sm:$0xff]   ;;  %v11222_v28 = vld [vmem:[%s18334_s1 + $0x110] ss:$8 sps:$4 sm:$0xff]   ;;  %v11225_v30 = vld [vmem:[%s18334_s1] ss:$8 sps:$4 sm:$0xff]  }
   0xb   :  { %2536 = vmatpush1.bf16.msra.mxu0 %v11195_v9  ;;  %v11226_v29 = vld [vmem:[%s18334_s1 + $0x104] ss:$8 sps:$4 sm:$0xff]   ;;  %v11229_v31 = vld [vmem:[%s18334_s1 + $0xf4] ss:$8 sps:$4 sm:$0xff]   ;;  %v11228_v32 = vld [vmem:[%s18334_s1 + $0x100] ss:$8 sps:$4 sm:$0xff]  }
   0xc   :  { %2537 = vmatprep.subr.bf16.mxu0 %v11199_v11  ;;  %2649 = vmatpush1.bf16.msra.mxu1 %v11198_v12  ;;  %v11232_v33 = vld [vmem:[%s18334_s1 + $0x1f4] ss:$8 sps:$4 sm:$0xff]   ;;  %v11231_v34 = vld [vmem:[%s18334_s1 + $0xf0] ss:$8 sps:$4 sm:$0xff]   ;;  %v11235_v35 = vld [vmem:[%s18334_s1 + $0xe4] ss:$8 sps:$4 sm:$0xff]  }
   0xd   :  { %2650 = vmatprep.subr.bf16.mxu1 %v11202_v13  ;;  %v11234_v36 = vld [vmem:[%s18334_s1 + $0x1f0] ss:$8 sps:$4 sm:$0xff]   ;;  %v11238_v37 = vld [vmem:[%s18334_s1 + $0x1e4] ss:$8 sps:$4 sm:$0xff]   ;;  %v11237_v38 = vld [vmem:[%s18334_s1 + $0xe0] ss:$8 sps:$4 sm:$0xff]  }
   0xe   :  { %v11241_v39 = vld [vmem:[%s18334_s1 + $0xd4] ss:$8 sps:$4 sm:$0xff]   ;;  %v11240_v40 = vld [vmem:[%s18334_s1 + $0x1e0] ss:$8 sps:$4 sm:$0xff]   ;;  %v11243_v42 = vld [vmem:[%s18334_s1 + $0xd0] ss:$8 sps:$4 sm:$0xff]  }
   0xf   :  { %2538 = vmatpush1.bf16.msra.mxu0 %v11201_v14  ;;  %v11244_v41 = vld [vmem:[%s18334_s1 + $0x1d4] ss:$8 sps:$4 sm:$0xff]   ;;  %v11246_v43 = vld [vmem:[%s18334_s1 + $0x1d0] ss:$8 sps:$4 sm:$0xff]   ;;  %v11247_v44 = vld [vmem:[%s18334_s1 + $0xc4] ss:$8 sps:$4 sm:$0xff]  }
  0x10   :  { %2539 = vmatprep.subr.bf16.mxu0 %v11205_v15  ;;  %2651 = vmatpush1.bf16.msra.mxu1 %v11204_v16  ;;  %v11249_v45 = vld [vmem:[%s18334_s1 + $0xc0] ss:$8 sps:$4 sm:$0xff]   ;;  %v11250_v46 = vld [vmem:[%s18334_s1 + $0x1c4] ss:$8 sps:$4 sm:$0xff]   ;;  %v43_v48 = vld [vmem:[%s18335_s0 + $0x18] sm:$0xff] }
  0x11   :  { %2652 = vmatprep.subr.bf16.mxu1 %v11208_v17  ;;  %v41_v47 = vld [vmem:[%s18335_s0 + $0x8] sm:$0xff]  ;;  %v11253_v49 = vld [vmem:[%s18334_s1 + $0xb4] ss:$8 sps:$4 sm:$0xff]   ;;  %v394_v50 = vrot.slane %v43_v48, 1  ;;  %v458_v52 = vrot.slane %v43_v48, 7  ;;  %v40_v54 = vld [vmem:[%s18335_s0] sm:$0xff] }
  0x12   :  { %v396_v51 = vrot.slane %v41_v47, 1  ;;  %v460_v53 = vrot.slane %v41_v47, 7  ;;  %v42_v55 = vld [vmem:[%s18335_s0 + $0x10] sm:$0xff]  ;;  %v522_v56 = vrot.slane %v43_v48, 5  ;;  %v524_v57 = vrot.slane %v41_v47, 5 }
  0x13   :  { %2540 = vmatpush1.bf16.msra.mxu0 %v11207_v18  ;;  %v11252_v58 = vld [vmem:[%s18334_s1 + $0x1c0] ss:$8 sps:$4 sm:$0xff]   ;;  %v12128_v59 = vsel %vm585_vm0, %v394_v50, %v458_v52  ;;  %v393_v61 = vrot.slane %v42_v55, 1  ;;  %v395_v62 = vrot.slane %v40_v54, 1  ;;  %v11256_v63 = vld [vmem:[%s18334_s1 + $0x1b4] ss:$8 sps:$4 sm:$0xff]  }
  0x14   :  { %2541 = vmatprep.subr.bf16.mxu0 %v11211_v19  ;;  %2653 = vmatpush1.bf16.msra.mxu1 %v11210_v20  ;;  %v12131_v60 = vsel %vm585_vm0, %v396_v51, %v460_v53  ;;  %v457_v1 = vrot.slane %v42_v55, 7  ;;  %v459_v2 = vrot.slane %v40_v54, 7  ;;  %v11255_v3 = vld [vmem:[%s18334_s1 + $0xb0] ss:$8 sps:$4 sm:$0xff]   ;;  %v12142_v4 = vsel %vm585_vm0, %v458_v52, %v522_v56  ;;  %v11259_v8 = vld [vmem:[%s18334_s1 + $0xa4] ss:$8 sps:$4 sm:$0xff]  }
  0x15   :  { %2654 = vmatprep.subr.bf16.mxu1 %v11214_v21  ;;  %v973_v0 = vpack.c.bf16 %v12131_v60, %v12128_v59  ;;  %v621_v5 = vsel %vm585_vm0, %v460_v53, %v524_v57  ;;  %v710_v6 = vrot.slane %v12128_v59, 1  ;;  %v716_v7 = vrot.slane %v12131_v60, 1  ;;  %v11258_v12 = vld [vmem:[%s18334_s1 + $0x1b0] ss:$8 sps:$4 sm:$0xff]   ;;  %v11262_v15 = vld [vmem:[%s18334_s1 + $0x1a4] ss:$8 sps:$4 sm:$0xff]  }
  0x16   :  { %v12151_v9 = vsel %vm585_vm0, %v393_v61, %v457_v1  ;;  %v711_v10 = vrot.slane %v12142_v4, 1  ;;  %v717_v11 = vrot.slane %v621_v5, 1  ;;  %v829_v13 = vrot.slane %v12131_v60, 2  ;;  %v45_v20 = vld [vmem:[%s18335_s0 + $0x28] sm:$0xff]  ;;  %v47_v61 = vld [vmem:[%s18335_s0 + $0x38] sm:$0xff] }
  0x17   :  { %2542 = vmatpush1.bf16.msra.mxu0 %v11213_v22  ;;  %2563 = vmatprep.mubr.bf16.mxu0 %v973_v0  ;;  %v12159_v14 = vsel %vm585_vm0, %v395_v62, %v459_v2  ;;  %v830_v18 = vrot.slane %v621_v5, 2  ;;  %v521_v19 = vrot.slane %v42_v55, 5  ;;  %v11261_v21 = vld [vmem:[%s18334_s1 + $0xa0] ss:$8 sps:$4 sm:$0xff]   ;;  %v11274_v50 = vld [vmem:[%s18334_s1 + $0x184] ss:$8 sps:$4 sm:$0xff]  }
  0x18   :  { %2543 = vmatprep.subr.bf16.mxu0 %v11217_v23  ;;  %2655 = vmatpush1.bf16.msra.mxu1 %v11216_v24  ;;  %v12165_v16 = vsel %vm706_vm1, %v710_v6, %v711_v10  ;;  %v12168_v17 = vsel %vm706_vm1, %v716_v7, %v717_v11  ;;  %v523_v24 = vrot.slane %v40_v54, 5  ;;  %v972_v51 = vpack.c.bf16 %v12159_v14, %v12151_v9  ;;  %v49_v62 = vld [vmem:[%s18335_s0 + $0x48] sm:$0xff]  ;;  %v48_v6 = vld [vmem:[%s18335_s0 + $0x40] sm:$0xff]  ;;  %v11279_v7 = vld [vmem:[%s18334_s1 + $0x274] ss:$8 sps:$4 sm:$0xff]  }
  0x19   :  { %2656 = vmatprep.subr.bf16.mxu1 %v11220_v25  ;;  %18582 = vst [vmem:[#allocation3_spill] sm:$0xff] %v12165_v16  ;;  %18583 = vst [vmem:[#allocation4_spill] sm:$0xff] %v12168_v17  ;;  %v975_v22 = vpack.c.bf16 %v12168_v17, %v12165_v16  ;;  %v707_v25 = vrot.slane %v12151_v9, 1  ;;  %v12224_v48 = vsel %vm819_vm2, %v829_v13, %v830_v18  ;;  %v11276_v0 = vld [vmem:[%s18334_s1 + $0x180] ss:$8 sps:$4 sm:$0xff]   ;;  %v464_v5 = vrot.slane %v47_v61, 7 }
  0x1a   :  { %v466_v11 = vrot.slane %v49_v62, 7  ;;  %v11277_v13 = vld [vmem:[%s18334_s1 + $0x270] ss:$8 sps:$4 sm:$0xff]  }
  0x1b   :  { %2544 = vmatpush1.bf16.msra.mxu0 %v11219_v26  ;;  %v44_v26 = vld [vmem:[%s18335_s0 + $0x20] sm:$0xff]  ;;  %2676 = vmatprep.mubr.bf16.mxu1 %v975_v22 }
  0x1c   :  { %2545 = vmatprep.subr.bf16.mxu0 %v11223_v27  ;;  %2657 = vmatpush1.bf16.msra.mxu1 %v11222_v28  ;;  %v11265_v27 = vld [vmem:[%s18334_s1 + $0x94] ss:$8 sps:$4 sm:$0xff]   ;;  %v12188_v28 = vsel %vm585_vm0, %v457_v1, %v521_v19  ;;  %v525_v47 = vrot.slane %v44_v26, 5 }
  0x1d   :  { %2658 = vmatprep.subr.bf16.mxu1 %v11226_v29  ;;  %v713_v29 = vrot.slane %v12159_v14, 1 }
  0x1f   :  { %2546 = vmatpush1.bf16.msra.mxu0 %v11225_v30  ;;  %v398_v30 = vrot.slane %v45_v20, 1 }
  0x20   :  { %2547 = vmatprep.subr.bf16.mxu0 %v11229_v31  ;;  %2659 = vmatpush1.bf16.msra.mxu1 %v11228_v32  ;;  %v462_v31 = vrot.slane %v45_v20, 7  ;;  %v11264_v32 = vld [vmem:[%s18334_s1 + $0x1a0] ss:$8 sps:$4 sm:$0xff]  }
  0x21   :  { %2660 = vmatprep.subr.bf16.mxu1 %v11232_v33  ;;  %v12195_v33 = vsel %vm585_vm0, %v459_v2, %v523_v24  ;;  %v400_v2 = vrot.slane %v47_v61, 1  ;;  %v401_v24 = vrot.slane %v48_v6, 1 }
  0x23   :  { %2548 = vmatpush2.bf16.msra.mxu0 %v11231_v34  ;;  %v708_v34 = vrot.slane %v12188_v28, 1  ;;  %v12282_v19 = vsel %vm585_vm0, %v400_v2, %v464_v5 }
  0x24   :  { %2549 = vmatprep.subr.bf16.mxu0 %v11235_v35  ;;  %2661 = vmatpush2.bf16.msra.mxu1 %v11234_v36  ;;  %v397_v35 = vrot.slane %v44_v26, 1  ;;  %v11268_v36 = vld [vmem:[%s18334_s1 + $0x194] ss:$8 sps:$4 sm:$0xff]  }
  0x25   :  { %2662 = vmatprep.subr.bf16.mxu1 %v11238_v37  ;;  %v714_v37 = vrot.slane %v12195_v33, 1 }
  0x27   :  { %2550 = vmatpush2.bf16.msra.mxu0 %v11237_v38  ;;  %v12203_v38 = vsel %vm585_vm0, %v398_v30, %v462_v31  ;;  %v530_v30 = vrot.slane %v49_v62, 5 }
  0x28   :  { %2551 = vmatprep.subr.bf16.mxu0 %v11241_v39  ;;  %2663 = vmatpush2.bf16.msra.mxu1 %v11240_v40  ;;  %v461_v39 = vrot.slane %v44_v26, 7  ;;  %v11267_v40 = vld [vmem:[%s18334_s1 + $0x90] ss:$8 sps:$4 sm:$0xff]   ;;  %v722_v54 = vrot.slane %v12203_v38, 1  ;;  %v12269_v10 = vpack.c.bf16 %v12203_v38, %v12128_v59  ;;  %v528_v26 = vrot.slane %v47_v61, 5 }
  0x29   :  { %2664 = vmatprep.subr.bf16.mxu1 %v11244_v41  ;;  %v12209_v41 = vsel %vm706_vm1, %v707_v25, %v708_v34  ;;  %v465_v25 = vrot.slane %v48_v6, 7  ;;  %v11285_v34 = vld [vmem:[%s18334_s1 + $0x264] ss:$8 sps:$4 sm:$0xff]   ;;  %v51_v61 = vld [vmem:[%s18335_s0 + $0x58] sm:$0xff] }
  0x2a   :  { %18584 = vst [vmem:[#allocation5_spill] sm:$0xff] %v12209_v41  ;;  %v12243_v57 = vsel %vm585_vm0, %v461_v39, %v525_v47  ;;  %18586 = vst [vmem:[#allocation7_spill] sm:$0xff] %v12269_v10 }
  0x2b   :  { %2552 = vmatpush2.bf16.msra.mxu0 %v11243_v42  ;;  %v526_v42 = vrot.slane %v45_v20, 5  ;;  %v720_v1 = vrot.slane %v12243_v57, 1 }
  0x2c   :  { %2553 = vmatprep.subr.bf16.mxu0 %v11247_v44  ;;  %2665 = vmatpush2.bf16.msra.mxu1 %v11246_v43  ;;  %v11270_v43 = vld [vmem:[%s18334_s1 + $0x190] ss:$8 sps:$4 sm:$0xff]   ;;  %v11271_v44 = vld [vmem:[%s18334_s1 + $0x84] ss:$8 sps:$4 sm:$0xff]  }
  0x2d   :  { %2666 = vmatprep.subr.bf16.mxu1 %v11250_v46  ;;  %v12221_v46 = vsel %vm585_vm0, %v397_v35, %v461_v39  ;;  %v12237_v53 = vsel %vm585_vm0, %v462_v31, %v526_v42  ;;  %v728_v31 = vrot.slane %v12282_v19, 1  ;;  %v11288_v42 = vld [vmem:[%s18334_s1 + $0x364] ss:$8 sps:$4 sm:$0xff]  }
  0x2e   :  { %v723_v56 = vrot.slane %v12237_v53, 1 }
  0x2f   :  { %2554 = vmatpush2.bf16.msra.mxu0 %v11249_v45  ;;  %v12218_v45 = vsel %vm706_vm1, %v713_v29, %v714_v37 }
  0x30   :  { %2555 = vmatprep.subr.bf16.mxu0 %v11253_v49  ;;  %2667 = vmatpush2.bf16.msra.mxu1 %v11252_v58  ;;  %18585 = vst [vmem:[#allocation6_spill] sm:$0xff] %v12218_v45  ;;  %v11273_v49 = vld [vmem:[%s18334_s1 + $0x80] ss:$8 sps:$4 sm:$0xff]   ;;  %v719_v58 = vrot.slane %v12221_v46, 1  ;;  %v12279_v18 = vsel %vm706_vm1, %v722_v54, %v723_v56  ;;  %v12327_v54 = vsel %vm585_vm0, %v401_v24, %v465_v25 }
  0x31   :  { %2668 = vmatprep.subr.bf16.mxu1 %v11256_v63  ;;  %v46_v63 = vld [vmem:[%s18335_s0 + $0x30] sm:$0xff]  ;;  %18588 = vst [vmem:[#allocation9_spill] sm:$0xff] %v12279_v18  ;;  %18592 = vst [vmem:[#allocation13_spill] sm:$0xff] %v12327_v54 }
  0x32   :  { %v463_v20 = vrot.slane %v46_v63, 7  ;;  %v12294_v29 = vsel %vm706_vm1, %v719_v58, %v720_v1  ;;  %v527_v39 = vrot.slane %v46_v63, 5 }
  0x33   :  { %2556 = vmatpush2.bf16.msra.mxu0 %v11255_v3  ;;  %v402_v3 = vrot.slane %v49_v62, 1  ;;  %18589 = vst [vmem:[#allocation10_spill] sm:$0xff] %v12294_v29  ;;  %v50_v62 = vld [vmem:[%s18335_s0 + $0x50] sm:$0xff] }
  0x34   :  { %2557 = vmatprep.subr.bf16.mxu0 %v11259_v8  ;;  %2669 = vmatpush2.bf16.msra.mxu1 %v11258_v12  ;;  %v974_v8 = vpack.c.bf16 %v12218_v45, %v12209_v41  ;;  %v399_v12 = vrot.slane %v46_v63, 1  ;;  %v12331_v58 = vsel %vm585_vm0, %v463_v20, %v527_v39  ;;  %v11286_v63 = vld [vmem:[%s18334_s1 + $0x360] ss:$8 sps:$4 sm:$0xff]  }
  0x35   :  { %2670 = vmatprep.subr.bf16.mxu1 %v11262_v15  ;;  %v12276_v15 = vpack.c.bf16 %v12221_v46, %v12151_v9  ;;  %v12288_v22 = vsel %vm585_vm0, %v402_v3, %v466_v11  ;;  %18593 = vst [vmem:[#allocation14_spill] sm:$0xff] %v12331_v58  ;;  %v404_v3 = vrot.slane %v51_v61, 1 }
  0x36   :  { %v12302_v35 = vsel %vm585_vm0, %v399_v12, %v463_v20  ;;  %v734_v37 = vrot.slane %v12288_v22, 1  ;;  %v11289_v20 = vld [vmem:[%s18334_s1 + $0x250] ss:$8 sps:$4 sm:$0xff]  }
  0x37   :  { %2558 = vmatpush2.bf16.msra.mxu0 %v11261_v21  ;;  %18587 = vst [vmem:[#allocation8_spill] sm:$0xff] %v12276_v15  ;;  %v11282_v21 = vld [vmem:[%s18334_s1 + $0x374] ss:$8 sps:$4 sm:$0xff]   ;;  %v725_v2 = vrot.slane %v12302_v35, 1 }
  0x38   :  { %2559 = vmatprep.subr.bf16.mxu0 %v11265_v27  ;;  %2671 = vmatpush2.bf16.msra.mxu1 %v11264_v32  ;;  %v11280_v27 = vld [vmem:[%s18334_s1 + $0x370] ss:$8 sps:$4 sm:$0xff]  }
  0x39   :  { %2672 = vmatprep.subr.bf16.mxu1 %v11268_v36  ;;  %v12305_v36 = vsel %vm585_vm0, %v464_v5, %v528_v26  ;;  %v52_v5 = vld [vmem:[%s18335_s0 + $0x60] sm:$0xff]  ;;  %v11294_v26 = vld [vmem:[%s18334_s1 + $0x354] ss:$8 sps:$4 sm:$0xff]  }
  0x3a   :  { %v729_v47 = vrot.slane %v12305_v36, 1  ;;  %v533_v55 = vrot.slane %v52_v5, 5 }
  0x3b   :  { %2560 = vmatpush2.bf16.msra.mxu0 %v11267_v40  ;;  %v11283_v40 = vld [vmem:[%s18334_s1 + $0x260] ss:$8 sps:$4 sm:$0xff]  }
  0x3c   :  { %2561 = vmatprep.subr.bf16.mxu0 %v11271_v44  ;;  %2673 = vmatpush2.bf16.msra.mxu1 %v11270_v43  ;;  %v12316_v43 = vpack.c.bf16 %v12279_v18, %v12165_v16  ;;  %v12319_v44 = vsel %vm585_vm0, %v466_v11, %v530_v30  ;;  %v726_v11 = vrot.slane %v12331_v58, 1  ;;  %v11307_v18 = vld [vmem:[%s18334_s1 + $0x220] ss:$8 sps:$4 sm:$0xff]  }
  0x3d   :  { %2674 = vmatprep.subr.bf16.mxu1 %v11274_v50  ;;  %v12324_v50 = vpack.c.bf16 %v12294_v29, %v12209_v41  ;;  %v735_v56 = vrot.slane %v12319_v44, 1  ;;  %v69_v58 = vld [vmem:[%s18335_s0 + $0xe8] sm:$0xff] }
  0x3e   :  { %18590 = vst [vmem:[#allocation11_spill] sm:$0xff] %v12316_v43 }
  0x3f   :  { %2562 = vmatpush2.bf16.msra.mxu0 %v11273_v49  ;;  %v529_v49 = vrot.slane %v48_v6, 5  ;;  %18591 = vst [vmem:[#allocation12_spill] sm:$0xff] %v12324_v50  ;;  %v11291_v6 = vld [vmem:[%s18334_s1 + $0x254] ss:$8 sps:$4 sm:$0xff]  }
  0x40   :  { %2757 = vmatprep.subr.bf16.mxu0 %v11279_v7  ;;  %2675 = vmatpush2.bf16.msra.mxu1 %v11276_v0  ;;  %v12347_v0 = vsel %vm706_vm1, %v728_v31, %v729_v47  ;;  %v12360_v7 = vsel %vm706_vm1, %v734_v37, %v735_v56  ;;  %v405_v31 = vrot.slane %v52_v5, 1  ;;  %v11292_v37 = vld [vmem:[%s18334_s1 + $0x350] ss:$8 sps:$4 sm:$0xff]   ;;  %v469_v47 = vrot.slane %v52_v5, 7  ;;  %v11297_v56 = vld [vmem:[%s18334_s1 + $0x244] ss:$8 sps:$4 sm:$0xff]  }
  0x41   :  { %2870 = vmatprep.subr.bf16.mxu1 %v11282_v21  ;;  %18594 = vst [vmem:[#allocation15_spill] sm:$0xff] %v12347_v0  ;;  %v12350_v1 = vsel %vm585_vm0, %v465_v25, %v529_v49  ;;  %18596 = vst [vmem:[#allocation17_spill] sm:$0xff] %v12360_v7  ;;  %v731_v21 = vrot.slane %v12327_v54, 1  ;;  %v403_v25 = vrot.slane %v50_v62, 1  ;;  %v12384_v39 = vpack.c.bf16 %v12360_v7, %v12347_v0 }
  0x42   :  { %2564 = vmatmul.mubr.bf16.vlgmr.msra.gmra.mxu0 %v972_v51  ;;  %v53_v51 = vld [vmem:[%s18335_s0 + $0x68] sm:$0xff]  ;;  %18595 = vst [vmem:[#allocation16_spill] sm:$0xff] %v12350_v1  ;;  %v532_v49 = vrot.slane %v51_v61, 5 }
  0x43   :  { %2758 = vmatpush1.bf16.msra.mxu0 %v11277_v13  ;;  %2573 = vmatprep.mubr.bf16.mxu0 %v12269_v10  ;;  %v406_v12 = vrot.slane %v53_v51, 1  ;;  %v468_v13 = vrot.slane %v51_v61, 7  ;;  %v470_v24 = vrot.slane %v53_v51, 7  ;;  %18599 = vst [vmem:[#allocation20_spill] sm:$0xff] %v12384_v39  ;;  %v534_v52 = vrot.slane %v53_v51, 5 }
  0x44   :  { %2677 = vmatmul.mubr.bf16.vlgmr.msra.gmra.mxu1 %v974_v8  ;;  %2759 = vmatprep.subr.bf16.mxu0 %v11285_v34  ;;  %v12369_v8 = vpack.c.bf16 %v12288_v22, %v12282_v19  ;;  %v467_v34 = vrot.slane %v50_v62, 7  ;;  %v11300_v61 = vld [vmem:[%s18334_s1 + $0x344] ss:$8 sps:$4 sm:$0xff]   ;;  %v531_v51 = vrot.slane %v50_v62, 5  ;;  %v59_v62 = vld [vmem:[%s18335_s0 + $0x98] sm:$0xff] }
  0x45   :  { %2871 = vmatpush1.bf16.msra.mxu1 %v11280_v27  ;;  %2686 = vmatprep.mubr.bf16.mxu1 %v12316_v43  ;;  %v732_v27 = vrot.slane %v12350_v1, 1  ;;  %v12377_v30 = vsel %vm585_vm0, %v404_v3, %v468_v13  ;;  %v538_v0 = vrot.slane %v59_v62, 5 }
  0x46   :  { %18597 = vst [vmem:[#allocation18_spill] sm:$0xff] %v12369_v8  ;;  %2872 = vmatprep.subr.bf16.mxu1 %v11288_v42  ;;  %18598 = vst [vmem:[#allocation19_spill] sm:$0xff] %v12377_v30  ;;  %v12387_v42 = vsel %vm585_vm0, %v406_v12, %v470_v24  ;;  %v12396_v3 = vsel %vm585_vm0, %v403_v25, %v467_v34  ;;  %v740_v23 = vrot.slane %v12377_v30, 1  ;;  %v11295_v12 = vld [vmem:[%s18334_s1 + $0x240] ss:$8 sps:$4 sm:$0xff]  }
  0x47   :  { %2760 = vmatpush1.bf16.msra.mxu0 %v11283_v40  ;;  %18600 = vst [vmem:[#allocation21_spill] sm:$0xff] %v12387_v42  ;;  %v12393_v40 = vsel %vm706_vm1, %v725_v2, %v726_v11  ;;  %18602 = vst [vmem:[#allocation23_spill] sm:$0xff] %v12396_v3  ;;  %v12409_v2 = vsel %vm585_vm0, %v468_v13, %v532_v49  ;;  %v746_v11 = vrot.slane %v12387_v42, 1  ;;  %v57_v13 = vld [vmem:[%s18335_s0 + $0x88] sm:$0xff] }
  0x48   :  { %2761 = vmatprep.subr.bf16.mxu0 %v11291_v6  ;;  %18601 = vst [vmem:[#allocation22_spill] sm:$0xff] %v12393_v40  ;;  %v12406_v6 = vsel %vm585_vm0, %v405_v31, %v469_v47  ;;  %18604 = vst [vmem:[#allocation25_spill] sm:$0xff] %v12409_v2  ;;  %v12417_v25 = vsel %vm585_vm0, %v470_v24, %v534_v52  ;;  %v741_v32 = vrot.slane %v12409_v2, 1  ;;  %v540_v17 = vrot.slane %v57_v13, 5 }
  0x49   :  { %2873 = vmatpush1.bf16.msra.mxu1 %v11286_v63  ;;  %18603 = vst [vmem:[#allocation24_spill] sm:$0xff] %v12406_v6  ;;  %v12414_v63 = vsel %vm706_vm1, %v731_v21, %v732_v27  ;;  %18606 = vst [vmem:[#allocation27_spill] sm:$0xff] %v12417_v25  ;;  %v747_v52 = vrot.slane %v12417_v25, 1  ;;  %v12434_v5 = vsel %vm585_vm0, %v467_v34, %v531_v51  ;;  %v737_v21 = vrot.slane %v12396_v3, 1  ;;  %v11298_v27 = vld [vmem:[%s18334_s1 + $0x340] ss:$8 sps:$4 sm:$0xff]  }
  0x4a   :  { %2574 = vmatmul.mubr.bf16.gmra.mxu0 %v12276_v15  ;;  %2874 = vmatprep.subr.bf16.mxu1 %v11294_v26  ;;  %18605 = vst [vmem:[#allocation26_spill] sm:$0xff] %v12414_v63  ;;  %v12429_v26 = vld [vmem:[%s18335_s0 + $0x90] sm:$0xff]  ;;  %18607 = vst [vmem:[#allocation28_spill] sm:$0xff] %v12434_v5  ;;  %v743_v24 = vrot.slane %v12406_v6, 1  ;;  %v12446_v31 = vsel %vm706_vm1, %v740_v23, %v741_v32  ;;  %v12449_v34 = vsel %vm585_vm0, %v469_v47, %v533_v55  ;;  %v56_v55 = vld [vmem:[%s18335_s0 + $0x80] sm:$0xff] }
  0x4b   :  { %2762 = vmatpush1.bf16.msra.mxu0 %v11289_v20  ;;  %2583 = vmatprep.mubr.bf16.mxu0 %v12369_v8  ;;  %v11303_v20 = vld [vmem:[%s18334_s1 + $0x234] ss:$8 sps:$4 sm:$0xff]   ;;  %18608 = vst [vmem:[#allocation29_spill] sm:$0xff] %v12446_v31  ;;  %18609 = vst [vmem:[#allocation30_spill] sm:$0xff] %v12449_v34  ;;  %v738_v49 = vrot.slane %v12434_v5, 1  ;;  %v410_v51 = vrot.slane %v59_v62, 1  ;;  %v12469_v47 = vpack.c.bf16 %v12414_v63, %v12393_v40 }
  0x4c   :  { %2687 = vmatmul.mubr.bf16.gmra.mxu1 %v12324_v50  ;;  %2763 = vmatprep.subr.bf16.mxu0 %v11297_v56  ;;  %v11301_v56 = vld [vmem:[%s18334_s1 + $0x230] ss:$8 sps:$4 sm:$0xff]   ;;  %v12457_v50 = vsel %vm706_vm1, %v746_v11, %v747_v52  ;;  %v744_v8 = vrot.slane %v12449_v34, 1  ;;  %v412_v23 = vrot.slane %v57_v13, 1  ;;  %v474_v32 = vrot.slane %v59_v62, 7  ;;  %v65_v34 = vld [vmem:[%s18335_s0 + $0xc8] sm:$0xff] }
  0x4d   :  { %2875 = vmatpush1.bf16.msra.mxu1 %v11292_v37  ;;  %2696 = vmatprep.mubr.bf16.mxu1 %v12384_v39  ;;  %18610 = vst [vmem:[#allocation31_spill] sm:$0xff] %v12457_v50  ;;  %v12465_v37 = vpack.c.bf16 %v12327_v54, %v12302_v35  ;;  %18612 = vst [vmem:[#allocation33_spill] sm:$0xff] %v12469_v47  ;;  %v11306_v11 = vld [vmem:[%s18334_s1 + $0x334] ss:$8 sps:$4 sm:$0xff]   ;;  %v476_v52 = vrot.slane %v57_v13, 7  ;;  %v409_v39 = vrot.slane %v12429_v26, 1 }
  0x4e   :  { %2876 = vmatprep.subr.bf16.mxu1 %v11300_v61  ;;  %v11304_v61 = vld [vmem:[%s18334_s1 + $0x330] ss:$8 sps:$4 sm:$0xff]   ;;  %v11309_v15 = vld [vmem:[%s18334_s1 + $0x224] ss:$8 sps:$4 sm:$0xff]   ;;  %v12483_v43 = vpack.c.bf16 %v12387_v42, %v12377_v30  ;;  %v12487_v10 = vpack.c.bf16 %v12457_v50, %v12446_v31  ;;  %v12490_v40 = vsel %vm585_vm0, %v410_v51, %v474_v32  ;;  %v411_v45 = vrot.slane %v56_v55, 1 }
  0x4f   :  { %18611 = vst [vmem:[#allocation32_spill] sm:$0xff] %v12465_v37  ;;  %2764 = vmatpush1.bf16.msra.mxu0 %v11295_v12  ;;  %v473_v12 = vrot.slane %v12429_v26, 7  ;;  %v12494_v29 = vsel %vm585_vm0, %v412_v23, %v476_v52  ;;  %v475_v41 = vrot.slane %v56_v55, 7  ;;  %v11312_v50 = vld [vmem:[%s18334_s1 + $0x324] ss:$8 sps:$4 sm:$0xff]   ;;  %v12503_v51 = vsel %vm706_vm1, %v737_v21, %v738_v49  ;;  %v12670_v54 = vld [vmem:[%s18335_s0 + $0xd8] sm:$0xff] }
  0x50   :  { %18613 = vst [vmem:[#allocation34_spill] sm:$0xff] %v12483_v43  ;;  %18614 = vst [vmem:[#allocation35_spill] sm:$0xff] %v12487_v10  ;;  %2765 = vmatprep.subr.bf16.mxu0 %v11303_v20  ;;  %v12506_v20 = vsel %vm706_vm1, %v743_v24, %v744_v8  ;;  %v12513_v62 = vsel %vm585_vm0, %v474_v32, %v538_v0  ;;  %v758_v16 = vrot.slane %v12494_v29, 1  ;;  %v537_v21 = vrot.slane %v12429_v26, 5  ;;  %v61_v8 = vld [vmem:[%s18335_s0 + $0xa8] sm:$0xff]  ;;  %v60_v26 = vld [vmem:[%s18335_s0 + $0xa0] sm:$0xff] }
  0x51   :  { %2877 = vmatpush1.bf16.msra.mxu1 %v11298_v27  ;;  %18615 = vst [vmem:[#allocation36_spill] sm:$0xff] %v12503_v51  ;;  %18616 = vst [vmem:[#allocation37_spill] sm:$0xff] %v12506_v20  ;;  %v12509_v23 = vsel %vm585_vm0, %v409_v39, %v473_v12  ;;  %v752_v27 = vrot.slane %v12490_v40, 1  ;;  %v12524_v39 = vpack.c.bf16 %v12406_v6, %v12396_v3  ;;  %v753_v13 = vrot.slane %v12513_v62, 1  ;;  %v11315_v49 = vld [vmem:[%s18334_s1 + $0x214] ss:$8 sps:$4 sm:$0xff]  }
  0x52   :  { %2584 = vmatmul.mubr.bf16.gmra.mxu0 %v12465_v37  ;;  %2878 = vmatprep.subr.bf16.mxu1 %v11306_v11  ;;  %v12527_v0 = vsel %vm585_vm0, %v476_v52, %v540_v17  ;;  %v539_v24 = vrot.slane %v56_v55, 5  ;;  %v12542_v17 = vsel %vm585_vm0, %v411_v45, %v475_v41  ;;  %v12546_v55 = vsel %vm585_vm0, %v473_v12, %v537_v21  ;;  %v11325_v42 = vld [vmem:[%s18334_s1 + $0x2f0] ss:$8 sps:$4 sm:$0xff]  }
  0x53   :  { %2766 = vmatpush1.bf16.msra.mxu0 %v11301_v56  ;;  %2593 = vmatprep.mubr.bf16.mxu0 %v12483_v43  ;;  %18617 = vst [vmem:[#allocation38_spill] sm:$0xff] %v12524_v39  ;;  %v12539_v56 = vpack.c.bf16 %v12506_v20, %v12503_v51  ;;  %v759_v32 = vrot.slane %v12527_v0, 1  ;;  %v1027_v11 = vpack.c.bf16 %v12494_v29, %v12490_v40  ;;  %v749_v45 = vrot.slane %v12509_v23, 1 }
  0x54   :  { %2697 = vmatmul.mubr.bf16.gmra.mxu1 %v12469_v47  ;;  %2767 = vmatprep.subr.bf16.mxu0 %v11309_v15  ;;  %v11310_v15 = vld [vmem:[%s18334_s1 + $0x320] ss:$8 sps:$4 sm:$0xff]   ;;  %v12555_v52 = vsel %vm585_vm0, %v475_v41, %v539_v24  ;;  %v414_v47 = vrot.slane %v61_v8, 1  ;;  %v12562_v12 = vsel %vm706_vm1, %v752_v27, %v753_v13  ;;  %v413_v43 = vrot.slane %v60_v26, 1  ;;  %v11313_v41 = vld [vmem:[%s18334_s1 + $0x210] ss:$8 sps:$4 sm:$0xff]  }
  0x55   :  { %18618 = vst [vmem:[#allocation39_spill] sm:$0xff] %v12539_v56  ;;  %2879 = vmatpush1.bf16.msra.mxu1 %v11304_v61  ;;  %2706 = vmatprep.mubr.bf16.mxu1 %v12487_v10  ;;  %v11318_v61 = vld [vmem:[%s18334_s1 + $0x314] ss:$8 sps:$4 sm:$0xff]   ;;  %18619 = vst [vmem:[#allocation40_spill] sm:$0xff] %v12562_v12  ;;  %v12565_v21 = vsel %vm706_vm1, %v758_v16, %v759_v32  ;;  %v478_v10 = vrot.slane %v61_v8, 7  ;;  %v750_v24 = vrot.slane %v12546_v55, 1 }
  0x56   :  { %2880 = vmatprep.subr.bf16.mxu1 %v11312_v50  ;;  %18620 = vst [vmem:[#allocation41_spill] sm:$0xff] %v12565_v21  ;;  %v755_v50 = vrot.slane %v12542_v17, 1  ;;  %v477_v37 = vrot.slane %v60_v26, 7  ;;  %v542_v20 = vrot.slane %v61_v8, 5  ;;  %v11321_v27 = vld [vmem:[%s18334_s1 + $0x204] ss:$8 sps:$4 sm:$0xff]   ;;  %v1029_v5 = vpack.c.bf16 %v12565_v21, %v12562_v12 }
  0x57   :  { %2768 = vmatpush1.bf16.msra.mxu0 %v11307_v18  ;;  %v756_v16 = vrot.slane %v12555_v52, 1  ;;  %v12577_v13 = vsel %vm585_vm0, %v414_v47, %v478_v10  ;;  %v541_v18 = vrot.slane %v60_v26, 5  ;;  %v63_v32 = vld [vmem:[%s18335_s0 + $0xb8] sm:$0xff]  ;;  %v18622_v8 = vrot.slane %v12142_v4, 2  ;;  %v11319_v26 = vld [vmem:[%s18334_s1 + $0x200] ss:$8 sps:$4 sm:$0xff]  }
  0x58   :  { %2769 = vmatprep.subr.bf16.mxu0 %v11315_v49  ;;  %18621 = vst [vmem:[#allocation42_spill] sm:$0xff] %v12577_v13  ;;  %v18623_v49 = vrot.slane %v12128_v59, 2  ;;  %v11316_v47 = vld [vmem:[%s18334_s1 + $0x310] ss:$8 sps:$4 sm:$0xff]   ;;  %v12601_v3 = vsel %vm585_vm0, %v478_v10, %v542_v20  ;;  %v11324_v4 = vld [vmem:[%s18334_s1 + $0x304] ss:$8 sps:$4 sm:$0xff]   ;;  %v1026_v20 = vpack.c.bf16 %v12542_v17, %v12509_v23 }
  0x59   :  { %2881 = vmatpush1.bf16.msra.mxu1 %v11310_v15  ;;  %18624 = vst [vmem:[#allocation43_spill] sm:$0xff] %v12601_v3  ;;  %v12608_v15 = vsel %vm585_vm0, %v413_v43, %v477_v37  ;;  %v12613_v25 = vsel %vm585_vm0, %v477_v37, %v541_v18  ;;  %v11322_v10 = vld [vmem:[%s18334_s1 + $0x300] ss:$8 sps:$4 sm:$0xff]   ;;  %v62_v43 = vld [vmem:[%s18335_s0 + $0xb0] sm:$0xff]  ;;  %v12634_v18 = vsel %vm706_vm1, %v755_v50, %v756_v16  ;;  %v482_v21 = vrot.slane %v65_v34, 7 }
  0x5a   :  { %v12590_v6 = vsel %vm819_vm2, %v18623_v49, %v18622_v8  ;;  %2594 = vmatmul.mubr.bf16.gmra.mxu0 %v12524_v39  ;;  %2882 = vmatprep.subr.bf16.mxu1 %v11318_v61  ;;  %18625 = vst [vmem:[#allocation44_spill] sm:$0xff] %v12608_v15  ;;  %v764_v8 = vrot.slane %v12577_v13, 1  ;;  %v765_v49 = vrot.slane %v12601_v3, 1  ;;  %18626 = vst [vmem:[#allocation45_spill] sm:$0xff] %v12613_v25  ;;  %v416_v61 = vrot.slane %v63_v32, 1  ;;  %v64_v37 = vld [vmem:[%s18335_s0 + $0xc0] sm:$0xff] }
  0x5b   :  { %2770 = vmatpush1.bf16.msra.mxu0 %v11313_v41  ;;  %2603 = vmatprep.mubr.bf16.mxu0 %v1027_v11  ;;  %v418_v39 = vrot.slane %v65_v34, 1  ;;  %v11327_v11 = vld [vmem:[%s18334_s1 + $0x2f4] ss:$8 sps:$4 sm:$0xff]   ;;  %v12631_v41 = vsel %vm706_vm1, %v749_v45, %v750_v24  ;;  %18628 = vst [vmem:[#allocation47_spill] sm:$0xff] %v12634_v18  ;;  %v480_v3 = vrot.slane %v63_v32, 7  ;;  %v761_v45 = vrot.slane %v12608_v15, 1 }
  0x5c   :  { %2707 = vmatmul.mubr.bf16.gmra.mxu1 %v12539_v56  ;;  %2771 = vmatprep.subr.bf16.mxu0 %v11321_v27  ;;  %18627 = vst [vmem:[#allocation46_spill] sm:$0xff] %v12631_v41  ;;  %v12641_v27 = vpack.c.bf16 %v12577_v13, %v12490_v40  ;;  %v12644_v56 = vsel %vm706_vm1, %v764_v8, %v765_v49  ;;  %v762_v24 = vrot.slane %v12613_v25, 1  ;;  %v11330_v50 = vld [vmem:[%s18334_s1 + $0x3f4] ss:$8 sps:$4 sm:$0xff]   ;;  %v417_v13 = vrot.slane %v64_v37, 1 }
  0x5d   :  { %2883 = vmatpush1.bf16.msra.mxu1 %v11316_v47  ;;  %2716 = vmatprep.mubr.bf16.mxu1 %v1029_v5  ;;  %18630 = vst [vmem:[#allocation49_spill] sm:$0xff] %v12644_v56  ;;  %v12652_v16 = vsel %vm585_vm0, %v416_v61, %v480_v3  ;;  %v12655_v5 = vsel %vm585_vm0, %v418_v39, %v482_v21  ;;  %v415_v47 = vrot.slane %v62_v43, 1  ;;  %v11328_v8 = vld [vmem:[%s18334_s1 + $0x3f0] ss:$8 sps:$4 sm:$0xff]   ;;  %v479_v49 = vrot.slane %v62_v43, 7 }
  0x5e   :  { %18629 = vst [vmem:[#allocation48_spill] sm:$0xff] %v12641_v27  ;;  %2884 = vmatprep.subr.bf16.mxu1 %v11324_v4  ;;  %18631 = vst [vmem:[#allocation50_spill] sm:$0xff] %v12652_v16  ;;  %v481_v25 = vrot.slane %v64_v37, 7  ;;  %v544_v4 = vrot.slane %v63_v32, 5  ;;  %v546_v2 = vrot.slane %v65_v34, 5  ;;  %v1028_v30 = vpack.c.bf16 %v12634_v18, %v12631_v41  ;;  %v18672_v63 = vld [vmem:[#allocation41_spill] sm:$0xff] }
  0x5f   :  { %18632 = vst [vmem:[#allocation51_spill] sm:$0xff] %v12655_v5  ;;  %2772 = vmatpush1.bf16.msra.mxu0 %v11319_v26  ;;  %v11333_v39 = vld [vmem:[%s18334_s1 + $0x2e4] ss:$8 sps:$4 sm:$0xff]   ;;  %v770_v61 = vrot.slane %v12652_v16, 1  ;;  %v776_v26 = vrot.slane %v12655_v5, 1  ;;  %v543_v1 = vrot.slane %v62_v43, 5  ;;  %v12677_v32 = vpack.c.bf16 %v12644_v56, %v12562_v12 }
  0x60   :  { %2773 = vmatprep.subr.bf16.mxu0 %v11327_v11  ;;  %v11331_v34 = vld [vmem:[%s18334_s1 + $0x2e0] ss:$8 sps:$4 sm:$0xff]   ;;  %v12680_v11 = vsel %vm585_vm0, %v480_v3, %v544_v4  ;;  %v12683_v18 = vsel %vm585_vm0, %v482_v21, %v546_v2  ;;  %v545_v43 = vrot.slane %v64_v37, 5  ;;  %v12692_v56 = vsel %vm706_vm1, %v761_v45, %v762_v24  ;;  %v11339_v21 = vld [vmem:[%s18334_s1 + $0x2d4] ss:$8 sps:$4 sm:$0xff]  }
  0x61   :  { %2885 = vmatpush1.bf16.msra.mxu1 %v11322_v10  ;;  %18633 = vst [vmem:[#allocation52_spill] sm:$0xff] %v12677_v32  ;;  %18634 = vst [vmem:[#allocation53_spill] sm:$0xff] %v12680_v11  ;;  %v11336_v10 = vld [vmem:[%s18334_s1 + $0x3e4] ss:$8 sps:$4 sm:$0xff]   ;;  %v771_v3 = vrot.slane %v12680_v11, 1  ;;  %v777_v4 = vrot.slane %v12683_v18, 1  ;;  %v12707_v37 = vsel %vm585_vm0, %v417_v13, %v481_v25  ;;  %v12710_v45 = vsel %vm585_vm0, %v479_v49, %v543_v1 }
  0x62   :  { %18635 = vst [vmem:[#allocation54_spill] sm:$0xff] %v12683_v18  ;;  %2604 = vmatmul.mubr.bf16.gmra.mxu0 %v1026_v20  ;;  %2886 = vmatprep.subr.bf16.mxu1 %v11330_v50  ;;  %18636 = vst [vmem:[#allocation55_spill] sm:$0xff] %v12692_v56  ;;  %v11334_v2 = vld [vmem:[%s18334_s1 + $0x3e0] ss:$8 sps:$4 sm:$0xff]   ;;  %v12704_v20 = vsel %vm585_vm0, %v415_v47, %v479_v49  ;;  %v422_v47 = vrot.slane %v69_v58, 1  ;;  %v66_v13 = vld [vmem:[%s18335_s0 + $0xd0] sm:$0xff]  ;;  %v12727_v1 = vpack.c.bf16 %v12608_v15, %v12509_v23 }
  0x63   :  { %2774 = vmatpush2.bf16.msra.mxu0 %v11325_v42  ;;  %2613 = vmatprep.mubr.bf16.mxu0 %v12641_v27  ;;  %18637 = vst [vmem:[#allocation56_spill] sm:$0xff] %v12710_v45  ;;  %v420_v42 = vrot.slane %v12670_v54, 1  ;;  %v12714_v24 = vsel %vm706_vm1, %v770_v61, %v771_v3  ;;  %v12717_v50 = vsel %vm706_vm1, %v776_v26, %v777_v4  ;;  %v484_v49 = vrot.slane %v12670_v54, 7  ;;  %v11342_v61 = vld [vmem:[%s18334_s1 + $0x3d4] ss:$8 sps:$4 sm:$0xff]   ;;  %v18674_v7 = vld [vmem:[#allocation47_spill] sm:$0xff] }
  0x64   :  { %2717 = vmatmul.mubr.bf16.gmra.mxu1 %v1028_v30  ;;  %2775 = vmatprep.subr.bf16.mxu0 %v11333_v39  ;;  %18638 = vst [vmem:[#allocation57_spill] sm:$0xff] %v12714_v24  ;;  %18639 = vst [vmem:[#allocation58_spill] sm:$0xff] %v12717_v50  ;;  %v12720_v27 = vsel %vm585_vm0, %v481_v25, %v545_v43  ;;  %v11337_v30 = vld [vmem:[%s18334_s1 + $0x2d0] ss:$8 sps:$4 sm:$0xff]   ;;  %v12735_v25 = vpack.c.bf16 %v12692_v56, %v12631_v41  ;;  %v486_v39 = vrot.slane %v69_v58, 7 }
  0x65   :  { %2887 = vmatpush2.bf16.msra.mxu1 %v11328_v8  ;;  %18640 = vst [vmem:[#allocation59_spill] sm:$0xff] %v12727_v1  ;;  %2726 = vmatprep.mubr.bf16.mxu1 %v12677_v32  ;;  %v68_v8 = vld [vmem:[%s18335_s0 + $0xe0] sm:$0xff]  ;;  %v12746_v26 = vpack.c.bf16 %v12655_v5, %v12652_v16  ;;  %v767_v43 = vrot.slane %v12704_v20, 1  ;;  %v768_v3 = vrot.slane %v12710_v45, 1  ;;  %v773_v4 = vrot.slane %v12707_v37, 1 }
  0x66   :  { %18641 = vst [vmem:[#allocation60_spill] sm:$0xff] %v12735_v25  ;;  %2888 = vmatprep.subr.bf16.mxu1 %v11336_v10  ;;  %v11340_v32 = vld [vmem:[%s18334_s1 + $0x3d0] ss:$8 sps:$4 sm:$0xff]   ;;  %v11345_v10 = vld [vmem:[%s18334_s1 + $0x2c4] ss:$8 sps:$4 sm:$0xff]   ;;  %v12759_v18 = vpack.c.bf16 %v12717_v50, %v12714_v24  ;;  %v774_v5 = vrot.slane %v12720_v27, 1  ;;  %v12763_v11 = vsel %vm585_vm0, %v420_v42, %v484_v49  ;;  %v12766_v45 = vsel %vm585_vm0, %v422_v47, %v486_v39 }
  0x67   :  { %18642 = vst [vmem:[#allocation61_spill] sm:$0xff] %v12746_v26  ;;  %2776 = vmatpush2.bf16.msra.mxu0 %v11331_v34  ;;  %v419_v34 = vrot.slane %v66_v13, 1  ;;  %v421_v16 = vrot.slane %v68_v8, 1  ;;  %v548_v15 = vrot.slane %v12670_v54, 5  ;;  %v550_v56 = vrot.slane %v69_v58, 5 }
  0x68   :  { %18643 = vst [vmem:[#allocation62_spill] sm:$0xff] %v12759_v18  ;;  %2777 = vmatprep.subr.bf16.mxu0 %v11339_v21  ;;  %v483_v41 = vrot.slane %v66_v13, 7  ;;  %v485_v12 = vrot.slane %v68_v8, 7  ;;  %v782_v50 = vrot.slane %v12763_v11, 1  ;;  %v547_v24 = vrot.slane %v66_v13, 5 }
  0x69   :  { %2889 = vmatpush2.bf16.msra.mxu1 %v11334_v2  ;;  %v11348_v42 = vld [vmem:[%s18334_s1 + $0x3c4] ss:$8 sps:$4 sm:$0xff]   ;;  %v12775_v21 = vsel %vm585_vm0, %v484_v49, %v548_v15  ;;  %v12778_v47 = vsel %vm585_vm0, %v486_v39, %v550_v56  ;;  %v788_v54 = vrot.slane %v12766_v45, 1  ;;  %v549_v58 = vrot.slane %v68_v8, 5  ;;  %v11343_v2 = vld [vmem:[%s18334_s1 + $0x2c0] ss:$8 sps:$4 sm:$0xff]  }
  0x6a   :  { %2614 = vmatmul.mubr.bf16.gmra.mxu0 %v12727_v1  ;;  %2890 = vmatprep.subr.bf16.mxu1 %v11342_v61  ;;  %v12787_v13 = vpack.c.bf16 %v12707_v37, %v12704_v20  ;;  %v783_v15 = vrot.slane %v12775_v21, 1  ;;  %v789_v49 = vrot.slane %v12778_v47, 1  ;;  %v11351_v56 = vld [vmem:[%s18334_s1 + $0x2b4] ss:$8 sps:$4 sm:$0xff]   ;;  %v12799_v39 = vsel %vm706_vm1, %v773_v4, %v774_v5  ;;  %v11346_v61 = vld [vmem:[%s18334_s1 + $0x3c0] ss:$8 sps:$4 sm:$0xff]  }
  0x6b   :  { %2778 = vmatpush2.bf16.msra.mxu0 %v11337_v30  ;;  %2623 = vmatprep.mubr.bf16.mxu0 %v12746_v26  ;;  %v12796_v30 = vsel %vm706_vm1, %v767_v43, %v768_v3  ;;  %18646 = vst [vmem:[#allocation65_spill] sm:$0xff] %v12799_v39  ;;  %v12814_v43 = vsel %vm585_vm0, %v483_v41, %v547_v24  ;;  %v11354_v5 = vld [vmem:[%s18334_s1 + $0x3b4] ss:$8 sps:$4 sm:$0xff]  }
  0x6c   :  { %18644 = vst [vmem:[#allocation63_spill] sm:$0xff] %v12787_v13  ;;  %2727 = vmatmul.mubr.bf16.gmra.mxu1 %v12735_v25  ;;  %2779 = vmatprep.subr.bf16.mxu0 %v11345_v10  ;;  %18645 = vst [vmem:[#allocation64_spill] sm:$0xff] %v12796_v30  ;;  %v12808_v10 = vsel %vm585_vm0, %v419_v34, %v483_v41  ;;  %v12811_v25 = vsel %vm585_vm0, %v421_v16, %v485_v12  ;;  %v11349_v41 = vld [vmem:[%s18334_s1 + $0x2b0] ss:$8 sps:$4 sm:$0xff]  }
  0x6d   :  { %2891 = vmatpush2.bf16.msra.mxu1 %v11340_v32  ;;  %2736 = vmatprep.mubr.bf16.mxu1 %v12759_v18  ;;  %v12820_v32 = vsel %vm706_vm1, %v782_v50, %v783_v15  ;;  %v12823_v3 = vsel %vm706_vm1, %v788_v54, %v789_v49  ;;  %v12826_v4 = vsel %vm585_vm0, %v485_v12, %v549_v58  ;;  %v11352_v34 = vld [vmem:[%s18334_s1 + $0x3b0] ss:$8 sps:$4 sm:$0xff]   ;;  %v779_v54 = vrot.slane %v12808_v10, 1  ;;  %v11363_v50 = vld [vmem:[%s18334_s1 + $0x294] ss:$8 sps:$4 sm:$0xff]  }
  0x6e   :  { %2892 = vmatprep.subr.bf16.mxu1 %v11348_v42  ;;  %18647 = vst [vmem:[#allocation66_spill] sm:$0xff] %v12820_v32  ;;  %18648 = vst [vmem:[#allocation67_spill] sm:$0xff] %v12823_v3  ;;  %v12835_v24 = vpack.c.bf16 %v12766_v45, %v12763_v11  ;;  %v12841_v12 = vpack.c.bf16 %v12799_v39, %v12796_v30  ;;  %v11357_v42 = vld [vmem:[%s18334_s1 + $0x2a4] ss:$8 sps:$4 sm:$0xff]   ;;  %v12852_v58 = vpack.c.bf16 %v12823_v3, %v12820_v32  ;;  %v18666_v18 = vld [vmem:[#allocation13_spill] sm:$0xff] }
  0x6f   :  { %2780 = vmatpush2.bf16.msra.mxu0 %v11343_v2  ;;  %v780_v2 = vrot.slane %v12814_v43, 1  ;;  %v785_v15 = vrot.slane %v12811_v25, 1  ;;  %v786_v49 = vrot.slane %v12826_v4, 1  ;;  %v844_v26 = vrot.slane %v18666_v18, 2  ;;  %v18699_v31 = vld [vmem:[#allocation54_spill] sm:$0xff] }
  0x70   :  { %18649 = vst [vmem:[#allocation68_spill] sm:$0xff] %v12835_v24  ;;  %2781 = vmatprep.subr.bf16.mxu0 %v11351_v56  ;;  %18650 = vst [vmem:[#allocation69_spill] sm:$0xff] %v12841_v12  ;;  %v11360_v56 = vld [vmem:[%s18334_s1 + $0x3a4] ss:$8 sps:$4 sm:$0xff]   ;;  %v890_v30 = vrot.slane %v18699_v31, 2 }
  0x71   :  { %2893 = vmatpush2.bf16.msra.mxu1 %v11346_v61  ;;  %18651 = vst [vmem:[#allocation70_spill] sm:$0xff] %v12852_v58  ;;  %v11355_v61 = vld [vmem:[%s18334_s1 + $0x2a0] ss:$8 sps:$4 sm:$0xff]   ;;  %v12875_v16 = vsel %vm706_vm1, %v779_v54, %v780_v2  ;;  %v12878_v8 = vsel %vm706_vm1, %v785_v15, %v786_v49  ;;  %v11366_v54 = vld [vmem:[%s18334_s1 + $0x394] ss:$8 sps:$4 sm:$0xff]   ;;  %v835_v49 = vrot.slane %v12203_v38, 2 }
  0x72   :  { %2624 = vmatmul.mubr.bf16.gmra.mxu0 %v12787_v13  ;;  %2894 = vmatprep.subr.bf16.mxu1 %v11354_v5  ;;  %v820_v5 = vrot.slane %v12151_v9, 2  ;;  %18652 = vst [vmem:[#allocation71_spill] sm:$0xff] %v12875_v16  ;;  %18653 = vst [vmem:[#allocation72_spill] sm:$0xff] %v12878_v8  ;;  %v12887_v13 = vpack.c.bf16 %v12811_v25, %v12808_v10  ;;  %v11361_v2 = vld [vmem:[%s18334_s1 + $0x290] ss:$8 sps:$4 sm:$0xff]  }
  0x73   :  { %2782 = vmatpush2.bf16.msra.mxu0 %v11349_v41  ;;  %2633 = vmatprep.mubr.bf16.mxu0 %v12835_v24  ;;  %v11358_v41 = vld [vmem:[%s18334_s1 + $0x3a0] ss:$8 sps:$4 sm:$0xff]   ;;  %v821_v24 = vrot.slane %v12188_v28, 2  ;;  %v12899_v28 = vpack.c.bf16 %v12878_v8, %v12875_v16 }
  0x74   :  { %2737 = vmatmul.mubr.bf16.gmra.mxu1 %v12841_v12  ;;  %2783 = vmatprep.subr.bf16.mxu0 %v11357_v42  ;;  %v826_v12 = vrot.slane %v12159_v14, 2  ;;  %18654 = vst [vmem:[#allocation73_spill] sm:$0xff] %v12887_v13  ;;  %v11427_v31 = vld [vmem:[%s18334_s1 + $0x4e0] ss:$8 sps:$4 sm:$0xff]  }
  0x75   :  { %2895 = vmatpush2.bf16.msra.mxu1 %v11352_v34  ;;  %2746 = vmatprep.mubr.bf16.mxu1 %v12852_v58  ;;  %v827_v34 = vrot.slane %v12195_v33, 2  ;;  %18655 = vst [vmem:[#allocation74_spill] sm:$0xff] %v12899_v28  ;;  %v11369_v33 = vld [vmem:[%s18334_s1 + $0x284] ss:$8 sps:$4 sm:$0xff]   ;;  %v12914_v15 = vsel %vm819_vm2, %v820_v5, %v821_v24  ;;  %v11375_v24 = vld [vmem:[%s18334_s1 + $0x474] ss:$8 sps:$4 sm:$0xff]  }
  0x76   :  { %2896 = vmatprep.subr.bf16.mxu1 %v11360_v56  ;;  %v836_v56 = vrot.slane %v12237_v53, 2  ;;  %18656 = vst [vmem:[#allocation75_spill] sm:$0xff] %v12914_v15  ;;  %v832_v53 = vrot.slane %v12221_v46, 2  ;;  %v866_v58 = vrot.slane %v12513_v62, 2 }
  0x77   :  { %2784 = vmatpush2.bf16.msra.mxu0 %v11355_v61  ;;  %v11364_v61 = vld [vmem:[%s18334_s1 + $0x390] ss:$8 sps:$4 sm:$0xff]   ;;  %v12917_v42 = vsel %vm819_vm2, %v826_v12, %v827_v34  ;;  %v18659_v34 = vpack.c.bf16 %v12128_v59, %v12131_v60 }
  0x78   :  { %2785 = vmatprep.subr.bf16.mxu0 %v11363_v50  ;;  %v11372_v50 = vld [vmem:[%s18334_s1 + $0x384] ss:$8 sps:$4 sm:$0xff]   ;;  %18657 = vst [vmem:[#allocation76_spill] sm:$0xff] %v12917_v42  ;;  %v12932_v12 = vsel %vm819_vm2, %v835_v49, %v836_v56  ;;  %v976_v5 = vpack.c.bf16 %v12917_v42, %v12914_v15  ;;  %v847_v56 = vrot.slane %v12288_v22, 2  ;;  %v11373_v60 = vld [vmem:[%s18334_s1 + $0x470] ss:$8 sps:$4 sm:$0xff]  }
  0x79   :  { %2897 = vmatpush2.bf16.msra.mxu1 %v11358_v41  ;;  %v833_v41 = vrot.slane %v12243_v57, 2  ;;  %v11370_v57 = vld [vmem:[%s18334_s1 + $0x380] ss:$8 sps:$4 sm:$0xff]  }
  0x7a   :  { %2634 = vmatmul.mubr.bf16.gmra.mxu0 %v12887_v13  ;;  %2898 = vmatprep.subr.bf16.mxu1 %v11366_v54  ;;  %v11367_v13 = vld [vmem:[%s18334_s1 + $0x280] ss:$8 sps:$4 sm:$0xff]   ;;  %v18658_v54 = vpack.c.bf16 %v12224_v48, %v12590_v6 }
  0x7b   :  { %2786 = vmatpush2.bf16.msra.mxu0 %v11361_v2  ;;  %v841_v2 = vrot.slane %v12282_v19, 2  ;;  %v12948_v49 = vsel %vm819_vm2, %v832_v53, %v833_v41  ;;  %v18671_v53 = vld [vmem:[#allocation21_spill] sm:$0xff] }
  0x7c   :  { %2789 = vmatprep.mubr.bf16.mxu0 %v18658_v54  ;;  %2747 = vmatmul.mubr.bf16.gmra.mxu1 %v12899_v28  ;;  %v842_v54 = vrot.slane %v12305_v36, 2  ;;  %18660 = vst [vmem:[#allocation77_spill] sm:$0xff] %v12948_v49  ;;  %v11376_v36 = vld [vmem:[%s18334_s1 + $0x570] ss:$8 sps:$4 sm:$0xff]   ;;  %v12974_v41 = vpack.c.bf16 %v12948_v49, %v12914_v15  ;;  %v865_v28 = vrot.slane %v12490_v40, 2  ;;  %v859_v1 = vrot.slane %v18671_v53, 2 }
  0x7d   :  { %2787 = vmatprep.subr.bf16.mxu0 %v11369_v33  ;;  %2899 = vmatpush2.bf16.msra.mxu1 %v11364_v61  ;;  %v11378_v33 = vld [vmem:[%s18334_s1 + $0x574] ss:$8 sps:$4 sm:$0xff]   ;;  %v848_v61 = vrot.slane %v12319_v44, 2  ;;  %v11381_v44 = vld [vmem:[%s18334_s1 + $0x464] ss:$8 sps:$4 sm:$0xff]  }
  0x7e   :  { %2902 = vmatprep.mubr.bf16.mxu1 %v18659_v34  ;;  %2900 = vmatprep.subr.bf16.mxu1 %v11372_v50  ;;  %v12962_v50 = vpack.c.bf16 %v12932_v12, %v12590_v6  ;;  %18662 = vst [vmem:[#allocation79_spill] sm:$0xff] %v12974_v41  ;;  %v991_v34 = vpack.c.bf16 %v12282_v19, %v12203_v38  ;;  %v11382_v38 = vld [vmem:[%s18334_s1 + $0x560] ss:$8 sps:$4 sm:$0xff]   ;;  %v11387_v19 = vld [vmem:[%s18334_s1 + $0x454] ss:$8 sps:$4 sm:$0xff]  }
  0x7f   :  { %2788 = vmatpush2.bf16.msra.mxu0 %v11367_v13  ;;  %v11379_v13 = vld [vmem:[%s18334_s1 + $0x460] ss:$8 sps:$4 sm:$0xff]   ;;  %v12987_v59 = vsel %vm819_vm2, %v847_v56, %v848_v61  ;;  %v863_v56 = vrot.slane %v12546_v55, 2  ;;  %v868_v61 = vrot.slane %v12542_v17, 2  ;;  %v11390_v55 = vld [vmem:[%s18334_s1 + $0x554] ss:$8 sps:$4 sm:$0xff]  }
  0x80   :  { %18661 = vst [vmem:[#allocation78_spill] sm:$0xff] %v12962_v50  ;;  %2983 = vmatprep.subr.bf16.mxu0 %v11375_v24  ;;  %v11384_v24 = vld [vmem:[%s18334_s1 + $0x564] ss:$8 sps:$4 sm:$0xff]   ;;  %18663 = vst [vmem:[#allocation80_spill] sm:$0xff] %v12987_v59 }
  0x81   :  { %2901 = vmatpush2.bf16.msra.mxu1 %v11370_v57  ;;  %v12984_v57 = vsel %vm819_vm2, %v841_v2, %v842_v54  ;;  %v872_v2 = vrot.slane %v12527_v0, 2  ;;  %v862_v54 = vrot.slane %v12509_v23, 2  ;;  %v838_v0 = vrot.slane %v12302_v35, 2  ;;  %v18676_v49 = vld [vmem:[#allocation27_spill] sm:$0xff] }
  0x82   :  { %2790 = vmatmul.mubr.bf16.vlgmr.msra.gmra.mxu0 %v976_v5  ;;  %3096 = vmatprep.subr.bf16.mxu1 %v11378_v33  ;;  %v871_v5 = vrot.slane %v12494_v29, 2  ;;  %v18664_v33 = vpack.c.bf16 %v12151_v9, %v12159_v14  ;;  %v18667_v9 = vld [vmem:[#allocation16_spill] sm:$0xff]  ;;  %v860_v42 = vrot.slane %v18676_v49, 2 }
  0x83   :  { %2984 = vmatpush1.bf16.msra.mxu0 %v11373_v60  ;;  %2799 = vmatprep.mubr.bf16.mxu0 %v12962_v50  ;;  %v869_v60 = vrot.slane %v12555_v52, 2  ;;  %v18665_v50 = vld [vmem:[#allocation14_spill] sm:$0xff]  ;;  %v845_v14 = vrot.slane %v18667_v9, 2  ;;  %v13020_v52 = vpack.c.bf16 %v12987_v59, %v12984_v57  ;;  %v13034_v9 = vsel %vm819_vm2, %v865_v28, %v866_v58  ;;  %v11393_v59 = vld [vmem:[%s18334_s1 + $0x444] ss:$8 sps:$4 sm:$0xff]  }
  0x84   :  { %2903 = vmatmul.mubr.bf16.vlgmr.msra.gmra.mxu1 %v18664_v33  ;;  %2985 = vmatprep.subr.bf16.mxu0 %v11381_v44  ;;  %v839_v62 = vrot.slane %v18665_v50, 2  ;;  %v18669_v44 = vld [vmem:[#allocation19_spill] sm:$0xff]  ;;  %v11385_v50 = vld [vmem:[%s18334_s1 + $0x450] ss:$8 sps:$4 sm:$0xff]   ;;  %v13037_v3 = vsel %vm819_vm2, %v871_v5, %v872_v2  ;;  %v13048_v15 = vsel %vm819_vm2, %v862_v54, %v863_v56  ;;  %v13095_v51 = vsel %vm819_vm2, %v859_v1, %v860_v42  ;;  %v11402_v1 = vld [vmem:[%s18334_s1 + $0x534] ss:$8 sps:$4 sm:$0xff]  }
  0x85   :  { %3097 = vmatpush1.bf16.msra.mxu1 %v11376_v36  ;;  %2912 = vmatprep.mubr.bf16.mxu1 %v991_v34  ;;  %18668 = vst [vmem:[#allocation14_spill] sm:$0xff] %v13020_v52  ;;  %v853_v36 = vrot.slane %v18669_v44, 2  ;;  %v18670_v34 = vld [vmem:[#allocation25_spill] sm:$0xff]  ;;  %v13051_v58 = vsel %vm819_vm2, %v868_v61, %v869_v60  ;;  %v1003_v5 = vpack.c.bf16 %v18669_v44, %v12288_v22  ;;  %v11396_v2 = vld [vmem:[%s18334_s1 + $0x544] ss:$8 sps:$4 sm:$0xff]  }
  0x86   :  { %3098 = vmatprep.subr.bf16.mxu1 %v11384_v24  ;;  %v854_v33 = vrot.slane %v18670_v34, 2  ;;  %v13031_v24 = vld [vmem:[%s18335_s0 + $0x78] sm:$0xff]  ;;  %v18673_v34 = vld [vmem:[#allocation40_spill] sm:$0xff]  ;;  %18677 = vst [vmem:[#allocation13_spill] sm:$0xff] %v13051_v58  ;;  %v18678_v56 = vld [vmem:[#allocation49_spill] sm:$0xff]  ;;  %v13080_v49 = vsel %vm819_vm2, %v838_v0, %v839_v62  ;;  %v13083_v28 = vsel %vm819_vm2, %v844_v26, %v845_v14  ;;  %v18681_v22 = vpack.c.bf16 %v12302_v35, %v12221_v46 }
  0x87   :  { %2986 = vmatpush1.bf16.msra.mxu0 %v11379_v13  ;;  %v18675_v13 = vld [vmem:[#allocation46_spill] sm:$0xff]  ;;  %v408_v54 = vrot.slane %v13031_v24, 1  ;;  %v18679_v61 = vld [vmem:[#allocation57_spill] sm:$0xff]  ;;  %v11391_v44 = vld [vmem:[%s18334_s1 + $0x440] ss:$8 sps:$4 sm:$0xff]   ;;  %v13106_v26 = vpack.c.bf16 %v13083_v28, %v13080_v49 }
  0x88   :  { %2987 = vmatprep.subr.bf16.mxu0 %v11387_v19  ;;  %v11388_v19 = vld [vmem:[%s18334_s1 + $0x550] ss:$8 sps:$4 sm:$0xff]   ;;  %v13092_v60 = vsel %vm819_vm2, %v853_v36, %v854_v33  ;;  %v18684_v42 = vld [vmem:[#allocation23_spill] sm:$0xff] }
  0x89   :  { %3099 = vmatpush1.bf16.msra.mxu1 %v11382_v38  ;;  %v18438_v38 = vrot.slane %v13031_v24, 7  ;;  %v54_v46 = vld [vmem:[%s18335_s0 + $0x70] sm:$0xff]  ;;  %18683 = vst [vmem:[#allocation16_spill] sm:$0xff] %v13106_v26  ;;  %v13122_v33 = vpack.c.bf16 %v13095_v51, %v13092_v60  ;;  %v18688_v35 = vld [vmem:[#allocation30_spill] sm:$0xff] }
  0x8a   :  { %2800 = vmatmul.mubr.bf16.gmra.mxu0 %v12974_v41  ;;  %3100 = vmatprep.subr.bf16.mxu1 %v11390_v55  ;;  %v11394_v55 = vld [vmem:[%s18334_s1 + $0x540] ss:$8 sps:$4 sm:$0xff]   ;;  %v11397_v36 = vld [vmem:[%s18334_s1 + $0x430] ss:$8 sps:$4 sm:$0xff]   ;;  %v857_v0 = vrot.slane %v18688_v35, 2  ;;  %v535_v35 = vrot.slane %v54_v46, 5 }
  0x8b   :  { %2988 = vmatpush1.bf16.msra.mxu0 %v11385_v50  ;;  %2809 = vmatprep.mubr.bf16.mxu0 %v13020_v52  ;;  %v11399_v50 = vld [vmem:[%s18334_s1 + $0x434] ss:$8 sps:$4 sm:$0xff]   ;;  %v13115_v14 = vsel %vm585_vm0, %v408_v54, %v18438_v38  ;;  %18685 = vst [vmem:[#allocation19_spill] sm:$0xff] %v13122_v33  ;;  %v1002_v54 = vpack.c.bf16 %v18684_v42, %v18666_v18  ;;  %v407_v38 = vrot.slane %v54_v46, 1  ;;  %v471_v52 = vrot.slane %v54_v46, 7 }
  0x8c   :  { %2913 = vmatmul.mubr.bf16.gmra.mxu1 %v18681_v22  ;;  %2989 = vmatprep.subr.bf16.mxu0 %v11393_v59  ;;  %v850_v59 = vrot.slane %v18684_v42, 2  ;;  %v11400_v41 = vld [vmem:[%s18334_s1 + $0x530] ss:$8 sps:$4 sm:$0xff]   ;;  %v11408_v18 = vld [vmem:[%s18334_s1 + $0x524] ss:$8 sps:$4 sm:$0xff]  }
  0x8d   :  { %3101 = vmatpush1.bf16.msra.mxu1 %v11388_v19  ;;  %2922 = vmatprep.mubr.bf16.mxu1 %v1003_v5  ;;  %v18686_v19 = vld [vmem:[#allocation28_spill] sm:$0xff]  ;;  %v11411_v46 = vld [vmem:[%s18334_s1 + $0x414] ss:$8 sps:$4 sm:$0xff]  }
  0x8e   :  { %3102 = vmatprep.subr.bf16.mxu1 %v11396_v2  ;;  %v851_v5 = vrot.slane %v18686_v19, 2  ;;  %v18687_v2 = vld [vmem:[#allocation24_spill] sm:$0xff]  ;;  %v1015_v19 = vpack.c.bf16 %v13115_v14, %v18671_v53 }
  0x8f   :  { %2990 = vmatpush1.bf16.msra.mxu0 %v11391_v44  ;;  %v856_v22 = vrot.slane %v18687_v2, 2  ;;  %v11405_v44 = vld [vmem:[%s18334_s1 + $0x424] ss:$8 sps:$4 sm:$0xff]  }
  0x90   :  { %2991 = vmatprep.subr.bf16.mxu0 %v11399_v50  ;;  %v70_v50 = vld [vmem:[%s18335_s0 + $0xf0] sm:$0xff]  ;;  %v13149_v42 = vsel %vm819_vm2, %v850_v59, %v851_v5  ;;  %v11406_v59 = vld [vmem:[%s18334_s1 + $0x520] ss:$8 sps:$4 sm:$0xff]  }
  0x91   :  { %3103 = vmatpush1.bf16.msra.mxu1 %v11394_v55  ;;  %v11403_v55 = vld [vmem:[%s18334_s1 + $0x420] ss:$8 sps:$4 sm:$0xff]   ;;  %v13152_v53 = vsel %vm819_vm2, %v856_v22, %v857_v0  ;;  %v13164_v0 = vsel %vm585_vm0, %v471_v52, %v535_v35  ;;  %v551_v62 = vrot.slane %v70_v50, 5 }
  0x92   :  { %2810 = vmatmul.mubr.bf16.gmra.mxu0 %v13106_v26  ;;  %3104 = vmatprep.subr.bf16.mxu1 %v11402_v1  ;;  %v13158_v1 = vsel %vm585_vm0, %v407_v38, %v471_v52  ;;  %v487_v26 = vrot.slane %v70_v50, 7  ;;  %v13169_v22 = vpack.c.bf16 %v13152_v53, %v13149_v42  ;;  %v11414_v38 = vld [vmem:[%s18334_s1 + $0x514] ss:$8 sps:$4 sm:$0xff]  }
  0x93   :  { %2992 = vmatpush1.bf16.msra.mxu0 %v11397_v36  ;;  %2819 = vmatprep.mubr.bf16.mxu0 %v13122_v33  ;;  %v423_v36 = vrot.slane %v70_v50, 1  ;;  %v956_v5 = vrot.slane %v13158_v1, 2  ;;  %v1014_v52 = vpack.c.bf16 %v13158_v1, %v18687_v2  ;;  %v18691_v33 = vld [vmem:[#allocation43_spill] sm:$0xff]  ;;  %v11412_v2 = vld [vmem:[%s18334_s1 + $0x510] ss:$8 sps:$4 sm:$0xff]  }
  0x94   :  { %2923 = vmatmul.mubr.bf16.gmra.mxu1 %v1002_v54  ;;  %2993 = vmatprep.subr.bf16.mxu0 %v11405_v44  ;;  %18689 = vst [vmem:[#allocation25_spill] sm:$0xff] %v13169_v22  ;;  %v11409_v54 = vld [vmem:[%s18334_s1 + $0x410] ss:$8 sps:$4 sm:$0xff]   ;;  %v1031_v44 = vpack.c.bf16 %v13037_v3, %v13034_v9  ;;  %v878_v39 = vrot.slane %v18691_v33, 2  ;;  %v11420_v33 = vld [vmem:[%s18334_s1 + $0x504] ss:$8 sps:$4 sm:$0xff]  }
  0x95   :  { %3105 = vmatpush1.bf16.msra.mxu1 %v11400_v41  ;;  %2932 = vmatprep.mubr.bf16.mxu1 %v1015_v19  ;;  %v957_v41 = vrot.slane %v13164_v0, 2  ;;  %v18690_v19 = vld [vmem:[#allocation42_spill] sm:$0xff]  ;;  %v11415_v50 = vld [vmem:[%s18334_s1 + $0x400] ss:$8 sps:$4 sm:$0xff]  }
  0x96   :  { %3106 = vmatprep.subr.bf16.mxu1 %v11408_v18  ;;  %v877_v35 = vrot.slane %v18690_v19, 2  ;;  %v11417_v18 = vld [vmem:[%s18334_s1 + $0x404] ss:$8 sps:$4 sm:$0xff]  }
  0x97   :  { %2994 = vmatpush1.bf16.msra.mxu0 %v11403_v55  ;;  %v13188_v55 = vsel %vm585_vm0, %v423_v36, %v487_v26  ;;  %v13191_v16 = vsel %vm819_vm2, %v956_v5, %v957_v41  ;;  %v648_v36 = vsel %vm585_vm0, %v487_v26, %v551_v62  ;;  %v899_v5 = vrot.slane %v12826_v4, 2  ;;  %v11418_v26 = vld [vmem:[%s18334_s1 + $0x500] ss:$8 sps:$4 sm:$0xff]  }
  0x98   :  { %2995 = vmatprep.subr.bf16.mxu0 %v11411_v46  ;;  %v946_v32 = vrot.slane %v13188_v55, 1  ;;  %v947_v41 = vrot.slane %v648_v36, 1  ;;  %v13213_v46 = vsel %vm819_vm2, %v877_v35, %v878_v39  ;;  %v962_v62 = vrot.slane %v13188_v55, 2 }
  0x99   :  { %3107 = vmatpush1.bf16.msra.mxu1 %v11406_v59  ;;  %v898_v59 = vrot.slane %v12811_v25, 2  ;;  %v18692_v4 = vpack.c.bf16 %v12490_v40, %v12494_v29  ;;  %v1030_v39 = vpack.c.bf16 %v13051_v58, %v13048_v15  ;;  %v11421_v40 = vld [vmem:[%s18334_s1 + $0x4f0] ss:$8 sps:$4 sm:$0xff]  }
  0x9a   :  { %2820 = vmatmul.mubr.bf16.gmra.mxu0 %v13169_v22  ;;  %3108 = vmatprep.subr.bf16.mxu1 %v11414_v38  ;;  %v11423_v38 = vld [vmem:[%s18334_s1 + $0x4f4] ss:$8 sps:$4 sm:$0xff]  }
  0x9b   :  { %2996 = vmatpush1.bf16.msra.mxu0 %v11409_v54  ;;  %2829 = vmatprep.mubr.bf16.mxu0 %v1031_v44  ;;  %v13223_v54 = vsel %vm706_vm1, %v946_v32, %v947_v41  ;;  %v18694_v44 = vld [vmem:[#allocation44_spill] sm:$0xff]  ;;  %v13239_v32 = vpack.c.bf16 %v13213_v46, %v13034_v9  ;;  %v13243_v41 = vsel %vm819_vm2, %v898_v59, %v899_v5  ;;  %v11424_v59 = vld [vmem:[%s18334_s1 + $0x5f0] ss:$8 sps:$4 sm:$0xff]  }
  0x9c   :  { %2933 = vmatmul.mubr.bf16.gmra.mxu1 %v1014_v52  ;;  %2997 = vmatprep.subr.bf16.mxu0 %v11417_v18  ;;  %18693 = vst [vmem:[#allocation41_spill] sm:$0xff] %v13223_v54  ;;  %v963_v52 = vrot.slane %v648_v36, 2  ;;  %v874_v35 = vrot.slane %v18694_v44, 2  ;;  %v18695_v18 = vld [vmem:[#allocation45_spill] sm:$0xff]  ;;  %v18698_v54 = vld [vmem:[#allocation51_spill] sm:$0xff] }
  0x9d   :  { %3109 = vmatpush1.bf16.msra.mxu1 %v11412_v2  ;;  %2942 = vmatprep.mubr.bf16.mxu1 %v18692_v4  ;;  %v11426_v2 = vld [vmem:[%s18334_s1 + $0x5f4] ss:$8 sps:$4 sm:$0xff]   ;;  %v875_v22 = vrot.slane %v18695_v18, 2  ;;  %v889_v8 = vrot.slane %v18698_v54, 2 }
  0x9e   :  { %3110 = vmatprep.subr.bf16.mxu1 %v11420_v33  ;;  %v18696_v33 = vld [vmem:[#allocation50_spill] sm:$0xff]  ;;  %v13246_v4 = vsel %vm819_vm2, %v962_v62, %v963_v52  ;;  %v18697_v18 = vld [vmem:[#allocation53_spill] sm:$0xff] }
  0x9f   :  { %2998 = vmatpush1.bf16.msra.mxu0 %v11415_v50  ;;  %v883_v36 = vrot.slane %v18696_v33, 2  ;;  %v11429_v50 = vld [vmem:[%s18334_s1 + $0x4e4] ss:$8 sps:$4 sm:$0xff]   ;;  %v884_v29 = vrot.slane %v18697_v18, 2  ;;  %v1045_v5 = vpack.c.bf16 %v18696_v33, %v18690_v19  ;;  %v13269_v62 = vsel %vm819_vm2, %v874_v35, %v875_v22  ;;  %v11430_v19 = vld [vmem:[%s18334_s1 + $0x5e0] ss:$8 sps:$4 sm:$0xff]  }
  0xa0   :  { %2999 = vmatprep.subr.bf16.mxu0 %v11423_v38  ;;  %v11432_v38 = vld [vmem:[%s18334_s1 + $0x5e4] ss:$8 sps:$4 sm:$0xff]   ;;  %v11435_v52 = vld [vmem:[%s18334_s1 + $0x4d4] ss:$8 sps:$4 sm:$0xff]   ;;  %v880_v35 = vrot.slane %v12704_v20, 2 }
  0xa1   :  { %3111 = vmatpush1.bf16.msra.mxu1 %v11418_v26  ;;  %v18700_v26 = vpack.c.bf16 %v12509_v23, %v12542_v17  ;;  %v11433_v23 = vld [vmem:[%s18334_s1 + $0x4d0] ss:$8 sps:$4 sm:$0xff]   ;;  %v13291_v17 = vpack.c.bf16 %v13269_v62, %v13048_v15  ;;  %v11438_v22 = vld [vmem:[%s18334_s1 + $0x5d4] ss:$8 sps:$4 sm:$0xff]  }
  0xa2   :  { %2830 = vmatmul.mubr.bf16.gmra.mxu0 %v1030_v39  ;;  %3112 = vmatprep.subr.bf16.mxu1 %v11426_v2  ;;  %v13281_v39 = vsel %vm819_vm2, %v883_v36, %v884_v29  ;;  %v13284_v2 = vsel %vm819_vm2, %v889_v8, %v890_v30  ;;  %v18701_v29 = vld [vmem:[#allocation56_spill] sm:$0xff]  ;;  %v1044_v8 = vpack.c.bf16 %v12704_v20, %v18694_v44  ;;  %v886_v36 = vrot.slane %v12707_v37, 2  ;;  %v13312_v18 = vld [vmem:[%s18335_s0 + $0xf8] sm:$0xff] }
  0xa3   :  { %3000 = vmatpush2.bf16.msra.mxu0 %v11421_v40  ;;  %2839 = vmatprep.mubr.bf16.mxu0 %v13239_v32  ;;  %v881_v30 = vrot.slane %v18701_v29, 2  ;;  %v11441_v40 = vld [vmem:[%s18334_s1 + $0x4c4] ss:$8 sps:$4 sm:$0xff]   ;;  %v13305_v33 = vpack.c.bf16 %v13284_v2, %v13281_v39  ;;  %v895_v20 = vrot.slane %v12763_v11, 2  ;;  %v896_v44 = vrot.slane %v12775_v21, 2 }
  0xa4   :  { %2943 = vmatmul.mubr.bf16.gmra.mxu1 %v18700_v26  ;;  %3001 = vmatprep.subr.bf16.mxu0 %v11429_v50  ;;  %v887_v50 = vrot.slane %v12720_v27, 2  ;;  %v1057_v27 = vpack.c.bf16 %v12763_v11, %v18698_v54  ;;  %v424_v21 = vrot.slane %v13312_v18, 1  ;;  %v488_v26 = vrot.slane %v13312_v18, 7  ;;  %v11450_v29 = vld [vmem:[%s18334_s1 + $0x5b4] ss:$8 sps:$4 sm:$0xff]  }
  0xa5   :  { %3113 = vmatpush2.bf16.msra.mxu1 %v11424_v59  ;;  %2952 = vmatprep.mubr.bf16.mxu1 %v1045_v5  ;;  %v901_v59 = vrot.slane %v12766_v45, 2  ;;  %v902_v5 = vrot.slane %v12778_v47, 2  ;;  %v11439_v47 = vld [vmem:[%s18334_s1 + $0x4c0] ss:$8 sps:$4 sm:$0xff]   ;;  %v13334_v11 = vsel %vm819_vm2, %v880_v35, %v881_v30 }
  0xa6   :  { %3114 = vmatprep.subr.bf16.mxu1 %v11432_v38  ;;  %v11436_v38 = vld [vmem:[%s18334_s1 + $0x5d0] ss:$8 sps:$4 sm:$0xff]   ;;  %v13337_v54 = vsel %vm819_vm2, %v886_v36, %v887_v50  ;;  %v13361_v30 = vsel %vm585_vm0, %v424_v21, %v488_v26  ;;  %v892_v36 = vrot.slane %v12808_v10, 2  ;;  %v893_v50 = vrot.slane %v12814_v43, 2  ;;  %v11456_v43 = vld [vmem:[%s18334_s1 + $0x5a4] ss:$8 sps:$4 sm:$0xff]  }
  0xa7   :  { %3002 = vmatpush2.bf16.msra.mxu0 %v11427_v31  ;;  %v11444_v31 = vld [vmem:[%s18334_s1 + $0x5c4] ss:$8 sps:$4 sm:$0xff]   ;;  %v13353_v35 = vpack.c.bf16 %v13337_v54, %v13334_v11  ;;  %v11462_v21 = vld [vmem:[%s18334_s1 + $0x594] ss:$8 sps:$4 sm:$0xff]  }
  0xa8   :  { %3003 = vmatprep.subr.bf16.mxu0 %v11435_v52  ;;  %v13343_v52 = vsel %vm819_vm2, %v895_v20, %v896_v44  ;;  %v1056_v20 = vpack.c.bf16 %v12808_v10, %v12707_v37  ;;  %v11453_v44 = vld [vmem:[%s18334_s1 + $0x4a4] ss:$8 sps:$4 sm:$0xff]   ;;  %v11451_v37 = vld [vmem:[%s18334_s1 + $0x4a0] ss:$8 sps:$4 sm:$0xff]   ;;  %v13391_v10 = vsel %vm819_vm2, %v892_v36, %v893_v50 }
  0xa9   :  { %3115 = vmatpush2.bf16.msra.mxu1 %v11430_v19  ;;  %v11447_v19 = vld [vmem:[%s18334_s1 + $0x4b4] ss:$8 sps:$4 sm:$0xff]   ;;  %v11463_v36 = vld [vmem:[%s18334_s1 + $0x480] ss:$8 sps:$4 sm:$0xff]  }
  0xaa   :  { %2840 = vmatmul.mubr.bf16.gmra.mxu0 %v13291_v17  ;;  %3116 = vmatprep.subr.bf16.mxu1 %v11438_v22  ;;  %v11442_v22 = vld [vmem:[%s18334_s1 + $0x5c0] ss:$8 sps:$4 sm:$0xff]  }
  0xab   :  { %3004 = vmatpush2.bf16.msra.mxu0 %v11433_v23  ;;  %2849 = vmatprep.mubr.bf16.mxu0 %v13305_v33  ;;  %v13346_v23 = vsel %vm819_vm2, %v901_v59, %v902_v5  ;;  %v11448_v59 = vld [vmem:[%s18334_s1 + $0x5b0] ss:$8 sps:$4 sm:$0xff]   ;;  %v1069_v5 = vpack.c.bf16 %v13361_v30, %v12766_v45  ;;  %v18702_v50 = vld [vmem:[#allocation3_spill] sm:$0xff] }
  0xac   :  { %2953 = vmatmul.mubr.bf16.gmra.mxu1 %v1044_v8  ;;  %3005 = vmatprep.subr.bf16.mxu0 %v11441_v40  ;;  %v11445_v8 = vld [vmem:[%s18334_s1 + $0x4b0] ss:$8 sps:$4 sm:$0xff]   ;;  %v13368_v40 = vpack.c.bf16 %v13346_v23, %v13343_v52 }
  0xad   :  { %3117 = vmatpush2.bf16.msra.mxu1 %v11436_v38  ;;  %2962 = vmatprep.mubr.bf16.mxu1 %v1057_v27  ;;  %v11459_v38 = vld [vmem:[%s18334_s1 + $0x494] ss:$8 sps:$4 sm:$0xff]   ;;  %v11454_v27 = vld [vmem:[%s18334_s1 + $0x5a0] ss:$8 sps:$4 sm:$0xff]  }
  0xae   :  { %3118 = vmatprep.subr.bf16.mxu1 %v11444_v31  ;;  %v13401_v31 = vpack.c.bf16 %v13243_v41, %v13391_v10 }
  0xaf   :  { %3006 = vmatpush2.bf16.msra.mxu0 %v11439_v47  ;;  %v11457_v47 = vld [vmem:[%s18334_s1 + $0x490] ss:$8 sps:$4 sm:$0xff]  }
  0xb0   :  { %3007 = vmatprep.subr.bf16.mxu0 %v11447_v19  ;;  %v1068_v19 = vpack.c.bf16 %v13188_v55, %v12811_v25 }
  0xb1   :  { %3119 = vmatpush2.bf16.msra.mxu1 %v11442_v22  ;;  %v11465_v22 = vld [vmem:[%s18334_s1 + $0x484] ss:$8 sps:$4 sm:$0xff]  }
  0xb2   :  { %2850 = vmatmul.mubr.bf16.gmra.mxu0 %v13353_v35  ;;  %3120 = vmatprep.subr.bf16.mxu1 %v11450_v29  ;;  %v11460_v29 = vld [vmem:[%s18334_s1 + $0x590] ss:$8 sps:$4 sm:$0xff]  }
  0xb3   :  { %3008 = vmatpush2.bf16.msra.mxu0 %v11445_v8  ;;  %2859 = vmatprep.mubr.bf16.mxu0 %v13368_v40  ;;  %v11468_v8 = vld [vmem:[%s18334_s1 + $0x584] ss:$8 sps:$4 sm:$0xff]  }
  0xb4   :  { %2963 = vmatmul.mubr.bf16.gmra.mxu1 %v1056_v20  ;;  %3009 = vmatprep.subr.bf16.mxu0 %v11453_v44  ;;  %v18703_v20 = vld [vmem:[#allocation4_spill] sm:$0xff] }
  0xb5   :  { %3121 = vmatpush2.bf16.msra.mxu1 %v11448_v59  ;;  %2972 = vmatprep.mubr.bf16.mxu1 %v1069_v5  ;;  %v18704_v44 = vpack.c.bf16 %v18702_v50, %v18703_v20  ;;  %v11471_v59 = vld [vmem:[%s18334_s1 + $0x674] ss:$8 sps:$4 sm:$0xff]   ;;  %v11466_v5 = vld [vmem:[%s18334_s1 + $0x580] ss:$8 sps:$4 sm:$0xff]   ;;  %v11480_v50 = vld [vmem:[%s18334_s1 + $0x764] ss:$8 sps:$4 sm:$0xff]  }
  0xb6   :  { %3122 = vmatprep.subr.bf16.mxu1 %v11456_v43  ;;  %v18705_v43 = vpack.c.bf16 %v12590_v6, %v12224_v48  ;;  %v11472_v48 = vld [vmem:[%s18334_s1 + $0x770] ss:$8 sps:$4 sm:$0xff]   ;;  %v995_v6 = vpack.c.bf16 %v12984_v57, %v12932_v12  ;;  %v11475_v20 = vld [vmem:[%s18334_s1 + $0x660] ss:$8 sps:$4 sm:$0xff]   ;;  %v11483_v57 = vld [vmem:[%s18334_s1 + $0x654] ss:$8 sps:$4 sm:$0xff]  }
  0xb7   :  { %3010 = vmatpush2.bf16.msra.mxu0 %v11451_v37  ;;  %v11474_v37 = vld [vmem:[%s18334_s1 + $0x774] ss:$8 sps:$4 sm:$0xff]  }
  0xb8   :  { %3011 = vmatprep.subr.bf16.mxu0 %v11459_v38  ;;  %v11469_v38 = vld [vmem:[%s18334_s1 + $0x670] ss:$8 sps:$4 sm:$0xff]  }
  0xb9   :  { %3123 = vmatpush2.bf16.msra.mxu1 %v11454_v27  ;;  %v18706_v27 = vld [vmem:[#allocation9_spill] sm:$0xff] }
  0xba   :  { %2860 = vmatmul.mubr.bf16.gmra.mxu0 %v13401_v31  ;;  %3124 = vmatprep.subr.bf16.mxu1 %v11462_v21  ;;  %v18707_v21 = vld [vmem:[#allocation15_spill] sm:$0xff] }
  0xbb   :  { %3012 = vmatpush2.bf16.msra.mxu0 %v11457_v47  ;;  %3015 = vmatprep.mubr.bf16.mxu0 %v18704_v44  ;;  %v993_v47 = vpack.c.bf16 %v18707_v21, %v18706_v27  ;;  %v18711_v44 = vld [vmem:[#allocation75_spill] sm:$0xff]  ;;  %v18716_v27 = vld [vmem:[#allocation22_spill] sm:$0xff] }
  0xbc   :  { %2973 = vmatmul.mubr.bf16.gmra.mxu1 %v1068_v19  ;;  %3013 = vmatprep.subr.bf16.mxu0 %v11465_v22  ;;  %v11477_v19 = vld [vmem:[%s18334_s1 + $0x664] ss:$8 sps:$4 sm:$0xff]   ;;  %v536_v22 = vrot.slane %v13031_v24, 5 }
  0xbd   :  { %3125 = vmatpush2.bf16.msra.mxu1 %v11460_v29  ;;  %3128 = vmatprep.mubr.bf16.mxu1 %v18705_v43  ;;  %v18708_v29 = vld [vmem:[#allocation5_spill] sm:$0xff]  ;;  %v18714_v43 = vrot.slane %v13031_v24, 7  ;;  %v11489_v24 = vld [vmem:[%s18334_s1 + $0x644] ss:$8 sps:$4 sm:$0xff]  }
  0xbe   :  { %3126 = vmatprep.subr.bf16.mxu1 %v11468_v8  ;;  %v18709_v8 = vld [vmem:[#allocation6_spill] sm:$0xff] }
  0xbf   :  { %3014 = vmatpush2.bf16.msra.mxu0 %v11463_v36  ;;  %v18710_v36 = vpack.c.bf16 %v18708_v29, %v18709_v8  ;;  %v11484_v8 = vld [vmem:[%s18334_s1 + $0x750] ss:$8 sps:$4 sm:$0xff]  }
  0xc0   :  { %3209 = vmatprep.subr.bf16.mxu0 %v11471_v59  ;;  %v18712_v59 = vld [vmem:[#allocation76_spill] sm:$0xff] }
  0xc1   :  { %3127 = vmatpush2.bf16.msra.mxu1 %v11466_v5  ;;  %v18713_v12 = vpack.c.bf16 %v18711_v44, %v18712_v59  ;;  %v11478_v5 = vld [vmem:[%s18334_s1 + $0x760] ss:$8 sps:$4 sm:$0xff]  }
  0xc2   :  { %3016 = vmatmul.mubr.bf16.vlgmr.msra.gmra.mxu0 %v18710_v36  ;;  %3322 = vmatprep.subr.bf16.mxu1 %v11474_v37  ;;  %v633_v37 = vsel %vm585_vm0, %v18714_v43, %v536_v22  ;;  %v943_v22 = vrot.slane %v13115_v14, 1  ;;  %v18718_v36 = vld [vmem:[#allocation80_spill] sm:$0xff] }
  0xc3   :  { %3210 = vmatpush1.bf16.msra.mxu0 %v11469_v38  ;;  %3025 = vmatprep.mubr.bf16.mxu0 %v993_v47  ;;  %v18715_v38 = vld [vmem:[#allocation10_spill] sm:$0xff]  ;;  %v944_v29 = vrot.slane %v633_v37, 1  ;;  %v960_v44 = vrot.slane %v633_v37, 2  ;;  %v11487_v59 = vld [vmem:[%s18334_s1 + $0x640] ss:$8 sps:$4 sm:$0xff]  }
  0xc4   :  { %3129 = vmatmul.mubr.bf16.vlgmr.msra.gmra.mxu1 %v18713_v12  ;;  %3211 = vmatprep.subr.bf16.mxu0 %v11477_v19  ;;  %v992_v21 = vpack.c.bf16 %v18716_v27, %v18715_v38  ;;  %v11486_v47 = vld [vmem:[%s18334_s1 + $0x754] ss:$8 sps:$4 sm:$0xff]   ;;  %v11481_v19 = vld [vmem:[%s18334_s1 + $0x650] ss:$8 sps:$4 sm:$0xff]   ;;  %v11490_v37 = vld [vmem:[%s18334_s1 + $0x740] ss:$8 sps:$4 sm:$0xff]  }
  0xc5   :  { %3323 = vmatpush1.bf16.msra.mxu1 %v11472_v48  ;;  %3138 = vmatprep.mubr.bf16.mxu1 %v995_v6  ;;  %v18717_v48 = vld [vmem:[#allocation77_spill] sm:$0xff]  ;;  %v13507_v43 = vsel %vm706_vm1, %v943_v22, %v944_v29  ;;  %v11501_v22 = vld [vmem:[%s18334_s1 + $0x624] ss:$8 sps:$4 sm:$0xff]  }
  0xc6   :  { %3324 = vmatprep.subr.bf16.mxu1 %v11480_v50  ;;  %v994_v6 = vpack.c.bf16 %v13080_v49, %v18717_v48  ;;  %v1007_v50 = vpack.c.bf16 %v13092_v60, %v18718_v36  ;;  %v11492_v49 = vld [vmem:[%s18334_s1 + $0x744] ss:$8 sps:$4 sm:$0xff]   ;;  %v18719_v12 = vld [vmem:[#allocation29_spill] sm:$0xff]  ;;  %v940_v48 = vrot.slane %v13158_v1, 1 }
  0xc7   :  { %3212 = vmatpush1.bf16.msra.mxu0 %v11475_v20  ;;  %v959_v20 = vrot.slane %v13115_v14, 2  ;;  %v11495_v60 = vld [vmem:[%s18334_s1 + $0x634] ss:$8 sps:$4 sm:$0xff]   ;;  %v11496_v29 = vld [vmem:[%s18334_s1 + $0x730] ss:$8 sps:$4 sm:$0xff]   ;;  %v18723_v36 = vld [vmem:[#allocation36_spill] sm:$0xff] }
  0xc8   :  { %3213 = vmatprep.subr.bf16.mxu0 %v11483_v57  ;;  %v18720_v57 = vld [vmem:[#allocation17_spill] sm:$0xff] }
  0xc9   :  { %3325 = vmatpush1.bf16.msra.mxu1 %v11478_v5  ;;  %v18721_v5 = vpack.c.bf16 %v18719_v12, %v18720_v57  ;;  %v11498_v38 = vld [vmem:[%s18334_s1 + $0x734] ss:$8 sps:$4 sm:$0xff]   ;;  %v13516_v27 = vsel %vm819_vm2, %v959_v20, %v960_v44  ;;  %v11502_v44 = vld [vmem:[%s18334_s1 + $0x720] ss:$8 sps:$4 sm:$0xff]  }
  0xca   :  { %3026 = vmatmul.mubr.bf16.gmra.mxu0 %v992_v21  ;;  %3326 = vmatprep.subr.bf16.mxu1 %v11486_v47  ;;  %v11493_v21 = vld [vmem:[%s18334_s1 + $0x630] ss:$8 sps:$4 sm:$0xff]   ;;  %v18722_v47 = vld [vmem:[#allocation31_spill] sm:$0xff]  ;;  %v11507_v20 = vld [vmem:[%s18334_s1 + $0x614] ss:$8 sps:$4 sm:$0xff]  }
  0xcb   :  { %3214 = vmatpush1.bf16.msra.mxu0 %v11481_v19  ;;  %3035 = vmatprep.mubr.bf16.mxu0 %v18721_v5  ;;  %v1017_v19 = vpack.c.bf16 %v13507_v43, %v18722_v47  ;;  %v11510_v57 = vld [vmem:[%s18334_s1 + $0x714] ss:$8 sps:$4 sm:$0xff]   ;;  %v11505_v5 = vld [vmem:[%s18334_s1 + $0x610] ss:$8 sps:$4 sm:$0xff]  }
  0xcc   :  { %3139 = vmatmul.mubr.bf16.gmra.mxu1 %v994_v6  ;;  %3215 = vmatprep.subr.bf16.mxu0 %v11489_v24  ;;  %v941_v6 = vrot.slane %v13164_v0, 1  ;;  %v1006_v24 = vpack.c.bf16 %v13149_v42, %v13083_v28  ;;  %v11504_v28 = vld [vmem:[%s18334_s1 + $0x724] ss:$8 sps:$4 sm:$0xff]   ;;  %v11499_v42 = vld [vmem:[%s18334_s1 + $0x620] ss:$8 sps:$4 sm:$0xff]  }
  0xcd   :  { %3327 = vmatpush1.bf16.msra.mxu1 %v11484_v8  ;;  %3148 = vmatprep.mubr.bf16.mxu1 %v1007_v50  ;;  %v1019_v8 = vpack.c.bf16 %v13516_v27, %v13095_v51  ;;  %v18724_v50 = vld [vmem:[#allocation26_spill] sm:$0xff] }
  0xce   :  { %3328 = vmatprep.subr.bf16.mxu1 %v11492_v49  ;;  %v18725_v49 = vpack.c.bf16 %v18723_v36, %v18724_v50  ;;  %v13545_v0 = vsel %vm706_vm1, %v940_v48, %v941_v6  ;;  %v18727_v48 = vpack.c.bf16 %v18673_v34, %v18672_v63  ;;  %v11519_v6 = vld [vmem:[%s18334_s1 + $0x6f4] ss:$8 sps:$4 sm:$0xff]   ;;  %v11517_v34 = vld [vmem:[%s18334_s1 + $0x6f0] ss:$8 sps:$4 sm:$0xff]   ;;  %v18729_v36 = vpack.c.bf16 %v18675_v13, %v18674_v7  ;;  %v11528_v50 = vld [vmem:[%s18334_s1 + $0x7e4] ss:$8 sps:$4 sm:$0xff]  }
  0xcf   :  { %3216 = vmatpush1.bf16.msra.mxu0 %v11487_v59  ;;  %v18726_v59 = vld [vmem:[#allocation37_spill] sm:$0xff]  ;;  %v11526_v13 = vld [vmem:[%s18334_s1 + $0x7e0] ss:$8 sps:$4 sm:$0xff]  }
  0xd0   :  { %3217 = vmatprep.subr.bf16.mxu0 %v11495_v60  ;;  %v1016_v12 = vpack.c.bf16 %v13545_v0, %v18726_v59  ;;  %v1018_v60 = vpack.c.bf16 %v13191_v16, %v13152_v53  ;;  %v11522_v63 = vld [vmem:[%s18334_s1 + $0x7f4] ss:$8 sps:$4 sm:$0xff]  }
  0xd1   :  { %3329 = vmatpush1.bf16.msra.mxu1 %v11490_v37  ;;  %v11513_v37 = vld [vmem:[%s18334_s1 + $0x604] ss:$8 sps:$4 sm:$0xff]   ;;  %v11531_v7 = vld [vmem:[%s18334_s1 + $0x6d4] ss:$8 sps:$4 sm:$0xff]  }
  0xd2   :  { %3036 = vmatmul.mubr.bf16.gmra.mxu0 %v18725_v49  ;;  %3330 = vmatprep.subr.bf16.mxu1 %v11498_v38  ;;  %v11508_v38 = vld [vmem:[%s18334_s1 + $0x710] ss:$8 sps:$4 sm:$0xff]   ;;  %v11523_v49 = vld [vmem:[%s18334_s1 + $0x6e0] ss:$8 sps:$4 sm:$0xff]  }
  0xd3   :  { %3218 = vmatpush1.bf16.msra.mxu0 %v11493_v21  ;;  %3045 = vmatprep.mubr.bf16.mxu0 %v1017_v19  ;;  %v11516_v21 = vld [vmem:[%s18334_s1 + $0x704] ss:$8 sps:$4 sm:$0xff]   ;;  %v11511_v19 = vld [vmem:[%s18334_s1 + $0x600] ss:$8 sps:$4 sm:$0xff]  }
  0xd4   :  { %3149 = vmatmul.mubr.bf16.gmra.mxu1 %v1006_v24  ;;  %3219 = vmatprep.subr.bf16.mxu0 %v11501_v22  ;;  %v11514_v24 = vld [vmem:[%s18334_s1 + $0x700] ss:$8 sps:$4 sm:$0xff]   ;;  %v18728_v22 = vpack.c.bf16 %v13034_v9, %v13037_v3  ;;  %v11520_v3 = vld [vmem:[%s18334_s1 + $0x7f0] ss:$8 sps:$4 sm:$0xff]   ;;  %v1049_v9 = vpack.c.bf16 %v13281_v39, %v13213_v46  ;;  %v18731_v46 = vmov %v13051_v58 }
  0xd5   :  { %3331 = vmatpush1.bf16.msra.mxu1 %v11496_v29  ;;  %3158 = vmatprep.mubr.bf16.mxu1 %v1019_v8  ;;  %v11525_v29 = vld [vmem:[%s18334_s1 + $0x6e4] ss:$8 sps:$4 sm:$0xff]   ;;  %v552_v8 = vrot.slane %v13312_v18, 5  ;;  %v18732_v39 = vpack.c.bf16 %v13048_v15, %v18731_v46  ;;  %v11534_v15 = vld [vmem:[%s18334_s1 + $0x7d4] ss:$8 sps:$4 sm:$0xff]   ;;  %v18455_v46 = vlaneseq }
  0xd6   :  { %3332 = vmatprep.subr.bf16.mxu1 %v11504_v28  ;;  %v18730_v28 = vpack.c.bf16 %v18679_v61, %v18678_v56  ;;  %v11529_v61 = vld [vmem:[%s18334_s1 + $0x6d0] ss:$8 sps:$4 sm:$0xff]   ;;  %v11537_v18 = vld [vmem:[%s18334_s1 + $0x6c4] ss:$8 sps:$4 sm:$0xff]  }
  0xd7   :  { %3220 = vmatpush1.bf16.msra.mxu0 %v11499_v42  ;;  %v649_v56 = vsel %vm585_vm0, %v488_v26, %v552_v8  ;;  %v1048_v42 = vpack.c.bf16 %v13334_v11, %v13269_v62  ;;  %v949_v26 = vrot.slane %v13361_v30, 1  ;;  %v11540_v62 = vld [vmem:[%s18334_s1 + $0x7c4] ss:$8 sps:$4 sm:$0xff]   ;;  %v965_v11 = vrot.slane %v13361_v30, 2  ;;  %v11544_v8 = vld [vmem:[%s18334_s1 + $0x7b0] ss:$8 sps:$4 sm:$0xff]  }
  0xd8   :  { %3221 = vmatprep.subr.bf16.mxu0 %v11507_v20  ;;  %v950_v20 = vrot.slane %v649_v56, 1 }
  0xd9   :  { %3333 = vmatpush1.bf16.msra.mxu1 %v11502_v44  ;;  %v11532_v44 = vld [vmem:[%s18334_s1 + $0x7d0] ss:$8 sps:$4 sm:$0xff]  }
  0xda   :  { %3046 = vmatmul.mubr.bf16.gmra.mxu0 %v1016_v12  ;;  %3334 = vmatprep.subr.bf16.mxu1 %v11510_v57  ;;  %v1061_v12 = vpack.c.bf16 %v13343_v52, %v13284_v2  ;;  %v18733_v57 = vld [vmem:[#allocation64_spill] sm:$0xff]  ;;  %v11543_v52 = vld [vmem:[%s18334_s1 + $0x6b4] ss:$8 sps:$4 sm:$0xff]  }
  0xdb   :  { %3222 = vmatpush1.bf16.msra.mxu0 %v11505_v5  ;;  %3055 = vmatprep.mubr.bf16.mxu0 %v18727_v48  ;;  %v18734_v5 = vld [vmem:[#allocation55_spill] sm:$0xff]  ;;  %v13660_v48 = vsel %vm706_vm1, %v949_v26, %v950_v20  ;;  %v1072_v26 = vpack.c.bf16 %v13246_v4, %v13243_v41 }
  0xdc   :  { %3159 = vmatmul.mubr.bf16.gmra.mxu1 %v1018_v60  ;;  %3223 = vmatprep.subr.bf16.mxu0 %v11513_v37  ;;  %v18735_v60 = vpack.c.bf16 %v18733_v57, %v18734_v5  ;;  %v966_v37 = vrot.slane %v649_v56, 2  ;;  %v18744_v56 = vld [vmem:[#allocation41_spill] sm:$0xff]  ;;  %v11561_v20 = vld [vmem:[%s18334_s1 + $0x684] ss:$8 sps:$4 sm:$0xff]   ;;  %v11559_v57 = vld [vmem:[%s18334_s1 + $0x680] ss:$8 sps:$4 sm:$0xff]  }
  0xdd   :  { %3335 = vmatpush1.bf16.msra.mxu1 %v11508_v38  ;;  %3168 = vmatprep.mubr.bf16.mxu1 %v18728_v22  ;;  %v11535_v38 = vld [vmem:[%s18334_s1 + $0x6c0] ss:$8 sps:$4 sm:$0xff]  }
  0xde   :  { %3336 = vmatprep.subr.bf16.mxu1 %v11516_v21  ;;  %v18736_v21 = vld [vmem:[#allocation66_spill] sm:$0xff]  ;;  %v13669_v22 = vsel %vm819_vm2, %v965_v11, %v966_v37  ;;  %v18746_v5 = vld [vmem:[#allocation7_spill] sm:$0xff] }
  0xdf   :  { %3224 = vmatpush1.bf16.msra.mxu0 %v11511_v19  ;;  %v18737_v19 = vld [vmem:[#allocation58_spill] sm:$0xff]  ;;  %v11562_v37 = vld [vmem:[%s18334_s1 + $0x780] ss:$8 sps:$4 sm:$0xff]  }
  0xe0   :  { %3225 = vmatprep.subr.bf16.mxu0 %v11519_v6  ;;  %v18738_v2 = vpack.c.bf16 %v18736_v21, %v18737_v19  ;;  %v11538_v6 = vld [vmem:[%s18334_s1 + $0x7c0] ss:$8 sps:$4 sm:$0xff]   ;;  %v11567_v11 = vld [vmem:[%s18334_s1 + $0x874] ss:$8 sps:$4 sm:$0xff]  }
  0xe1   :  { %3337 = vmatpush1.bf16.msra.mxu1 %v11514_v24  ;;  %v11546_v24 = vld [vmem:[%s18334_s1 + $0x7b4] ss:$8 sps:$4 sm:$0xff]  }
  0xe2   :  { %3056 = vmatmul.mubr.bf16.gmra.mxu0 %v18729_v36  ;;  %3338 = vmatprep.subr.bf16.mxu1 %v11522_v63  ;;  %v11541_v63 = vld [vmem:[%s18334_s1 + $0x6b0] ss:$8 sps:$4 sm:$0xff]   ;;  %v1073_v36 = vpack.c.bf16 %v13669_v22, %v13346_v23 }
  0xe3   :  { %3226 = vmatpush2.bf16.msra.mxu0 %v11517_v34  ;;  %3065 = vmatprep.mubr.bf16.mxu0 %v18730_v28  ;;  %v18739_v34 = vld [vmem:[#allocation67_spill] sm:$0xff] }
  0xe4   :  { %3169 = vmatmul.mubr.bf16.gmra.mxu1 %v18732_v39  ;;  %3227 = vmatprep.subr.bf16.mxu0 %v11525_v29  ;;  %v1071_v29 = vpack.c.bf16 %v13660_v48, %v18739_v34  ;;  %v11555_v39 = vld [vmem:[%s18334_s1 + $0x694] ss:$8 sps:$4 sm:$0xff]  }
  0xe5   :  { %3339 = vmatpush2.bf16.msra.mxu1 %v11520_v3  ;;  %3178 = vmatprep.mubr.bf16.mxu1 %v1049_v9  ;;  %v1060_v3 = vpack.c.bf16 %v13391_v10, %v13337_v54  ;;  %v11549_v9 = vld [vmem:[%s18334_s1 + $0x6a4] ss:$8 sps:$4 sm:$0xff]   ;;  %v11547_v10 = vld [vmem:[%s18334_s1 + $0x6a0] ss:$8 sps:$4 sm:$0xff]  }
  0xe6   :  { %3340 = vmatprep.subr.bf16.mxu1 %v11528_v50  ;;  %v18740_v50 = vld [vmem:[#allocation71_spill] sm:$0xff] }
  0xe7   :  { %3228 = vmatpush2.bf16.msra.mxu0 %v11523_v49  ;;  %v18741_v49 = vld [vmem:[#allocation65_spill] sm:$0xff]  ;;  %v11552_v54 = vld [vmem:[%s18334_s1 + $0x7a4] ss:$8 sps:$4 sm:$0xff]  }
  0xe8   :  { %3229 = vmatprep.subr.bf16.mxu0 %v11531_v7  ;;  %v18742_v28 = vpack.c.bf16 %v18740_v50, %v18741_v49  ;;  %v11550_v7 = vld [vmem:[%s18334_s1 + $0x7a0] ss:$8 sps:$4 sm:$0xff]   ;;  %v11573_v49 = vld [vmem:[%s18334_s1 + $0x854] ss:$8 sps:$4 sm:$0xff]  }
  0xe9   :  { %3341 = vmatpush2.bf16.msra.mxu1 %v11526_v13  ;;  %v18743_v13 = vld [vmem:[#allocation72_spill] sm:$0xff] }
  0xea   :  { %3066 = vmatmul.mubr.bf16.gmra.mxu0 %v18735_v60  ;;  %3342 = vmatprep.subr.bf16.mxu1 %v11534_v15  ;;  %v1070_v15 = vpack.c.bf16 %v18744_v56, %v18743_v13  ;;  %v18750_v50 = vld [vmem:[#allocation12_spill] sm:$0xff] }
  0xeb   :  { %3230 = vmatpush2.bf16.msra.mxu0 %v11529_v61  ;;  %3075 = vmatprep.mubr.bf16.mxu0 %v18738_v2  ;;  %v11558_v61 = vld [vmem:[%s18334_s1 + $0x794] ss:$8 sps:$4 sm:$0xff]   ;;  %v11565_v2 = vld [vmem:[%s18334_s1 + $0x870] ss:$8 sps:$4 sm:$0xff]  }
  0xec   :  { %3179 = vmatmul.mubr.bf16.gmra.mxu1 %v1048_v42  ;;  %3231 = vmatprep.subr.bf16.mxu0 %v11537_v18  ;;  %v11553_v42 = vld [vmem:[%s18334_s1 + $0x690] ss:$8 sps:$4 sm:$0xff]   ;;  %v13710_v18 = vshrl.u32 %v18455_v46, 7 }
  0xed   :  { %3343 = vmatpush2.bf16.msra.mxu1 %v11532_v44  ;;  %3188 = vmatprep.mubr.bf16.mxu1 %v1061_v12  ;;  %v11556_v44 = vld [vmem:[%s18334_s1 + $0x790] ss:$8 sps:$4 sm:$0xff]   ;;  %v11564_v12 = vld [vmem:[%s18334_s1 + $0x784] ss:$8 sps:$4 sm:$0xff]  }
  0xee   :  { %3344 = vmatprep.subr.bf16.mxu1 %v11540_v62  ;;  %18745 = vst [vmem:[#allocation40_spill] sm:$0xff] %v13710_v18  ;;  %v1083_v60 = vsub.s32 0, %v13710_v18  ;;  %v360_v62 = vld [vmem:[%s18336_s2] sm:$0x3]  ;;  %v1087_v21 = vsub.s32 1, %v13710_v18  ;;  %s11907_s2 = smov 56  }
  0xef   :  { %3232 = vmatpush2.bf16.msra.mxu0 %v11535_v38  ;;  %v18747_v38 = vld [vmem:[#allocation11_spill] sm:$0xff] }
  0xf0   :  { %3233 = vmatprep.subr.bf16.mxu0 %v11543_v52  ;;  %v13739_v19 = vrot.slane %v360_v62, %v1083_v60  ;;  %v11570_v52 = vld [vmem:[%s18334_s1 + $0x864] ss:$8 sps:$4 sm:$0xff]  }
  0xf1   :  { %3345 = vmatpush2.bf16.msra.mxu1 %v11538_v6  ;;  %v13747_v6 = vrot.slane %v360_v62, %v1087_v21  ;;  %v18752_v62 = vld [vmem:[#allocation32_spill] sm:$0xff]  ;;  %v18753_v21 = vld [vmem:[#allocation34_spill] sm:$0xff] }
  0xf2   :  { %3076 = vmatmul.mubr.bf16.gmra.mxu0 %v18742_v28  ;;  %3346 = vmatprep.subr.bf16.mxu1 %v11546_v24 }
  0xf3   :  { %3234 = vmatpush2.bf16.msra.mxu0 %v11541_v63  ;;  %3085 = vmatprep.mubr.bf16.mxu0 %v1071_v29  ;;  %v18748_v63 = vld [vmem:[#allocation8_spill] sm:$0xff] }
  0xf4   :  { %3189 = vmatmul.mubr.bf16.gmra.mxu1 %v1060_v3  ;;  %3235 = vmatprep.subr.bf16.mxu0 %v11549_v9  ;;  %v11568_v3 = vld [vmem:[%s18334_s1 + $0x860] ss:$8 sps:$4 sm:$0xff]   ;;  %v18749_v9 = vld [vmem:[#allocation18_spill] sm:$0xff] }
  0xf5   :  { %3347 = vmatpush2.bf16.msra.mxu1 %v11544_v8  ;;  %3198 = vmatprep.mubr.bf16.mxu1 %v1073_v36 }
  0xf6   :  { %3348 = vmatprep.subr.bf16.mxu1 %v11552_v54 }
  0xf7   :  { %3236 = vmatpush2.bf16.msra.mxu0 %v11547_v10  ;;  %v18751_v10 = vld [vmem:[#allocation20_spill] sm:$0xff] }
  0xf8   :  { %3237 = vmatprep.subr.bf16.mxu0 %v11555_v39 }
  0xf9   :  { %3349 = vmatpush2.bf16.msra.mxu1 %v11550_v7 }
  0xfa   :  { %3086 = vmatmul.mubr.bf16.gmra.mxu0 %v1070_v15  ;;  %3350 = vmatprep.subr.bf16.mxu1 %v11558_v61 }
  0xfb   :  { %3238 = vmatpush2.bf16.msra.mxu0 %v11553_v42  ;;  %3241 = vmatprep.mubr.bf16.mxu0 %v18746_v5  ;;  %v11571_v42 = vld [vmem:[%s18334_s1 + $0x850] ss:$8 sps:$4 sm:$0xff]  }
  0xfc   :  { %3199 = vmatmul.mubr.bf16.gmra.mxu1 %v1072_v26  ;;  %3239 = vmatprep.subr.bf16.mxu0 %v11561_v20 }
  0xfd   :  { %3351 = vmatpush2.bf16.msra.mxu1 %v11556_v44  ;;  %3354 = vmatprep.mubr.bf16.mxu1 %v18747_v38  ;;  %v11576_v44 = vld [vmem:[%s18334_s1 + $0x844] ss:$8 sps:$4 sm:$0xff]   ;;  %v11574_v38 = vld [vmem:[%s18334_s1 + $0x840] ss:$8 sps:$4 sm:$0xff]  }
  0xfe   :  { %3352 = vmatprep.subr.bf16.mxu1 %v11564_v12 }
  0xff   :  { %3240 = vmatpush2.bf16.msra.mxu0 %v11559_v57 }
 0x100   :  { %3435 = vmatprep.subr.bf16.mxu0 %v11567_v11 }
 0x101   :  { %3353 = vmatpush2.bf16.msra.mxu1 %v11562_v37 }
 0x102   :  { %v2565_v24 = vpop.f32.mrf.mxu0  ;;  %3242 = vmatmul.mubr.bf16.vlgmr.msra.gmra.mxu0 %v18748_v63  ;;  %v11579_v63 = vld [vmem:[%s18334_s1 + $0x834] ss:$8 sps:$4 sm:$0xff]  }
 0x103   :  { %v2566_v29 = vadd.f32 %v2565_v24, %v13739_v19  ;;  %3436 = vmatpush1.bf16.msra.mxu0 %v11565_v2  ;;  %3251 = vmatprep.mubr.bf16.mxu0 %v18749_v9  ;;  %v18754_v24 = vld [vmem:[#allocation33_spill] sm:$0xff]  ;;  %v18755_v9 = vld [vmem:[#allocation35_spill] sm:$0xff] }
 0x104   :  { %v2567_v8 = vpop.f32.mrf.mxu0  ;;  %v2678_v36 = vpop.f32.mrf.mxu1  ;;  %3355 = vmatmul.mubr.bf16.vlgmr.msra.gmra.mxu1 %v18750_v50  ;;  %3437 = vmatprep.subr.bf16.mxu0 %v11570_v52 }
 0x105   :  { %v2568_v28 = vadd.f32 %v2567_v8, %v13747_v6  ;;  %v13760_v54 = vadd.f32 %v2678_v36, %v2566_v29  ;;  %3364 = vmatprep.mubr.bf16.mxu1 %v18751_v10  ;;  %v18756_v10 = vld [vmem:[#allocation21_spill] sm:$0xff] }
 0x106   :  { %v2569_v39 = vpop.f32.mrf.mxu0  ;;  %v2680_v7 = vpop.f32.mrf.mxu1 }
 0x107   :  { %v2570_v15 = vadd.f32 %v2569_v39, %v13739_v19  ;;  %v13764_v61 = vadd.f32 %v2680_v7, %v2568_v28  ;;  %3438 = vmatpush1.bf16.msra.mxu0 %v11568_v3  ;;  %v11577_v28 = vld [vmem:[%s18334_s1 + $0x830] ss:$8 sps:$4 sm:$0xff]   ;;  %v1021_v39 = vpack.c.bf16 %v18756_v10, %v13115_v14 }
 0x108   :  { %v2571_v26 = vpop.f32.mrf.mxu0  ;;  %v2682_v20 = vpop.f32.mrf.mxu1  ;;  %3439 = vmatprep.subr.bf16.mxu0 %v11573_v49 }
 0x109   :  { %v2572_v12 = vadd.f32 %v2571_v26, %v13747_v6  ;;  %v13773_v57 = vadd.f32 %v2682_v20, %v2570_v15 }
 0x10a   :  { %v2575_v5 = vpop.f32.mrf.mxu0  ;;  %v2684_v60 = vpop.f32.mrf.mxu1  ;;  %3252 = vmatmul.mubr.bf16.gmra.mxu0 %v18752_v62 }
 0x10b   :  { %v2576_v11 = vadd.f32 %v2575_v5, %v13739_v19  ;;  %v13777_v37 = vadd.f32 %v2684_v60, %v2572_v12  ;;  %3440 = vmatpush1.bf16.msra.mxu0 %v11571_v42  ;;  %3261 = vmatprep.mubr.bf16.mxu0 %v18753_v21  ;;  %v11582_v42 = vld [vmem:[%s18334_s1 + $0x824] ss:$8 sps:$4 sm:$0xff]   ;;  %v18757_v60 = vld [vmem:[#allocation38_spill] sm:$0xff] }
 0x10c   :  { %v2577_v2 = vpop.f32.mrf.mxu0  ;;  %v2688_v52 = vpop.f32.mrf.mxu1  ;;  %3365 = vmatmul.mubr.bf16.gmra.mxu1 %v18754_v24  ;;  %3441 = vmatprep.subr.bf16.mxu0 %v11576_v44  ;;  %v1023_v44 = vpack.c.bf16 %v18722_v47, %v13507_v43  ;;  %v11585_v43 = vld [vmem:[%s18334_s1 + $0x814] ss:$8 sps:$4 sm:$0xff]  }
 0x10d   :  { %v2578_v29 = vadd.f32 %v2577_v2, %v13747_v6  ;;  %v13788_v3 = vadd.f32 %v2688_v52, %v2576_v11  ;;  %3374 = vmatprep.mubr.bf16.mxu1 %v18755_v9  ;;  %v11580_v11 = vld [vmem:[%s18334_s1 + $0x820] ss:$8 sps:$4 sm:$0xff]  }
 0x10e   :  { %v2579_v8 = vpop.f32.mrf.mxu0  ;;  %v2690_v36 = vpop.f32.mrf.mxu1  ;;  %v18758_v2 = vld [vmem:[#allocation39_spill] sm:$0xff] }
 0x10f   :  { %v2580_v50 = vadd.f32 %v2579_v8, %v13739_v19  ;;  %v13792_v49 = vadd.f32 %v2690_v36, %v2578_v29  ;;  %3442 = vmatpush1.bf16.msra.mxu0 %v11574_v38  ;;  %v18759_v29 = vld [vmem:[#allocation24_spill] sm:$0xff] }
 0x110   :  { %v2581_v7 = vpop.f32.mrf.mxu0  ;;  %v2692_v15 = vpop.f32.mrf.mxu1  ;;  %3443 = vmatprep.subr.bf16.mxu0 %v11579_v63  ;;  %v1020_v9 = vpack.c.bf16 %v18759_v29, %v13158_v1 }
 0x111   :  { %v2582_v26 = vadd.f32 %v2581_v7, %v13747_v6  ;;  %v13803_v20 = vadd.f32 %v2692_v15, %v2580_v50  ;;  %v11583_v50 = vld [vmem:[%s18334_s1 + $0x810] ss:$8 sps:$4 sm:$0xff]   ;;  %v11588_v7 = vld [vmem:[%s18334_s1 + $0x804] ss:$8 sps:$4 sm:$0xff]  }
 0x112   :  { %v2585_v12 = vpop.f32.mrf.mxu0  ;;  %v2694_v5 = vpop.f32.mrf.mxu1  ;;  %3262 = vmatmul.mubr.bf16.gmra.mxu0 %v18757_v60 }
 0x113   :  { %v2586_v14 = vadd.f32 %v2585_v12, %v13739_v19  ;;  %v13809_v62 = vadd.f32 %v2694_v5, %v2582_v26  ;;  %3444 = vmatpush1.bf16.msra.mxu0 %v11577_v28  ;;  %3271 = vmatprep.mubr.bf16.mxu0 %v1021_v39  ;;  %v1022_v39 = vpack.c.bf16 %v18726_v59, %v13545_v0  ;;  %v11586_v0 = vld [vmem:[%s18334_s1 + $0x800] ss:$8 sps:$4 sm:$0xff]  }
 0x114   :  { %v2587_v38 = vpop.f32.mrf.mxu0  ;;  %v2698_v21 = vpop.f32.mrf.mxu1  ;;  %3375 = vmatmul.mubr.bf16.gmra.mxu1 %v18758_v2  ;;  %3445 = vmatprep.subr.bf16.mxu0 %v11582_v42  ;;  %v18760_v59 = vld [vmem:[#allocation48_spill] sm:$0xff] }
 0x115   :  { %v2588_v47 = vadd.f32 %v2587_v38, %v13747_v6  ;;  %v13819_v52 = vadd.f32 %v2698_v21, %v2586_v14  ;;  %3384 = vmatprep.mubr.bf16.mxu1 %v1023_v44  ;;  %v11591_v14 = vld [vmem:[%s18334_s1 + $0x8f4] ss:$8 sps:$4 sm:$0xff]   ;;  %v18761_v21 = vld [vmem:[#allocation52_spill] sm:$0xff] }
 0x116   :  { %v2589_v24 = vpop.f32.mrf.mxu0  ;;  %v2700_v63 = vpop.f32.mrf.mxu1 }
 0x117   :  { %v2590_v8 = vadd.f32 %v2589_v24, %v13739_v19  ;;  %v13824_v36 = vadd.f32 %v2700_v63, %v2588_v47  ;;  %3446 = vmatpush1.bf16.msra.mxu0 %v11580_v11  ;;  %v11589_v63 = vld [vmem:[%s18334_s1 + $0x8f0] ss:$8 sps:$4 sm:$0xff]  }
 0x118   :  { %v2591_v28 = vpop.f32.mrf.mxu0  ;;  %v2702_v10 = vpop.f32.mrf.mxu1  ;;  %3447 = vmatprep.subr.bf16.mxu0 %v11585_v43 }
 0x119   :  { %v2592_v1 = vadd.f32 %v2591_v28, %v13747_v6  ;;  %v13835_v15 = vadd.f32 %v2702_v10, %v2590_v8  ;;  %v11594_v8 = vld [vmem:[%s18334_s1 + $0x8e4] ss:$8 sps:$4 sm:$0xff]  }
 0x11a   :  { %v2595_v42 = vpop.f32.mrf.mxu0  ;;  %v2704_v26 = vpop.f32.mrf.mxu1  ;;  %3272 = vmatmul.mubr.bf16.gmra.mxu0 %v1020_v9 }
 0x11b   :  { %v2596_v44 = vadd.f32 %v2595_v42, %v13739_v19  ;;  %v13838_v12 = vadd.f32 %v2704_v26, %v2592_v1  ;;  %3448 = vmatpush1.bf16.msra.mxu0 %v11583_v50  ;;  %3281 = vmatprep.mubr.bf16.mxu0 %v18760_v59  ;;  %v11592_v26 = vld [vmem:[%s18334_s1 + $0x8e0] ss:$8 sps:$4 sm:$0xff]  }
 0x11c   :  { %v2597_v5 = vpop.f32.mrf.mxu0  ;;  %v2708_v60 = vpop.f32.mrf.mxu1  ;;  %3385 = vmatmul.mubr.bf16.gmra.mxu1 %v1022_v39  ;;  %3449 = vmatprep.subr.bf16.mxu0 %v11588_v7  ;;  %v18762_v7 = vld [vmem:[#allocation59_spill] sm:$0xff] }
 0x11d   :  { %v2598_v11 = vadd.f32 %v2597_v5, %v13747_v6  ;;  %v13848_v38 = vadd.f32 %v2708_v60, %v2596_v44  ;;  %3394 = vmatprep.mubr.bf16.mxu1 %v18761_v21  ;;  %v18763_v44 = vld [vmem:[#allocation61_spill] sm:$0xff]  ;;  %v18764_v5 = vld [vmem:[#allocation60_spill] sm:$0xff]  ;;  %v18765_v21 = vld [vmem:[#allocation62_spill] sm:$0xff] }
 0x11e   :  { %v2599_v2 = vpop.f32.mrf.mxu0  ;;  %v2710_v43 = vpop.f32.mrf.mxu1  ;;  %v11597_v60 = vld [vmem:[%s18334_s1 + $0x8d4] ss:$8 sps:$4 sm:$0xff]  }
 0x11f   :  { %v2600_v47 = vadd.f32 %v2599_v2, %v13739_v19  ;;  %v13852_v24 = vadd.f32 %v2710_v43, %v2598_v11  ;;  %3450 = vmatpush1.bf16.msra.mxu0 %v11586_v0 }
 0x120   :  { %v2601_v29 = vpop.f32.mrf.mxu0  ;;  %v2712_v9 = vpop.f32.mrf.mxu1  ;;  %3451 = vmatprep.subr.bf16.mxu0 %v11591_v14 }
 0x121   :  { %v2602_v50 = vadd.f32 %v2601_v29, %v13747_v6  ;;  %v13861_v28 = vadd.f32 %v2712_v9, %v2600_v47  ;;  %v11595_v29 = vld [vmem:[%s18334_s1 + $0x8d0] ss:$8 sps:$4 sm:$0xff]  }
 0x122   :  { %v2605_v10 = vpop.f32.mrf.mxu0  ;;  %v2714_v39 = vpop.f32.mrf.mxu1  ;;  %3282 = vmatmul.mubr.bf16.gmra.mxu0 %v18762_v7 }
 0x123   :  { %v2606_v1 = vadd.f32 %v2605_v10, %v13739_v19  ;;  %v13865_v42 = vadd.f32 %v2714_v39, %v2602_v50  ;;  %3452 = vmatpush2.bf16.msra.mxu0 %v11589_v63  ;;  %3291 = vmatprep.mubr.bf16.mxu0 %v18763_v44  ;;  %v11600_v50 = vld [vmem:[%s18334_s1 + $0x8c4] ss:$8 sps:$4 sm:$0xff]   ;;  %v11598_v44 = vld [vmem:[%s18334_s1 + $0x8c0] ss:$8 sps:$4 sm:$0xff]  }
 0x124   :  { %v2607_v0 = vpop.f32.mrf.mxu0  ;;  %v2718_v59 = vpop.f32.mrf.mxu1  ;;  %3395 = vmatmul.mubr.bf16.gmra.mxu1 %v18764_v5  ;;  %3453 = vmatprep.subr.bf16.mxu0 %v11594_v8 }
 0x125   :  { %v2608_v14 = vadd.f32 %v2607_v0, %v13747_v6  ;;  %v13876_v11 = vadd.f32 %v2718_v59, %v2606_v1  ;;  %3404 = vmatprep.mubr.bf16.mxu1 %v18765_v21  ;;  %v18766_v1 = vld [vmem:[#allocation63_spill] sm:$0xff]  ;;  %v18767_v0 = vld [vmem:[#allocation68_spill] sm:$0xff] }
 0x126   :  { %v2609_v2 = vpop.f32.mrf.mxu0  ;;  %v2720_v43 = vpop.f32.mrf.mxu1 }
 0x127   :  { %v2610_v47 = vadd.f32 %v2609_v2, %v13739_v19  ;;  %v13880_v63 = vadd.f32 %v2720_v43, %v2608_v14  ;;  %3454 = vmatpush2.bf16.msra.mxu0 %v11592_v26  ;;  %v11603_v14 = vld [vmem:[%s18334_s1 + $0x8b4] ss:$8 sps:$4 sm:$0xff]  }
 0x128   :  { %v13885_v9 = vpop.f32.mrf.mxu0  ;;  %v2722_v8 = vpop.f32.mrf.mxu1  ;;  %3455 = vmatprep.subr.bf16.mxu0 %v11597_v60  ;;  %v18768_v60 = vld [vmem:[#allocation69_spill] sm:$0xff]  ;;  %v18769_v43 = vld [vmem:[#allocation70_spill] sm:$0xff] }
 0x129   :  { %v13890_v10 = vadd.f32 %v2722_v8, %v2610_v47 }
 0x12a   :  { %v2615_v39 = vpop.f32.mrf.mxu0  ;;  %v13892_v7 = vpop.f32.mrf.mxu1  ;;  %3292 = vmatmul.mubr.bf16.gmra.mxu0 %v18766_v1  ;;  %v1075_v1 = vpack.c.bf16 %v12766_v45, %v13361_v30  ;;  %v11604_v30 = vld [vmem:[%s18334_s1 + $0x8a0] ss:$8 sps:$4 sm:$0xff]  }
 0x12b   :  { %v2616_v26 = vadd.f32 %v2615_v39, %v13739_v19  ;;  %3456 = vmatpush2.bf16.msra.mxu0 %v11595_v29  ;;  %3301 = vmatprep.mubr.bf16.mxu0 %v18767_v0 }
 0x12c   :  { %v2617_v59 = vpop.f32.mrf.mxu0  ;;  %v2728_v5 = vpop.f32.mrf.mxu1  ;;  %3405 = vmatmul.mubr.bf16.gmra.mxu1 %v18768_v60  ;;  %3457 = vmatprep.subr.bf16.mxu0 %v11600_v50  ;;  %v11601_v50 = vld [vmem:[%s18334_s1 + $0x8b0] ss:$8 sps:$4 sm:$0xff]  }
 0x12d   :  { %v2618_v21 = vadd.f32 %v2617_v59, %v13747_v6  ;;  %v13905_v2 = vadd.f32 %v2728_v5, %v2616_v26  ;;  %3414 = vmatprep.mubr.bf16.mxu1 %v18769_v43  ;;  %v11606_v26 = vld [vmem:[%s18334_s1 + $0x8a4] ss:$8 sps:$4 sm:$0xff]  }
 0x12e   :  { %v2619_v47 = vpop.f32.mrf.mxu0  ;;  %v2730_v29 = vpop.f32.mrf.mxu1 }
 0x12f   :  { %v2620_v8 = vadd.f32 %v2619_v47, %v13739_v19  ;;  %v13909_v39 = vadd.f32 %v2730_v29, %v2618_v21  ;;  %3458 = vmatpush2.bf16.msra.mxu0 %v11598_v44  ;;  %v1077_v44 = vpack.c.bf16 %v18739_v34, %v13660_v48  ;;  %v18770_v47 = vld [vmem:[#allocation73_spill] sm:$0xff] }
 0x130   :  { %v2621_v0 = vpop.f32.mrf.mxu0  ;;  %v2732_v59 = vpop.f32.mrf.mxu1  ;;  %3459 = vmatprep.subr.bf16.mxu0 %v11603_v14  ;;  %v11609_v48 = vld [vmem:[%s18334_s1 + $0x894] ss:$8 sps:$4 sm:$0xff]  }
 0x131   :  { %v13920_v5 = vadd.f32 %v2621_v0, %v13747_v6  ;;  %v13922_v60 = vadd.f32 %v2732_v59, %v2620_v8  ;;  %v18771_v8 = vld [vmem:[#allocation74_spill] sm:$0xff] }
 0x132   :  { %v2625_v21 = vpop.f32.mrf.mxu0  ;;  %v13926_v43 = vpop.f32.mrf.mxu1  ;;  %3302 = vmatmul.mubr.bf16.gmra.mxu0 %v18770_v47 }
 0x133   :  { %v2626_v45 = vadd.f32 %v2625_v21, %v13739_v19  ;;  %3460 = vmatpush2.bf16.msra.mxu0 %v11601_v50  ;;  %3311 = vmatprep.mubr.bf16.mxu0 %v1075_v1  ;;  %v1074_v21 = vpack.c.bf16 %v12811_v25, %v13188_v55 }
 0x134   :  { %v2627_v14 = vpop.f32.mrf.mxu0  ;;  %v2738_v29 = vpop.f32.mrf.mxu1  ;;  %3415 = vmatmul.mubr.bf16.gmra.mxu1 %v18771_v8  ;;  %3461 = vmatprep.subr.bf16.mxu0 %v11606_v26  ;;  %v11607_v26 = vld [vmem:[%s18334_s1 + $0x890] ss:$8 sps:$4 sm:$0xff]  }
 0x135   :  { %v2628_v34 = vadd.f32 %v2627_v14, %v13747_v6  ;;  %v13938_v0 = vadd.f32 %v2738_v29, %v2626_v45  ;;  %3424 = vmatprep.mubr.bf16.mxu1 %v1077_v44  ;;  %v11612_v44 = vld [vmem:[%s18334_s1 + $0x884] ss:$8 sps:$4 sm:$0xff]   ;;  %v11610_v29 = vld [vmem:[%s18334_s1 + $0x880] ss:$8 sps:$4 sm:$0xff]   ;;  %s11897_s1 = smov 64  }
 0x136   :  { %v2629_v50 = vpop.f32.mrf.mxu0  ;;  %v2740_v59 = vpop.f32.mrf.mxu1 }
 0x137   :  { %v2630_v1 = vadd.f32 %v2629_v50, %v13739_v19  ;;  %v13943_v47 = vadd.f32 %v2740_v59, %v2628_v34  ;;  %3462 = vmatpush2.bf16.msra.mxu0 %v11604_v30  ;;  %v18774_v59 = vpack.c.bf16 %v18743_v13, %v18744_v56 }
 0x138   :  { %v2631_v8 = vpop.f32.mrf.mxu0  ;;  %v2742_v46 = vpop.f32.mrf.mxu1  ;;  %3463 = vmatprep.subr.bf16.mxu0 %v11609_v48  ;;  %v18773_v48 = vld [vmem:[#allocation78_spill] sm:$0xff] }
 0x139   :  { %v13952_v45 = vadd.f32 %v2631_v8, %v13747_v6  ;;  %v13954_v25 = vadd.f32 %v2742_v46, %v2630_v1 }
 0x13a   :  { %v2635_v55 = vpop.f32.mrf.mxu0  ;;  %v13956_v14 = vpop.f32.mrf.mxu1  ;;  %3312 = vmatmul.mubr.bf16.gmra.mxu0 %v1074_v21 }
 0x13b   :  { %18772 = vst [vmem:[#allocation47_spill] sm:$0xff] %v13956_v14  ;;  %v2636_v30 = vadd.f32 %v2635_v55, %v13739_v19  ;;  %3464 = vmatpush2.bf16.msra.mxu0 %v11607_v26  ;;  %3467 = vmatprep.mubr.bf16.mxu0 %v18773_v48 }
 0x13c   :  { %v2637_v34 = vpop.f32.mrf.mxu0  ;;  %v2748_v50 = vpop.f32.mrf.mxu1  ;;  %3425 = vmatmul.mubr.bf16.gmra.mxu1 %v18774_v59  ;;  %3465 = vmatprep.subr.bf16.mxu0 %v11612_v44  ;;  %v18776_v44 = vld [vmem:[#allocation79_spill] sm:$0xff] }
 0x13d   :  { %v2638_v46 = vadd.f32 %v2637_v34, %v13747_v6  ;;  %v13967_v1 = vadd.f32 %v2748_v50, %v2636_v30  ;;  %v18777_v34 = vld [vmem:[#allocation14_spill] sm:$0xff] }
 0x13e   :  { %v2639_v21 = vpop.f32.mrf.mxu0  ;;  %v2750_v8 = vpop.f32.mrf.mxu1 }
 0x13f   :  { %v2640_v26 = vadd.f32 %v2639_v21, %v13739_v19  ;;  %v13970_v55 = vadd.f32 %v2750_v8, %v2638_v46  ;;  %3466 = vmatpush2.bf16.msra.mxu0 %v11610_v29 }
 0x140   :  { %v2641_v58 = vpop.f32.mrf.mxu0  ;;  %v2752_v48 = vpop.f32.mrf.mxu1 }
 0x141   :  { %v13973_v18 = vadd.f32 %v2641_v58, %v13747_v6  ;;  %v13975_v14 = vadd.f32 %v2752_v48, %v2640_v26 }
 0x142   :  { %v13977_v13 = vpop.f32.mrf.mxu1  ;;  %v2791_v56 = vpop.f32.mrf.mxu0  ;;  %3468 = vmatmul.mubr.bf16.vlgmr.msra.gmra.mxu0 %v18776_v44 }
 0x143   :  { %18775 = vst [vmem:[#allocation46_spill] sm:$0xff] %v13977_v13  ;;  %v2792_v30 = vadd.f32 %v2791_v56, %v13760_v54  ;;  %3477 = vmatprep.mubr.bf16.mxu0 %v18777_v34  ;;  %v18778_v13 = vld [vmem:[#allocation16_spill] sm:$0xff] }
 0x144   :  { %v2793_v19 = vpop.f32.mrf.mxu0  ;;  %v2904_v50 = vpop.f32.mrf.mxu1 }
 0x145   :  { %v2794_v29 = vadd.f32 %v2793_v19, %v13764_v61  ;;  %v13983_v59 = vadd.f32 %v2904_v50, %v2792_v30  ;;  %v18779_v30 = vld [vmem:[#allocation19_spill] sm:$0xff] }
 0x146   :  { %v2795_v46 = vpop.f32.mrf.mxu0  ;;  %v2906_v58 = vpop.f32.mrf.mxu1 }
 0x147   :  { %v2796_v21 = vadd.f32 %v2795_v46, %v13773_v57  ;;  %v13986_v8 = vadd.f32 %v2906_v58, %v2794_v29 }
 0x148   :  { %v2797_v26 = vpop.f32.mrf.mxu0  ;;  %v2908_v48 = vpop.f32.mrf.mxu1 }
 0x149   :  { %v13989_v44 = vadd.f32 %v2797_v26, %v13777_v37  ;;  %v13991_v54 = vadd.f32 %v2908_v48, %v2796_v21  ;;  %v1025_v26 = vpack.c.bf16 %v13095_v51, %v13516_v27 }
 0x14a   :  { %v2801_v56 = vpop.f32.mrf.mxu0  ;;  %v13993_v34 = vpop.f32.mrf.mxu1  ;;  %3478 = vmatmul.mubr.bf16.gmra.mxu0 %v18778_v13 }
 0x14b   :  { %v2802_v61 = vadd.f32 %v2801_v56, %v13788_v3  ;;  %3487 = vmatprep.mubr.bf16.mxu0 %v18779_v30 }
 0x14c   :  { %v2803_v19 = vpop.f32.mrf.mxu0  ;;  %v2914_v57 = vpop.f32.mrf.mxu1 }
 0x14d   :  { %v2804_v50 = vadd.f32 %v2803_v19, %v13792_v49  ;;  %v13999_v29 = vadd.f32 %v2914_v57, %v2802_v61  ;;  %v18780_v61 = vld [vmem:[#allocation25_spill] sm:$0xff] }
 0x14e   :  { %v2805_v46 = vpop.f32.mrf.mxu0  ;;  %v2916_v37 = vpop.f32.mrf.mxu1 }
 0x14f   :  { %v2806_v58 = vadd.f32 %v2805_v46, %v13803_v20  ;;  %v14002_v21 = vadd.f32 %v2916_v37, %v2804_v50 }
 0x150   :  { %v2807_v13 = vpop.f32.mrf.mxu0  ;;  %v2918_v48 = vpop.f32.mrf.mxu1 }
 0x151   :  { %v14007_v3 = vadd.f32 %v2807_v13, %v13809_v62  ;;  %v14009_v56 = vadd.f32 %v2918_v48, %v2806_v58  ;;  %v11613_v62 = vld [vmem:[%s18337_s3 + $0x78] sm:$0xff]  }
 0x152   :  { %v2811_v30 = vpop.f32.mrf.mxu0  ;;  %v14011_v49 = vpop.f32.mrf.mxu1  ;;  %3488 = vmatmul.mubr.bf16.gmra.mxu0 %v18780_v61  ;;  %10011 = vmatprep.subr.bf16.mxu1 %v11613_v62 }
 0x153   :  { %v2812_v19 = vadd.f32 %v2811_v30, %v13819_v52  ;;  %3497 = vmatprep.mubr.bf16.mxu0 %v1025_v26  ;;  %v11614_v52 = vld [vmem:[%s18337_s3 + $0x38] sm:$0xff]  }
 0x154   :  { %v2813_v20 = vpop.f32.mrf.mxu0  ;;  %v2924_v57 = vpop.f32.mrf.mxu1  ;;  %10012 = vmatpush3.bf16.msra.mxu1 %v11614_v52 }
 0x155   :  { %v2814_v50 = vadd.f32 %v2813_v20, %v13824_v36  ;;  %v14016_v51 = vadd.f32 %v2924_v57, %v2812_v19 }
 0x156   :  { %v2815_v27 = vpop.f32.mrf.mxu0  ;;  %v2926_v46 = vpop.f32.mrf.mxu1 }
 0x157   :  { %v2816_v37 = vadd.f32 %v2815_v27, %v13835_v15  ;;  %v14022_v58 = vadd.f32 %v2926_v46, %v2814_v50  ;;  %v18781_v15 = vpack.c.bf16 %v13152_v53, %v13191_v16  ;;  %v11615_v27 = vld [vmem:[%s18337_s3 + $0x70] sm:$0xff]  }
 0x158   :  { %v2817_v26 = vpop.f32.mrf.mxu0  ;;  %v2928_v13 = vpop.f32.mrf.mxu1  ;;  %v11616_v46 = vld [vmem:[%s18337_s3 + $0x30] sm:$0xff]   ;;  %10013 = vmatprep.subr.bf16.mxu1 %v11615_v27 }
 0x159   :  { %v14028_v36 = vadd.f32 %v2817_v26, %v13838_v12  ;;  %v14030_v48 = vadd.f32 %v2928_v13, %v2816_v37  ;;  %10014 = vmatpush3.bf16.msra.mxu1 %v11616_v46 }
 0x15a   :  { %v2821_v30 = vpop.f32.mrf.mxu0  ;;  %v14032_v61 = vpop.f32.mrf.mxu1  ;;  %3498 = vmatmul.mubr.bf16.gmra.mxu0 %v18781_v15 }
 0x15b   :  { %v2822_v19 = vadd.f32 %v2821_v30, %v13848_v38  ;;  %3507 = vmatprep.mubr.bf16.mxu0 %v13239_v32 }
 0x15c   :  { %v2823_v20 = vpop.f32.mrf.mxu0  ;;  %v2934_v57 = vpop.f32.mrf.mxu1 }
 0x15d   :  { %v2824_v50 = vadd.f32 %v2823_v20, %v13852_v24  ;;  %v14040_v12 = vadd.f32 %v2934_v57, %v2822_v19  ;;  %v11618_v57 = vld [vmem:[%s18337_s3 + $0x28] sm:$0xff]  }
 0x15e   :  { %v2825_v16 = vpop.f32.mrf.mxu0  ;;  %v2936_v53 = vpop.f32.mrf.mxu1 }
 0x15f   :  { %v2826_v38 = vadd.f32 %v2825_v16, %v13861_v28  ;;  %v14049_v62 = vadd.f32 %v2936_v53, %v2824_v50 }
 0x160   :  { %v2827_v32 = vpop.f32.mrf.mxu0  ;;  %v2938_v37 = vpop.f32.mrf.mxu1 }
 0x161   :  { %v14052_v24 = vadd.f32 %v2827_v32, %v13865_v42  ;;  %v14054_v52 = vadd.f32 %v2938_v37, %v2826_v38  ;;  %v11617_v42 = vld [vmem:[%s18337_s3 + $0x68] sm:$0xff]  }
 0x162   :  { %v2831_v26 = vpop.f32.mrf.mxu0  ;;  %v14056_v13 = vpop.f32.mrf.mxu1  ;;  %3508 = vmatmul.mubr.bf16.gmra.mxu0 %v13291_v17  ;;  %10015 = vmatprep.subr.bf16.mxu1 %v11617_v42 }
 0x163   :  { %v2832_v30 = vadd.f32 %v2831_v26, %v13876_v11  ;;  %3517 = vmatprep.mubr.bf16.mxu0 %v13305_v33  ;;  %10016 = vmatpush3.bf16.msra.mxu1 %v11618_v57 }
 0x164   :  { %v2833_v28 = vpop.f32.mrf.mxu0  ;;  %v2944_v15 = vpop.f32.mrf.mxu1 }
 0x165   :  { %v2834_v19 = vadd.f32 %v2833_v28, %v13880_v63  ;;  %v14062_v20 = vadd.f32 %v2944_v15, %v2832_v30  ;;  %v11619_v30 = vld [vmem:[%s18337_s3 + $0x60] sm:$0xff]  }
 0x166   :  { %v2835_v50 = vpop.f32.mrf.mxu0  ;;  %v2946_v17 = vpop.f32.mrf.mxu1  ;;  %v11620_v28 = vld [vmem:[%s18337_s3 + $0x20] sm:$0xff]   ;;  %10017 = vmatprep.subr.bf16.mxu1 %v11619_v30 }
 0x167   :  { %v2836_v11 = vadd.f32 %v2835_v50, %v13890_v10  ;;  %v14071_v27 = vadd.f32 %v2946_v17, %v2834_v19  ;;  %10018 = vmatpush3.bf16.msra.mxu1 %v11620_v28 }
 0x168   :  { %v14073_v33 = vpop.f32.mrf.mxu0  ;;  %v2948_v63 = vpop.f32.mrf.mxu1 }
 0x169   :  { %v14075_v46 = vadd.f32 %v2948_v63, %v2836_v11 }
 0x16a   :  { %v2841_v16 = vpop.f32.mrf.mxu0  ;;  %v14077_v53 = vpop.f32.mrf.mxu1  ;;  %3518 = vmatmul.mubr.bf16.gmra.mxu0 %v13353_v35 }
 0x16b   :  { %v2842_v38 = vadd.f32 %v2841_v16, %v13905_v2  ;;  %3527 = vmatprep.mubr.bf16.mxu0 %v13368_v40  ;;  %v1079_v40 = vpack.c.bf16 %v13346_v23, %v13669_v22  ;;  %v11621_v22 = vld [vmem:[%s18337_s3 + $0x58] sm:$0xff]  }
 0x16c   :  { %v2843_v32 = vpop.f32.mrf.mxu0  ;;  %v2954_v10 = vpop.f32.mrf.mxu1  ;;  %10019 = vmatprep.subr.bf16.mxu1 %v11621_v22  ;;  %v11626_v22 = vld [vmem:[%s18337_s3 + $0x50] sm:$0xff]  }
 0x16d   :  { %v2844_v37 = vadd.f32 %v2843_v32, %v13909_v39  ;;  %v14083_v26 = vadd.f32 %v2954_v10, %v2842_v38  ;;  %v11622_v38 = vld [vmem:[%s18337_s3 + $0x18] sm:$0xff]  }
 0x16e   :  { %v2845_v15 = vpop.f32.mrf.mxu0  ;;  %v2956_v35 = vpop.f32.mrf.mxu1  ;;  %10020 = vmatpush3.bf16.msra.mxu1 %v11622_v38 }
 0x16f   :  { %v2846_v2 = vadd.f32 %v2845_v15, %v13922_v60  ;;  %v14092_v19 = vadd.f32 %v2956_v35, %v2844_v37  ;;  %v11625_v35 = vld [vmem:[%s18337_s3 + $0xf0] sm:$0xff]   ;;  %10021 = vmatprep.subr.bf16.mxu1 %v11626_v22 }
 0x170   :  { %v14096_v39 = vpop.f32.mrf.mxu0  ;;  %v2958_v42 = vpop.f32.mrf.mxu1 }
 0x171   :  { %v14098_v57 = vadd.f32 %v2958_v42, %v2846_v2  ;;  %v11627_v42 = vld [vmem:[%s18337_s3 + $0xb0] sm:$0xff]  }
 0x172   :  { %v2851_v50 = vpop.f32.mrf.mxu0  ;;  %v14100_v17 = vpop.f32.mrf.mxu1  ;;  %3528 = vmatmul.mubr.bf16.gmra.mxu0 %v13401_v31  ;;  %v11623_v31 = vld [vmem:[%s18337_s3 + $0xf8] sm:$0xff]  }
 0x173   :  { %v2852_v11 = vadd.f32 %v2851_v50, %v13938_v0  ;;  %3537 = vmatprep.mubr.bf16.mxu0 %v1079_v40  ;;  %10075 = vmatprep.subr.bf16.mxu0 %v11623_v31 }
 0x174   :  { %v2853_v60 = vpop.f32.mrf.mxu0  ;;  %v2964_v63 = vpop.f32.mrf.mxu1 }
 0x175   :  { %v2854_v16 = vadd.f32 %v2853_v60, %v13943_v47  ;;  %v14105_v23 = vadd.f32 %v2964_v63, %v2852_v11  ;;  %v11624_v47 = vld [vmem:[%s18337_s3 + $0xb8] sm:$0xff]  }
 0x176   :  { %v2855_v0 = vpop.f32.mrf.mxu0  ;;  %v2966_v32 = vpop.f32.mrf.mxu1  ;;  %10076 = vmatpush3.bf16.msra.mxu0 %v11624_v47 }
 0x177   :  { %v2856_v10 = vadd.f32 %v2855_v0, %v13954_v25  ;;  %v14120_v37 = vadd.f32 %v2966_v32, %v2854_v16  ;;  %v18782_v25 = vpack.c.bf16 %v13243_v41, %v13246_v4  ;;  %10077 = vmatprep.subr.bf16.mxu0 %v11625_v35  ;;  %v11628_v41 = vld [vmem:[%s18337_s3 + $0x10] sm:$0xff]   ;;  %v11629_v4 = vld [vmem:[%s18337_s3 + $0xe8] sm:$0xff]  }
 0x178   :  { %v14122_v30 = vpop.f32.mrf.mxu0  ;;  %v2968_v28 = vpop.f32.mrf.mxu1  ;;  %10022 = vmatpush3.bf16.msra.mxu1 %v11628_v41 }
 0x179   :  { %v14124_v15 = vadd.f32 %v2968_v28, %v2856_v10  ;;  %v11631_v28 = vld [vmem:[%s18337_s3 + $0xe0] sm:$0xff]  }
 0x17a   :  { %v2861_v2 = vpop.f32.mrf.mxu0  ;;  %v14129_v40 = vpop.f32.mrf.mxu1  ;;  %3538 = vmatmul.mubr.bf16.gmra.mxu0 %v18782_v25 }
 0x17b   :  { %v2862_v50 = vadd.f32 %v2861_v2, %v13967_v1  ;;  %10078 = vmatpush3.bf16.msra.mxu0 %v11627_v42 }
 0x17c   :  { %v2863_v11 = vpop.f32.mrf.mxu0  ;;  %v2974_v60 = vpop.f32.mrf.mxu1  ;;  %10079 = vmatprep.subr.bf16.mxu0 %v11629_v4 }
 0x17d   :  { %v2864_v63 = vadd.f32 %v2863_v11, %v13970_v55  ;;  %v14139_v16 = vadd.f32 %v2974_v60, %v2862_v50  ;;  %v11630_v55 = vld [vmem:[%s18337_s3 + $0xa8] sm:$0xff]   ;;  %v11633_v50 = vld [vmem:[%s18337_s3 + $0xa0] sm:$0xff]  }
 0x17e   :  { %v2865_v1 = vpop.f32.mrf.mxu0  ;;  %v2976_v38 = vpop.f32.mrf.mxu1 }
 0x17f   :  { %v2866_v31 = vadd.f32 %v2865_v1, %v13975_v14  ;;  %v14154_v0 = vadd.f32 %v2976_v38, %v2864_v63  ;;  %10080 = vmatpush3.bf16.msra.mxu0 %v11630_v55 }
 0x180   :  { %v14156_v32 = vpop.f32.mrf.mxu0  ;;  %v2978_v47 = vpop.f32.mrf.mxu1  ;;  %10081 = vmatprep.subr.bf16.mxu0 %v11631_v28 }
 0x181   :  { %v14158_v10 = vadd.f32 %v2978_v47, %v2866_v31 }
 0x182   :  { %v14163_v35 = vpop.f32.mrf.mxu1  ;;  %v3017_v2 = vpop.f32.mrf.mxu0 }
 0x183   :  { %18783 = vst [vmem:[#allocation27_spill] sm:$0xff] %v14163_v35  ;;  %v3018_v14 = vadd.f32 %v3017_v2, %v13983_v59  ;;  %10082 = vmatpush3.bf16.msra.mxu0 %v11633_v50  ;;  %v11635_v59 = vld [vmem:[%s18337_s3 + $0xd8] sm:$0xff]   ;;  %v11634_v50 = vld [vmem:[%s18337_s3 + $0x8] sm:$0xff]  }
 0x184   :  { %v3019_v25 = vpop.f32.mrf.mxu0  ;;  %v3130_v42 = vpop.f32.mrf.mxu1  ;;  %10083 = vmatprep.subr.bf16.mxu0 %v11635_v59 }
 0x185   :  { %v3020_v11 = vadd.f32 %v3019_v25, %v13986_v8  ;;  %v14170_v60 = vadd.f32 %v3130_v42, %v3018_v14  ;;  %v11636_v8 = vld [vmem:[%s18337_s3 + $0x98] sm:$0xff]   ;;  %v11632_v14 = vld [vmem:[%s18337_s3 + $0x48] sm:$0xff]  }
 0x186   :  { %v3021_v63 = vpop.f32.mrf.mxu0  ;;  %v3132_v22 = vpop.f32.mrf.mxu1  ;;  %10023 = vmatprep.subr.bf16.mxu1 %v11632_v14  ;;  %v11640_v14 = vld [vmem:[%s18337_s3] sm:$0xff]  }
 0x187   :  { %v3022_v41 = vadd.f32 %v3021_v63, %v13991_v54  ;;  %v14173_v4 = vadd.f32 %v3132_v22, %v3020_v11  ;;  %10084 = vmatpush3.bf16.msra.mxu0 %v11636_v8  ;;  %v11637_v11 = vld [vmem:[%s18337_s3 + $0xd0] sm:$0xff]   ;;  %10024 = vmatpush3.bf16.msra.mxu1 %v11634_v50 }
 0x188   :  { %v14178_v1 = vpop.f32.mrf.mxu0  ;;  %v3134_v38 = vpop.f32.mrf.mxu1  ;;  %v11639_v22 = vld [vmem:[%s18337_s3 + $0x90] sm:$0xff]   ;;  %10085 = vmatprep.subr.bf16.mxu0 %v11637_v11 }
 0x189   :  { %v14183_v55 = vadd.f32 %v3134_v38, %v3022_v41 }
 0x18a   :  { %v3027_v31 = vpop.f32.mrf.mxu0  ;;  %v14185_v47 = vpop.f32.mrf.mxu1 }
 0x18b   :  { %18784 = vst [vmem:[#allocation49_spill] sm:$0xff] %v14185_v47  ;;  %v3028_v54 = vadd.f32 %v3027_v31, %v13999_v29  ;;  %10086 = vmatpush3.bf16.msra.mxu0 %v11639_v22 }
 0x18c   :  { %v3029_v28 = vpop.f32.mrf.mxu0  ;;  %v3140_v2 = vpop.f32.mrf.mxu1 }
 0x18d   :  { %v3030_v25 = vadd.f32 %v3029_v28, %v14002_v21  ;;  %v14192_v42 = vadd.f32 %v3140_v2, %v3028_v54  ;;  %v11638_v28 = vld [vmem:[%s18337_s3 + $0x40] sm:$0xff]  }
 0x18e   :  { %v3031_v63 = vpop.f32.mrf.mxu0  ;;  %v3142_v29 = vpop.f32.mrf.mxu1  ;;  %10025 = vmatprep.subr.bf16.mxu1 %v11638_v28 }
 0x18f   :  { %v3032_v41 = vadd.f32 %v3031_v63, %v14009_v56  ;;  %v14204_v21 = vadd.f32 %v3142_v29, %v3030_v25  ;;  %v11641_v56 = vld [vmem:[%s18337_s3 + $0xc8] sm:$0xff]   ;;  %10026 = vmatpush3.bf16.msra.mxu1 %v11640_v14 }
 0x190   :  { %v14206_v59 = vpop.f32.mrf.mxu0  ;;  %v3144_v38 = vpop.f32.mrf.mxu1  ;;  %v11642_v25 = vld [vmem:[%s18337_s3 + $0x88] sm:$0xff]   ;;  %10087 = vmatprep.subr.bf16.mxu0 %v11641_v56 }
 0x191   :  { %v14208_v8 = vadd.f32 %v3144_v38, %v3032_v41  ;;  %10088 = vmatpush3.bf16.msra.mxu0 %v11642_v25 }
 0x192   :  { %v3037_v31 = vpop.f32.mrf.mxu0  ;;  %v14210_v54 = vpop.f32.mrf.mxu1 }
 0x193   :  { %18785 = vst [vmem:[#allocation57_spill] sm:$0xff] %v14210_v54  ;;  %v3038_v2 = vadd.f32 %v3037_v31, %v14016_v51 }
 0x194   :  { %v3039_v50 = vpop.f32.mrf.mxu0  ;;  %v3150_v11 = vpop.f32.mrf.mxu1 }
 0x195   :  { %v3040_v63 = vadd.f32 %v3039_v50, %v14022_v58  ;;  %v14226_v29 = vadd.f32 %v3150_v11, %v3038_v2 }
 0x196   :  { %v3041_v22 = vpop.f32.mrf.mxu0  ;;  %v3152_v51 = vpop.f32.mrf.mxu1 }
 0x197   :  { %v3042_v41 = vadd.f32 %v3041_v22, %v14030_v48  ;;  %v14229_v38 = vadd.f32 %v3152_v51, %v3040_v63  ;;  %v11643_v48 = vld [vmem:[%s18337_s3 + $0xc0] sm:$0xff]  }
 0x198   :  { %v14231_v31 = vpop.f32.mrf.mxu0  ;;  %v3154_v54 = vpop.f32.mrf.mxu1  ;;  %10089 = vmatprep.subr.bf16.mxu0 %v11643_v48 }
 0x199   :  { %v14233_v47 = vadd.f32 %v3154_v54, %v3042_v41 }
 0x19a   :  { %v3047_v35 = vpop.f32.mrf.mxu0  ;;  %v14235_v28 = vpop.f32.mrf.mxu1 }
 0x19b   :  { %18786 = vst [vmem:[#allocation23_spill] sm:$0xff] %v14235_v28  ;;  %v3048_v58 = vadd.f32 %v3047_v35, %v14040_v12  ;;  %v11644_v12 = vld [vmem:[%s18337_s3 + $0x80] sm:$0xff]  }
 0x19c   :  { %v3049_v56 = vpop.f32.mrf.mxu0  ;;  %v3160_v2 = vpop.f32.mrf.mxu1  ;;  %10090 = vmatpush3.bf16.msra.mxu0 %v11644_v12 }
 0x19d   :  { %v3050_v14 = vadd.f32 %v3049_v56, %v14049_v62  ;;  %v14239_v25 = vadd.f32 %v3160_v2, %v3048_v58  ;;  %v11645_v62 = vld [vmem:[%s18337_s3 + $0x178] sm:$0xff]  }
 0x19e   :  { %v3051_v50 = vpop.f32.mrf.mxu0  ;;  %v3162_v11 = vpop.f32.mrf.mxu1  ;;  %10139 = vmatprep.subr.bf16.mxu1 %v11645_v62 }
 0x19f   :  { %v3052_v54 = vadd.f32 %v3051_v50, %v14054_v52  ;;  %v14245_v63 = vadd.f32 %v3162_v11, %v3050_v14 }
 0x1a0   :  { %v14253_v35 = vpop.f32.mrf.mxu0  ;;  %v3164_v22 = vpop.f32.mrf.mxu1 }
 0x1a1   :  { %18787 = vst [vmem:[#allocation28_spill] sm:$0xff] %v14253_v35  ;;  %v14255_v51 = vadd.f32 %v3164_v22, %v3052_v54 }
 0x1a2   :  { %v3057_v41 = vpop.f32.mrf.mxu0  ;;  %v14257_v52 = vpop.f32.mrf.mxu1 }
 0x1a3   :  { %18788 = vst [vmem:[#allocation30_spill] sm:$0xff] %v14257_v52  ;;  %v3058_v58 = vadd.f32 %v3057_v41, %v14062_v20 }
 0x1a4   :  { %v3059_v56 = vpop.f32.mrf.mxu0  ;;  %v3170_v2 = vpop.f32.mrf.mxu1 }
 0x1a5   :  { %v3060_v14 = vadd.f32 %v3059_v56, %v14071_v27  ;;  %v14261_v48 = vadd.f32 %v3170_v2, %v3058_v58 }
 0x1a6   :  { %v3061_v50 = vpop.f32.mrf.mxu0  ;;  %v3172_v11 = vpop.f32.mrf.mxu1 }
 0x1a7   :  { %v3062_v28 = vadd.f32 %v3061_v50, %v14075_v46  ;;  %v14264_v35 = vadd.f32 %v3172_v11, %v3060_v14 }
 0x1a8   :  { %v14266_v54 = vpop.f32.mrf.mxu0  ;;  %v3174_v12 = vpop.f32.mrf.mxu1 }
 0x1a9   :  { %18789 = vst [vmem:[#allocation42_spill] sm:$0xff] %v14266_v54  ;;  %v14268_v62 = vadd.f32 %v3174_v12, %v3062_v28 }
 0x1aa   :  { %v3067_v22 = vpop.f32.mrf.mxu0  ;;  %v14270_v52 = vpop.f32.mrf.mxu1 }
 0x1ab   :  { %18790 = vst [vmem:[#allocation43_spill] sm:$0xff] %v14270_v52  ;;  %v3068_v20 = vadd.f32 %v3067_v22, %v14083_v26 }
 0x1ac   :  { %v3069_v41 = vpop.f32.mrf.mxu0  ;;  %v3180_v27 = vpop.f32.mrf.mxu1 }
 0x1ad   :  { %v3070_v58 = vadd.f32 %v3069_v41, %v14092_v19  ;;  %v14274_v56 = vadd.f32 %v3180_v27, %v3068_v20 }
 0x1ae   :  { %v3071_v2 = vpop.f32.mrf.mxu0  ;;  %v3182_v46 = vpop.f32.mrf.mxu1 }
 0x1af   :  { %v3072_v14 = vadd.f32 %v3071_v2, %v14098_v57  ;;  %v14277_v50 = vadd.f32 %v3182_v46, %v3070_v58 }
 0x1b0   :  { %v14279_v11 = vpop.f32.mrf.mxu0  ;;  %v3184_v28 = vpop.f32.mrf.mxu1 }
 0x1b1   :  { %18791 = vst [vmem:[#allocation44_spill] sm:$0xff] %v14279_v11  ;;  %v14281_v12 = vadd.f32 %v3184_v28, %v3072_v14 }
 0x1b2   :  { %v3077_v52 = vpop.f32.mrf.mxu0  ;;  %v14283_v54 = vpop.f32.mrf.mxu1 }
 0x1b3   :  { %18792 = vst [vmem:[#allocation45_spill] sm:$0xff] %v14283_v54  ;;  %v3078_v26 = vadd.f32 %v3077_v52, %v14105_v23 }
 0x1b4   :  { %v3079_v22 = vpop.f32.mrf.mxu0  ;;  %v3190_v19 = vpop.f32.mrf.mxu1 }
 0x1b5   :  { %v3080_v20 = vadd.f32 %v3079_v22, %v14120_v37  ;;  %v14287_v41 = vadd.f32 %v3190_v19, %v3078_v26 }
 0x1b6   :  { %v3081_v27 = vpop.f32.mrf.mxu0  ;;  %v3192_v57 = vpop.f32.mrf.mxu1 }
 0x1b7   :  { %v3082_v58 = vadd.f32 %v3081_v27, %v14124_v15  ;;  %v14290_v2 = vadd.f32 %v3192_v57, %v3080_v20 }
 0x1b8   :  { %v14292_v46 = vpop.f32.mrf.mxu0  ;;  %v3194_v14 = vpop.f32.mrf.mxu1 }
 0x1b9   :  { %v14294_v28 = vadd.f32 %v3194_v14, %v3082_v58 }
 0x1ba   :  { %v3087_v54 = vpop.f32.mrf.mxu0  ;;  %v14296_v11 = vpop.f32.mrf.mxu1 }
 0x1bb   :  { %18793 = vst [vmem:[#allocation50_spill] sm:$0xff] %v14296_v11  ;;  %v3088_v23 = vadd.f32 %v3087_v54, %v14139_v16 }
 0x1bc   :  { %v3089_v52 = vpop.f32.mrf.mxu0  ;;  %v3200_v37 = vpop.f32.mrf.mxu1 }
 0x1bd   :  { %v3090_v26 = vadd.f32 %v3089_v52, %v14154_v0  ;;  %v14300_v22 = vadd.f32 %v3200_v37, %v3088_v23 }
 0x1be   :  { %v3091_v19 = vpop.f32.mrf.mxu0  ;;  %v3202_v15 = vpop.f32.mrf.mxu1 }
 0x1bf   :  { %v3092_v20 = vadd.f32 %v3091_v19, %v14158_v10  ;;  %v14303_v27 = vadd.f32 %v3202_v15, %v3090_v26 }
 0x1c0   :  { %v14305_v57 = vpop.f32.mrf.mxu0  ;;  %v3204_v58 = vpop.f32.mrf.mxu1 }
 0x1c1   :  { %v14307_v14 = vadd.f32 %v3204_v58, %v3092_v20 }
 0x1c2   :  { %v14309_v11 = vpop.f32.mrf.mxu1  ;;  %v3243_v16 = vpop.f32.mrf.mxu0 }
 0x1c3   :  { %v14312_v54 = vadd.f32 %v3243_v16, %v14170_v60 }
 0x1c4   :  { %v3245_v0 = vpop.f32.mrf.mxu0  ;;  %v14314_v23 = vpop.f32.mrf.mxu1 }
 0x1c5   :  { %18794 = vst [vmem:[#allocation53_spill] sm:$0xff] %v14314_v23  ;;  %v14317_v52 = vadd.f32 %v3245_v0, %v14173_v4 }
 0x1c6   :  { %v3247_v10 = vpop.f32.mrf.mxu0  ;;  %v14319_v37 = vpop.f32.mrf.mxu1 }
 0x1c7   :  { %18795 = vst [vmem:[#allocation51_spill] sm:$0xff] %v14319_v37  ;;  %v14322_v26 = vadd.f32 %v3247_v10, %v14183_v55 }
 0x1c8   :  { %v14324_v19 = vpop.f32.mrf.mxu0  ;;  %v14326_v15 = vpop.f32.mrf.mxu1 }
 0x1c9   :  { %18796 = vst [vmem:[#allocation54_spill] sm:$0xff] %v14322_v26  ;;  %18797 = vst [vmem:[#allocation56_spill] sm:$0xff] %v14326_v15 }
 0x1ca   :  { %v3253_v20 = vpop.f32.mrf.mxu0  ;;  %v14328_v58 = vpop.f32.mrf.mxu1 }
 0x1cb   :  { %18798 = vst [vmem:[#allocation3_spill] sm:$0xff] %v14328_v58  ;;  %v14331_v60 = vadd.f32 %v3253_v20, %v14192_v42 }
 0x1cc   :  { %v3255_v16 = vpop.f32.mrf.mxu0  ;;  %v14333_v23 = vpop.f32.mrf.mxu1 }
 0x1cd   :  { %18799 = vst [vmem:[#allocation4_spill] sm:$0xff] %v14333_v23  ;;  %v14336_v4 = vadd.f32 %v3255_v16, %v14204_v21 }
 0x1ce   :  { %v3257_v0 = vpop.f32.mrf.mxu0  ;;  %v14338_v37 = vpop.f32.mrf.mxu1 }
 0x1cf   :  { %18800 = vst [vmem:[#allocation9_spill] sm:$0xff] %v14338_v37  ;;  %v14341_v55 = vadd.f32 %v3257_v0, %v14208_v8 }
 0x1d0   :  { %v14343_v10 = vpop.f32.mrf.mxu0  ;;  %v14345_v15 = vpop.f32.mrf.mxu1 }
 0x1d1   :  { %18801 = vst [vmem:[#allocation15_spill] sm:$0xff] %v14341_v55  ;;  %18802 = vst [vmem:[#allocation5_spill] sm:$0xff] %v14345_v15 }
 0x1d2   :  { %v3263_v58 = vpop.f32.mrf.mxu0  ;;  %v14347_v26 = vpop.f32.mrf.mxu1 }
 0x1d3   :  { %18803 = vst [vmem:[#allocation6_spill] sm:$0xff] %v14347_v26  ;;  %v14350_v42 = vadd.f32 %v3263_v58, %v14226_v29  ;;  %v11655_v29 = vld [vmem:[%s18337_s3 + $0x1f8] sm:$0xff]  }
 0x1d4   :  { %v3265_v20 = vpop.f32.mrf.mxu0  ;;  %v14352_v23 = vpop.f32.mrf.mxu1  ;;  %10203 = vmatprep.subr.bf16.mxu0 %v11655_v29 }
 0x1d5   :  { %18804 = vst [vmem:[#allocation75_spill] sm:$0xff] %v14352_v23  ;;  %v14355_v21 = vadd.f32 %v3265_v20, %v14229_v38 }
 0x1d6   :  { %v3267_v16 = vpop.f32.mrf.mxu0  ;;  %v14357_v37 = vpop.f32.mrf.mxu1 }
 0x1d7   :  { %18805 = vst [vmem:[#allocation76_spill] sm:$0xff] %v14355_v21  ;;  %18806 = vst [vmem:[#allocation10_spill] sm:$0xff] %v14357_v37  ;;  %v14360_v8 = vadd.f32 %v3267_v16, %v14233_v47 }
 0x1d8   :  { %v14362_v0 = vpop.f32.mrf.mxu0  ;;  %v14364_v15 = vpop.f32.mrf.mxu1 }
 0x1d9   :  { %18807 = vst [vmem:[#allocation22_spill] sm:$0xff] %v14360_v8  ;;  %18808 = vst [vmem:[#allocation77_spill] sm:$0xff] %v14364_v15 }
 0x1da   :  { %v3273_v26 = vpop.f32.mrf.mxu0  ;;  %v14366_v55 = vpop.f32.mrf.mxu1 }
 0x1db   :  { %18809 = vst [vmem:[#allocation80_spill] sm:$0xff] %v14366_v55  ;;  %v14372_v38 = vadd.f32 %v3273_v26, %v14239_v25 }
 0x1dc   :  { %v3275_v58 = vpop.f32.mrf.mxu0  ;;  %v14374_v20 = vpop.f32.mrf.mxu1 }
 0x1dd   :  { %18810 = vst [vmem:[#allocation29_spill] sm:$0xff] %v14374_v20  ;;  %v14377_v47 = vadd.f32 %v3275_v58, %v14245_v63 }
 0x1de   :  { %v3277_v16 = vpop.f32.mrf.mxu0  ;;  %v14379_v8 = vpop.f32.mrf.mxu1 }
 0x1df   :  { %18811 = vst [vmem:[#allocation17_spill] sm:$0xff] %v14379_v8  ;;  %v3278_v15 = vadd.f32 %v3277_v16, %v14255_v51 }
 0x1e0   :  { %v14382_v55 = vpop.f32.mrf.mxu0  ;;  %v3390_v37 = vpop.f32.mrf.mxu1 }
 0x1e1   :  { %v14384_v21 = vadd.f32 %v3390_v37, %v3278_v15 }
 0x1e2   :  { %v3283_v23 = vpop.f32.mrf.mxu0  ;;  %v14386_v25 = vpop.f32.mrf.mxu1 }
 0x1e3   :  { %18812 = vst [vmem:[#allocation31_spill] sm:$0xff] %v14384_v21  ;;  %v14389_v26 = vadd.f32 %v3283_v23, %v14261_v48 }
 0x1e4   :  { %v3285_v29 = vpop.f32.mrf.mxu0  ;;  %v14391_v20 = vpop.f32.mrf.mxu1 }
 0x1e5   :  { %18813 = vst [vmem:[#allocation36_spill] sm:$0xff] %v14391_v20  ;;  %v14394_v63 = vadd.f32 %v3285_v29, %v14264_v35 }
 0x1e6   :  { %v3287_v58 = vpop.f32.mrf.mxu0  ;;  %v14396_v8 = vpop.f32.mrf.mxu1 }
 0x1e7   :  { %v14399_v51 = vadd.f32 %v3287_v58, %v14268_v62  ;;  %v2612_v62 = vadd.f32 %v13885_v9, %v13747_v6  ;;  %v18820_v6 = vld [vmem:[#allocation47_spill] sm:$0xff] }
 0x1e8   :  { %v14401_v37 = vpop.f32.mrf.mxu0  ;;  %v14403_v15 = vpop.f32.mrf.mxu1  ;;  %v2745_v9 = vadd.f32 %v18820_v6, %v13952_v45 }
 0x1e9   :  { %18814 = vst [vmem:[#allocation26_spill] sm:$0xff] %v14399_v51  ;;  %18815 = vst [vmem:[#allocation37_spill] sm:$0xff] %v14403_v15 }
 0x1ea   :  { %v3293_v16 = vpop.f32.mrf.mxu0  ;;  %v14405_v21 = vpop.f32.mrf.mxu1 }
 0x1eb   :  { %18816 = vst [vmem:[#allocation13_spill] sm:$0xff] %v14405_v21  ;;  %v14408_v48 = vadd.f32 %v3293_v16, %v14274_v56  ;;  %v2725_v56 = vadd.f32 %v13892_v7, %v2612_v62  ;;  %v2735_v16 = vadd.f32 %v13926_v43, %v13920_v5  ;;  %v2911_v5 = vadd.f32 %v13993_v34, %v13989_v44 }
 0x1ec   :  { %v3295_v23 = vpop.f32.mrf.mxu0  ;;  %v14410_v20 = vpop.f32.mrf.mxu1  ;;  %v2858_v43 = vadd.f32 %v14122_v30, %v2745_v9  ;;  %v2941_v34 = vadd.f32 %v14056_v13, %v14052_v24  ;;  %v18825_v24 = vld [vmem:[#allocation44_spill] sm:$0xff]  ;;  %v18826_v9 = vld [vmem:[#allocation49_spill] sm:$0xff] }
 0x1ed   :  { %v14413_v35 = vadd.f32 %v3295_v23, %v14277_v50 }
 0x1ee   :  { %v3297_v29 = vpop.f32.mrf.mxu0  ;;  %v14417_v58 = vpop.f32.mrf.mxu1 }
 0x1ef   :  { %18817 = vst [vmem:[#allocation64_spill] sm:$0xff] %v14413_v35  ;;  %18818 = vst [vmem:[#allocation55_spill] sm:$0xff] %v14417_v58  ;;  %v14420_v15 = vadd.f32 %v3297_v29, %v14281_v12  ;;  %v18821_v58 = vld [vmem:[#allocation46_spill] sm:$0xff]  ;;  %v2838_v29 = vadd.f32 %v14073_v33, %v2725_v56 }
 0x1f0   :  { %v14422_v51 = vpop.f32.mrf.mxu0  ;;  %v14424_v21 = vpop.f32.mrf.mxu1  ;;  %v2755_v35 = vadd.f32 %v18821_v58, %v13973_v18  ;;  %v2921_v18 = vadd.f32 %v14011_v49, %v14007_v3  ;;  %v3024_v58 = vadd.f32 %v14178_v1, %v2911_v5 }
 0x1f1   :  { %18819 = vst [vmem:[#allocation66_spill] sm:$0xff] %v14424_v21  ;;  %v2848_v21 = vadd.f32 %v14096_v39, %v2735_v16  ;;  %v2931_v39 = vadd.f32 %v14032_v61, %v14028_v36  ;;  %v2951_v30 = vadd.f32 %v14077_v53, %v2838_v29  ;;  %v18822_v36 = vld [vmem:[#allocation27_spill] sm:$0xff]  ;;  %v18824_v16 = vld [vmem:[#allocation42_spill] sm:$0xff] }
 0x1f2   :  { %v3303_v50 = vpop.f32.mrf.mxu0  ;;  %v14429_v23 = vpop.f32.mrf.mxu1  ;;  %v2868_v45 = vadd.f32 %v14156_v32, %v2755_v35  ;;  %v3034_v3 = vadd.f32 %v14206_v59, %v2921_v18  ;;  %v2971_v35 = vadd.f32 %v14129_v40, %v2858_v43  ;;  %v18828_v43 = vld [vmem:[#allocation23_spill] sm:$0xff] }
 0x1f3   :  { %v14436_v12 = vadd.f32 %v3303_v50, %v14287_v41  ;;  %v2961_v32 = vadd.f32 %v14100_v17, %v2848_v21  ;;  %v3044_v1 = vadd.f32 %v14231_v31, %v2931_v39  ;;  %v3064_v50 = vadd.f32 %v18824_v16, %v2951_v30  ;;  %v18829_v39 = vld [vmem:[#allocation30_spill] sm:$0xff] }
 0x1f4   :  { %v3305_v7 = vpop.f32.mrf.mxu0  ;;  %v14440_v62 = vpop.f32.mrf.mxu1  ;;  %v2981_v61 = vadd.f32 %v18822_v36, %v2868_v45  ;;  %v3137_v17 = vadd.f32 %v18826_v9, %v3024_v58  ;;  %v3084_v59 = vadd.f32 %v14292_v46, %v2971_v35  ;;  %v18830_v46 = vld [vmem:[#allocation43_spill] sm:$0xff]  ;;  %v18832_v35 = vld [vmem:[#allocation50_spill] sm:$0xff] }
 0x1f5   :  { %v14447_v6 = vadd.f32 %v3305_v7, %v14290_v2  ;;  %v3074_v13 = vadd.f32 %v18825_v24, %v2961_v32  ;;  %v18827_v7 = vld [vmem:[#allocation57_spill] sm:$0xff]  ;;  %v3157_v45 = vadd.f32 %v18828_v43, %v3044_v1  ;;  %v18836_v24 = vld [vmem:[#allocation56_spill] sm:$0xff]  ;;  %v18837_v9 = vld [vmem:[#allocation3_spill] sm:$0xff] }
 0x1f6   :  { %v3307_v41 = vpop.f32.mrf.mxu0  ;;  %v14451_v33 = vpop.f32.mrf.mxu1  ;;  %v3094_v21 = vadd.f32 %v14305_v57, %v2981_v61  ;;  %v3147_v31 = vadd.f32 %v18827_v7, %v3034_v3  ;;  %v3250_v18 = vadd.f32 %v14324_v19, %v3137_v17  ;;  %v18831_v57 = vld [vmem:[#allocation45_spill] sm:$0xff]  ;;  %v3197_v36 = vadd.f32 %v18832_v35, %v3084_v59  ;;  %v18844_v43 = vld [vmem:[#allocation76_spill] sm:$0xff] }
 0x1f7   :  { %v14457_v44 = vadd.f32 %v3307_v41, %v14294_v28  ;;  %v18823_v28 = vld [vmem:[#allocation28_spill] sm:$0xff]  ;;  %v3187_v30 = vadd.f32 %v18831_v57, %v3074_v13  ;;  %v3270_v61 = vadd.f32 %v14362_v0, %v3157_v45  ;;  %v18845_v45 = vld [vmem:[#allocation10_spill] sm:$0xff] }
 0x1f8   :  { %v3309_v49 = vpop.f32.mrf.mxu0  ;;  %v14464_v2 = vpop.f32.mrf.mxu1  ;;  %v3054_v56 = vadd.f32 %v18823_v28, %v2941_v34  ;;  %v3177_v34 = vadd.f32 %v18830_v46, %v3064_v50  ;;  %v3207_v3 = vadd.f32 %v14309_v11, %v3094_v21  ;;  %v18835_v50 = vld [vmem:[#allocation54_spill] sm:$0xff]  ;;  %v3363_v11 = vadd.f32 %v18837_v9, %v3250_v18  ;;  %v18838_v0 = vld [vmem:[#allocation4_spill] sm:$0xff]  ;;  %v18841_v21 = vld [vmem:[#allocation5_spill] sm:$0xff] }
 0x1f9   :  { %v14506_v17 = vadd.f32 %v18838_v0, %v14331_v60  ;;  %v14525_v18 = vadd.f32 %v18845_v45, %v18844_v43  ;;  %v18848_v57 = vld [vmem:[#allocation80_spill] sm:$0xff]  ;;  %v18857_v45 = vld [vmem:[#allocation66_spill] sm:$0xff] }
 0x1fa   :  { %v3313_v53 = vpop.f32.mrf.mxu0  ;;  %v14478_v40 = vpop.f32.mrf.mxu1  ;;  %v3167_v58 = vadd.f32 %v18829_v39, %v3054_v56  ;;  %v18834_v56 = vld [vmem:[#allocation51_spill] sm:$0xff]  ;;  %v3290_v60 = vadd.f32 %v14401_v37, %v3177_v34  ;;  %v18851_v34 = vld [vmem:[#allocation36_spill] sm:$0xff] }
 0x1fb   :  { %v14476_v29 = vadd.f32 %v3313_v53, %v14300_v22  ;;  %v3260_v22 = vadd.f32 %v14343_v10, %v3147_v31  ;;  %v3359_v16 = vadd.f32 %v18834_v56, %v14317_v52  ;;  %v3361_v10 = vadd.f32 %v18836_v24, %v18835_v50  ;;  %v18842_v52 = vld [vmem:[#allocation6_spill] sm:$0xff]  ;;  %v18850_v56 = vld [vmem:[#allocation17_spill] sm:$0xff] }
 0x1fc   :  { %v3315_v5 = vpop.f32.mrf.mxu0  ;;  %v3426_v1 = vpop.f32.mrf.mxu1  ;;  %v3280_v13 = vadd.f32 %v14382_v55, %v3167_v58  ;;  %v18843_v55 = vld [vmem:[#allocation75_spill] sm:$0xff]  ;;  %v18847_v58 = vld [vmem:[#allocation77_spill] sm:$0xff]  ;;  %v14541_v50 = vadd.f32 %v18850_v56, %v14377_v47  ;;  %v14548_v24 = vadd.f32 %v18851_v34, %v14389_v26  ;;  %v14564_v26 = vadd.f32 %v14410_v20, %v14408_v48 }
 0x1fd   :  { %v14484_v41 = vadd.f32 %v3315_v5, %v14303_v27  ;;  %v18833_v27 = vld [vmem:[#allocation53_spill] sm:$0xff]  ;;  %v14517_v31 = vadd.f32 %v18842_v52, %v3260_v22  ;;  %v14521_v5 = vadd.f32 %v18843_v55, %v14350_v42 }
 0x1fe   :  { %v3317_v32 = vpop.f32.mrf.mxu0  ;;  %v3357_v28 = vadd.f32 %v18833_v27, %v14312_v54  ;;  %v18840_v54 = vld [vmem:[#allocation15_spill] sm:$0xff]  ;;  %v18849_v22 = vld [vmem:[#allocation29_spill] sm:$0xff]  ;;  %v3428_v42 = vpop.f32.mrf.mxu1  ;;  %v14544_v37 = vadd.f32 %v14386_v25, %v3280_v13 }
 0x1ff   :  { %v14494_v19 = vadd.f32 %v3317_v32, %v14307_v14  ;;  %v18839_v14 = vld [vmem:[#allocation9_spill] sm:$0xff]  ;;  %v14514_v7 = vadd.f32 %v18841_v21, %v18840_v54  ;;  %v14533_v32 = vadd.f32 %v18848_v57, %v3270_v61  ;;  %v14537_v35 = vadd.f32 %v18849_v22, %v14372_v38  ;;  %v18855_v21 = vld [vmem:[#allocation64_spill] sm:$0xff] }
 0x200   :  { %v3319_v53 = vpop.f32.mrf.mxu0  ;;  %v14510_v59 = vadd.f32 %v18839_v14, %v14336_v4  ;;  %v18846_v4 = vld [vmem:[#allocation22_spill] sm:$0xff]  ;;  %v14552_v61 = vadd.f32 %v14396_v8, %v14394_v63  ;;  %v3300_v38 = vadd.f32 %v14422_v51, %v3187_v30  ;;  %v18853_v47 = vld [vmem:[#allocation37_spill] sm:$0xff]  ;;  %v18856_v8 = vld [vmem:[#allocation55_spill] sm:$0xff]  ;;  %v3310_v51 = vadd.f32 %v3309_v49, %v3197_v36  ;;  %v3430_v30 = vpop.f32.mrf.mxu1 }
 0x201   :  { %v14530_v46 = vadd.f32 %v18847_v58, %v18846_v4  ;;  %v18852_v14 = vld [vmem:[#allocation26_spill] sm:$0xff]  ;;  %v18854_v25 = vld [vmem:[#allocation13_spill] sm:$0xff]  ;;  %v14568_v63 = vadd.f32 %v18856_v8, %v18855_v21  ;;  %v14579_v49 = vadd.f32 %v14440_v62, %v14436_v12  ;;  %v14583_v36 = vadd.f32 %v14451_v33, %v14447_v6 }
 0x202   :  { %v3469_v39 = vpop.f32.mrf.mxu0  ;;  %v14557_v54 = vadd.f32 %v18853_v47, %v18852_v14  ;;  %v14560_v13 = vadd.f32 %v18854_v25, %v3290_v60  ;;  %v14575_v20 = vadd.f32 %v14429_v23, %v3300_v38  ;;  %v14590_v23 = vadd.f32 %v14478_v40, %v3310_v51  ;;  %v3432_v56 = vpop.f32.mrf.mxu1 }
 0x203   :  { %v3470_v27 = vadd.f32 %v3469_v39, %v3357_v28  ;;  %v14572_v39 = vadd.f32 %v18857_v45, %v14420_v15  ;;  %v3320_v15 = vadd.f32 %v3319_v53, %v3207_v3  ;;  %v14601_v53 = vadd.f32 %v3428_v42, %v14484_v41 }
 0x204   :  { %v3471_v9 = vpop.f32.mrf.mxu0 }
 0x205   :  { %vm3548_vm3 = vcmp.gt.f32.partialorder %v3470_v27, 0.0  ;;  %v3580_v28 = vmul.f32 0.01, %v3470_v27  ;;  %v3472_v0 = vadd.f32 %v3471_v9, %v3359_v16 }
 0x206   :  { %v3473_v52 = vpop.f32.mrf.mxu0 }
 0x207   :  { %v3612_v55 = vsel %vm3548_vm3, %v3470_v27, %v3580_v28  ;;  %v3581_v16 = vmul.f32 0.01, %v3472_v0  ;;  %v3474_v43 = vadd.f32 %v3473_v52, %v3361_v10  ;;  %vm3549_vm4 = vcmp.gt.f32.partialorder %v3472_v0, 0.0 }
 0x208   :  { %v3967_v60 = vrot.slane %v3612_v55, 1  ;;  %v4031_v4 = vrot.slane %v3612_v55, 7  ;;  %v3475_v58 = vpop.f32.mrf.mxu0  ;;  %v4095_v10 = vrot.slane %v3612_v55, 5  ;;  %v14587_v27 = vadd.f32 %v14464_v2, %v14457_v44 }
 0x209   :  { %vm3550_vm5 = vcmp.gt.f32.partialorder %v3474_v43, 0.0  ;;  %v3582_v48 = vmul.f32 0.01, %v3474_v43  ;;  %v3476_v57 = vadd.f32 %v3475_v58, %v3363_v11  ;;  %v14593_v11 = vadd.f32 %v3426_v1, %v14476_v29 }
 0x20a   :  { %v3479_v22 = vpop.f32.mrf.mxu0  ;;  %v14595_v12 = vsel %vm3549_vm4, %v3472_v0, %v3581_v16  ;;  %v14598_v62 = vsel %vm585_vm0, %v3967_v60, %v4031_v4  ;;  %v14604_v44 = vadd.f32 %v3430_v30, %v14494_v19  ;;  %v14606_v29 = vadd.f32 %v3432_v56, %v3320_v15 }
 0x20b   :  { %18858 = vst [vmem:[#allocation58_spill] sm:$0xff] %v14598_v62  ;;  %v3614_v6 = vsel %vm3550_vm5, %v3474_v43, %v3582_v48  ;;  %vm3551_vm6 = vcmp.gt.f32.partialorder %v3476_v57, 0.0  ;;  %v3583_v33 = vmul.f32 0.01, %v3476_v57  ;;  %v4191_v1 = vsel %vm585_vm0, %v4031_v4, %v4095_v10 }
 0x20c   :  { %v3481_v3 = vpop.f32.mrf.mxu0  ;;  %v3965_v2 = vrot.slane %v3614_v6, 1  ;;  %v4029_v40 = vrot.slane %v3614_v6, 7  ;;  %v4093_v34 = vrot.slane %v3614_v6, 5  ;;  %v3480_v9 = vadd.f32 %v3479_v22, %v14506_v17 }
 0x20d   :  { %v4283_v28 = vrot.slane %v14598_v62, 1  ;;  %v3968_v0 = vrot.slane %v14595_v12, 1  ;;  %v4032_v41 = vrot.slane %v14595_v12, 7  ;;  %v14613_v42 = vsel %vm3551_vm6, %v3476_v57, %v3583_v33 }
 0x20e   :  { %v3483_v38 = vpop.f32.mrf.mxu0  ;;  %v14616_v19 = vsel %vm585_vm0, %v3965_v2, %v4029_v40  ;;  %v4189_v14 = vsel %vm585_vm0, %v4029_v40, %v4093_v34  ;;  %vm3552_vm7 = vcmp.gt.f32.partialorder %v3480_v9, 0.0  ;;  %v3482_v47 = vadd.f32 %v3481_v3, %v14510_v59 }
 0x20f   :  { %18859 = vst [vmem:[#allocation67_spill] sm:$0xff] %v14616_v19  ;;  %v4284_v21 = vrot.slane %v4191_v1, 1  ;;  %v4395_v17 = vrot.slane %v14598_v62, 2  ;;  %v4396_v8 = vrot.slane %v4191_v1, 2  ;;  %v3584_v52 = vmul.f32 0.01, %v3480_v9 }
 0x210   :  { %v3485_v25 = vpop.f32.mrf.mxu0  ;;  %v4096_v51 = vrot.slane %v14595_v12, 5  ;;  %v3966_v30 = vrot.slane %v14613_v42, 1  ;;  %v3484_v55 = vadd.f32 %v3483_v38, %v14514_v7  ;;  %v4277_v45 = vrot.slane %v14616_v19, 1 }
 0x211   :  { %v3486_v16 = vadd.f32 %v3485_v25, %v14517_v31  ;;  %v4278_v60 = vrot.slane %v4189_v14, 1  ;;  %v4030_v59 = vrot.slane %v14613_v42, 7  ;;  %v14627_v4 = vsel %vm3552_vm7, %v3480_v9, %v3584_v52 }
 0x212   :  { %v3489_v43 = vpop.f32.mrf.mxu0  ;;  %v4389_v58 = vrot.slane %v14616_v19, 2  ;;  %v4390_v48 = vrot.slane %v4189_v14, 2  ;;  %v3585_v57 = vmul.f32 0.01, %v3482_v47  ;;  %v18459_v22 = vrot.slane %v14627_v4, 7 }
 0x213   :  { %v3490_v15 = vadd.f32 %v3489_v43, %v14521_v5  ;;  %v4097_v7 = vrot.slane %v14627_v4, 5  ;;  %vm3553_vm8 = vcmp.gt.f32.partialorder %v3482_v47, 0.0  ;;  %vm3554_vm9 = vcmp.gt.f32.partialorder %v3484_v55, 0.0 }
 0x214   :  { %v3491_v10 = vpop.f32.mrf.mxu0  ;;  %v14634_v31 = vsel %vm706_vm1, %v4283_v28, %v4284_v21  ;;  %v14637_v56 = vsel %vm819_vm2, %v4395_v17, %v4396_v8  ;;  %v3586_v6 = vmul.f32 0.01, %v3484_v55  ;;  %v3587_v33 = vmul.f32 0.01, %v3486_v16 }
 0x215   :  { %18860 = vst [vmem:[#allocation71_spill] sm:$0xff] %v14634_v31  ;;  %v14640_v2 = vsel %vm706_vm1, %v4277_v45, %v4278_v60  ;;  %v4094_v5 = vrot.slane %v14613_v42, 5  ;;  %vm3555_vm10 = vcmp.gt.f32.partialorder %v3486_v16, 0.0  ;;  %v14644_v40 = vsel %vm585_vm0, %v3966_v30, %v4030_v59 }
 0x216   :  { %v3493_v3 = vpop.f32.mrf.mxu0  ;;  %18861 = vst [vmem:[#allocation65_spill] sm:$0xff] %v14640_v2  ;;  %v14647_v1 = vsel %vm819_vm2, %v4389_v58, %v4390_v48  ;;  %v14649_v34 = vsel %vm3553_vm8, %v3482_v47, %v3585_v57  ;;  %v14651_v9 = vsel %vm3554_vm9, %v3484_v55, %v3586_v6  ;;  %v3588_v38 = vmul.f32 0.01, %v3490_v15  ;;  %v11646_v48 = vld [vmem:[%s18337_s3 + $0x138] sm:$0xff]  }
 0x217   :  { %v14657_v25 = vsel %vm585_vm0, %v18459_v22, %v4097_v7  ;;  %vm3556_vm11 = vcmp.gt.f32.partialorder %v3490_v15, 0.0  ;;  %v14662_v42 = vsel %vm585_vm0, %v3968_v0, %v4032_v41  ;;  %v18458_v47 = vrot.slane %v14651_v9, 7 }
 0x218   :  { %v3495_v28 = vpop.f32.mrf.mxu0  ;;  %18862 = vst [vmem:[#allocation72_spill] sm:$0xff] %v14657_v25  ;;  %v4099_v21 = vrot.slane %v14651_v9, 5  ;;  %v14666_v17 = vsel %vm3555_vm10, %v3486_v16, %v3587_v33  ;;  %v4542_v8 = vpack.c.bf16 %v14662_v42, %v14644_v40  ;;  %v3970_v30 = vrot.slane %v14649_v34, 1 }
 0x219   :  { %v4034_v55 = vrot.slane %v14649_v34, 7  ;;  %v4098_v43 = vrot.slane %v14649_v34, 5  ;;  %v3492_v45 = vadd.f32 %v3491_v10, %v14525_v18  ;;  %v14677_v16 = vsel %vm3556_vm11, %v3490_v15, %v3588_v38  ;;  %v11647_v15 = vld [vmem:[%s18337_s3 + $0x170] sm:$0xff]   ;;  %v11649_v38 = vld [vmem:[%s18337_s3 + $0x168] sm:$0xff]  }
 0x21a   :  { %v3499_v52 = vpop.f32.mrf.mxu0  ;;  %5551 = vmatprep.mubr.bf16.mxu1 %v4542_v8  ;;  %v4541_v18 = vpack.c.bf16 %v14598_v62, %v14616_v19  ;;  %v3494_v10 = vadd.f32 %v3493_v3, %v14530_v46  ;;  %v14689_v6 = vsel %vm585_vm0, %v4030_v59, %v4094_v5  ;;  %v14697_v33 = vsel %vm585_vm0, %v18458_v47, %v4099_v21 }
 0x21b   :  { %v14704_v46 = vsel %vm585_vm0, %v4032_v41, %v4096_v51  ;;  %v18460_v3 = vrot.slane %v14677_v16, 7  ;;  %v4101_v5 = vrot.slane %v14677_v16, 5  ;;  %v3589_v8 = vmul.f32 0.01, %v3492_v45  ;;  %v11648_v41 = vld [vmem:[%s18337_s3 + $0x130] sm:$0xff]  }
 0x21c   :  { %v14682_v57 = vpop.f32.mrf.mxu0  ;;  %5552 = vmatmul.mubr.bf16.vlgmr.msra.gmra.mxu1 %v4541_v18  ;;  %vm3558_vm12 = vcmp.gt.f32.partialorder %v3494_v10, 0.0  ;;  %v3590_v21 = vmul.f32 0.01, %v3494_v10  ;;  %v4280_v60 = vrot.slane %v14644_v40, 1  ;;  %v4281_v58 = vrot.slane %v14689_v6, 1 }
 0x21d   :  { %10140 = vmatpush3.bf16.msra.mxu1 %v11646_v48  ;;  %v4286_v12 = vrot.slane %v14662_v42, 1  ;;  %vm3557_vm13 = vcmp.gt.f32.partialorder %v3492_v45, 0.0  ;;  %v4287_v18 = vrot.slane %v14704_v46, 1  ;;  %v14721_v48 = vsel %vm585_vm0, %v3970_v30, %v4034_v55 }
 0x21e   :  { %v14706_v59 = vpop.f32.mrf.mxu0  ;;  %10141 = vmatprep.subr.bf16.mxu1 %v11647_v15  ;;  %v14727_v0 = vsel %vm706_vm1, %v4280_v60, %v4281_v58  ;;  %v14731_v7 = vpack.c.bf16 %v14721_v48, %v14644_v40  ;;  %v3496_v47 = vadd.f32 %v3495_v28, %v14533_v32  ;;  %v3500_v34 = vadd.f32 %v3499_v52, %v14537_v35  ;;  %v11650_v52 = vld [vmem:[%s18337_s3 + $0x128] sm:$0xff]  }
 0x21f   :  { %18863 = vst [vmem:[#allocation41_spill] sm:$0xff] %v14727_v0  ;;  %v14741_v15 = vsel %vm585_vm0, %v18460_v3, %v4101_v5  ;;  %v14744_v60 = vsel %vm3558_vm12, %v3494_v10, %v3590_v21  ;;  %v14747_v58 = vsel %vm706_vm1, %v4286_v12, %v4287_v18  ;;  %v14750_v32 = vsel %vm3557_vm13, %v3492_v45, %v3589_v8  ;;  %v11656_v10 = vld [vmem:[%s18337_s3 + $0x1b8] sm:$0xff]   ;;  %v11651_v12 = vld [vmem:[%s18337_s3 + $0x160] sm:$0xff]  }
 0x220   :  { %v14716_v51 = vpop.f32.mrf.mxu0  ;;  %18864 = vst [vmem:[#allocation7_spill] sm:$0xff] %v14731_v7  ;;  %18865 = vst [vmem:[#allocation11_spill] sm:$0xff] %v14747_v58  ;;  %v4544_v35 = vpack.c.bf16 %v14747_v58, %v14727_v0  ;;  %5559 = vmatprep.mubr.bf16.mxu1 %v14731_v7  ;;  %v4543_v28 = vpack.c.bf16 %v14634_v31, %v14640_v2  ;;  %vm3560_vm14 = vcmp.gt.f32.partialorder %v3500_v34, 0.0  ;;  %v3592_v45 = vmul.f32 0.01, %v3500_v34 }
 0x221   :  { %10142 = vmatpush3.bf16.msra.mxu1 %v11648_v41  ;;  %v14764_v5 = vsel %vm585_vm0, %v4034_v55, %v4098_v43  ;;  %v4292_v8 = vrot.slane %v14721_v48, 1  ;;  %v4103_v18 = vrot.slane %v14744_v60, 5  ;;  %v3591_v22 = vmul.f32 0.01, %v3496_v47  ;;  %v11657_v55 = vld [vmem:[%s18337_s3 + $0x1f0] sm:$0xff]  }
 0x222   :  { %v14735_v14 = vpop.f32.mrf.mxu0  ;;  %10143 = vmatprep.subr.bf16.mxu1 %v11649_v38  ;;  %5648 = vmatprep.mubr.bf16.mxu0 %v4544_v35  ;;  %v4293_v30 = vrot.slane %v14764_v5, 1  ;;  %v3974_v3 = vrot.slane %v14750_v32, 1  ;;  %vm3559_vm15 = vcmp.gt.f32.partialorder %v3496_v47, 0.0  ;;  %v3624_v35 = vsel %vm3560_vm14, %v3500_v34, %v3592_v45  ;;  %v11659_v43 = vld [vmem:[%s18337_s3 + $0x1b0] sm:$0xff]  }
 0x223   :  { %5649 = vmatmul.mubr.bf16.vlgmr.msra.gmra.mxu0 %v4543_v28  ;;  %v3502_v28 = vadd.f32 %v14682_v57, %v14541_v50  ;;  %v18868_v7 = vrot.slane %v14627_v4, 7  ;;  %v18869_v34 = vrot.slane %v14627_v4, 1  ;;  %v18871_v50 = vrot.slane %v14744_v60, 7 }
 0x224   :  { %v14767_v21 = vpop.f32.mrf.mxu0  ;;  %v14785_v31 = vsel %vm706_vm1, %v4292_v8, %v4293_v30  ;;  %10204 = vmatpush3.bf16.msra.mxu0 %v11656_v10  ;;  %v11652_v8 = vld [vmem:[%s18337_s3 + $0x120] sm:$0xff]   ;;  %v14817_v4 = vsel %vm3559_vm15, %v3496_v47, %v3591_v22  ;;  %v18873_v22 = vrot.slane %v14666_v17, 7  ;;  %v18874_v47 = vrot.slane %v14666_v17, 1 }
 0x225   :  { %18866 = vst [vmem:[#allocation8_spill] sm:$0xff] %v14785_v31  ;;  %10144 = vmatpush3.bf16.msra.mxu1 %v11650_v52  ;;  %v14792_v38 = vpack.c.bf16 %v14785_v31, %v14727_v0  ;;  %v14801_v30 = vsel %vm585_vm0, %v18869_v34, %v18868_v7  ;;  %v18870_v52 = vld [vmem:[#allocation31_spill] sm:$0xff]  ;;  %v14814_v57 = vsel %vm585_vm0, %v18871_v50, %v4103_v18  ;;  %v3977_v34 = vrot.slane %v3624_v35, 1 }
 0x226   :  { %v3504_v10 = vadd.f32 %v14706_v59, %v18870_v52  ;;  %v14805_v45 = vpop.f32.mrf.mxu0  ;;  %10145 = vmatprep.subr.bf16.mxu1 %v11651_v12  ;;  %v14821_v7 = vpack.c.bf16 %v14801_v30, %v14616_v19  ;;  %v11653_v59 = vld [vmem:[%s18337_s3 + $0x158] sm:$0xff]   ;;  %10205 = vmatprep.subr.bf16.mxu0 %v11657_v55  ;;  %v11661_v12 = vld [vmem:[%s18337_s3 + $0x1e8] sm:$0xff]   ;;  %v4041_v52 = vrot.slane %v3624_v35, 7  ;;  %v4105_v18 = vrot.slane %v3624_v35, 5 }
 0x227   :  { %18867 = vst [vmem:[#allocation18_spill] sm:$0xff] %v14792_v38  ;;  %5656 = vmatprep.mubr.bf16.mxu0 %v14792_v38  ;;  %v14835_v50 = vsel %vm585_vm0, %v18874_v47, %v18873_v22  ;;  %vm3561_vm3 = vcmp.gt.f32.partialorder %v3502_v28, 0.0  ;;  %v3593_v41 = vmul.f32 0.01, %v3502_v28  ;;  %v18875_v55 = vrot.slane %v14750_v32, 7  ;;  %v11662_v38 = vld [vmem:[%s18337_s3 + $0x1a8] sm:$0xff]  }
 0x228   :  { %18872 = vst [vmem:[#allocation12_spill] sm:$0xff] %v14821_v7  ;;  %5560 = vmatmul.mubr.bf16.gmra.mxu1 %v14821_v7  ;;  %v4289_v35 = vrot.slane %v14801_v30, 1  ;;  %10206 = vmatpush3.bf16.msra.mxu0 %v11659_v43  ;;  %v3594_v0 = vmul.f32 0.01, %v3504_v10  ;;  %v3506_v47 = vadd.f32 %v14716_v51, %v14544_v37  ;;  %v3510_v7 = vadd.f32 %v14735_v14, %v14548_v24  ;;  %v11654_v43 = vld [vmem:[%s18337_s3 + $0x118] sm:$0xff]   ;;  %v11658_v24 = vld [vmem:[%s18337_s3 + $0x150] sm:$0xff]  }
 0x229   :  { %v14841_v31 = vsel %vm585_vm0, %v3974_v3, %v18875_v55  ;;  %v14855_v3 = vpop.f32.mrf.mxu0  ;;  %10146 = vmatpush3.bf16.msra.mxu1 %v11652_v8  ;;  %v11663_v55 = vld [vmem:[%s18337_s3 + $0x1e0] sm:$0xff]   ;;  %vm3562_vm4 = vcmp.gt.f32.partialorder %v3504_v10, 0.0  ;;  %10207 = vmatprep.subr.bf16.mxu0 %v11661_v12  ;;  %v14872_v8 = vsel %vm585_vm0, %v4041_v52, %v4105_v18  ;;  %v18877_v19 = vrot.slane %v14657_v25, 1 }
 0x22a   :  { %v14849_v22 = vpack.c.bf16 %v14841_v31, %v14835_v50  ;;  %10147 = vmatprep.subr.bf16.mxu1 %v11653_v59  ;;  %v14881_v59 = vsel %vm585_vm0, %v3977_v34, %v4041_v52  ;;  %v14884_v37 = vsel %vm3561_vm3, %v3502_v28, %v3593_v41  ;;  %vm3564_vm5 = vcmp.gt.f32.partialorder %v3510_v7, 0.0  ;;  %v11665_v18 = vld [vmem:[%s18337_s3 + $0x1a0] sm:$0xff]  }
 0x22b   :  { %v14878_v58 = vsel %vm706_vm1, %v4289_v35, %v18877_v19  ;;  %18879 = vst [vmem:[#allocation34_spill] sm:$0xff] %v14881_v59  ;;  %v14893_v51 = vsel %vm3562_vm4, %v3504_v10, %v3594_v0  ;;  %v3595_v19 = vmul.f32 0.01, %v3506_v47  ;;  %v3596_v35 = vmul.f32 0.01, %v3510_v7  ;;  %v14902_v28 = vpop.f32.mrf.mxu0  ;;  %v11667_v0 = vld [vmem:[%s18337_s3 + $0x1d8] sm:$0xff]  }
 0x22c   :  { %18876 = vst [vmem:[#allocation20_spill] sm:$0xff] %v14849_v22  ;;  %5567 = vmatprep.mubr.bf16.mxu1 %v14849_v22  ;;  %18878 = vst [vmem:[#allocation32_spill] sm:$0xff] %v14878_v58  ;;  %v14888_v12 = vpack.c.bf16 %v14878_v58, %v14640_v2  ;;  %10208 = vmatpush3.bf16.msra.mxu0 %v11662_v38  ;;  %v18882_v34 = vrot.slane %v14666_v17, 5  ;;  %v18883_v52 = vrot.slane %v14666_v17, 7  ;;  %v11660_v38 = vld [vmem:[%s18337_s3 + $0x110] sm:$0xff]   ;;  %vm3563_vm6 = vcmp.gt.f32.partialorder %v3506_v47, 0.0 }
 0x22d   :  { %18881 = vst [vmem:[#allocation35_spill] sm:$0xff] %v14893_v51  ;;  %10148 = vmatpush3.bf16.msra.mxu1 %v11654_v43  ;;  %10209 = vmatprep.subr.bf16.mxu0 %v11663_v55  ;;  %v18884_v17 = vrot.slane %v14750_v32, 5  ;;  %v18885_v43 = vrot.slane %v14750_v32, 7  ;;  %v11664_v55 = vld [vmem:[%s18337_s3 + $0x148] sm:$0xff]   ;;  %v14926_v14 = vsel %vm3564_vm5, %v3510_v7, %v3596_v35  ;;  %v14936_v58 = vsel %vm3563_vm6, %v3506_v47, %v3595_v19  ;;  %v14942_v10 = vpop.f32.mrf.mxu0  ;;  %v11669_v47 = vld [vmem:[%s18337_s3 + $0x1d0] sm:$0xff]  }
 0x22e   :  { %18880 = vst [vmem:[#allocation33_spill] sm:$0xff] %v14888_v12  ;;  %v14900_v41 = vsel %vm585_vm0, %v18883_v52, %v18882_v34  ;;  %5657 = vmatmul.mubr.bf16.gmra.mxu0 %v14888_v12  ;;  %10149 = vmatprep.subr.bf16.mxu1 %v11658_v24  ;;  %v3978_v52 = vrot.slane %v14884_v37, 1  ;;  %v4298_v12 = vrot.slane %v14835_v50, 1  ;;  %18887 = vst [vmem:[#allocation38_spill] sm:$0xff] %v14936_v58  ;;  %v4304_v7 = vrot.slane %v14841_v31, 1 }
 0x22f   :  { %v14918_v34 = vsel %vm585_vm0, %v18885_v43, %v18884_v17  ;;  %v4107_v17 = vrot.slane %v14893_v51, 5  ;;  %v4299_v24 = vrot.slane %v14900_v41, 1  ;;  %v11668_v43 = vld [vmem:[%s18337_s3 + $0x198] sm:$0xff]   ;;  %v3512_v22 = vadd.f32 %v14767_v21, %v14552_v61 }
 0x230   :  { %18886 = vst [vmem:[#allocation21_spill] sm:$0xff] %v14918_v34  ;;  %10210 = vmatpush3.bf16.msra.mxu0 %v11665_v18  ;;  %v4305_v35 = vrot.slane %v14918_v34, 1  ;;  %v11666_v18 = vld [vmem:[%s18337_s3 + $0x108] sm:$0xff]   ;;  %v18888_v32 = vrot.slane %v14651_v9, 7  ;;  %v18889_v2 = vrot.slane %v14651_v9, 1  ;;  %v18891_v21 = vrot.slane %v14677_v16, 7 }
 0x231   :  { %10150 = vmatpush3.bf16.msra.mxu1 %v11660_v38  ;;  %10211 = vmatprep.subr.bf16.mxu0 %v11667_v0  ;;  %v18892_v38 = vrot.slane %v14677_v16, 1  ;;  %v3514_v0 = vadd.f32 %v14805_v45, %v14557_v54  ;;  %v4111_v19 = vrot.slane %v14926_v14, 5  ;;  %v14969_v25 = vsel %vm706_vm1, %v4298_v12, %v4299_v24  ;;  %v11671_v45 = vld [vmem:[%s18337_s3 + $0x190] sm:$0xff]  }
 0x232   :  { %v14956_v61 = vsel %vm585_vm0, %v18889_v2, %v18888_v32  ;;  %10151 = vmatprep.subr.bf16.mxu1 %v11664_v55  ;;  %18894 = vst [vmem:[#allocation48_spill] sm:$0xff] %v14969_v25  ;;  %v14972_v9 = vsel %vm706_vm1, %v4304_v7, %v4305_v35  ;;  %vm3565_vm7 = vcmp.gt.f32.partialorder %v3512_v22, 0.0  ;;  %v11670_v2 = vld [vmem:[%s18337_s3 + $0x140] sm:$0xff]   ;;  %v3597_v32 = vmul.f32 0.01, %v3512_v22 }
 0x233   :  { %18890 = vst [vmem:[#allocation39_spill] sm:$0xff] %v14956_v61  ;;  %v14963_v34 = vsel %vm585_vm0, %v18892_v38, %v18891_v21  ;;  %18895 = vst [vmem:[#allocation52_spill] sm:$0xff] %v14972_v9  ;;  %v14979_v16 = vpack.c.bf16 %v14972_v9, %v14969_v25  ;;  %vm3566_vm8 = vcmp.gt.f32.partialorder %v3514_v0, 0.0  ;;  %v3598_v12 = vmul.f32 0.01, %v3514_v0  ;;  %v11672_v9 = vld [vmem:[%s18337_s3 + $0x100] sm:$0xff]  }
 0x234   :  { %18893 = vst [vmem:[#allocation24_spill] sm:$0xff] %v14963_v34  ;;  %v14983_v54 = vpack.c.bf16 %v14963_v34, %v14956_v61  ;;  %10212 = vmatpush3.bf16.msra.mxu0 %v11668_v43  ;;  %v18898_v55 = vrot.slane %v14817_v4, 7  ;;  %v18899_v24 = vrot.slane %v14817_v4, 1  ;;  %v18900_v35 = vrot.slane %v14884_v37, 7  ;;  %v15001_v43 = vpop.f32.mrf.mxu0 }
 0x235   :  { %18896 = vst [vmem:[#allocation59_spill] sm:$0xff] %v14979_v16  ;;  %v4295_v38 = vrot.slane %v14956_v61, 1  ;;  %10152 = vmatpush3.bf16.msra.mxu1 %v11666_v18  ;;  %10213 = vmatprep.subr.bf16.mxu0 %v11669_v47  ;;  %v4301_v18 = vrot.slane %v14963_v34, 1  ;;  %v3516_v47 = vadd.f32 %v14855_v3, %v14560_v13  ;;  %v18903_v25 = vrot.slane %v14893_v51, 7 }
 0x236   :  { %18897 = vst [vmem:[#allocation61_spill] sm:$0xff] %v14983_v54  ;;  %v14993_v7 = vsel %vm585_vm0, %v18899_v24, %v18898_v55  ;;  %v14998_v21 = vsel %vm585_vm0, %v3978_v52, %v18900_v35  ;;  %v11673_v55 = vld [vmem:[%s18337_s3 + $0x1c8] sm:$0xff]   ;;  %5664 = vmatprep.mubr.bf16.mxu0 %v14979_v16  ;;  %5568 = vmatmul.mubr.bf16.gmra.mxu1 %v14983_v54  ;;  %v11677_v35 = vld [vmem:[%s18337_s3 + $0x278] sm:$0xff]   ;;  %v18905_v16 = vrot.slane %v14926_v14, 7  ;;  %v18909_v54 = vrot.slane %v14741_v15, 1 }
 0x237   :  { %18901 = vst [vmem:[#allocation60_spill] sm:$0xff] %v14998_v21  ;;  %v15014_v52 = vpack.c.bf16 %v14998_v21, %v14993_v7  ;;  %v15025_v24 = vsel %vm585_vm0, %v18903_v25, %v4107_v17  ;;  %v3630_v34 = vsel %vm3566_vm8, %v3514_v0, %v3598_v12  ;;  %10153 = vmatprep.subr.bf16.mxu1 %v11670_v2  ;;  %v18907_v25 = vrot.slane %v14697_v33, 1  ;;  %v3525_v2 = vpop.f32.mrf.mxu0 }
 0x238   :  { %18904 = vst [vmem:[#allocation63_spill] sm:$0xff] %v15025_v24  ;;  %v15031_v61 = vsel %vm585_vm0, %v18905_v16, %v4111_v19  ;;  %v15035_v13 = vsel %vm3565_vm7, %v3512_v22, %v3597_v32  ;;  %v4045_v3 = vrot.slane %v3630_v34, 7  ;;  %v4109_v62 = vrot.slane %v3630_v34, 5  ;;  %10214 = vmatpush3.bf16.msra.mxu0 %v11671_v45  ;;  %v11674_v16 = vld [vmem:[%s18337_s3 + $0x188] sm:$0xff]  }
 0x239   :  { %18902 = vst [vmem:[#allocation62_spill] sm:$0xff] %v15014_v52  ;;  %18906 = vst [vmem:[#allocation68_spill] sm:$0xff] %v15031_v61  ;;  %5575 = vmatprep.mubr.bf16.mxu1 %v15014_v52  ;;  %v15041_v17 = vsel %vm706_vm1, %v4295_v38, %v18907_v25  ;;  %v15046_v19 = vsel %vm706_vm1, %v4301_v18, %v18909_v54  ;;  %vm3567_vm9 = vcmp.gt.f32.partialorder %v3516_v47, 0.0  ;;  %v3599_v0 = vmul.f32 0.01, %v3516_v47  ;;  %v3529_v18 = vpop.f32.mrf.mxu0 }
 0x23a   :  { %18908 = vst [vmem:[#allocation69_spill] sm:$0xff] %v15041_v17  ;;  %18910 = vst [vmem:[#allocation70_spill] sm:$0xff] %v15046_v19  ;;  %v3520_v22 = vadd.f32 %v14902_v28, %v14564_v26  ;;  %10154 = vmatpush3.bf16.msra.mxu1 %v11672_v9  ;;  %10215 = vmatprep.subr.bf16.mxu0 %v11673_v55  ;;  %v15057_v54 = vpack.c.bf16 %v15046_v19, %v15041_v17  ;;  %v18912_v12 = vrot.slane %v14817_v4, 5  ;;  %v11675_v28 = vld [vmem:[%s18337_s3 + $0x1c0] sm:$0xff]  }
 0x23b   :  { %v18913_v38 = vrot.slane %v14817_v4, 7  ;;  %10267 = vmatprep.subr.bf16.mxu1 %v11677_v35  ;;  %v3984_v55 = vrot.slane %v15035_v13, 1  ;;  %v3981_v25 = vrot.slane %v3630_v34, 1  ;;  %v15073_v32 = vsel %vm585_vm0, %v4045_v3, %v4109_v62 }
 0x23c   :  { %18911 = vst [vmem:[#allocation73_spill] sm:$0xff] %v15057_v54  ;;  %vm3568_vm10 = vcmp.gt.f32.partialorder %v3520_v22, 0.0  ;;  %18914 = vst [vmem:[#allocation74_spill] sm:$0xff] %v15073_v32  ;;  %5665 = vmatmul.mubr.bf16.gmra.mxu0 %v15057_v54  ;;  %v15077_v4 = vsel %vm3567_vm9, %v3516_v47, %v3599_v0  ;;  %v18916_v35 = vrot.slane %v14884_v37, 7  ;;  %v4310_v45 = vrot.slane %v14993_v7, 1  ;;  %v11676_v47 = vld [vmem:[%s18337_s3 + $0x180] sm:$0xff]  }
 0x23d   :  { %v15064_v26 = vsel %vm585_vm0, %v18913_v38, %v18912_v12  ;;  %v3600_v12 = vmul.f32 0.01, %v3520_v22  ;;  %v18915_v38 = vrot.slane %v14884_v37, 5  ;;  %v4316_v62 = vrot.slane %v14998_v21, 1  ;;  %10216 = vmatpush3.bf16.msra.mxu0 %v11674_v16  ;;  %v11687_v16 = vld [vmem:[%s18337_s3 + $0x2f8] sm:$0xff]  }
 0x23e   :  { %v4311_v34 = vrot.slane %v15064_v26, 1  ;;  %v3522_v37 = vadd.f32 %v14942_v10, %v14568_v63  ;;  %10217 = vmatprep.subr.bf16.mxu0 %v11675_v28  ;;  %v15131_v17 = vsel %vm585_vm0, %v3981_v25, %v4045_v3  ;;  %v4313_v24 = vrot.slane %v14881_v59, 1 }
 0x23f   :  { %v15084_v9 = vsel %vm585_vm0, %v18916_v35, %v18915_v38  ;;  %v15092_v0 = vsel %vm3568_vm10, %v3520_v22, %v3600_v12  ;;  %v18917_v38 = vrot.slane %v14744_v60, 7  ;;  %v18918_v35 = vrot.slane %v14744_v60, 1 }
 0x240   :  { %v4317_v54 = vrot.slane %v15084_v9, 1  ;;  %v3982_v22 = vrot.slane %v15077_v4, 1  ;;  %v4113_v19 = vrot.slane %v15092_v0, 5  ;;  %v15111_v63 = vsel %vm706_vm1, %v4310_v45, %v4311_v34  ;;  %v3531_v34 = vpop.f32.mrf.mxu0 }
 0x241   :  { %v15102_v52 = vsel %vm585_vm0, %v18918_v35, %v18917_v38  ;;  %18919 = vst [vmem:[#allocation78_spill] sm:$0xff] %v15111_v63  ;;  %vm3569_vm11 = vcmp.gt.f32.partialorder %v3522_v37, 0.0  ;;  %v3601_v60 = vmul.f32 0.01, %v3522_v37  ;;  %v4046_v38 = vrot.slane %v15077_v4, 7  ;;  %10218 = vmatpush3.bf16.msra.mxu0 %v11676_v47 }
 0x242   :  { %v15114_v10 = vsel %vm706_vm1, %v4316_v62, %v4317_v54  ;;  %v15118_v28 = vpack.c.bf16 %v14881_v59, %v15102_v52  ;;  %v3524_v12 = vadd.f32 %v15001_v43, %v14572_v39  ;;  %v4307_v45 = vrot.slane %v15102_v52, 1  ;;  %10331 = vmatprep.subr.bf16.mxu0 %v11687_v16 }
 0x243   :  { %18920 = vst [vmem:[#allocation79_spill] sm:$0xff] %v15114_v10  ;;  %v15123_v35 = vpack.c.bf16 %v15114_v10, %v15111_v63  ;;  %v4112_v62 = vrot.slane %v15035_v13, 5  ;;  %v18923_v39 = vrot.slane %v15092_v0, 7  ;;  %v15143_v47 = vsel %vm3569_vm11, %v3522_v37, %v3601_v60 }
 0x244   :  { %18921 = vst [vmem:[#allocation14_spill] sm:$0xff] %v15118_v28  ;;  %5576 = vmatmul.mubr.bf16.gmra.mxu1 %v15118_v28  ;;  %vm3570_vm12 = vcmp.gt.f32.partialorder %v3524_v12, 0.0  ;;  %v3602_v3 = vmul.f32 0.01, %v3524_v12  ;;  %v18924_v25 = vrot.slane %v14814_v57, 1  ;;  %v18926_v16 = vrot.slane %v14872_v8, 1 }
 0x245   :  { %18922 = vst [vmem:[#allocation16_spill] sm:$0xff] %v15123_v35  ;;  %v15139_v43 = vsel %vm585_vm0, %v18923_v39, %v4113_v19  ;;  %5672 = vmatprep.mubr.bf16.mxu0 %v15123_v35  ;;  %v3526_v19 = vadd.f32 %v3525_v2, %v14575_v20  ;;  %v3530_v37 = vadd.f32 %v3529_v18, %v14579_v49  ;;  %v18930_v28 = vrot.slane %v15035_v13, 7 }
 0x246   :  { %v15148_v54 = vsel %vm706_vm1, %v4307_v45, %v18924_v25  ;;  %v15153_v10 = vsel %vm706_vm1, %v4313_v24, %v18926_v16  ;;  %v15162_v60 = vsel %vm585_vm0, %v3982_v22, %v4046_v38  ;;  %v3533_v25 = vpop.f32.mrf.mxu0  ;;  %v15169_v35 = vsel %vm3570_vm12, %v3524_v12, %v3602_v3 }
 0x247   :  { %18925 = vst [vmem:[#allocation19_spill] sm:$0xff] %v15148_v54  ;;  %18927 = vst [vmem:[#allocation25_spill] sm:$0xff] %v15153_v10  ;;  %v15158_v39 = vpack.c.bf16 %v15153_v10, %v15148_v54  ;;  %v15167_v45 = vsel %vm585_vm0, %v3984_v55, %v18930_v28  ;;  %vm3571_vm13 = vcmp.gt.f32.partialorder %v3526_v19, 0.0  ;;  %v3603_v24 = vmul.f32 0.01, %v3526_v19 }
 0x248   :  { %18929 = vst [vmem:[#allocation46_spill] sm:$0xff] %v15162_v60  ;;  %18931 = vst [vmem:[#allocation27_spill] sm:$0xff] %v15167_v45  ;;  %v4596_v20 = vpack.c.bf16 %v15167_v45, %v15162_v60  ;;  %v4115_v18 = vrot.slane %v15169_v35, 5  ;;  %vm3572_vm14 = vcmp.gt.f32.partialorder %v3530_v37, 0.0  ;;  %v4110_v55 = vrot.slane %v15077_v4, 5  ;;  %v3535_v10 = vpop.f32.mrf.mxu0 }
 0x249   :  { %18928 = vst [vmem:[#allocation47_spill] sm:$0xff] %v15158_v39  ;;  %5673 = vmatmul.mubr.bf16.gmra.mxu0 %v15158_v39  ;;  %v3604_v28 = vmul.f32 0.01, %v3530_v37  ;;  %v3986_v16 = vrot.slane %v15143_v47, 1  ;;  %v4050_v2 = vrot.slane %v15143_v47, 7  ;;  %v15184_v49 = vsel %vm3571_vm13, %v3526_v19, %v3603_v24 }
 0x24a   :  { %5583 = vmatprep.mubr.bf16.mxu1 %v4596_v20  ;;  %v4114_v39 = vrot.slane %v15143_v47, 5  ;;  %v3532_v12 = vadd.f32 %v3531_v34, %v14583_v36  ;;  %v18932_v20 = vrot.slane %v15169_v35, 7  ;;  %v18933_v19 = vrot.slane %v14926_v14, 7 }
 0x24b   :  { %v15188_v54 = vsel %vm3572_vm14, %v3530_v37, %v3604_v28  ;;  %v18934_v24 = vrot.slane %v14926_v14, 1  ;;  %v3534_v34 = vadd.f32 %v3533_v25, %v14587_v27  ;;  %v4322_v14 = vrot.slane %v15162_v60, 1 }
 0x24c   :  { %v15194_v3 = vsel %vm585_vm0, %v18932_v20, %v4115_v18  ;;  %v4117_v63 = vrot.slane %v15188_v54, 5  ;;  %v15210_v18 = vsel %vm585_vm0, %v4046_v38, %v4110_v55  ;;  %v18936_v20 = vrot.slane %v15035_v13, 7 }
 0x24d   :  { %v15203_v47 = vsel %vm585_vm0, %v18934_v24, %v18933_v19  ;;  %v4323_v19 = vrot.slane %v15210_v18, 1  ;;  %v3539_v24 = vpop.f32.mrf.mxu0  ;;  %vm3573_vm15 = vcmp.gt.f32.partialorder %v3532_v12, 0.0  ;;  %v3605_v27 = vmul.f32 0.01, %v3532_v12 }
 0x24e   :  { %18935 = vst [vmem:[#allocation28_spill] sm:$0xff] %v15203_v47  ;;  %v4595_v36 = vpack.c.bf16 %v15203_v47, %v15131_v17  ;;  %v15216_v4 = vsel %vm585_vm0, %v18936_v20, %v4112_v62  ;;  %v18937_v38 = vrot.slane %v15188_v54, 7  ;;  %vm3574_vm3 = vcmp.gt.f32.partialorder %v3534_v34, 0.0 }
 0x24f   :  { %v3606_v13 = vmul.f32 0.01, %v3534_v34  ;;  %v15228_v62 = vsel %vm706_vm1, %v4322_v14, %v4323_v19  ;;  %v4328_v55 = vrot.slane %v15167_v45, 1  ;;  %v4329_v20 = vrot.slane %v15216_v4, 1  ;;  %v3541_v19 = vpop.f32.mrf.mxu0 }
 0x250   :  { %5584 = vmatmul.mubr.bf16.gmra.mxu1 %v4595_v36  ;;  %v15225_v25 = vsel %vm585_vm0, %v18937_v38, %v4117_v63  ;;  %18938 = vst [vmem:[#allocation42_spill] sm:$0xff] %v15228_v62  ;;  %v15233_v37 = vsel %vm585_vm0, %v3986_v16, %v4050_v2  ;;  %v4319_v22 = vrot.slane %v15131_v17, 1  ;;  %v4325_v38 = vrot.slane %v15203_v47, 1 }
 0x251   :  { %18939 = vst [vmem:[#allocation44_spill] sm:$0xff] %v15233_v37  ;;  %v15236_v36 = vsel %vm3574_vm3, %v3534_v34, %v3606_v13  ;;  %v15240_v63 = vpack.c.bf16 %v15233_v37, %v15162_v60  ;;  %v3536_v14 = vadd.f32 %v3535_v10, %v14590_v23  ;;  %v15248_v58 = vsel %vm706_vm1, %v4328_v55, %v4329_v20 }
 0x252   :  { %18941 = vst [vmem:[#allocation57_spill] sm:$0xff] %v15248_v58  ;;  %v4119_v34 = vrot.slane %v15236_v36, 5  ;;  %v4598_v13 = vpack.c.bf16 %v15248_v58, %v15228_v62  ;;  %v18942_v47 = vrot.slane %v15073_v32, 1  ;;  %v18944_v10 = vrot.slane %v15031_v61, 1 }
 0x253   :  { %18940 = vst [vmem:[#allocation49_spill] sm:$0xff] %v15240_v63  ;;  %5591 = vmatprep.mubr.bf16.mxu1 %v15240_v63  ;;  %v3637_v20 = vsel %vm3573_vm15, %v3532_v12, %v3605_v27  ;;  %v3540_v16 = vadd.f32 %v3539_v24, %v14593_v11  ;;  %v3607_v58 = vmul.f32 0.01, %v3536_v14  ;;  %vm3575_vm4 = vcmp.gt.f32.partialorder %v3536_v14, 0.0 }
 0x254   :  { %v15257_v23 = vsel %vm706_vm1, %v4319_v22, %v18942_v47  ;;  %v15262_v28 = vsel %vm706_vm1, %v4325_v38, %v18944_v10  ;;  %5680 = vmatprep.mubr.bf16.mxu0 %v4598_v13  ;;  %v15271_v22 = vsel %vm585_vm0, %v4050_v2, %v4114_v39  ;;  %v4334_v47 = vrot.slane %v15233_v37, 1  ;;  %v3543_v38 = vpop.f32.mrf.mxu0 }
 0x255   :  { %18943 = vst [vmem:[#allocation23_spill] sm:$0xff] %v15257_v23  ;;  %18945 = vst [vmem:[#allocation30_spill] sm:$0xff] %v15262_v28  ;;  %v4597_v51 = vpack.c.bf16 %v15262_v28, %v15257_v23  ;;  %vm3576_vm5 = vcmp.gt.f32.partialorder %v3540_v16, 0.0  ;;  %v3608_v10 = vmul.f32 0.01, %v3540_v16  ;;  %v4335_v12 = vrot.slane %v15271_v22, 1 }
 0x256   :  { %18946 = vst [vmem:[#allocation43_spill] sm:$0xff] %v15271_v22  ;;  %v3990_v27 = vrot.slane %v3637_v20, 1  ;;  %v4054_v55 = vrot.slane %v3637_v20, 7  ;;  %v18947_v11 = vrot.slane %v15236_v36, 7  ;;  %v3542_v13 = vadd.f32 %v3541_v19, %v14601_v53 }
 0x257   :  { %5681 = vmatmul.mubr.bf16.gmra.mxu0 %v4597_v51  ;;  %v3640_v39 = vsel %vm3576_vm5, %v3540_v16, %v3608_v10  ;;  %v15282_v2 = vsel %vm706_vm1, %v4334_v47, %v4335_v12  ;;  %v18949_v51 = vrot.slane %v15092_v0, 7  ;;  %v18950_v63 = vrot.slane %v15092_v0, 1 }
 0x258   :  { %v15278_v24 = vsel %vm585_vm0, %v18947_v11, %v4119_v34  ;;  %18948 = vst [vmem:[#allocation45_spill] sm:$0xff] %v15282_v2  ;;  %v3544_v61 = vadd.f32 %v3543_v38, %v14604_v44  ;;  %v4118_v32 = vrot.slane %v3637_v20, 5  ;;  %v3639_v22 = vsel %vm3575_vm4, %v3536_v14, %v3607_v58 }
 0x259   :  { %v15289_v28 = vsel %vm585_vm0, %v18950_v63, %v18949_v51  ;;  %v4057_v37 = vrot.slane %v3640_v39, 7  ;;  %v15294_v34 = vpack.c.bf16 %v15282_v2, %v15228_v62  ;;  %v4121_v53 = vrot.slane %v3640_v39, 5 }
 0x25a   :  { %18951 = vst [vmem:[#allocation50_spill] sm:$0xff] %v15289_v28  ;;  %vm3577_vm6 = vcmp.gt.f32.partialorder %v3542_v13, 0.0  ;;  %v3609_v19 = vmul.f32 0.01, %v3542_v13  ;;  %v15298_v16 = vpack.c.bf16 %v15289_v28, %v15131_v17  ;;  %v3610_v58 = vmul.f32 0.01, %v3544_v61 }
 0x25b   :  { %18952 = vst [vmem:[#allocation53_spill] sm:$0xff] %v15294_v34  ;;  %5688 = vmatprep.mubr.bf16.mxu0 %v15294_v34  ;;  %v3993_v14 = vrot.slane %v3640_v39, 1  ;;  %vm3578_vm7 = vcmp.gt.f32.partialorder %v3544_v61, 0.0  ;;  %v15306_v47 = vsel %vm585_vm0, %v3990_v27, %v4054_v55  ;;  %v3992_v38 = vrot.slane %v3639_v22, 1  ;;  %v3545_v27 = vpop.f32.mrf.mxu0 }
 0x25c   :  { %18953 = vst [vmem:[#allocation51_spill] sm:$0xff] %v15298_v16  ;;  %v3641_v20 = vsel %vm3577_vm6, %v3542_v13, %v3609_v19  ;;  %5592 = vmatmul.mubr.bf16.gmra.mxu1 %v15298_v16  ;;  %18954 = vst [vmem:[#allocation54_spill] sm:$0xff] %v15306_v47  ;;  %v4056_v10 = vrot.slane %v3639_v22, 7  ;;  %v4120_v12 = vrot.slane %v3639_v22, 5  ;;  %v18955_v11 = vrot.slane %v15184_v49, 7 }
 0x25d   :  { %v18956_v51 = vrot.slane %v15184_v49, 1  ;;  %v15316_v63 = vsel %vm585_vm0, %v4057_v37, %v4121_v53  ;;  %v3994_v13 = vrot.slane %v3641_v20, 1  ;;  %v4058_v39 = vrot.slane %v3641_v20, 7 }
 0x25e   :  { %18957 = vst [vmem:[#allocation56_spill] sm:$0xff] %v15316_v63  ;;  %v15322_v0 = vsel %vm3578_vm7, %v3544_v61, %v3610_v58  ;;  %v4331_v22 = vrot.slane %v15289_v28, 1  ;;  %v18959_v16 = vrot.slane %v15184_v49, 5  ;;  %v18960_v34 = vmov %v18955_v11 }
 0x25f   :  { %v15313_v44 = vsel %vm585_vm0, %v18956_v51, %v18955_v11  ;;  %v15333_v53 = vsel %vm585_vm0, %v4054_v55, %v4118_v32  ;;  %v15336_v51 = vsel %vm585_vm0, %v3993_v14, %v4057_v37  ;;  %v4346_v2 = vrot.slane %v15306_v47, 1 }
 0x260   :  { %v15320_v19 = vpack.c.bf16 %v15306_v47, %v15313_v44  ;;  %v15330_v11 = vsel %vm585_vm0, %v18960_v34, %v18959_v16  ;;  %v4340_v61 = vrot.slane %v15313_v44, 1  ;;  %v4356_v62 = vrot.slane %v15316_v63, 1 }
 0x261   :  { %v4341_v58 = vrot.slane %v15330_v11, 1  ;;  %v18961_v34 = vrot.slane %v15139_v43, 1  ;;  %v3546_v37 = vadd.f32 %v3545_v27, %v14606_v29  ;;  %v4122_v55 = vrot.slane %v3641_v20, 5 }
 0x262   :  { %18958 = vst [vmem:[#allocation3_spill] sm:$0xff] %v15320_v19  ;;  %5599 = vmatprep.mubr.bf16.mxu1 %v15320_v19  ;;  %v4347_v19 = vrot.slane %v15333_v53, 1  ;;  %v18964_v47 = vrot.slane %v15169_v35, 7  ;;  %v18965_v49 = vrot.slane %v15169_v35, 1  ;;  %v18967_v29 = vrot.slane %v15188_v54, 1 }
 0x263   :  { %v15347_v32 = vsel %vm706_vm1, %v4331_v22, %v18961_v34  ;;  %v18966_v22 = vrot.slane %v15188_v54, 7  ;;  %v15371_v27 = vsel %vm585_vm0, %v3992_v38, %v4056_v10  ;;  %v15374_v34 = vsel %vm585_vm0, %v3994_v13, %v4058_v39 }
 0x264   :  { %18962 = vst [vmem:[#allocation4_spill] sm:$0xff] %v15347_v32  ;;  %v15353_v14 = vpack.c.bf16 %v15347_v32, %v15257_v23  ;;  %v15361_v63 = vsel %vm585_vm0, %v18965_v49, %v18964_v47  ;;  %18969 = vst [vmem:[#allocation5_spill] sm:$0xff] %v15371_v27  ;;  %v15378_v35 = vsel %vm706_vm1, %v4340_v61, %v4341_v58  ;;  %vm3579_vm8 = vcmp.gt.f32.partialorder %v3546_v37, 0.0  ;;  %v11679_v23 = vld [vmem:[%s18337_s3 + $0x270] sm:$0xff]  }
 0x265   :  { %v15368_v20 = vsel %vm585_vm0, %v18967_v29, %v18966_v22  ;;  %18970 = vst [vmem:[#allocation6_spill] sm:$0xff] %v15378_v35  ;;  %v15381_v47 = vsel %vm706_vm1, %v4346_v2, %v4347_v19  ;;  %v15389_v49 = vpack.c.bf16 %v15374_v34, %v15371_v27  ;;  %v3611_v13 = vmul.f32 0.01, %v3546_v37 }
 0x266   :  { %18963 = vst [vmem:[#allocation9_spill] sm:$0xff] %v15353_v14  ;;  %18968 = vst [vmem:[#allocation15_spill] sm:$0xff] %v15368_v20  ;;  %5689 = vmatmul.mubr.bf16.gmra.mxu0 %v15353_v14  ;;  %v15385_v54 = vpack.c.bf16 %v15368_v20, %v15361_v63  ;;  %v15394_v22 = vpack.c.bf16 %v15381_v47, %v15378_v35  ;;  %v4337_v2 = vrot.slane %v15361_v63, 1  ;;  %v4343_v19 = vrot.slane %v15368_v20, 1 }
 0x267   :  { %18971 = vst [vmem:[#allocation75_spill] sm:$0xff] %v15381_v47  ;;  %18973 = vst [vmem:[#allocation10_spill] sm:$0xff] %v15389_v49  ;;  %v15400_v61 = vsel %vm585_vm0, %v4056_v10, %v4120_v12  ;;  %v15403_v58 = vsel %vm585_vm0, %v4058_v39, %v4122_v55  ;;  %v4352_v29 = vrot.slane %v15371_v27, 1  ;;  %v4358_v38 = vrot.slane %v15374_v34, 1 }
 0x268   :  { %18972 = vst [vmem:[#allocation76_spill] sm:$0xff] %v15385_v54  ;;  %18974 = vst [vmem:[#allocation22_spill] sm:$0xff] %v15394_v22  ;;  %5600 = vmatmul.mubr.bf16.gmra.mxu1 %v15385_v54  ;;  %5696 = vmatprep.mubr.bf16.mxu0 %v15394_v22  ;;  %v4353_v16 = vrot.slane %v15400_v61, 1  ;;  %v4359_v54 = vrot.slane %v15403_v58, 1  ;;  %v18975_v14 = vrot.slane %v15194_v3, 1  ;;  %v18977_v12 = vrot.slane %v15225_v25, 1 }
 0x269   :  { %5607 = vmatprep.mubr.bf16.mxu1 %v15389_v49  ;;  %v18979_v55 = vrot.slane %v15236_v36, 7  ;;  %v18980_v49 = vrot.slane %v15236_v36, 1  ;;  %v4392_v47 = vrot.slane %v14644_v40, 2 }
 0x26a   :  { %v15414_v10 = vsel %vm706_vm1, %v4337_v2, %v18975_v14  ;;  %v15419_v39 = vsel %vm706_vm1, %v4343_v19, %v18977_v12  ;;  %v15434_v14 = vsel %vm706_vm1, %v4352_v29, %v4353_v16  ;;  %v15437_v2 = vsel %vm706_vm1, %v4358_v38, %v4359_v54 }
 0x26b   :  { %18976 = vst [vmem:[#allocation77_spill] sm:$0xff] %v15414_v10  ;;  %18978 = vst [vmem:[#allocation80_spill] sm:$0xff] %v15419_v39  ;;  %v15426_v22 = vsel %vm585_vm0, %v18980_v49, %v18979_v55  ;;  %v15431_v32 = vpack.c.bf16 %v15419_v39, %v15414_v10  ;;  %v15445_v36 = vpack.c.bf16 %v15437_v2, %v15434_v14  ;;  %v4393_v49 = vrot.slane %v14689_v6, 2 }
 0x26c   :  { %18981 = vst [vmem:[#allocation29_spill] sm:$0xff] %v15426_v22  ;;  %18983 = vst [vmem:[#allocation36_spill] sm:$0xff] %v15434_v14  ;;  %v15441_v19 = vpack.c.bf16 %v15336_v51, %v15426_v22  ;;  %v4398_v12 = vrot.slane %v14662_v42, 2  ;;  %v4399_v55 = vrot.slane %v14704_v46, 2  ;;  %v15451_v16 = vsel %vm3579_vm8, %v3546_v37, %v3611_v13 }
 0x26d   :  { %18982 = vst [vmem:[#allocation17_spill] sm:$0xff] %v15431_v32  ;;  %18984 = vst [vmem:[#allocation26_spill] sm:$0xff] %v15437_v2  ;;  %v4349_v54 = vrot.slane %v15426_v22, 1  ;;  %v4355_v38 = vrot.slane %v15336_v51, 1  ;;  %v4545_v29 = vpack.c.bf16 %v14637_v56, %v14647_v1  ;;  %v15459_v2 = vsel %vm819_vm2, %v4392_v47, %v4393_v49  ;;  %v18991_v49 = vld [vmem:[#allocation58_spill] sm:$0xff] }
 0x26e   :  { %18985 = vst [vmem:[#allocation37_spill] sm:$0xff] %v15441_v19  ;;  %18986 = vst [vmem:[#allocation13_spill] sm:$0xff] %v15445_v36  ;;  %5697 = vmatmul.mubr.bf16.gmra.mxu0 %v15431_v32  ;;  %v15462_v6 = vsel %vm819_vm2, %v4398_v12, %v4399_v55  ;;  %v4404_v46 = vrot.slane %v14721_v48, 2  ;;  %v4405_v37 = vrot.slane %v14764_v5, 2  ;;  %v18987_v14 = vrot.slane %v15278_v24, 1  ;;  %v18992_v12 = vld [vmem:[#allocation67_spill] sm:$0xff] }
 0x26f   :  { %5704 = vmatprep.mubr.bf16.mxu0 %v15445_v36  ;;  %v4546_v39 = vpack.c.bf16 %v15462_v6, %v15459_v2  ;;  %v15476_v47 = vsel %vm706_vm1, %v4355_v38, %v4356_v62  ;;  %v4401_v55 = vrot.slane %v14801_v30, 2  ;;  %v4411_v62 = vrot.slane %v14900_v41, 2  ;;  %v18993_v36 = vld [vmem:[#allocation72_spill] sm:$0xff]  ;;  %v18997_v41 = vld [vmem:[#allocation39_spill] sm:$0xff] }
 0x270   :  { %v15473_v32 = vsel %vm706_vm1, %v4349_v54, %v18987_v14  ;;  %18989 = vst [vmem:[#allocation55_spill] sm:$0xff] %v15476_v47  ;;  %5608 = vmatmul.mubr.bf16.gmra.mxu1 %v15441_v19  ;;  %v4548_v14 = vpack.c.bf16 %v14644_v40, %v14662_v42  ;;  %v4410_v54 = vrot.slane %v14835_v50, 2  ;;  %v4416_v38 = vrot.slane %v14841_v31, 2 }
 0x271   :  { %18988 = vst [vmem:[#allocation64_spill] sm:$0xff] %v15473_v32  ;;  %v15483_v5 = vpack.c.bf16 %v15476_v47, %v15473_v32  ;;  %5745 = vmatprep.mubr.bf16.mxu1 %v4546_v39  ;;  %v15492_v13 = vsel %vm819_vm2, %v4404_v46, %v4405_v37  ;;  %v4547_v19 = vpack.c.bf16 %v18992_v12, %v18991_v49  ;;  %v18994_v47 = vrot.slane %v18993_v36, 2  ;;  %v18995_v39 = vld [vmem:[#allocation21_spill] sm:$0xff]  ;;  %v18998_v37 = vld [vmem:[#allocation24_spill] sm:$0xff] }
 0x272   :  { %v4417_v10 = vrot.slane %v18995_v39, 2  ;;  %v15507_v42 = vsel %vm819_vm2, %v4410_v54, %v4411_v62  ;;  %v4407_v46 = vrot.slane %v18997_v41, 2  ;;  %v4413_v35 = vrot.slane %v18998_v37, 2 }
 0x273   :  { %18990 = vst [vmem:[#allocation66_spill] sm:$0xff] %v15483_v5  ;;  %v15499_v32 = vsel %vm819_vm2, %v4401_v55, %v18994_v47  ;;  %v4422_v36 = vrot.slane %v14993_v7, 2  ;;  %v4423_v47 = vrot.slane %v15064_v26, 2  ;;  %v4428_v12 = vrot.slane %v14998_v21, 2  ;;  %v11678_v55 = vld [vmem:[%s18337_s3 + $0x238] sm:$0xff]  }
 0x274   :  { %v15504_v40 = vpack.c.bf16 %v15499_v32, %v14647_v1  ;;  %v15512_v49 = vsel %vm819_vm2, %v4416_v38, %v4417_v10  ;;  %v19001_v62 = vrot.slane %v14697_v33, 2  ;;  %v19002_v10 = vrot.slane %v14741_v15, 2 }
 0x275   :  { %18999 = vst [vmem:[#allocation58_spill] sm:$0xff] %v15512_v49  ;;  %v15522_v54 = vpack.c.bf16 %v15512_v49, %v15507_v42  ;;  %v4429_v26 = vrot.slane %v15084_v9, 2  ;;  %v4560_v21 = vpack.c.bf16 %v14835_v50, %v14721_v48  ;;  %v15546_v15 = vsel %vm819_vm2, %v4422_v36, %v4423_v47  ;;  %v19051_v49 = vld [vmem:[#allocation60_spill] sm:$0xff] }
 0x276   :  { %18996 = vst [vmem:[#allocation31_spill] sm:$0xff] %v15504_v40  ;;  %v15527_v39 = vsel %vm819_vm2, %v4407_v46, %v19001_v62  ;;  %v15532_v38 = vsel %vm819_vm2, %v4413_v35, %v19002_v10  ;;  %5705 = vmatmul.mubr.bf16.gmra.mxu0 %v15483_v5  ;;  %19005 = vst [vmem:[#allocation39_spill] sm:$0xff] %v15546_v15  ;;  %v15552_v9 = vpack.c.bf16 %v15492_v13, %v15459_v2  ;;  %v11688_v5 = vld [vmem:[%s18337_s3 + $0x2b8] sm:$0xff]  }
 0x277   :  { %19000 = vst [vmem:[#allocation67_spill] sm:$0xff] %v15522_v54  ;;  %19003 = vst [vmem:[#allocation72_spill] sm:$0xff] %v15532_v38  ;;  %v15543_v33 = vpack.c.bf16 %v15532_v38, %v15527_v39  ;;  %5842 = vmatprep.mubr.bf16.mxu0 %v4548_v14  ;;  %v15555_v48 = vsel %vm819_vm2, %v4428_v12, %v4429_v26  ;;  %v4419_v50 = vrot.slane %v15102_v52, 2  ;;  %v4425_v46 = vrot.slane %v14881_v59, 2  ;;  %v11680_v12 = vld [vmem:[%s18337_s3 + $0x230] sm:$0xff]   ;;  %v19050_v38 = vld [vmem:[#allocation23_spill] sm:$0xff] }
 0x278   :  { %19006 = vst [vmem:[#allocation24_spill] sm:$0xff] %v15552_v9  ;;  %19007 = vst [vmem:[#allocation81_spill] sm:$0xff] %v15555_v48  ;;  %5746 = vmatmul.mubr.bf16.vlgmr.msra.gmra.mxu1 %v4545_v29  ;;  %v15561_v36 = vpack.c.bf16 %v15555_v48, %v15546_v15  ;;  %v4434_v47 = vrot.slane %v15162_v60, 2  ;;  %v4435_v14 = vrot.slane %v15210_v18, 2  ;;  %v4440_v62 = vrot.slane %v15167_v45, 2  ;;  %v11681_v29 = vld [vmem:[%s18337_s3 + $0x268] sm:$0xff]  }
 0x279   :  { %19004 = vst [vmem:[#allocation21_spill] sm:$0xff] %v15543_v33  ;;  %5753 = vmatprep.mubr.bf16.mxu1 %v15552_v9  ;;  %10268 = vmatpush3.bf16.msra.mxu1 %v11678_v55  ;;  %v19009_v10 = vrot.slane %v14814_v57, 2  ;;  %v19011_v35 = vrot.slane %v14872_v8, 2  ;;  %v4441_v9 = vrot.slane %v15216_v4, 2  ;;  %v11682_v45 = vld [vmem:[%s18337_s3 + $0x228] sm:$0xff]   ;;  %v19016_v60 = vld [vmem:[#allocation74_spill] sm:$0xff] }
 0x27a   :  { %19008 = vst [vmem:[#allocation82_spill] sm:$0xff] %v15561_v36  ;;  %10269 = vmatprep.subr.bf16.mxu1 %v11679_v23  ;;  %v4431_v23 = vrot.slane %v15131_v17, 2 }
 0x27b   :  { %v15575_v26 = vsel %vm819_vm2, %v4419_v50, %v19009_v10  ;;  %v15580_v18 = vsel %vm819_vm2, %v4425_v46, %v19011_v35  ;;  %v15593_v50 = vsel %vm819_vm2, %v4434_v47, %v4435_v14  ;;  %v15598_v4 = vsel %vm819_vm2, %v4440_v62, %v4441_v9  ;;  %v19013_v35 = vld [vmem:[#allocation28_spill] sm:$0xff]  ;;  %v19015_v14 = vld [vmem:[#allocation43_spill] sm:$0xff]  ;;  %v11689_v62 = vld [vmem:[%s18337_s3 + $0x2f0] sm:$0xff]  }
 0x27c   :  { %19010 = vst [vmem:[#allocation83_spill] sm:$0xff] %v15575_v26  ;;  %v15590_v57 = vpack.c.bf16 %v15580_v18, %v15575_v26  ;;  %v4437_v46 = vrot.slane %v19013_v35, 2  ;;  %v19014_v10 = vld [vmem:[#allocation44_spill] sm:$0xff]  ;;  %v4447_v59 = vrot.slane %v19015_v14, 2  ;;  %v4443_v9 = vrot.slane %v15289_v28, 2  ;;  %v11690_v28 = vld [vmem:[%s18337_s3 + $0x250] sm:$0xff]  }
 0x27d   :  { %v4446_v55 = vrot.slane %v19014_v10, 2  ;;  %10270 = vmatpush3.bf16.msra.mxu1 %v11680_v12  ;;  %v19018_v14 = vld [vmem:[#allocation68_spill] sm:$0xff]  ;;  %v4452_v10 = vrot.slane %v15313_v44, 2  ;;  %v11683_v12 = vld [vmem:[%s18337_s3 + $0x260] sm:$0xff]   ;;  %v19054_v26 = vpack.c.bf16 %v15102_v52, %v18998_v37  ;;  %v11703_v52 = vld [vmem:[%s18337_s3 + $0x290] sm:$0xff]  }
 0x27e   :  { %19012 = vst [vmem:[#allocation84_spill] sm:$0xff] %v15590_v57  ;;  %v19017_v57 = vrot.slane %v19016_v60, 2  ;;  %v19019_v48 = vrot.slane %v19018_v14, 2  ;;  %5843 = vmatmul.mubr.bf16.vlgmr.msra.gmra.mxu0 %v4547_v19  ;;  %10271 = vmatprep.subr.bf16.mxu1 %v11681_v29  ;;  %v19022_v19 = vrot.slane %v15139_v43, 2  ;;  %v19024_v60 = vrot.slane %v15194_v3, 2  ;;  %v11686_v3 = vld [vmem:[%s18337_s3 + $0x218] sm:$0xff]  }
 0x27f   :  { %5850 = vmatprep.mubr.bf16.mxu0 %v4560_v21  ;;  %10332 = vmatpush3.bf16.msra.mxu0 %v11688_v5  ;;  %v11693_v5 = vld [vmem:[%s18337_s3 + $0x2e8] sm:$0xff]  }
 0x280   :  { %v15622_v47 = vsel %vm819_vm2, %v4431_v23, %v19017_v57  ;;  %v15627_v8 = vsel %vm819_vm2, %v4437_v46, %v19019_v48  ;;  %v15637_v57 = vsel %vm819_vm2, %v4446_v55, %v4447_v59  ;;  %v4453_v23 = vrot.slane %v15330_v11, 2  ;;  %v19021_v48 = vld [vmem:[#allocation54_spill] sm:$0xff]  ;;  %v11691_v59 = vld [vmem:[%s18337_s3 + $0x2b0] sm:$0xff]   ;;  %5754 = vmatmul.mubr.bf16.gmra.mxu1 %v15504_v40  ;;  %10333 = vmatprep.subr.bf16.mxu0 %v11689_v62  ;;  %v11684_v62 = vld [vmem:[%s18337_s3 + $0x220] sm:$0xff]  }
 0x281   :  { %19020 = vst [vmem:[#allocation28_spill] sm:$0xff] %v15637_v57  ;;  %v4458_v46 = vrot.slane %v19021_v48, 2  ;;  %v15643_v14 = vpack.c.bf16 %v15637_v57, %v15593_v50  ;;  %v15648_v29 = vsel %vm819_vm2, %v4443_v9, %v19022_v19  ;;  %v4459_v55 = vrot.slane %v15333_v53, 2  ;;  %5761 = vmatprep.mubr.bf16.mxu1 %v15522_v54  ;;  %10272 = vmatpush3.bf16.msra.mxu1 %v11682_v45  ;;  %v11685_v53 = vld [vmem:[%s18337_s3 + $0x258] sm:$0xff]  }
 0x282   :  { %v15659_v21 = vpack.c.bf16 %v15648_v29, %v15622_v47  ;;  %v15662_v43 = vsel %vm819_vm2, %v4452_v10, %v4453_v23  ;;  %v4449_v9 = vrot.slane %v15361_v63, 2  ;;  %v4455_v10 = vrot.slane %v15368_v20, 2  ;;  %10273 = vmatprep.subr.bf16.mxu1 %v11683_v12  ;;  %v11709_v57 = vld [vmem:[%s18337_s3 + $0x378] sm:$0xff]  }
 0x283   :  { %v15675_v19 = vsel %vm819_vm2, %v4458_v46, %v4459_v55  ;;  %v4464_v23 = vrot.slane %v15371_v27, 2  ;;  %v4465_v11 = vrot.slane %v15400_v61, 2  ;;  %v4470_v55 = vrot.slane %v15374_v34, 2  ;;  %10334 = vmatpush3.bf16.msra.mxu0 %v11691_v59  ;;  %v11694_v61 = vld [vmem:[%s18337_s3 + $0x2a8] sm:$0xff]  }
 0x284   :  { %19023 = vst [vmem:[#allocation43_spill] sm:$0xff] %v15675_v19  ;;  %v15685_v45 = vpack.c.bf16 %v15675_v19, %v15662_v43  ;;  %v15690_v46 = vsel %vm819_vm2, %v4449_v9, %v19024_v60  ;;  %v4471_v54 = vrot.slane %v15403_v58, 2  ;;  %v19025_v12 = vrot.slane %v15225_v25, 2  ;;  %10335 = vmatprep.subr.bf16.mxu0 %v11693_v5  ;;  %v11695_v25 = vld [vmem:[%s18337_s3 + $0x2e0] sm:$0xff]   ;;  %v19065_v19 = vld [vmem:[#allocation34_spill] sm:$0xff] }
 0x285   :  { %v15703_v48 = vsel %vm819_vm2, %v4464_v23, %v4465_v11  ;;  %v19026_v60 = vrot.slane %v15451_v16, 7  ;;  %v19027_v58 = vrot.slane %v15451_v16, 1  ;;  %v4461_v23 = vrot.slane %v15426_v22, 2  ;;  %10274 = vmatpush3.bf16.msra.mxu1 %v11684_v62 }
 0x286   :  { %v15700_v40 = vsel %vm819_vm2, %v4455_v10, %v19025_v12  ;;  %v15722_v11 = vsel %vm819_vm2, %v4470_v55, %v4471_v54  ;;  %v19029_v12 = vld [vmem:[#allocation38_spill] sm:$0xff]  ;;  %v4467_v55 = vrot.slane %v15336_v51, 2  ;;  %v19033_v10 = vrot.slane %v15322_v0, 7  ;;  %10275 = vmatprep.subr.bf16.mxu1 %v11685_v53  ;;  %v11697_v53 = vld [vmem:[%s18337_s3 + $0x2a0] sm:$0xff]  }
 0x287   :  { %v15712_v59 = vsel %vm585_vm0, %v19027_v58, %v19026_v60  ;;  %v15719_v9 = vpack.c.bf16 %v15700_v40, %v15690_v46  ;;  %v19030_v60 = vrot.slane %v19029_v12, 7  ;;  %v19031_v5 = vrot.slane %v19029_v12, 1  ;;  %10336 = vmatpush3.bf16.msra.mxu0 %v11694_v61 }
 0x288   :  { %v15739_v54 = vpack.c.bf16 %v15722_v11, %v15703_v48  ;;  %v19034_v20 = vrot.slane %v15322_v0, 1  ;;  %v19035_v62 = vpack.c.bf16 %v18997_v41, %v14801_v30  ;;  %v19039_v30 = vrot.slane %v15322_v0, 5  ;;  %5762 = vmatmul.mubr.bf16.gmra.mxu1 %v15543_v33  ;;  %10337 = vmatprep.subr.bf16.mxu0 %v11695_v25  ;;  %v11692_v25 = vld [vmem:[%s18337_s3 + $0x210] sm:$0xff]  }
 0x289   :  { %19028 = vst [vmem:[#allocation74_spill] sm:$0xff] %v15719_v9  ;;  %v15732_v58 = vsel %vm585_vm0, %v19031_v5, %v19030_v60  ;;  %v4108_v60 = vrot.slane %v19029_v12, 5  ;;  %v19036_v5 = vld [vmem:[#allocation35_spill] sm:$0xff]  ;;  %v19040_v41 = vmov %v19033_v10  ;;  %5769 = vmatprep.mubr.bf16.mxu1 %v15561_v36  ;;  %10276 = vmatpush3.bf16.msra.mxu1 %v11686_v3  ;;  %v19046_v3 = vrot.slane %v19029_v12, 7 }
 0x28a   :  { %19032 = vst [vmem:[#allocation68_spill] sm:$0xff] %v15739_v54  ;;  %v15747_v22 = vsel %vm585_vm0, %v19034_v20, %v19033_v10  ;;  %5851 = vmatmul.mubr.bf16.gmra.mxu0 %v19035_v62  ;;  %v19037_v9 = vrot.slane %v19036_v5, 7  ;;  %v19038_v27 = vrot.slane %v19036_v5, 1  ;;  %v15772_v62 = vsel %vm585_vm0, %v19040_v41, %v19039_v30  ;;  %v19043_v10 = vld [vmem:[#allocation56_spill] sm:$0xff]  ;;  %v19045_v30 = vld [vmem:[#allocation63_spill] sm:$0xff]  ;;  %10277 = vmatprep.subr.bf16.mxu1 %v11690_v28  ;;  %v11700_v28 = vld [vmem:[%s18337_s3 + $0x298] sm:$0xff]  }
 0x28b   :  { %v19044_v20 = vrot.slane %v19043_v10, 2  ;;  %v4526_v41 = vrot.slane %v19045_v30, 2  ;;  %v11696_v10 = vld [vmem:[%s18337_s3 + $0x248] sm:$0xff]   ;;  %v4516_v61 = vrot.slane %v15772_v62, 1  ;;  %10338 = vmatpush3.bf16.msra.mxu0 %v11697_v53  ;;  %v4124_v12 = vrot.slane %v15451_v16, 5 }
 0x28c   :  { %v15758_v54 = vsel %vm585_vm0, %v19038_v27, %v19037_v9  ;;  %v19041_v27 = vpack.c.bf16 %v14993_v7, %v14841_v31  ;;  %v19042_v9 = vrot.slane %v15278_v24, 2  ;;  %v11699_v31 = vld [vmem:[%s18337_s3 + $0x2d8] sm:$0xff]   ;;  %v4584_v15 = vpack.c.bf16 %v15732_v58, %v19051_v49  ;;  %v19055_v49 = vld [vmem:[#allocation81_spill] sm:$0xff] }
 0x28d   :  { %v15788_v0 = vsel %vm819_vm2, %v4467_v55, %v19044_v20  ;;  %v4528_v55 = vrot.slane %v15732_v58, 2  ;;  %v4525_v20 = vrot.slane %v15758_v54, 2  ;;  %10339 = vmatprep.subr.bf16.mxu0 %v11699_v31  ;;  %10278 = vmatpush3.bf16.msra.mxu1 %v11692_v25  ;;  %v11698_v31 = vld [vmem:[%s18337_s3 + $0x208] sm:$0xff]   ;;  %v4532_v33 = vrot.slane %v15772_v62, 2  ;;  %v11702_v25 = vld [vmem:[%s18337_s3 + $0x240] sm:$0xff]   ;;  %v19057_v62 = vld [vmem:[#allocation77_spill] sm:$0xff] }
 0x28e   :  { %5858 = vmatprep.mubr.bf16.mxu0 %v19041_v27  ;;  %v15783_v5 = vsel %vm819_vm2, %v4461_v23, %v19042_v9  ;;  %v15819_v9 = vsel %vm585_vm0, %v19046_v3, %v4108_v60  ;;  %v11701_v60 = vld [vmem:[%s18337_s3 + $0x2d0] sm:$0xff]   ;;  %v19049_v23 = vld [vmem:[#allocation30_spill] sm:$0xff]  ;;  %10279 = vmatprep.subr.bf16.mxu1 %v11696_v10  ;;  %v4534_v36 = vrot.slane %v15712_v59, 2  ;;  %v19063_v53 = vpack.c.bf16 %v15598_v4, %v15593_v50 }
 0x28f   :  { %v15797_v7 = vpack.c.bf16 %v15788_v0, %v15783_v5  ;;  %v4529_v24 = vrot.slane %v15819_v9, 2  ;;  %v15835_v3 = vsel %vm819_vm2, %v4525_v20, %v4526_v41  ;;  %v4518_v41 = vrot.slane %v15712_v59, 1  ;;  %10340 = vmatpush3.bf16.msra.mxu0 %v11700_v28  ;;  %v19059_v20 = vld [vmem:[#allocation36_spill] sm:$0xff] }
 0x290   :  { %10341 = vmatprep.subr.bf16.mxu0 %v11701_v60  ;;  %v11704_v60 = vld [vmem:[%s18337_s3 + $0x200] sm:$0xff]  }
 0x291   :  { %v15847_v27 = vsel %vm819_vm2, %v4528_v55, %v4529_v24  ;;  %v19060_v55 = vld [vmem:[#allocation84_spill] sm:$0xff]  ;;  %v4515_v24 = vrot.slane %v15747_v22, 1  ;;  %10280 = vmatpush3.bf16.msra.mxu1 %v11698_v31 }
 0x292   :  { %5859 = vmatmul.mubr.bf16.gmra.mxu0 %v19054_v26  ;;  %5770 = vmatmul.mubr.bf16.gmra.mxu1 %v19060_v55  ;;  %v19064_v55 = vrot.slane %v15451_v16, 7  ;;  %v4531_v26 = vrot.slane %v15747_v22, 2  ;;  %v4583_v16 = vpack.c.bf16 %v15758_v54, %v19065_v19 }
 0x293   :  { %5866 = vmatprep.mubr.bf16.mxu0 %v4584_v15  ;;  %v11705_v15 = vld [vmem:[%s18337_s3 + $0x2c8] sm:$0xff]   ;;  %5777 = vmatprep.mubr.bf16.mxu1 %v19063_v53  ;;  %v15902_v10 = vsel %vm706_vm1, %v4515_v24, %v4516_v61  ;;  %v11707_v61 = vld [vmem:[%s18337_s3 + $0x2c0] sm:$0xff]  }
 0x294   :  { %v4220_v28 = vsel %vm585_vm0, %v19064_v55, %v4124_v12  ;;  %10281 = vmatprep.subr.bf16.mxu1 %v11702_v25  ;;  %10342 = vmatpush3.bf16.msra.mxu0 %v11703_v52  ;;  %v11706_v12 = vld [vmem:[%s18337_s3 + $0x288] sm:$0xff]   ;;  %v19066_v55 = vld [vmem:[#allocation55_spill] sm:$0xff]  ;;  %v15912_v37 = vsel %vm819_vm2, %v4531_v26, %v4532_v33  ;;  %v19067_v33 = vld [vmem:[#allocation26_spill] sm:$0xff] }
 0x295   :  { %v4519_v53 = vrot.slane %v4220_v28, 1  ;;  %v4535_v31 = vrot.slane %v4220_v28, 2  ;;  %10343 = vmatprep.subr.bf16.mxu0 %v11705_v15  ;;  %10282 = vmatpush3.bf16.msra.mxu1 %v11704_v60  ;;  %v19068_v25 = vld [vmem:[#allocation46_spill] sm:$0xff]  ;;  %v19069_v28 = vld [vmem:[#allocation27_spill] sm:$0xff]  ;;  %v19071_v60 = vpack.c.bf16 %v15627_v8, %v15622_v47 }
 0x296   :  { %10395 = vmatprep.subr.bf16.mxu1 %v11709_v57  ;;  %v19070_v15 = vpack.c.bf16 %v19068_v25, %v19069_v28  ;;  %v11719_v25 = vld [vmem:[%s18337_s3 + $0x3f8] sm:$0xff]   ;;  %v19073_v28 = vld [vmem:[#allocation44_spill] sm:$0xff] }
 0x297   :  { %v15918_v24 = vsel %vm706_vm1, %v4518_v41, %v4519_v53  ;;  %v15921_v52 = vsel %vm819_vm2, %v4534_v36, %v4535_v31  ;;  %v4645_v53 = vpack.c.bf16 %v19066_v55, %v15902_v10  ;;  %v11708_v36 = vld [vmem:[%s18337_s3 + $0x280] sm:$0xff]   ;;  %v19078_v57 = vld [vmem:[#allocation54_spill] sm:$0xff]  ;;  %v19087_v31 = vld [vmem:[#allocation41_spill] sm:$0xff] }
 0x298   :  { %v4640_v26 = vpack.c.bf16 %v15918_v24, %v19067_v33  ;;  %v4646_v41 = vpack.c.bf16 %v19067_v33, %v15918_v24  ;;  %10344 = vmatpush3.bf16.msra.mxu0 %v11706_v12  ;;  %v19072_v12 = vpack.c.bf16 %v15131_v17, %v19013_v35  ;;  %v19081_v17 = vld [vmem:[#allocation68_spill] sm:$0xff]  ;;  %v19082_v35 = vld [vmem:[#allocation29_spill] sm:$0xff] }
 0x299   :  { %10345 = vmatprep.subr.bf16.mxu0 %v11707_v61  ;;  %v19075_v61 = vld [vmem:[#allocation50_spill] sm:$0xff] }
 0x29a   :  { %5867 = vmatmul.mubr.bf16.gmra.mxu0 %v4583_v16  ;;  %5778 = vmatmul.mubr.bf16.gmra.mxu1 %v19071_v60  ;;  %v19076_v60 = vpack.c.bf16 %v15361_v63, %v19075_v61  ;;  %v19077_v16 = vld [vmem:[#allocation5_spill] sm:$0xff]  ;;  %v19089_v61 = vld [vmem:[#allocation71_spill] sm:$0xff] }
 0x29b   :  { %5874 = vmatprep.mubr.bf16.mxu0 %v19070_v15  ;;  %5785 = vmatprep.mubr.bf16.mxu1 %v15643_v14  ;;  %v19074_v15 = vpack.c.bf16 %v15313_v44, %v19073_v28  ;;  %v19085_v28 = vpack.c.bf16 %v15712_v59, %v15374_v34 }
 0x29c   :  { %10346 = vmatpush3.bf16.msra.mxu0 %v11708_v36  ;;  %v19079_v36 = vpack.c.bf16 %v19077_v16, %v19078_v57  ;;  %v11710_v57 = vld [vmem:[%s18337_s3 + $0x338] sm:$0xff]   ;;  %v19088_v16 = vpack.c.bf16 %v15747_v22, %v15336_v51 }
 0x29d   :  { %10459 = vmatprep.subr.bf16.mxu0 %v11719_v25  ;;  %v19080_v25 = vld [vmem:[#allocation74_spill] sm:$0xff] }
 0x2a2   :  { %5875 = vmatmul.mubr.bf16.gmra.mxu0 %v19072_v12  ;;  %5786 = vmatmul.mubr.bf16.gmra.mxu1 %v15659_v21  ;;  %v19083_v12 = vld [vmem:[#allocation15_spill] sm:$0xff] }
 0x2a3   :  { %5882 = vmatprep.mubr.bf16.mxu0 %v19074_v15  ;;  %5793 = vmatprep.mubr.bf16.mxu1 %v15685_v45  ;;  %v19084_v44 = vpack.c.bf16 %v19082_v35, %v19083_v12  ;;  %v19086_v15 = vld [vmem:[#allocation11_spill] sm:$0xff]  ;;  %v11711_v35 = vld [vmem:[%s18337_s3 + $0x370] sm:$0xff]   ;;  %v19092_v12 = vld [vmem:[#allocation8_spill] sm:$0xff] }
 0x2a4   :  { %v4550_v63 = vpack.c.bf16 %v19087_v31, %v19086_v15  ;;  %v19091_v31 = vpack.c.bf16 %v15459_v2, %v15462_v6  ;;  %v11712_v15 = vld [vmem:[%s18337_s3 + $0x330] sm:$0xff]   ;;  %v11720_v2 = vld [vmem:[%s18337_s3 + $0x3b8] sm:$0xff]  }
 0x2a5   :  { %v11721_v6 = vld [vmem:[%s18337_s3 + $0x3f0] sm:$0xff]  }
 0x2aa   :  { %5883 = vmatmul.mubr.bf16.gmra.mxu0 %v19076_v60  ;;  %5794 = vmatmul.mubr.bf16.gmra.mxu1 %v19080_v25  ;;  %v19090_v60 = vld [vmem:[#allocation65_spill] sm:$0xff] }
 0x2ab   :  { %5890 = vmatprep.mubr.bf16.mxu0 %v19079_v36  ;;  %5801 = vmatprep.mubr.bf16.mxu1 %v19081_v17  ;;  %v4549_v36 = vpack.c.bf16 %v19090_v60, %v19089_v61  ;;  %v19095_v61 = vld [vmem:[#allocation32_spill] sm:$0xff]  ;;  %v19096_v60 = vld [vmem:[#allocation69_spill] sm:$0xff] }
 0x2b2   :  { %5891 = vmatmul.mubr.bf16.gmra.mxu0 %v19084_v44  ;;  %5802 = vmatmul.mubr.bf16.gmra.mxu1 %v15797_v7  ;;  %v19093_v44 = vld [vmem:[#allocation48_spill] sm:$0xff] }
 0x2b3   :  { %5898 = vmatprep.mubr.bf16.mxu0 %v19085_v28  ;;  %5939 = vmatprep.mubr.bf16.mxu1 %v4550_v63  ;;  %v4562_v28 = vpack.c.bf16 %v19093_v44, %v19092_v12  ;;  %v11713_v63 = vld [vmem:[%s18337_s3 + $0x368] sm:$0xff]   ;;  %v19099_v44 = vld [vmem:[#allocation78_spill] sm:$0xff] }
 0x2b4   :  { %v19098_v12 = vld [vmem:[#allocation52_spill] sm:$0xff] }
 0x2ba   :  { %5899 = vmatmul.mubr.bf16.gmra.mxu0 %v19088_v16  ;;  %5940 = vmatmul.mubr.bf16.vlgmr.msra.gmra.mxu1 %v4549_v36  ;;  %v19094_v16 = vpack.c.bf16 %v14647_v1, %v14637_v56  ;;  %v4561_v36 = vpack.c.bf16 %v19096_v60, %v19095_v61  ;;  %v11723_v56 = vld [vmem:[%s18337_s3 + $0x3b0] sm:$0xff]   ;;  %v4512_v1 = vrot.slane %v15732_v58, 1  ;;  %v19101_v61 = vld [vmem:[#allocation70_spill] sm:$0xff]  ;;  %v19102_v60 = vld [vmem:[#allocation19_spill] sm:$0xff] }
 0x2bb   :  { %6036 = vmatprep.mubr.bf16.mxu0 %v19091_v31  ;;  %5947 = vmatprep.mubr.bf16.mxu1 %v4562_v28  ;;  %v19097_v31 = vpack.c.bf16 %v15507_v42, %v15492_v13  ;;  %v4574_v28 = vpack.c.bf16 %v19099_v44, %v19098_v12  ;;  %v11716_v13 = vld [vmem:[%s18337_s3 + $0x320] sm:$0xff]   ;;  %v11717_v42 = vld [vmem:[%s18337_s3 + $0x358] sm:$0xff]  }
 0x2bc   :  { %10396 = vmatpush3.bf16.msra.mxu1 %v11710_v57  ;;  %v11714_v57 = vld [vmem:[%s18337_s3 + $0x328] sm:$0xff]   ;;  %v19103_v12 = vld [vmem:[#allocation39_spill] sm:$0xff]  ;;  %v19104_v44 = vld [vmem:[#allocation58_spill] sm:$0xff] }
 0x2bd   :  { %10397 = vmatprep.subr.bf16.mxu1 %v11711_v35  ;;  %v11715_v35 = vld [vmem:[%s18337_s3 + $0x360] sm:$0xff]  }
 0x2c0   :  { %10398 = vmatpush3.bf16.msra.mxu1 %v11712_v15  ;;  %v4513_v15 = vrot.slane %v15819_v9, 1  ;;  %v11726_v9 = vld [vmem:[%s18337_s3 + $0x3a8] sm:$0xff]  }
 0x2c1   :  { %10399 = vmatprep.subr.bf16.mxu1 %v11713_v63  ;;  %v11725_v63 = vld [vmem:[%s18337_s3 + $0x3e8] sm:$0xff]  }
 0x2c2   :  { %6037 = vmatmul.mubr.bf16.vlgmr.msra.gmra.mxu0 %v19094_v16  ;;  %5948 = vmatmul.mubr.bf16.gmra.mxu1 %v4561_v36  ;;  %v19100_v16 = vpack.c.bf16 %v15527_v39, %v15499_v32  ;;  %v4573_v36 = vpack.c.bf16 %v19102_v60, %v19101_v61  ;;  %v4509_v32 = vrot.slane %v15758_v54, 1  ;;  %v11729_v39 = vld [vmem:[%s18337_s3 + $0x3a0] sm:$0xff]   ;;  %v19110_v60 = vld [vmem:[#allocation25_spill] sm:$0xff] }
 0x2c3   :  { %6044 = vmatprep.mubr.bf16.mxu0 %v19097_v31  ;;  %10460 = vmatpush3.bf16.msra.mxu0 %v11720_v2  ;;  %v16045_v2 = vsel %vm706_vm1, %v4512_v1, %v4513_v15  ;;  %v4510_v31 = vrot.slane %v19045_v30, 1  ;;  %v11731_v30 = vld [vmem:[%s18337_s3 + $0x3d8] sm:$0xff]   ;;  %v11724_v15 = vld [vmem:[%s18337_s3 + $0x310] sm:$0xff]  }
 0x2c4   :  { %10461 = vmatprep.subr.bf16.mxu0 %v11721_v6  ;;  %5955 = vmatprep.mubr.bf16.mxu1 %v4574_v28  ;;  %v11727_v6 = vld [vmem:[%s18337_s3 + $0x3e0] sm:$0xff]   ;;  %v19105_v28 = vpack.c.bf16 %v19103_v12, %v19104_v44  ;;  %v11735_v12 = vld [vmem:[%s18337_s3 + $0x390] sm:$0xff]   ;;  %v11737_v44 = vld [vmem:[%s18337_s3 + $0x3c8] sm:$0xff]  }
 0x2c5   :  { %10400 = vmatpush3.bf16.msra.mxu1 %v11714_v57  ;;  %v11718_v57 = vld [vmem:[%s18337_s3 + $0x318] sm:$0xff]  }
 0x2c6   :  { %10401 = vmatprep.subr.bf16.mxu1 %v11715_v35  ;;  %v11722_v35 = vld [vmem:[%s18337_s3 + $0x350] sm:$0xff]  }
 0x2c7   :  { %10462 = vmatpush3.bf16.msra.mxu0 %v11723_v56  ;;  %v19106_v56 = vld [vmem:[#allocation79_spill] sm:$0xff] }
 0x2c8   :  { %10463 = vmatprep.subr.bf16.mxu0 %v11725_v63  ;;  %v4586_v1 = vpack.c.bf16 %v16045_v2, %v19106_v56  ;;  %v11728_v63 = vld [vmem:[%s18337_s3 + $0x348] sm:$0xff]  }
 0x2c9   :  { %10402 = vmatpush3.bf16.msra.mxu1 %v11716_v13  ;;  %v16081_v13 = vsel %vm706_vm1, %v4509_v32, %v4510_v31  ;;  %v19111_v31 = vpack.c.bf16 %v15847_v27, %v19055_v49 }
 0x2ca   :  { %6045 = vmatmul.mubr.bf16.gmra.mxu0 %v19100_v16  ;;  %10403 = vmatprep.subr.bf16.mxu1 %v11717_v42  ;;  %v11732_v42 = vld [vmem:[%s18337_s3 + $0x398] sm:$0xff]   ;;  %v19108_v16 = vld [vmem:[#allocation72_spill] sm:$0xff] }
 0x2cb   :  { %6052 = vmatprep.mubr.bf16.mxu0 %v19105_v28  ;;  %10464 = vmatpush3.bf16.msra.mxu0 %v11726_v9  ;;  %v11733_v9 = vld [vmem:[%s18337_s3 + $0x3d0] sm:$0xff]   ;;  %v19112_v28 = vld [vmem:[#allocation42_spill] sm:$0xff] }
 0x2cc   :  { %5956 = vmatmul.mubr.bf16.gmra.mxu1 %v4573_v36  ;;  %10465 = vmatprep.subr.bf16.mxu0 %v11727_v6  ;;  %v11730_v6 = vld [vmem:[%s18337_s3 + $0x308] sm:$0xff]   ;;  %v4585_v36 = vpack.c.bf16 %v16081_v13, %v19110_v60 }
 0x2cd   :  { %5963 = vmatprep.mubr.bf16.mxu1 %v4586_v1  ;;  %10404 = vmatpush3.bf16.msra.mxu1 %v11718_v57  ;;  %v19107_v57 = vld [vmem:[#allocation83_spill] sm:$0xff]  ;;  %v19113_v1 = vld [vmem:[#allocation57_spill] sm:$0xff] }
 0x2ce   :  { %10405 = vmatprep.subr.bf16.mxu1 %v11722_v35  ;;  %v19109_v61 = vpack.c.bf16 %v19107_v57, %v19108_v16  ;;  %v11734_v35 = vld [vmem:[%s18337_s3 + $0x340] sm:$0xff]   ;;  %v19114_v32 = vpack.c.bf16 %v19112_v28, %v19113_v1  ;;  %v19117_v57 = vpack.c.bf16 %v19050_v38, %v19049_v23  ;;  %v19118_v16 = vld [vmem:[#allocation6_spill] sm:$0xff] }
 0x2cf   :  { %10466 = vmatpush3.bf16.msra.mxu0 %v11729_v39  ;;  %v11736_v39 = vld [vmem:[%s18337_s3 + $0x300] sm:$0xff]  }
 0x2d0   :  { %10467 = vmatprep.subr.bf16.mxu0 %v11731_v30  ;;  %v11741_v30 = vld [vmem:[%s18337_s3 + $0x478] sm:$0xff]   ;;  %v19126_v28 = vld [vmem:[#allocation75_spill] sm:$0xff] }
 0x2d1   :  { %10406 = vmatpush3.bf16.msra.mxu1 %v11724_v15  ;;  %v11738_v15 = vld [vmem:[%s18337_s3 + $0x388] sm:$0xff]   ;;  %v19127_v1 = vpack.c.bf16 %v19059_v20, %v19126_v28  ;;  %v19137_v28 = vld [vmem:[#allocation7_spill] sm:$0xff] }
 0x2d2   :  { %6053 = vmatmul.mubr.bf16.gmra.mxu0 %v19109_v61  ;;  %10407 = vmatprep.subr.bf16.mxu1 %v11728_v63  ;;  %v11739_v63 = vld [vmem:[%s18337_s3 + $0x3c0] sm:$0xff]   ;;  %v19119_v61 = vld [vmem:[#allocation45_spill] sm:$0xff] }
 0x2d3   :  { %6060 = vmatprep.mubr.bf16.mxu0 %v19111_v31  ;;  %10468 = vmatpush3.bf16.msra.mxu0 %v11732_v42  ;;  %v19115_v42 = vpack.c.bf16 %v15835_v3, %v15580_v18 }
 0x2d4   :  { %5964 = vmatmul.mubr.bf16.gmra.mxu1 %v4585_v36  ;;  %10469 = vmatprep.subr.bf16.mxu0 %v11733_v9  ;;  %v19116_v9 = vpack.c.bf16 %v15593_v50, %v15598_v4  ;;  %v19120_v36 = vpack.c.bf16 %v19118_v16, %v19119_v61  ;;  %v19121_v50 = vpack.c.bf16 %v15622_v47, %v15627_v8  ;;  %v19122_v4 = vld [vmem:[#allocation28_spill] sm:$0xff]  ;;  %v16154_v8 = vld [vmem:[%s18338_s4] ss:$0 sm:$0xff] }
 0x2d5   :  { %5971 = vmatprep.mubr.bf16.mxu1 %v19114_v32  ;;  %10408 = vmatpush3.bf16.msra.mxu1 %v11730_v6  ;;  %v11740_v6 = vld [vmem:[%s18337_s3 + $0x380] sm:$0xff]   ;;  %v19123_v31 = vpack.c.bf16 %v15662_v43, %v19122_v4  ;;  %v19134_v4 = vpack.c.bf16 %v15783_v5, %v15700_v40 }
 0x2d6   :  { %10409 = vmatprep.subr.bf16.mxu1 %v11734_v35 }
 0x2d7   :  { %10470 = vmatpush3.bf16.msra.mxu0 %v11735_v12 }
 0x2d8   :  { %10471 = vmatprep.subr.bf16.mxu0 %v11737_v44  ;;  %v19124_v44 = vld [vmem:[#allocation4_spill] sm:$0xff] }
 0x2d9   :  { %10410 = vmatpush3.bf16.msra.mxu1 %v11736_v39  ;;  %v19125_v38 = vpack.c.bf16 %v19057_v62, %v19124_v44  ;;  %v19136_v44 = vpack.c.bf16 %v15902_v10, %v19066_v55 }
 0x2da   :  { %6061 = vmatmul.mubr.bf16.gmra.mxu0 %v19115_v42  ;;  %10523 = vmatprep.subr.bf16.mxu1 %v11741_v30  ;;  %v19128_v30 = vpack.c.bf16 %v15690_v46, %v15648_v29  ;;  %v19131_v42 = vld [vmem:[#allocation64_spill] sm:$0xff] }
 0x2db   :  { %6068 = vmatprep.mubr.bf16.mxu0 %v19116_v9  ;;  %10472 = vmatpush3.bf16.msra.mxu0 %v11738_v15  ;;  %v19129_v15 = vld [vmem:[#allocation43_spill] sm:$0xff]  ;;  %v19132_v9 = vld [vmem:[#allocation80_spill] sm:$0xff] }
 0x2dc   :  { %5972 = vmatmul.mubr.bf16.gmra.mxu1 %v19117_v57  ;;  %10473 = vmatprep.subr.bf16.mxu0 %v11739_v63  ;;  %v10027_v35 = vpop.f32.mrf.mxu1  ;;  %v19130_v63 = vpack.c.bf16 %v15703_v48, %v19129_v15  ;;  %v11743_v15 = vld [vmem:[%s18337_s3 + $0x470] sm:$0xff]  }
 0x2dd   :  { %5979 = vmatprep.mubr.bf16.mxu1 %v19120_v36 }
 0x2de   :  { %v10028_v12 = vpop.f32.mrf.mxu1 }
 0x2df   :  { %10474 = vmatpush3.bf16.msra.mxu0 %v11740_v6  ;;  %v10029_v23 = vadd.f32 %v10028_v12, %v10027_v35  ;;  %v19133_v6 = vpack.c.bf16 %v19131_v42, %v19132_v9  ;;  %v19140_v9 = vld [vmem:[#allocation12_spill] sm:$0xff] }
 0x2e0   :  { %v10030_v32 = vpop.f32.mrf.mxu1 }
 0x2e1   :  { %v5554_v62 = vadd.f32 %v10029_v23, %v16154_v8 }
 0x2e2   :  { %6069 = vmatmul.mubr.bf16.gmra.mxu0 %v19121_v50  ;;  %v10031_v47 = vpop.f32.mrf.mxu1 }
 0x2e3   :  { %6076 = vmatprep.mubr.bf16.mxu0 %v19123_v31  ;;  %v10032_v39 = vadd.f32 %v10031_v47, %v10030_v32  ;;  %v10091_v43 = vpop.f32.mrf.mxu0 }
 0x2e4   :  { %5980 = vmatmul.mubr.bf16.gmra.mxu1 %v19125_v38 }
 0x2e5   :  { %5987 = vmatprep.mubr.bf16.mxu1 %v19127_v1  ;;  %v10092_v20 = vpop.f32.mrf.mxu0  ;;  %v5557_v29 = vadd.f32 %v10032_v39, %v16154_v8  ;;  %v11742_v39 = vld [vmem:[%s18337_s3 + $0x438] sm:$0xff]  }
 0x2e6   :  { %v10093_v57 = vadd.f32 %v10092_v20, %v10091_v43  ;;  %v19139_v20 = vld [vmem:[#allocation18_spill] sm:$0xff] }
 0x2e7   :  { %v10094_v16 = vpop.f32.mrf.mxu0 }
 0x2e8   :  { %v16169_v61 = vadd.f32 %v10093_v57, %v5554_v62  ;;  %v10033_v46 = vpop.f32.mrf.mxu1  ;;  %v19138_v62 = vpack.c.bf16 %v15912_v37, %v15788_v0  ;;  %v19141_v57 = vld [vmem:[#allocation20_spill] sm:$0xff] }
 0x2e9   :  { %v10095_v36 = vpop.f32.mrf.mxu0 }
 0x2ea   :  { %6077 = vmatmul.mubr.bf16.gmra.mxu0 %v19128_v30  ;;  %v10096_v35 = vadd.f32 %v10095_v36, %v10094_v16  ;;  %v10034_v48 = vpop.f32.mrf.mxu1  ;;  %v11744_v16 = vld [vmem:[%s18337_s3 + $0x430] sm:$0xff]  }
 0x2eb   :  { %6084 = vmatprep.mubr.bf16.mxu0 %v19130_v63  ;;  %v10035_v50 = vadd.f32 %v10034_v48, %v10033_v46  ;;  %v11745_v46 = vld [vmem:[%s18337_s3 + $0x468] sm:$0xff]  }
 0x2ec   :  { %5988 = vmatmul.mubr.bf16.gmra.mxu1 %v19133_v6  ;;  %v16175_v31 = vadd.f32 %v10096_v35, %v5557_v29  ;;  %v10036_v12 = vpop.f32.mrf.mxu1 }
 0x2ed   :  { %5995 = vmatprep.mubr.bf16.mxu1 %v4640_v26  ;;  %v19135_v26 = vpack.c.bf16 %v15921_v52, %v15722_v11  ;;  %v5562_v1 = vadd.f32 %v10035_v50, %v16154_v8  ;;  %v11746_v50 = vld [vmem:[%s18337_s3 + $0x428] sm:$0xff]  }
 0x2ee   :  { %v10097_v38 = vpop.f32.mrf.mxu0  ;;  %v10037_v23 = vpop.f32.mrf.mxu1 }
 0x2ef   :  { %v10038_v32 = vadd.f32 %v10037_v23, %v10036_v12 }
 0x2f0   :  { %v10098_v40 = vpop.f32.mrf.mxu0 }
 0x2f1   :  { %v10099_v5 = vadd.f32 %v10098_v40, %v10097_v38  ;;  %v5565_v30 = vadd.f32 %v10038_v32, %v16154_v8  ;;  %v19143_v38 = vld [vmem:[#allocation59_spill] sm:$0xff]  ;;  %v19145_v40 = vld [vmem:[#allocation62_spill] sm:$0xff] }
 0x2f2   :  { %6085 = vmatmul.mubr.bf16.gmra.mxu0 %v19134_v4  ;;  %v10100_v47 = vpop.f32.mrf.mxu0  ;;  %v19142_v4 = vld [vmem:[#allocation33_spill] sm:$0xff] }
 0x2f3   :  { %6092 = vmatprep.mubr.bf16.mxu0 %v19135_v26  ;;  %v16188_v43 = vadd.f32 %v10099_v5, %v5562_v1  ;;  %v19144_v1 = vld [vmem:[#allocation61_spill] sm:$0xff] }
 0x2f4   :  { %5996 = vmatmul.mubr.bf16.gmra.mxu1 %v19136_v44  ;;  %v10101_v63 = vpop.f32.mrf.mxu0  ;;  %v11747_v44 = vld [vmem:[%s18337_s3 + $0x460] sm:$0xff]  }
 0x2f5   :  { %6133 = vmatprep.mubr.bf16.mxu1 %v19137_v28  ;;  %v10102_v42 = vadd.f32 %v10101_v63, %v10100_v47  ;;  %v11748_v47 = vld [vmem:[%s18337_s3 + $0x420] sm:$0xff]  }
 0x2f6   :  { %v10039_v6 = vpop.f32.mrf.mxu1 }
 0x2f7   :  { %v16203_v29 = vadd.f32 %v10102_v42, %v5565_v30  ;;  %v11749_v30 = vld [vmem:[%s18337_s3 + $0x458] sm:$0xff]  }
 0x2f8   :  { %v10040_v36 = vpop.f32.mrf.mxu1 }
 0x2f9   :  { %v10041_v35 = vadd.f32 %v10040_v36, %v10039_v6  ;;  %v19146_v6 = vld [vmem:[#allocation73_spill] sm:$0xff]  ;;  %v19148_v36 = vld [vmem:[#allocation60_spill] sm:$0xff] }
 0x2fa   :  { %6093 = vmatmul.mubr.bf16.gmra.mxu0 %v19138_v62  ;;  %v10042_v48 = vpop.f32.mrf.mxu1 }
 0x2fb   :  { %6230 = vmatprep.mubr.bf16.mxu0 %v19139_v20  ;;  %v5570_v23 = vadd.f32 %v10041_v35, %v16154_v8  ;;  %v4590_v35 = vpack.c.bf16 %v19148_v36, %v15732_v58  ;;  %v11753_v58 = vld [vmem:[%s18337_s3 + $0x448] sm:$0xff]  }
 0x2fc   :  { %6134 = vmatmul.mubr.bf16.vlgmr.msra.gmra.mxu1 %v19140_v9  ;;  %v10103_v12 = vpop.f32.mrf.mxu0  ;;  %v10043_v26 = vpop.f32.mrf.mxu1  ;;  %v11750_v9 = vld [vmem:[%s18337_s3 + $0x418] sm:$0xff]  }
 0x2fd   :  { %6141 = vmatprep.mubr.bf16.mxu1 %v19141_v57  ;;  %10524 = vmatpush3.bf16.msra.mxu1 %v11742_v39  ;;  %v10044_v28 = vadd.f32 %v10043_v26, %v10042_v48 }
 0x2fe   :  { %10525 = vmatprep.subr.bf16.mxu1 %v11743_v15  ;;  %v10104_v32 = vpop.f32.mrf.mxu0 }
 0x2ff   :  { %v10105_v5 = vadd.f32 %v10104_v32, %v10103_v12  ;;  %v5573_v15 = vadd.f32 %v10044_v28, %v16154_v8 }
 0x300   :  { %v10106_v39 = vpop.f32.mrf.mxu0 }
 0x301   :  { %10526 = vmatpush3.bf16.msra.mxu1 %v11744_v16  ;;  %v16225_v62 = vadd.f32 %v10105_v5, %v5570_v23  ;;  %v11751_v16 = vld [vmem:[%s18337_s3 + $0x450] sm:$0xff]  }
 0x302   :  { %6231 = vmatmul.mubr.bf16.vlgmr.msra.gmra.mxu0 %v19142_v4  ;;  %10527 = vmatprep.subr.bf16.mxu1 %v11745_v46  ;;  %v10107_v20 = vpop.f32.mrf.mxu0  ;;  %v19147_v46 = vld [vmem:[#allocation16_spill] sm:$0xff]  ;;  %v19149_v4 = vld [vmem:[#allocation14_spill] sm:$0xff] }
 0x303   :  { %6238 = vmatprep.mubr.bf16.mxu0 %v19143_v38  ;;  %v10108_v42 = vadd.f32 %v10107_v20, %v10106_v39  ;;  %v19150_v39 = vld [vmem:[#allocation47_spill] sm:$0xff] }
 0x304   :  { %6142 = vmatmul.mubr.bf16.gmra.mxu1 %v19144_v1  ;;  %v10045_v63 = vpop.f32.mrf.mxu1 }
 0x305   :  { %6149 = vmatprep.mubr.bf16.mxu1 %v19145_v40  ;;  %10528 = vmatpush3.bf16.msra.mxu1 %v11746_v50  ;;  %v16238_v48 = vadd.f32 %v10108_v42, %v5573_v15  ;;  %v4592_v40 = vpack.c.bf16 %v19106_v56, %v16045_v2  ;;  %v11755_v2 = vld [vmem:[%s18337_s3 + $0x440] sm:$0xff]  }
 0x306   :  { %10529 = vmatprep.subr.bf16.mxu1 %v11747_v44  ;;  %v10046_v57 = vpop.f32.mrf.mxu1  ;;  %v11752_v44 = vld [vmem:[%s18337_s3 + $0x410] sm:$0xff]  }
 0x307   :  { %v10047_v50 = vadd.f32 %v10046_v57, %v10045_v63 }
 0x308   :  { %v10048_v12 = vpop.f32.mrf.mxu1 }
 0x309   :  { %10530 = vmatpush3.bf16.msra.mxu1 %v11748_v47  ;;  %v10109_v26 = vpop.f32.mrf.mxu0  ;;  %v5578_v38 = vadd.f32 %v10047_v50, %v16154_v8  ;;  %v11754_v47 = vld [vmem:[%s18337_s3 + $0x408] sm:$0xff]  }
 0x30a   :  { %6239 = vmatmul.mubr.bf16.gmra.mxu0 %v19146_v6  ;;  %10531 = vmatprep.subr.bf16.mxu1 %v11749_v30  ;;  %v10049_v23 = vpop.f32.mrf.mxu1  ;;  %v4589_v30 = vpack.c.bf16 %v19065_v19, %v15758_v54  ;;  %v11756_v19 = vld [vmem:[%s18337_s3 + $0x400] sm:$0xff]   ;;  %s11903_s3 = smov 24  }
 0x30b   :  { %6246 = vmatprep.mubr.bf16.mxu0 %v19147_v46  ;;  %v10110_v28 = vpop.f32.mrf.mxu0  ;;  %v10050_v1 = vadd.f32 %v10049_v23, %v10048_v12 }
 0x30c   :  { %6150 = vmatmul.mubr.bf16.gmra.mxu1 %v19149_v4  ;;  %v10111_v32 = vadd.f32 %v10110_v28, %v10109_v26  ;;  %v19153_v4 = vld [vmem:[#allocation51_spill] sm:$0xff] }
 0x30d   :  { %6157 = vmatprep.mubr.bf16.mxu1 %v4590_v35  ;;  %10532 = vmatpush3.bf16.msra.mxu1 %v11750_v9  ;;  %v10112_v5 = vpop.f32.mrf.mxu0  ;;  %v5581_v63 = vadd.f32 %v10050_v1, %v16154_v8  ;;  %v19151_v9 = vld [vmem:[#allocation49_spill] sm:$0xff]  ;;  %v19154_v26 = vld [vmem:[#allocation3_spill] sm:$0xff] }
 0x30e   :  { %10533 = vmatprep.subr.bf16.mxu1 %v11751_v16  ;;  %v16256_v15 = vadd.f32 %v10111_v32, %v5578_v38  ;;  %v4591_v16 = vpack.c.bf16 %v19110_v60, %v16081_v13  ;;  %v19152_v35 = vld [vmem:[#allocation53_spill] sm:$0xff] }
 0x30f   :  { %v10113_v56 = vpop.f32.mrf.mxu0  ;;  %v19155_v60 = vld [vmem:[#allocation9_spill] sm:$0xff] }
 0x310   :  { %v10051_v20 = vpop.f32.mrf.mxu1  ;;  %v10114_v42 = vadd.f32 %v10113_v56, %v10112_v5 }
 0x311   :  { %10534 = vmatpush3.bf16.msra.mxu1 %v11752_v44 }
 0x312   :  { %6247 = vmatmul.mubr.bf16.gmra.mxu0 %v19150_v39  ;;  %10535 = vmatprep.subr.bf16.mxu1 %v11753_v58  ;;  %v16266_v54 = vadd.f32 %v10114_v42, %v5581_v63  ;;  %v10052_v6 = vpop.f32.mrf.mxu1  ;;  %v19158_v63 = vld [vmem:[#allocation10_spill] sm:$0xff] }
 0x313   :  { %6254 = vmatprep.mubr.bf16.mxu0 %v4592_v40  ;;  %v10053_v57 = vadd.f32 %v10052_v6, %v10051_v20  ;;  %v19156_v40 = vld [vmem:[#allocation22_spill] sm:$0xff] }
 0x314   :  { %6158 = vmatmul.mubr.bf16.gmra.mxu1 %v4589_v30  ;;  %v10054_v46 = vpop.f32.mrf.mxu1 }
 0x315   :  { %6165 = vmatprep.mubr.bf16.mxu1 %v19151_v9  ;;  %10536 = vmatpush3.bf16.msra.mxu1 %v11754_v47  ;;  %v5586_v44 = vadd.f32 %v10053_v57, %v16154_v8  ;;  %v19157_v47 = vld [vmem:[#allocation76_spill] sm:$0xff]  ;;  %v19160_v57 = vld [vmem:[#allocation13_spill] sm:$0xff] }
 0x316   :  { %10537 = vmatprep.subr.bf16.mxu1 %v11755_v2  ;;  %v10055_v36 = vpop.f32.mrf.mxu1 }
 0x317   :  { %v10056_v50 = vadd.f32 %v10055_v36, %v10054_v46  ;;  %v10115_v12 = vpop.f32.mrf.mxu0  ;;  %v19161_v36 = vld [vmem:[#allocation37_spill] sm:$0xff] }
 0x319   :  { %10538 = vmatpush3.bf16.msra.mxu1 %v11756_v19  ;;  %v10116_v38 = vpop.f32.mrf.mxu0  ;;  %v5589_v13 = vadd.f32 %v10056_v50, %v16154_v8  ;;  %v19159_v19 = vld [vmem:[#allocation17_spill] sm:$0xff]  ;;  %v19162_v50 = vpack.c.bf16 %v15374_v34, %v15712_v59 }
 0x31a   :  { %6255 = vmatmul.mubr.bf16.gmra.mxu0 %v4591_v16  ;;  %v10117_v23 = vadd.f32 %v10116_v38, %v10115_v12 }
 0x31b   :  { %6262 = vmatprep.mubr.bf16.mxu0 %v19152_v35  ;;  %v10118_v58 = vpop.f32.mrf.mxu0 }
 0x31c   :  { %6166 = vmatmul.mubr.bf16.gmra.mxu1 %v19153_v4  ;;  %v16274_v28 = vadd.f32 %v10117_v23, %v5586_v44  ;;  %v10057_v1 = vpop.f32.mrf.mxu1 }
 0x31d   :  { %6173 = vmatprep.mubr.bf16.mxu1 %v19154_v26  ;;  %v10119_v32 = vpop.f32.mrf.mxu0 }
 0x31e   :  { %v10120_v5 = vadd.f32 %v10119_v32, %v10118_v58  ;;  %v10058_v39 = vpop.f32.mrf.mxu1 }
 0x31f   :  { %v10059_v2 = vadd.f32 %v10058_v39, %v10057_v1  ;;  %v19163_v1 = vld [vmem:[#allocation66_spill] sm:$0xff]  ;;  %v19164_v39 = vpack.c.bf16 %v15336_v51, %v15747_v22 }
 0x320   :  { %v16280_v30 = vadd.f32 %v10120_v5, %v5589_v13  ;;  %v10060_v56 = vpop.f32.mrf.mxu1 }
 0x321   :  { %v5594_v6 = vadd.f32 %v10059_v2, %v16154_v8  ;;  %v19165_v2 = vld [vmem:[#allocation24_spill] sm:$0xff] }
 0x322   :  { %6263 = vmatmul.mubr.bf16.gmra.mxu0 %v19155_v60  ;;  %v10061_v20 = vpop.f32.mrf.mxu1 }
 0x323   :  { %6270 = vmatprep.mubr.bf16.mxu0 %v19156_v40  ;;  %v10062_v42 = vadd.f32 %v10061_v20, %v10060_v56 }
 0x324   :  { %6174 = vmatmul.mubr.bf16.gmra.mxu1 %v19157_v47 }
 0x325   :  { %6181 = vmatprep.mubr.bf16.mxu1 %v19158_v63  ;;  %v5597_v44 = vadd.f32 %v10062_v42, %v16154_v8 }
 0x326   :  { %v10121_v9 = vpop.f32.mrf.mxu0 }
 0x328   :  { %v10122_v16 = vpop.f32.mrf.mxu0  ;;  %v10063_v46 = vpop.f32.mrf.mxu1 }
 0x329   :  { %v10123_v35 = vadd.f32 %v10122_v16, %v10121_v9 }
 0x32a   :  { %6271 = vmatmul.mubr.bf16.gmra.mxu0 %v19159_v19  ;;  %v10124_v4 = vpop.f32.mrf.mxu0  ;;  %v10064_v12 = vpop.f32.mrf.mxu1 }
 0x32b   :  { %6278 = vmatprep.mubr.bf16.mxu0 %v19160_v57  ;;  %v16290_v26 = vadd.f32 %v10123_v35, %v5594_v6  ;;  %v10065_v38 = vadd.f32 %v10064_v12, %v10063_v46  ;;  %v19166_v35 = vld [vmem:[#allocation31_spill] sm:$0xff] }
 0x32c   :  { %6182 = vmatmul.mubr.bf16.gmra.mxu1 %v19161_v36  ;;  %v10125_v23 = vpop.f32.mrf.mxu0  ;;  %v10066_v58 = vpop.f32.mrf.mxu1 }
 0x32d   :  { %6189 = vmatprep.mubr.bf16.mxu1 %v19162_v50  ;;  %v10126_v13 = vadd.f32 %v10125_v23, %v10124_v4  ;;  %v5602_v5 = vadd.f32 %v10065_v38, %v16154_v8  ;;  %v19167_v4 = vld [vmem:[#allocation67_spill] sm:$0xff] }
 0x32e   :  { %v10127_v60 = vpop.f32.mrf.mxu0  ;;  %v10067_v32 = vpop.f32.mrf.mxu1 }
 0x32f   :  { %v16294_v40 = vadd.f32 %v10126_v13, %v5597_v44  ;;  %v10068_v34 = vadd.f32 %v10067_v32, %v10066_v58 }
 0x330   :  { %v10128_v59 = vpop.f32.mrf.mxu0  ;;  %v10069_v47 = vpop.f32.mrf.mxu1 }
 0x331   :  { %v10129_v63 = vadd.f32 %v10128_v59, %v10127_v60  ;;  %v5605_v9 = vadd.f32 %v10068_v34, %v16154_v8 }
 0x332   :  { %6279 = vmatmul.mubr.bf16.gmra.mxu0 %v19163_v1  ;;  %v10130_v56 = vpop.f32.mrf.mxu0  ;;  %v10070_v20 = vpop.f32.mrf.mxu1 }
 0x333   :  { %6286 = vmatprep.mubr.bf16.mxu0 %v4646_v41  ;;  %v16304_v42 = vadd.f32 %v10129_v63, %v5602_v5  ;;  %v10071_v19 = vadd.f32 %v10070_v20, %v10069_v47  ;;  %v19168_v47 = vld [vmem:[#allocation21_spill] sm:$0xff] }
 0x334   :  { %6190 = vmatmul.mubr.bf16.gmra.mxu1 %v19164_v39  ;;  %v10131_v6 = vpop.f32.mrf.mxu0  ;;  %v10072_v24 = vpop.f32.mrf.mxu1 }
 0x335   :  { %6327 = vmatprep.mubr.bf16.mxu1 %v19165_v2  ;;  %v10132_v33 = vadd.f32 %v10131_v6, %v10130_v56  ;;  %v5610_v57 = vadd.f32 %v10071_v19, %v16154_v8  ;;  %v19169_v2 = vld [vmem:[#allocation82_spill] sm:$0xff] }
 0x336   :  { %v10133_v41 = vpop.f32.mrf.mxu0  ;;  %v10073_v51 = vpop.f32.mrf.mxu1 }
 0x337   :  { %v16310_v22 = vadd.f32 %v10132_v33, %v5605_v9  ;;  %v10074_v16 = vadd.f32 %v10073_v51, %v10072_v24 }
 0x338   :  { %v10134_v46 = vpop.f32.mrf.mxu0  ;;  %v10155_v36 = vpop.f32.mrf.mxu1 }
 0x339   :  { %v10135_v50 = vadd.f32 %v10134_v46, %v10133_v41  ;;  %v5613_v10 = vadd.f32 %v10074_v16, %v16154_v8 }
 0x33a   :  { %6287 = vmatmul.mubr.bf16.gmra.mxu0 %v4645_v53  ;;  %v10136_v12 = vpop.f32.mrf.mxu0  ;;  %v10156_v44 = vpop.f32.mrf.mxu1 }
 0x33b   :  { %v16315_v38 = vadd.f32 %v10135_v50, %v5610_v57  ;;  %v10157_v55 = vadd.f32 %v10156_v44, %v10155_v36  ;;  %v19171_v50 = vpack.c.bf16 %v19055_v49, %v15847_v27  ;;  %v19172_v49 = vpack.c.bf16 %v15580_v18, %v15835_v3  ;;  %v11758_v3 = vld [vmem:[%s18339_s5 + $0x38] sm:$0xff]  }
 0x33c   :  { %6328 = vmatmul.mubr.bf16.vlgmr.msra.gmra.mxu1 %v19166_v35  ;;  %v10137_v53 = vpop.f32.mrf.mxu0  ;;  %v10158_v23 = vpop.f32.mrf.mxu1 }
 0x33d   :  { %6335 = vmatprep.mubr.bf16.mxu1 %v19167_v4  ;;  %v10138_v58 = vadd.f32 %v10137_v53, %v10136_v12  ;;  %v5748_v13 = vadd.f32 %v10157_v55, %v16169_v61 }
 0x33e   :  { %v10219_v60 = vpop.f32.mrf.mxu0  ;;  %v10159_v1 = vpop.f32.mrf.mxu1 }
 0x33f   :  { %v16319_v32 = vadd.f32 %v10138_v58, %v5613_v10  ;;  %v10160_v5 = vadd.f32 %v10159_v1, %v10158_v23 }
 0x340   :  { %v10220_v34 = vpop.f32.mrf.mxu0  ;;  %v10161_v59 = vpop.f32.mrf.mxu1 }
 0x341   :  { %v10221_v39 = vadd.f32 %v10220_v34, %v10219_v60  ;;  %v5751_v63 = vadd.f32 %v10160_v5, %v16175_v31  ;;  %v19170_v31 = vld [vmem:[#allocation84_spill] sm:$0xff] }
 0x342   :  { %v10222_v8 = vpop.f32.mrf.mxu0  ;;  %v10162_v56 = vpop.f32.mrf.mxu1 }
 0x343   :  { %v16324_v20 = vadd.f32 %v10221_v39, %v5748_v13  ;;  %v10163_v9 = vadd.f32 %v10162_v56, %v10161_v59 }
 0x344   :  { %6336 = vmatmul.mubr.bf16.gmra.mxu1 %v19168_v47  ;;  %v10223_v61 = vpop.f32.mrf.mxu0  ;;  %v10164_v19 = vpop.f32.mrf.mxu1 }
 0x345   :  { %6343 = vmatprep.mubr.bf16.mxu1 %v19169_v2  ;;  %v10224_v6 = vadd.f32 %v10223_v61, %v10222_v8  ;;  %v5756_v24 = vadd.f32 %v10163_v9, %v16188_v43  ;;  %v11757_v8 = vld [vmem:[%s18339_s5 + $0x78] sm:$0xff]  }
 0x346   :  { %v10165_v41 = vpop.f32.mrf.mxu1  ;;  %10587 = vmatprep.subr.bf16.mxu0 %v11757_v8  ;;  %v19173_v8 = vpack.c.bf16 %v15722_v11, %v15921_v52 }
 0x347   :  { %v16327_v51 = vadd.f32 %v10224_v6, %v5751_v63  ;;  %v10166_v57 = vadd.f32 %v10165_v41, %v10164_v19  ;;  %10588 = vmatpush3.bf16.msra.mxu0 %v11758_v3 }
 0x348   :  { %v10167_v46 = vpop.f32.mrf.mxu1 }
 0x349   :  { %v5759_v35 = vadd.f32 %v10166_v57, %v16203_v29 }
 0x34a   :  { %v10225_v33 = vpop.f32.mrf.mxu0  ;;  %v10168_v12 = vpop.f32.mrf.mxu1 }
 0x34b   :  { %v10169_v43 = vadd.f32 %v10168_v12, %v10167_v46  ;;  %v11759_v46 = vld [vmem:[%s18339_s5 + $0x70] sm:$0xff]  }
 0x34c   :  { %v10226_v16 = vpop.f32.mrf.mxu0  ;;  %6344 = vmatmul.mubr.bf16.gmra.mxu1 %v19170_v31  ;;  %v10170_v55 = vpop.f32.mrf.mxu1  ;;  %v11760_v31 = vld [vmem:[%s18339_s5 + $0x30] sm:$0xff]   ;;  %10589 = vmatprep.subr.bf16.mxu0 %v11759_v46 }
 0x34d   :  { %v10227_v36 = vadd.f32 %v10226_v16, %v10225_v33  ;;  %6351 = vmatprep.mubr.bf16.mxu1 %v19171_v50  ;;  %v5764_v23 = vadd.f32 %v10169_v43, %v16225_v62  ;;  %10590 = vmatpush3.bf16.msra.mxu0 %v11760_v31 }
 0x34e   :  { %v10228_v4 = vpop.f32.mrf.mxu0  ;;  %v10171_v13 = vpop.f32.mrf.mxu1 }
 0x34f   :  { %v16334_v44 = vadd.f32 %v10227_v36, %v5756_v24  ;;  %v10172_v1 = vadd.f32 %v10171_v13, %v10170_v55 }
 0x350   :  { %v10229_v10 = vpop.f32.mrf.mxu0 }
 0x351   :  { %v10230_v53 = vadd.f32 %v10229_v10, %v10228_v4  ;;  %v5767_v34 = vadd.f32 %v10172_v1, %v16238_v48  ;;  %v11761_v1 = vld [vmem:[%s18339_s5 + $0x68] sm:$0xff]  }
 0x352   :  { %v10231_v58 = vpop.f32.mrf.mxu0  ;;  %v10173_v5 = vpop.f32.mrf.mxu1  ;;  %10591 = vmatprep.subr.bf16.mxu0 %v11761_v1 }
 0x353   :  { %v16337_v60 = vadd.f32 %v10230_v53, %v5759_v35 }
 0x354   :  { %v10232_v29 = vpop.f32.mrf.mxu0  ;;  %6352 = vmatmul.mubr.bf16.gmra.mxu1 %v19172_v49  ;;  %v10174_v47 = vpop.f32.mrf.mxu1 }
 0x355   :  { %v10233_v27 = vadd.f32 %v10232_v29, %v10231_v58  ;;  %6359 = vmatprep.mubr.bf16.mxu1 %v15643_v14  ;;  %v10175_v62 = vadd.f32 %v10174_v47, %v10173_v5  ;;  %v11762_v29 = vld [vmem:[%s18339_s5 + $0x28] sm:$0xff]  }
 0x356   :  { %v10234_v59 = vpop.f32.mrf.mxu0  ;;  %v10176_v2 = vpop.f32.mrf.mxu1  ;;  %10592 = vmatpush3.bf16.msra.mxu0 %v11762_v29 }
 0x357   :  { %v16344_v39 = vadd.f32 %v10233_v27, %v5764_v23  ;;  %v5772_v18 = vadd.f32 %v10175_v62, %v16256_v15 }
 0x358   :  { %v10235_v63 = vpop.f32.mrf.mxu0  ;;  %v10177_v14 = vpop.f32.mrf.mxu1 }
 0x359   :  { %v10236_v56 = vadd.f32 %v10235_v63, %v10234_v59  ;;  %v10178_v61 = vadd.f32 %v10177_v14, %v10176_v2 }
 0x35a   :  { %v10237_v48 = vpop.f32.mrf.mxu0  ;;  %v10179_v6 = vpop.f32.mrf.mxu1 }
 0x35b   :  { %v16353_v9 = vadd.f32 %v10236_v56, %v5767_v34  ;;  %v5775_v33 = vadd.f32 %v10178_v61, %v16266_v54 }
 0x35c   :  { %v10238_v19 = vpop.f32.mrf.mxu0  ;;  %6360 = vmatmul.mubr.bf16.gmra.mxu1 %v15659_v21  ;;  %v10180_v41 = vpop.f32.mrf.mxu1 }
 0x35d   :  { %v10239_v24 = vadd.f32 %v10238_v19, %v10237_v48  ;;  %6367 = vmatprep.mubr.bf16.mxu1 %v15685_v45  ;;  %v10181_v16 = vadd.f32 %v10180_v41, %v10179_v6  ;;  %v11763_v48 = vld [vmem:[%s18339_s5 + $0x60] sm:$0xff]   ;;  %v19174_v41 = vpack.c.bf16 %v15788_v0, %v15912_v37  ;;  %v11767_v0 = vld [vmem:[%s18339_s5 + $0xb8] sm:$0xff]  }
 0x35e   :  { %v10240_v15 = vpop.f32.mrf.mxu0  ;;  %v10182_v21 = vpop.f32.mrf.mxu1  ;;  %10593 = vmatprep.subr.bf16.mxu0 %v11763_v48 }
 0x35f   :  { %v16358_v57 = vadd.f32 %v10239_v24, %v5772_v18  ;;  %v5780_v54 = vadd.f32 %v10181_v16, %v16274_v28 }
 0x360   :  { %v10241_v36 = vpop.f32.mrf.mxu0  ;;  %v10183_v50 = vpop.f32.mrf.mxu1 }
 0x361   :  { %v10242_v35 = vadd.f32 %v10241_v36, %v10240_v15  ;;  %v10184_v12 = vadd.f32 %v10183_v50, %v10182_v21 }
 0x362   :  { %v10243_v45 = vpop.f32.mrf.mxu0  ;;  %v10185_v10 = vpop.f32.mrf.mxu1 }
 0x363   :  { %v16367_v4 = vadd.f32 %v10242_v35, %v5775_v33  ;;  %v5783_v53 = vadd.f32 %v10184_v12, %v16280_v30  ;;  %v11765_v35 = vld [vmem:[%s18339_s5 + $0xf8] sm:$0xff]  }
 0x364   :  { %v10244_v43 = vpop.f32.mrf.mxu0  ;;  %6368 = vmatmul.mubr.bf16.gmra.mxu1 %v19080_v25  ;;  %v10186_v58 = vpop.f32.mrf.mxu1  ;;  %10651 = vmatprep.subr.bf16.mxu1 %v11765_v35 }
 0x365   :  { %v10245_v55 = vadd.f32 %v10244_v43, %v10243_v45  ;;  %6375 = vmatprep.mubr.bf16.mxu1 %v19081_v17  ;;  %v10187_v28 = vadd.f32 %v10186_v58, %v10185_v10  ;;  %10652 = vmatpush3.bf16.msra.mxu1 %v11767_v0  ;;  %v11770_v58 = vld [vmem:[%s18339_s5 + $0xb0] sm:$0xff]  }
 0x366   :  { %v10246_v23 = vpop.f32.mrf.mxu0  ;;  %v10188_v25 = vpop.f32.mrf.mxu1 }
 0x367   :  { %v16372_v13 = vadd.f32 %v10245_v55, %v5780_v54  ;;  %v5788_v30 = vadd.f32 %v10187_v28, %v16290_v26  ;;  %v11766_v54 = vld [vmem:[%s18339_s5 + $0x58] sm:$0xff]  }
 0x368   :  { %v10247_v5 = vpop.f32.mrf.mxu0  ;;  %v10189_v27 = vpop.f32.mrf.mxu1 }
 0x369   :  { %v10248_v49 = vadd.f32 %v10247_v5, %v10246_v23  ;;  %v10190_v59 = vadd.f32 %v10189_v27, %v10188_v25  ;;  %v11769_v23 = vld [vmem:[%s18339_s5 + $0xf0] sm:$0xff]  }
 0x36a   :  { %v10249_v17 = vpop.f32.mrf.mxu0  ;;  %v10191_v62 = vpop.f32.mrf.mxu1  ;;  %10653 = vmatprep.subr.bf16.mxu1 %v11769_v23  ;;  %v11772_v27 = vld [vmem:[%s18339_s5 + $0x50] sm:$0xff]  }
 0x36b   :  { %v16381_v34 = vadd.f32 %v10248_v49, %v5783_v53  ;;  %v5791_v2 = vadd.f32 %v10190_v59, %v16294_v40  ;;  %10654 = vmatpush3.bf16.msra.mxu1 %v11770_v58  ;;  %v11773_v59 = vld [vmem:[%s18339_s5 + $0xa8] sm:$0xff]  }
 0x36c   :  { %v10250_v47 = vpop.f32.mrf.mxu0  ;;  %6376 = vmatmul.mubr.bf16.gmra.mxu1 %v15797_v7  ;;  %v10192_v26 = vpop.f32.mrf.mxu1  ;;  %v11764_v7 = vld [vmem:[%s18339_s5 + $0x20] sm:$0xff]  }
 0x36d   :  { %v10251_v63 = vadd.f32 %v10250_v47, %v10249_v17  ;;  %6383 = vmatprep.mubr.bf16.mxu1 %v19173_v8  ;;  %v10193_v3 = vadd.f32 %v10192_v26, %v10191_v62  ;;  %10594 = vmatpush3.bf16.msra.mxu0 %v11764_v7  ;;  %v11771_v17 = vld [vmem:[%s18339_s5 + $0xe8] sm:$0xff]   ;;  %v11774_v62 = vld [vmem:[%s18339_s5 + $0x10] sm:$0xff]  }
 0x36e   :  { %v10252_v56 = vpop.f32.mrf.mxu0  ;;  %v10194_v61 = vpop.f32.mrf.mxu1  ;;  %10595 = vmatprep.subr.bf16.mxu0 %v11766_v54  ;;  %10655 = vmatprep.subr.bf16.mxu1 %v11771_v17 }
 0x36f   :  { %v16388_v18 = vadd.f32 %v10251_v63, %v5788_v30  ;;  %v5796_v19 = vadd.f32 %v10193_v3, %v16304_v42  ;;  %10656 = vmatpush3.bf16.msra.mxu1 %v11773_v59 }
 0x370   :  { %v10253_v14 = vpop.f32.mrf.mxu0  ;;  %v10195_v52 = vpop.f32.mrf.mxu1 }
 0x371   :  { %v10254_v40 = vadd.f32 %v10253_v14, %v10252_v56  ;;  %v10196_v24 = vadd.f32 %v10195_v52, %v10194_v61 }
 0x372   :  { %v10255_v11 = vpop.f32.mrf.mxu0  ;;  %v10197_v15 = vpop.f32.mrf.mxu1 }
 0x373   :  { %v16397_v6 = vadd.f32 %v10254_v40, %v5791_v2  ;;  %v5799_v46 = vadd.f32 %v10196_v24, %v16310_v22  ;;  %v11768_v22 = vld [vmem:[%s18339_s5 + $0x18] sm:$0xff]  }
 0x374   :  { %v10256_v33 = vpop.f32.mrf.mxu0  ;;  %6384 = vmatmul.mubr.bf16.gmra.mxu1 %v19174_v41  ;;  %v10198_v36 = vpop.f32.mrf.mxu1  ;;  %10596 = vmatpush3.bf16.msra.mxu0 %v11768_v22 }
 0x375   :  { %v10257_v16 = vadd.f32 %v10256_v33, %v10255_v11  ;;  %v10199_v42 = vadd.f32 %v10198_v36, %v10197_v15  ;;  %10597 = vmatprep.subr.bf16.mxu0 %v11772_v27  ;;  %v11776_v11 = vld [vmem:[%s18339_s5 + $0xa0] sm:$0xff]   ;;  %v11779_v36 = vld [vmem:[%s18339_s5 + $0x98] sm:$0xff]  }
 0x376   :  { %v10258_v31 = vpop.f32.mrf.mxu0  ;;  %v10200_v45 = vpop.f32.mrf.mxu1 }
 0x377   :  { %v16403_v21 = vadd.f32 %v10257_v16, %v5796_v19  ;;  %v5804_v12 = vadd.f32 %v10199_v42, %v16315_v38 }
 0x378   :  { %v10259_v37 = vpop.f32.mrf.mxu0  ;;  %v10201_v10 = vpop.f32.mrf.mxu1  ;;  %10598 = vmatpush3.bf16.msra.mxu0 %v11774_v62 }
 0x379   :  { %v10260_v50 = vadd.f32 %v10259_v37, %v10258_v31  ;;  %v10202_v53 = vadd.f32 %v10201_v10, %v10200_v45  ;;  %v11778_v31 = vld [vmem:[%s18339_s5 + $0x48] sm:$0xff]  }
 0x37a   :  { %v10261_v43 = vpop.f32.mrf.mxu0  ;;  %v10283_v1 = vpop.f32.mrf.mxu1  ;;  %10599 = vmatprep.subr.bf16.mxu0 %v11778_v31 }
 0x37b   :  { %v16418_v55 = vadd.f32 %v10260_v50, %v5799_v46  ;;  %v5807_v29 = vadd.f32 %v10202_v53, %v16319_v32  ;;  %v11777_v46 = vld [vmem:[%s18339_s5 + $0xd8] sm:$0xff]   ;;  %v11781_v50 = vld [vmem:[%s18339_s5 + $0xd0] sm:$0xff]  }
 0x37c   :  { %v10262_v28 = vpop.f32.mrf.mxu0  ;;  %v10284_v25 = vpop.f32.mrf.mxu1 }
 0x37d   :  { %v10263_v38 = vadd.f32 %v10262_v28, %v10261_v43  ;;  %v10285_v30 = vadd.f32 %v10284_v25, %v10283_v1 }
 0x37e   :  { %v10264_v5 = vpop.f32.mrf.mxu0  ;;  %v10286_v47 = vpop.f32.mrf.mxu1 }
 0x37f   :  { %v16427_v49 = vadd.f32 %v10263_v38, %v5804_v12  ;;  %v5942_v2 = vadd.f32 %v10285_v30, %v16324_v20  ;;  %v11775_v20 = vld [vmem:[%s18339_s5 + $0xe0] sm:$0xff]   ;;  %v11782_v12 = vld [vmem:[%s18339_s5 + $0x90] sm:$0xff]   ;;  %v11783_v38 = vld [vmem:[%s18339_s5 + $0xc8] sm:$0xff]  }
 0x380   :  { %v10265_v32 = vpop.f32.mrf.mxu0  ;;  %v10287_v56 = vpop.f32.mrf.mxu1  ;;  %10657 = vmatprep.subr.bf16.mxu1 %v11775_v20  ;;  %v11789_v20 = vld [vmem:[%s18339_s5 + $0x178] sm:$0xff]  }
 0x381   :  { %v10266_v63 = vadd.f32 %v10265_v32, %v10264_v5  ;;  %v10288_v3 = vadd.f32 %v10287_v56, %v10286_v47  ;;  %10658 = vmatpush3.bf16.msra.mxu1 %v11776_v11  ;;  %v11785_v5 = vld [vmem:[%s18339_s5 + $0x88] sm:$0xff]  }
 0x382   :  { %v10347_v8 = vpop.f32.mrf.mxu0  ;;  %v10289_v7 = vpop.f32.mrf.mxu1  ;;  %10659 = vmatprep.subr.bf16.mxu1 %v11777_v46 }
 0x383   :  { %v16442_v26 = vadd.f32 %v10266_v63, %v5807_v29  ;;  %v16445_v61 = vadd.f32 %v10288_v3, %v16327_v51  ;;  %v11784_v29 = vld [vmem:[%s18339_s5 + $0x40] sm:$0xff]  }
 0x384   :  { %v10348_v48 = vpop.f32.mrf.mxu0  ;;  %v10290_v19 = vpop.f32.mrf.mxu1  ;;  %v11787_v63 = vld [vmem:[%s18339_s5 + $0xc0] sm:$0xff]  }
 0x385   :  { %v10349_v14 = vadd.f32 %v10348_v48, %v10347_v8  ;;  %v10291_v24 = vadd.f32 %v10290_v19, %v10289_v7  ;;  %10660 = vmatpush3.bf16.msra.mxu1 %v11779_v36 }
 0x386   :  { %v16447_v40 = vpop.f32.mrf.mxu0  ;;  %v10292_v15 = vpop.f32.mrf.mxu1  ;;  %10661 = vmatprep.subr.bf16.mxu1 %v11781_v50 }
 0x387   :  { %v16455_v52 = vadd.f32 %v10349_v14, %v5942_v2  ;;  %v5950_v51 = vadd.f32 %v10291_v24, %v16334_v44  ;;  %v11780_v44 = vld [vmem:[%s18339_s5 + $0x8] sm:$0xff]   ;;  %v11788_v2 = vld [vmem:[%s18339_s5 + $0x80] sm:$0xff]  }
 0x388   :  { %v16457_v33 = vpop.f32.mrf.mxu0  ;;  %v10293_v16 = vpop.f32.mrf.mxu1  ;;  %10600 = vmatpush3.bf16.msra.mxu0 %v11780_v44 }
 0x389   :  { %v10294_v42 = vadd.f32 %v10293_v16, %v10292_v15  ;;  %10662 = vmatpush3.bf16.msra.mxu1 %v11782_v12  ;;  %10601 = vmatprep.subr.bf16.mxu0 %v11784_v29 }
 0x38a   :  { %v10353_v41 = vpop.f32.mrf.mxu0  ;;  %10663 = vmatprep.subr.bf16.mxu1 %v11783_v38 }
 0x38b   :  { %v5953_v37 = vadd.f32 %v10294_v42, %v16337_v60 }
 0x38c   :  { %v10354_v35 = vpop.f32.mrf.mxu0  ;;  %v10295_v54 = vpop.f32.mrf.mxu1 }
 0x38d   :  { %v10355_v0 = vadd.f32 %v10354_v35, %v10353_v41  ;;  %10664 = vmatpush3.bf16.msra.mxu1 %v11785_v5 }
 0x38e   :  { %v10356_v45 = vpop.f32.mrf.mxu0  ;;  %v10296_v22 = vpop.f32.mrf.mxu1  ;;  %10665 = vmatprep.subr.bf16.mxu1 %v11787_v63 }
 0x38f   :  { %v16479_v43 = vadd.f32 %v10355_v0, %v5950_v51  ;;  %v10297_v10 = vadd.f32 %v10296_v22, %v10295_v54 }
 0x390   :  { %v10357_v53 = vpop.f32.mrf.mxu0  ;;  %v10298_v23 = vpop.f32.mrf.mxu1 }
 0x391   :  { %v10358_v58 = vadd.f32 %v10357_v53, %v10356_v45  ;;  %v5958_v60 = vadd.f32 %v10297_v10, %v16344_v39  ;;  %v11786_v39 = vld [vmem:[%s18339_s5] sm:$0xff]   ;;  %10666 = vmatpush3.bf16.msra.mxu1 %v11788_v2 }
 0x392   :  { %v10359_v28 = vpop.f32.mrf.mxu0  ;;  %v10299_v1 = vpop.f32.mrf.mxu1  ;;  %10602 = vmatpush3.bf16.msra.mxu0 %v11786_v39 }
 0x393   :  { %v16491_v25 = vadd.f32 %v10358_v58, %v5953_v37  ;;  %v10300_v30 = vadd.f32 %v10299_v1, %v10298_v23  ;;  %10715 = vmatprep.subr.bf16.mxu0 %v11789_v20 }
 0x394   :  { %v10360_v17 = vpop.f32.mrf.mxu0  ;;  %v10301_v27 = vpop.f32.mrf.mxu1 }
 0x395   :  { %v10361_v59 = vadd.f32 %v10360_v17, %v10359_v28  ;;  %v5961_v32 = vadd.f32 %v10300_v30, %v16353_v9 }
 0x396   :  { %v10362_v47 = vpop.f32.mrf.mxu0  ;;  %v10302_v62 = vpop.f32.mrf.mxu1 }
 0x397   :  { %v16503_v8 = vadd.f32 %v10361_v59, %v5958_v60  ;;  %v10303_v56 = vadd.f32 %v10302_v62, %v10301_v27 }
 0x398   :  { %v10363_v3 = vpop.f32.mrf.mxu0  ;;  %v10304_v48 = vpop.f32.mrf.mxu1 }
 0x399   :  { %v10364_v7 = vadd.f32 %v10363_v3, %v10362_v47  ;;  %v5966_v9 = vadd.f32 %v10303_v56, %v16358_v57 }
 0x39a   :  { %v10365_v14 = vpop.f32.mrf.mxu0  ;;  %v10305_v19 = vpop.f32.mrf.mxu1 }
 0x39b   :  { %v16509_v11 = vadd.f32 %v10364_v7, %v5961_v32  ;;  %v10306_v24 = vadd.f32 %v10305_v19, %v10304_v48 }
 0x39c   :  { %v10366_v15 = vpop.f32.mrf.mxu0  ;;  %v10307_v51 = vpop.f32.mrf.mxu1 }
 0x39d   :  { %v10367_v41 = vadd.f32 %v10366_v15, %v10365_v14  ;;  %v5969_v16 = vadd.f32 %v10306_v24, %v16367_v4 }
 0x39e   :  { %v10368_v46 = vpop.f32.mrf.mxu0  ;;  %v10308_v31 = vpop.f32.mrf.mxu1 }
 0x39f   :  { %v16512_v36 = vadd.f32 %v10367_v41, %v5966_v9  ;;  %v10309_v57 = vadd.f32 %v10308_v31, %v10307_v51 }
 0x3a0   :  { %v10369_v42 = vpop.f32.mrf.mxu0  ;;  %v10310_v44 = vpop.f32.mrf.mxu1 }
 0x3a1   :  { %v10370_v35 = vadd.f32 %v10369_v42, %v10368_v46  ;;  %v5974_v54 = vadd.f32 %v10309_v57, %v16372_v13 }
 0x3a2   :  { %v10371_v0 = vpop.f32.mrf.mxu0  ;;  %v10311_v37 = vpop.f32.mrf.mxu1 }
 0x3a3   :  { %v16515_v45 = vadd.f32 %v10370_v35, %v5969_v16  ;;  %v10312_v22 = vadd.f32 %v10311_v37, %v10310_v44 }
 0x3a4   :  { %v10372_v50 = vpop.f32.mrf.mxu0  ;;  %v10313_v12 = vpop.f32.mrf.mxu1 }
 0x3a5   :  { %v10373_v10 = vadd.f32 %v10372_v50, %v10371_v0  ;;  %v5977_v4 = vadd.f32 %v10312_v22, %v16381_v34  ;;  %v11797_v0 = vld [vmem:[%s18339_s5 + $0x1f8] sm:$0xff]  }
 0x3a6   :  { %v10374_v53 = vpop.f32.mrf.mxu0  ;;  %v10314_v23 = vpop.f32.mrf.mxu1  ;;  %10779 = vmatprep.subr.bf16.mxu1 %v11797_v0 }
 0x3a7   :  { %v16518_v58 = vadd.f32 %v10373_v10, %v5974_v54  ;;  %v10315_v60 = vadd.f32 %v10314_v23, %v10313_v12 }
 0x3a8   :  { %v10375_v28 = vpop.f32.mrf.mxu0  ;;  %v10316_v1 = vpop.f32.mrf.mxu1 }
 0x3a9   :  { %v10376_v38 = vadd.f32 %v10375_v28, %v10374_v53  ;;  %v5982_v13 = vadd.f32 %v10315_v60, %v16388_v18 }
 0x3aa   :  { %v10377_v29 = vpop.f32.mrf.mxu0  ;;  %v10317_v5 = vpop.f32.mrf.mxu1 }
 0x3ab   :  { %v16521_v30 = vadd.f32 %v10376_v38, %v5977_v4  ;;  %v10318_v39 = vadd.f32 %v10317_v5, %v10316_v1 }
 0x3ac   :  { %v10378_v17 = vpop.f32.mrf.mxu0  ;;  %v10319_v27 = vpop.f32.mrf.mxu1 }
 0x3ad   :  { %v10379_v59 = vadd.f32 %v10378_v17, %v10377_v29  ;;  %v5985_v34 = vadd.f32 %v10318_v39, %v16397_v6 }
 0x3ae   :  { %v10380_v32 = vpop.f32.mrf.mxu0  ;;  %v10320_v47 = vpop.f32.mrf.mxu1 }
 0x3af   :  { %v16524_v62 = vadd.f32 %v10379_v59, %v5982_v13  ;;  %v10321_v63 = vadd.f32 %v10320_v47, %v10319_v27 }
 0x3b0   :  { %v10381_v2 = vpop.f32.mrf.mxu0  ;;  %v10322_v56 = vpop.f32.mrf.mxu1 }
 0x3b1   :  { %v10382_v3 = vadd.f32 %v10381_v2, %v10380_v32  ;;  %v5990_v18 = vadd.f32 %v10321_v63, %v16403_v21 }
 0x3b2   :  { %v10383_v48 = vpop.f32.mrf.mxu0  ;;  %v10323_v7 = vpop.f32.mrf.mxu1 }
 0x3b3   :  { %v16527_v9 = vadd.f32 %v10382_v3, %v5985_v34  ;;  %v10324_v14 = vadd.f32 %v10323_v7, %v10322_v56 }
 0x3b4   :  { %v10384_v19 = vpop.f32.mrf.mxu0  ;;  %v10325_v20 = vpop.f32.mrf.mxu1 }
 0x3b5   :  { %v10385_v24 = vadd.f32 %v10384_v19, %v10383_v48  ;;  %v5993_v6 = vadd.f32 %v10324_v14, %v16418_v55 }
 0x3b6   :  { %v10386_v15 = vpop.f32.mrf.mxu0  ;;  %v10326_v51 = vpop.f32.mrf.mxu1 }
 0x3b7   :  { %v16530_v41 = vadd.f32 %v10385_v24, %v5990_v18  ;;  %v10327_v16 = vadd.f32 %v10326_v51, %v10325_v20 }
 0x3b8   :  { %v10387_v46 = vpop.f32.mrf.mxu0  ;;  %v10328_v31 = vpop.f32.mrf.mxu1 }
 0x3b9   :  { %v10388_v57 = vadd.f32 %v10387_v46, %v10386_v15  ;;  %v5998_v21 = vadd.f32 %v10327_v16, %v16427_v49 }
 0x3ba   :  { %v10389_v42 = vpop.f32.mrf.mxu0  ;;  %v10329_v44 = vpop.f32.mrf.mxu1 }
 0x3bb   :  { %v16533_v35 = vadd.f32 %v10388_v57, %v5993_v6  ;;  %v10330_v54 = vadd.f32 %v10329_v44, %v10328_v31 }
 0x3bc   :  { %v10390_v55 = vpop.f32.mrf.mxu0  ;;  %v10411_v37 = vpop.f32.mrf.mxu1 }
 0x3bd   :  { %v10391_v22 = vadd.f32 %v10390_v55, %v10389_v42  ;;  %v6001_v50 = vadd.f32 %v10330_v54, %v16442_v26 }
 0x3be   :  { %v10392_v12 = vpop.f32.mrf.mxu0  ;;  %v10412_v10 = vpop.f32.mrf.mxu1 }
 0x3bf   :  { %v16539_v4 = vadd.f32 %v10391_v22, %v5998_v21  ;;  %v10413_v49 = vadd.f32 %v10412_v10, %v10411_v37 }
 0x3c0   :  { %v10393_v53 = vpop.f32.mrf.mxu0  ;;  %v16541_v23 = vpop.f32.mrf.mxu1 }
 0x3c1   :  { %v10394_v60 = vadd.f32 %v10393_v53, %v10392_v12  ;;  %v16544_v28 = vadd.f32 %v10413_v49, %v16455_v52 }
 0x3c2   :  { %v16546_v1 = vpop.f32.mrf.mxu0  ;;  %v16548_v38 = vpop.f32.mrf.mxu1 }
 0x3c3   :  { %v16550_v13 = vadd.f32 %v10394_v60, %v6001_v50 }
 0x3c4   :  { %v16552_v26 = vpop.f32.mrf.mxu0  ;;  %v10417_v29 = vpop.f32.mrf.mxu1 }
 0x3c6   :  { %v16554_v5 = vpop.f32.mrf.mxu0  ;;  %v10418_v39 = vpop.f32.mrf.mxu1 }
 0x3c7   :  { %v10419_v17 = vadd.f32 %v10418_v39, %v10417_v29 }
 0x3c8   :  { %v16556_v27 = vpop.f32.mrf.mxu0  ;;  %v10420_v59 = vpop.f32.mrf.mxu1 }
 0x3c9   :  { %v16559_v34 = vadd.f32 %v10419_v17, %v16479_v43 }
 0x3ca   :  { %v16561_v52 = vpop.f32.mrf.mxu0  ;;  %v10421_v32 = vpop.f32.mrf.mxu1 }
 0x3cb   :  { %v10422_v47 = vadd.f32 %v10421_v32, %v10420_v59 }
 0x3cc   :  { %v16563_v63 = vpop.f32.mrf.mxu0  ;;  %v10423_v2 = vpop.f32.mrf.mxu1 }
 0x3cd   :  { %v16566_v56 = vadd.f32 %v10422_v47, %v16491_v25 }
 0x3ce   :  { %v16568_v3 = vpop.f32.mrf.mxu0  ;;  %v10424_v18 = vpop.f32.mrf.mxu1 }
 0x3cf   :  { %v10425_v48 = vadd.f32 %v10424_v18, %v10423_v2 }
 0x3d0   :  { %v16570_v7 = vpop.f32.mrf.mxu0  ;;  %v10426_v14 = vpop.f32.mrf.mxu1 }
 0x3d1   :  { %v16573_v43 = vadd.f32 %v10425_v48, %v16503_v8 }
 0x3d2   :  { %v16575_v19 = vpop.f32.mrf.mxu0  ;;  %v10427_v20 = vpop.f32.mrf.mxu1 }
 0x3d3   :  { %v10428_v24 = vadd.f32 %v10427_v20, %v10426_v14 }
 0x3d4   :  { %v16577_v6 = vpop.f32.mrf.mxu0  ;;  %v10429_v15 = vpop.f32.mrf.mxu1 }
 0x3d5   :  { %v16580_v25 = vadd.f32 %v10428_v24, %v16509_v11 }
 0x3d6   :  { %v16582_v51 = vpop.f32.mrf.mxu0  ;;  %v10430_v16 = vpop.f32.mrf.mxu1 }
 0x3d7   :  { %v10431_v46 = vadd.f32 %v10430_v16, %v10429_v15 }
 0x3d8   :  { %v16584_v31 = vpop.f32.mrf.mxu0  ;;  %v10432_v57 = vpop.f32.mrf.mxu1 }
 0x3d9   :  { %v16587_v8 = vadd.f32 %v10431_v46, %v16512_v36 }
 0x3da   :  { %v16589_v21 = vpop.f32.mrf.mxu0  ;;  %v10433_v42 = vpop.f32.mrf.mxu1 }
 0x3db   :  { %v10434_v44 = vadd.f32 %v10433_v42, %v10432_v57 }
 0x3dc   :  { %v10494_v54 = vpop.f32.mrf.mxu0  ;;  %v10435_v0 = vpop.f32.mrf.mxu1 }
 0x3dd   :  { %v16592_v55 = vadd.f32 %v10434_v44, %v16515_v45 }
 0x3de   :  { %v10496_v11 = vpop.f32.mrf.mxu0  ;;  %v10436_v37 = vpop.f32.mrf.mxu1 }
 0x3df   :  { %v10437_v22 = vadd.f32 %v10436_v37, %v10435_v0 }
 0x3e0   :  { %v10497_v50 = vpop.f32.mrf.mxu0  ;;  %v10438_v12 = vpop.f32.mrf.mxu1 }
 0x3e1   :  { %v16595_v10 = vadd.f32 %v10437_v22, %v16518_v58 }
 0x3e2   :  { %v10499_v49 = vpop.f32.mrf.mxu0  ;;  %v10439_v36 = vpop.f32.mrf.mxu1 }
 0x3e3   :  { %v10440_v53 = vadd.f32 %v10439_v36, %v10438_v12 }
 0x3e4   :  { %v10500_v60 = vpop.f32.mrf.mxu0  ;;  %v10441_v29 = vpop.f32.mrf.mxu1 }
 0x3e5   :  { %v16598_v39 = vadd.f32 %v10440_v53, %v16521_v30 }
 0x3e6   :  { %v10502_v17 = vpop.f32.mrf.mxu0  ;;  %v10442_v59 = vpop.f32.mrf.mxu1 }
 0x3e7   :  { %v10443_v45 = vadd.f32 %v10442_v59, %v10441_v29  ;;  %v10416_v59 = vadd.f32 %v16548_v38, %v16541_v23 }
 0x3e8   :  { %v10503_v32 = vpop.f32.mrf.mxu0  ;;  %v10444_v47 = vpop.f32.mrf.mxu1 }
 0x3e9   :  { %v16601_v2 = vadd.f32 %v10443_v45, %v16524_v62 }
 0x3ea   :  { %v10505_v18 = vpop.f32.mrf.mxu0  ;;  %v10445_v48 = vpop.f32.mrf.mxu1 }
 0x3eb   :  { %v10446_v58 = vadd.f32 %v10445_v48, %v10444_v47 }
 0x3ec   :  { %v10506_v14 = vpop.f32.mrf.mxu0  ;;  %v10447_v20 = vpop.f32.mrf.mxu1 }
 0x3ed   :  { %v16604_v24 = vadd.f32 %v10446_v58, %v16527_v9  ;;  %v10352_v9 = vadd.f32 %v16457_v33, %v16447_v40  ;;  %v10480_v40 = vadd.f32 %v16556_v27, %v16554_v5  ;;  %v10483_v33 = vadd.f32 %v16563_v63, %v16561_v52 }
 0x3ee   :  { %v10508_v15 = vpop.f32.mrf.mxu0  ;;  %v10448_v16 = vpop.f32.mrf.mxu1 }
 0x3ef   :  { %v10449_v30 = vadd.f32 %v10448_v16, %v10447_v20  ;;  %v6042_v48 = vadd.f32 %v10352_v9, %v16445_v61  ;;  %v10489_v61 = vadd.f32 %v16577_v6, %v16575_v19  ;;  %v10507_v6 = vadd.f32 %v10506_v14, %v10505_v18 }
 0x3f0   :  { %v10509_v46 = vpop.f32.mrf.mxu0  ;;  %v10450_v57 = vpop.f32.mrf.mxu1 }
 0x3f1   :  { %v16607_v42 = vadd.f32 %v10449_v30, %v16530_v41  ;;  %v6139_v30 = vadd.f32 %v10416_v59, %v6042_v48 }
 0x3f2   :  { %v10511_v44 = vpop.f32.mrf.mxu0  ;;  %v10451_v0 = vpop.f32.mrf.mxu1 }
 0x3f3   :  { %v10452_v62 = vadd.f32 %v10451_v0, %v10450_v57  ;;  %v10498_v0 = vadd.f32 %v10497_v50, %v10496_v11 }
 0x3f4   :  { %v10512_v37 = vpop.f32.mrf.mxu0  ;;  %v10453_v22 = vpop.f32.mrf.mxu1 }
 0x3f5   :  { %v16610_v12 = vadd.f32 %v10452_v62, %v16533_v35  ;;  %v10477_v35 = vadd.f32 %v16552_v26, %v16546_v1  ;;  %v10492_v1 = vadd.f32 %v16584_v31, %v16582_v51  ;;  %v10495_v26 = vadd.f32 %v10494_v54, %v16589_v21 }
 0x3f6   :  { %v10514_v36 = vpop.f32.mrf.mxu0  ;;  %v10454_v53 = vpop.f32.mrf.mxu1  ;;  %v6236_v62 = vadd.f32 %v10480_v40, %v6139_v30  ;;  %v10513_v50 = vadd.f32 %v10512_v37, %v10511_v44 }
 0x3f7   :  { %v10455_v29 = vadd.f32 %v10454_v53, %v10453_v22  ;;  %v6233_v52 = vadd.f32 %v10477_v35, %v16544_v28  ;;  %v6241_v22 = vadd.f32 %v10483_v33, %v16559_v34  ;;  %v16639_v31 = vadd.f32 %v10492_v1, %v16580_v25 }
 0x3f8   :  { %v10515_v45 = vpop.f32.mrf.mxu0  ;;  %v10456_v41 = vpop.f32.mrf.mxu1  ;;  %v16642_v21 = vadd.f32 %v10495_v26, %v16587_v8  ;;  %v16645_v28 = vadd.f32 %v10498_v0, %v16592_v55  ;;  %v10510_v34 = vadd.f32 %v10509_v46, %v10508_v15  ;;  %v16660_v53 = vadd.f32 %v10513_v50, %v16607_v42 }
 0x3f9   :  { %v6192_v47 = vadd.f32 %v10455_v29, %v16539_v4  ;;  %v10486_v4 = vadd.f32 %v16570_v7, %v16568_v3  ;;  %v10501_v3 = vadd.f32 %v10500_v60, %v10499_v49  ;;  %v10504_v7 = vadd.f32 %v10503_v32, %v10502_v17 }
 0x3fa   :  { %v10517_v58 = vpop.f32.mrf.mxu0  ;;  %v10457_v20 = vpop.f32.mrf.mxu1  ;;  %v10516_v25 = vadd.f32 %v10515_v45, %v10514_v36  ;;  %v16654_v32 = vadd.f32 %v10507_v6, %v16601_v2  ;;  %v16657_v15 = vadd.f32 %v10510_v34, %v16604_v24 }
 0x3fb   :  { %v10458_v16 = vadd.f32 %v10457_v20, %v10456_v41  ;;  %v6244_v19 = vadd.f32 %v10486_v4, %v16566_v56  ;;  %v16651_v60 = vadd.f32 %v10504_v7, %v16598_v39 }
 0x3fc   :  { %v10518_v23 = vpop.f32.mrf.mxu0  ;;  %v10539_v38 = vpop.f32.mrf.mxu1  ;;  %v16663_v29 = vadd.f32 %v10516_v25, %v16610_v12 }
 0x3fd   :  { %v6195_v57 = vadd.f32 %v10458_v16, %v16550_v13  ;;  %v16636_v13 = vadd.f32 %v10489_v61, %v16573_v43  ;;  %v16648_v43 = vadd.f32 %v10501_v3, %v16595_v10  ;;  %v10519_v17 = vadd.f32 %v10518_v23, %v10517_v58 }
 0x3fe   :  { %v10520_v5 = vpop.f32.mrf.mxu0  ;;  %v10540_v27 = vpop.f32.mrf.mxu1 }
 0x3ff   :  { %v10541_v63 = vadd.f32 %v10540_v27, %v10539_v38  ;;  %v16665_v2 = vadd.f32 %v10519_v17, %v6192_v47 }
 0x400   :  { %v10542_v9 = vpop.f32.mrf.mxu1  ;;  %v10521_v54 = vpop.f32.mrf.mxu0 }
 0x401   :  { %v6330_v51 = vadd.f32 %v10541_v63, %v6233_v52  ;;  %v10522_v55 = vadd.f32 %v10521_v54, %v10520_v5 }
 0x402   :  { %v10543_v11 = vpop.f32.mrf.mxu1 }
 0x403   :  { %vm6392_vm9 = vcmp.gt.f32.partialorder %v6330_v51, 0.0  ;;  %v6408_v56 = vmul.f32 0.01, %v6330_v51  ;;  %v10544_v49 = vadd.f32 %v10543_v11, %v10542_v9  ;;  %v16671_v41 = vadd.f32 %v10522_v55, %v6195_v57 }
 0x404   :  { %v10545_v8 = vpop.f32.mrf.mxu1 }
 0x405   :  { %v6424_v18 = vsel %vm6392_vm9, %v6330_v51, %v6408_v56  ;;  %v6333_v14 = vadd.f32 %v10544_v49, %v6236_v62 }
 0x406   :  { %v6602_v46 = vrot.slane %v6424_v18, 1  ;;  %v6634_v44 = vrot.slane %v6424_v18, 7  ;;  %v6666_v37 = vrot.slane %v6424_v18, 5  ;;  %v10546_v10 = vpop.f32.mrf.mxu1 }
 0x407   :  { %vm6393_vm10 = vcmp.gt.f32.partialorder %v6333_v14, 0.0  ;;  %v6409_v39 = vmul.f32 0.01, %v6333_v14  ;;  %v10547_v36 = vadd.f32 %v10546_v10, %v10545_v8 }
 0x408   :  { %v10548_v59 = vpop.f32.mrf.mxu1  ;;  %v16668_v45 = vsel %vm585_vm0, %v6602_v46, %v6634_v44  ;;  %v6714_v24 = vsel %vm585_vm0, %v6634_v44, %v6666_v37 }
 0x409   :  { %v6425_v48 = vsel %vm6393_vm10, %v6333_v14, %v6409_v39  ;;  %v6338_v58 = vadd.f32 %v10547_v36, %v6241_v22  ;;  %v6760_v42 = vrot.slane %v16668_v45, 1  ;;  %v6761_v12 = vrot.slane %v6714_v24, 1 }
 0x40a   :  { %v6601_v20 = vrot.slane %v6425_v48, 1  ;;  %v6633_v35 = vrot.slane %v6425_v48, 7  ;;  %v6665_v16 = vrot.slane %v6425_v48, 5  ;;  %v10549_v30 = vpop.f32.mrf.mxu1  ;;  %v6816_v33 = vrot.slane %v16668_v45, 2 }
 0x40b   :  { %vm6394_vm11 = vcmp.gt.f32.partialorder %v6338_v58, 0.0  ;;  %v6410_v47 = vmul.f32 0.01, %v6338_v58  ;;  %v10550_v40 = vadd.f32 %v10549_v30, %v10548_v59  ;;  %v16680_v61 = vsel %vm706_vm1, %v6760_v42, %v6761_v12  ;;  %v11790_v59 = vld [vmem:[%s18339_s5 + $0x138] sm:$0xff]  }
 0x40c   :  { %v10551_v23 = vpop.f32.mrf.mxu1  ;;  %v16676_v38 = vsel %vm585_vm0, %v6601_v20, %v6633_v35  ;;  %v6713_v4 = vsel %vm585_vm0, %v6633_v35, %v6665_v16  ;;  %v6817_v57 = vrot.slane %v6714_v24, 2  ;;  %v11801_v24 = vld [vmem:[%s18339_s5 + $0x1f0] sm:$0xff]  }
 0x40d   :  { %v6426_v1 = vsel %vm6394_vm11, %v6338_v58, %v6410_v47  ;;  %v6341_v26 = vadd.f32 %v10550_v40, %v6244_v19  ;;  %v6813_v0 = vrot.slane %v16676_v38, 2  ;;  %v6889_v5 = vpack.c.bf16 %v16668_v45, %v16676_v38  ;;  %v11791_v35 = vld [vmem:[%s18339_s5 + $0x170] sm:$0xff]  }
 0x40e   :  { %v6603_v27 = vrot.slane %v6426_v1, 1  ;;  %v6635_v52 = vrot.slane %v6426_v1, 7  ;;  %v6667_v63 = vrot.slane %v6426_v1, 5  ;;  %v10552_v62 = vpop.f32.mrf.mxu1  ;;  %v6892_v22 = vpack.c.bf16 %v16676_v38, %v16668_v45 }
 0x40f   :  { %vm6395_vm12 = vcmp.gt.f32.partialorder %v6341_v26, 0.0  ;;  %v6411_v3 = vmul.f32 0.01, %v6341_v26  ;;  %v10553_v7 = vadd.f32 %v10552_v62, %v10551_v23  ;;  %v6757_v9 = vrot.slane %v16676_v38, 1 }
 0x410   :  { %7510 = vmatprep.mubr.bf16.mxu1 %v6892_v22  ;;  %v10554_v6 = vpop.f32.mrf.mxu1  ;;  %v6758_v19 = vrot.slane %v6713_v4, 1  ;;  %v6814_v51 = vrot.slane %v6713_v4, 2  ;;  %v16689_v34 = vsel %vm819_vm2, %v6816_v33, %v6817_v57  ;;  %v16692_v54 = vsel %vm585_vm0, %v6603_v27, %v6635_v52  ;;  %v11802_v4 = vld [vmem:[%s18339_s5 + $0x1b0] sm:$0xff]  }
 0x411   :  { %v16694_v11 = vsel %vm6395_vm12, %v6341_v26, %v6411_v3  ;;  %v6346_v50 = vadd.f32 %v10553_v7, %v16636_v13  ;;  %v6715_v56 = vsel %vm585_vm0, %v6635_v52, %v6667_v63  ;;  %v6763_v49 = vrot.slane %v16692_v54, 1  ;;  %v11799_v13 = vld [vmem:[%s18339_s5 + $0x1b8] sm:$0xff]   ;;  %v11792_v27 = vld [vmem:[%s18339_s5 + $0x130] sm:$0xff]   ;;  %v11803_v52 = vld [vmem:[%s18339_s5 + $0x1e8] sm:$0xff]  }
 0x412   :  { %v6604_v25 = vrot.slane %v16694_v11, 1  ;;  %v6636_v17 = vrot.slane %v16694_v11, 7  ;;  %v6668_v8 = vrot.slane %v16694_v11, 5  ;;  %v10555_v55 = vpop.f32.mrf.mxu1  ;;  %v16703_v18 = vsel %vm706_vm1, %v6757_v9, %v6758_v19  ;;  %v11793_v3 = vld [vmem:[%s18339_s5 + $0x168] sm:$0xff]   ;;  %v11807_v11 = vld [vmem:[%s18339_s5 + $0x1e0] sm:$0xff]  }
 0x413   :  { %vm6396_vm13 = vcmp.gt.f32.partialorder %v6346_v50, 0.0  ;;  %v6412_v14 = vmul.f32 0.01, %v6346_v50  ;;  %v10556_v46 = vadd.f32 %v10555_v55, %v10554_v6  ;;  %v16706_v44 = vsel %vm819_vm2, %v6813_v0, %v6814_v51 }
 0x414   :  { %v6890_v37 = vpack.c.bf16 %v16680_v61, %v16703_v18  ;;  %v6891_v10 = vpack.c.bf16 %v16689_v34, %v16706_v44  ;;  %v10557_v36 = vpop.f32.mrf.mxu1  ;;  %v6764_v45 = vrot.slane %v6715_v56, 1  ;;  %v6820_v42 = vrot.slane %v6715_v56, 2  ;;  %v11805_v56 = vld [vmem:[%s18339_s5 + $0x1a8] sm:$0xff]  }
 0x415   :  { %v6428_v48 = vsel %vm6396_vm13, %v6346_v50, %v6412_v14  ;;  %v6349_v58 = vadd.f32 %v10556_v46, %v16639_v31  ;;  %v16727_v20 = vsel %vm585_vm0, %v6604_v25, %v6636_v17  ;;  %v6819_v0 = vrot.slane %v16692_v54, 2 }
 0x416   :  { %v6605_v16 = vrot.slane %v6428_v48, 1  ;;  %v6637_v30 = vrot.slane %v6428_v48, 7  ;;  %v6669_v12 = vrot.slane %v6428_v48, 5  ;;  %7413 = vmatprep.mubr.bf16.mxu0 %v6890_v37  ;;  %7511 = vmatmul.mubr.bf16.vlgmr.msra.gmra.mxu1 %v6891_v10  ;;  %v10558_v47 = vpop.f32.mrf.mxu1  ;;  %v16733_v40 = vsel %vm706_vm1, %v6763_v49, %v6764_v45 }
 0x417   :  { %vm6397_vm14 = vcmp.gt.f32.partialorder %v6349_v58, 0.0  ;;  %v6413_v31 = vmul.f32 0.01, %v6349_v58  ;;  %7414 = vmatmul.mubr.bf16.vlgmr.msra.gmra.mxu0 %v6889_v5  ;;  %v10559_v33 = vadd.f32 %v10558_v47, %v10557_v36  ;;  %v16737_v23 = vpack.c.bf16 %v16733_v40, %v16703_v18  ;;  %10780 = vmatpush3.bf16.msra.mxu1 %v11799_v13  ;;  %v11794_v13 = vld [vmem:[%s18339_s5 + $0x128] sm:$0xff]   ;;  %v11795_v36 = vld [vmem:[%s18339_s5 + $0x160] sm:$0xff]  }
 0x418   :  { %10716 = vmatpush3.bf16.msra.mxu0 %v11790_v59  ;;  %v6822_v57 = vrot.slane %v16727_v20, 2  ;;  %v6898_v1 = vpack.c.bf16 %v16727_v20, %v16692_v54  ;;  %v10560_v26 = vpop.f32.mrf.mxu1  ;;  %v16748_v5 = vpack.c.bf16 %v16692_v54, %v16676_v38  ;;  %10781 = vmatprep.subr.bf16.mxu1 %v11801_v24  ;;  %v16762_v38 = vsel %vm585_vm0, %v6605_v16, %v6637_v30  ;;  %v11808_v16 = vld [vmem:[%s18339_s5 + $0x1a0] sm:$0xff]  }
 0x419   :  { %v16757_v63 = vsel %vm6397_vm14, %v6349_v58, %v6413_v31  ;;  %v6354_v62 = vadd.f32 %v10559_v33, %v16642_v21  ;;  %7421 = vmatprep.mubr.bf16.mxu0 %v16737_v23  ;;  %10717 = vmatprep.subr.bf16.mxu0 %v11791_v35  ;;  %v6766_v22 = vrot.slane %v16727_v20, 1  ;;  %v16772_v19 = vsel %vm819_vm2, %v6819_v0, %v6820_v42 }
 0x41a   :  { %v6606_v7 = vrot.slane %v16757_v63, 1  ;;  %v6638_v9 = vrot.slane %v16757_v63, 7  ;;  %v6670_v6 = vrot.slane %v16757_v63, 5  ;;  %7518 = vmatprep.mubr.bf16.mxu1 %v6898_v1  ;;  %v10561_v21 = vpop.f32.mrf.mxu1  ;;  %v16776_v50 = vpack.c.bf16 %v16772_v19, %v16706_v44 }
 0x41b   :  { %vm6398_vm15 = vcmp.gt.f32.partialorder %v6354_v62, 0.0  ;;  %v6414_v51 = vmul.f32 0.01, %v6354_v62  ;;  %v10562_v54 = vadd.f32 %v10561_v21, %v10560_v26  ;;  %10782 = vmatpush3.bf16.msra.mxu1 %v11802_v4  ;;  %v6716_v25 = vsel %vm585_vm0, %v6636_v17, %v6668_v8  ;;  %v11796_v4 = vld [vmem:[%s18339_s5 + $0x120] sm:$0xff]  }
 0x41c   :  { %v10563_v49 = vpop.f32.mrf.mxu1  ;;  %10718 = vmatpush3.bf16.msra.mxu0 %v11792_v27  ;;  %v16787_v55 = vsel %vm585_vm0, %v6637_v30, %v6669_v12  ;;  %v6769_v14 = vrot.slane %v16762_v38, 1  ;;  %v16793_v46 = vsel %vm585_vm0, %v6606_v7, %v6638_v9  ;;  %10783 = vmatprep.subr.bf16.mxu1 %v11803_v52  ;;  %v6767_v37 = vrot.slane %v6716_v25, 1  ;;  %v11798_v52 = vld [vmem:[%s18339_s5 + $0x158] sm:$0xff]  }
 0x41d   :  { %v6430_v17 = vsel %vm6398_vm15, %v6354_v62, %v6414_v51  ;;  %v6357_v8 = vadd.f32 %v10562_v54, %v16645_v28  ;;  %v6770_v10 = vrot.slane %v16787_v55, 1  ;;  %10719 = vmatprep.subr.bf16.mxu0 %v11793_v3  ;;  %v6823_v58 = vrot.slane %v6716_v25, 2  ;;  %v11809_v62 = vld [vmem:[%s18339_s5 + $0x1d8] sm:$0xff]  }
 0x41e   :  { %v6607_v59 = vrot.slane %v6430_v17, 1  ;;  %v6639_v45 = vrot.slane %v6430_v17, 7  ;;  %v6671_v24 = vrot.slane %v6430_v17, 5  ;;  %7519 = vmatmul.mubr.bf16.gmra.mxu1 %v16776_v50  ;;  %v10564_v48 = vpop.f32.mrf.mxu1  ;;  %v16809_v35 = vsel %vm706_vm1, %v6766_v22, %v6767_v37 }
 0x41f   :  { %vm6399_vm3 = vcmp.gt.f32.partialorder %v6357_v8, 0.0  ;;  %v6415_v42 = vmul.f32 0.01, %v6357_v8  ;;  %7422 = vmatmul.mubr.bf16.gmra.mxu0 %v16748_v5  ;;  %v10565_v28 = vadd.f32 %v10564_v48, %v10563_v49  ;;  %10784 = vmatpush3.bf16.msra.mxu1 %v11805_v56  ;;  %v16818_v12 = vsel %vm706_vm1, %v6769_v14, %v6770_v10  ;;  %v11811_v49 = vld [vmem:[%s18339_s5 + $0x198] sm:$0xff]   ;;  %v11814_v48 = vld [vmem:[%s18339_s5 + $0x190] sm:$0xff]  }
 0x420   :  { %v16815_v30 = vsel %vm585_vm0, %v6607_v59, %v6639_v45  ;;  %v6826_v47 = vrot.slane %v16787_v55, 2  ;;  %v10566_v33 = vpop.f32.mrf.mxu1  ;;  %10720 = vmatpush3.bf16.msra.mxu0 %v11794_v13  ;;  %10785 = vmatprep.subr.bf16.mxu1 %v11807_v11  ;;  %v16831_v0 = vpack.c.bf16 %v16818_v12, %v16809_v35  ;;  %v6828_v27 = vrot.slane %v16793_v46, 2  ;;  %v11800_v11 = vld [vmem:[%s18339_s5 + $0x118] sm:$0xff]  }
 0x421   :  { %v16826_v1 = vsel %vm6399_vm3, %v6357_v8, %v6415_v42  ;;  %v6362_v26 = vadd.f32 %v10565_v28, %v16648_v43  ;;  %10721 = vmatprep.subr.bf16.mxu0 %v11795_v36  ;;  %v6904_v7 = vpack.c.bf16 %v16793_v46, %v16762_v38  ;;  %v16849_v56 = vsel %vm819_vm2, %v6822_v57, %v6823_v58 }
 0x422   :  { %v6608_v22 = vrot.slane %v16826_v1, 1  ;;  %v18580_v3 = vrot.slane %v16826_v1, 7  ;;  %v10567_v21 = vpop.f32.mrf.mxu1  ;;  %7429 = vmatprep.mubr.bf16.mxu0 %v16831_v0  ;;  %v6825_v25 = vrot.slane %v16762_v38, 2  ;;  %v16857_v55 = vpack.c.bf16 %v16762_v38, %v16727_v20  ;;  %v11813_v20 = vld [vmem:[%s18339_s5 + $0x1d0] sm:$0xff]  }
 0x423   :  { %vm6400_vm4 = vcmp.gt.f32.partialorder %v6362_v26, 0.0  ;;  %v6416_v51 = vmul.f32 0.01, %v6362_v26  ;;  %v10568_v54 = vadd.f32 %v10567_v21, %v10566_v33  ;;  %10786 = vmatpush3.bf16.msra.mxu1 %v11808_v16  ;;  %7526 = vmatprep.mubr.bf16.mxu1 %v6904_v7  ;;  %v6718_v57 = vsel %vm585_vm0, %v6638_v9, %v6670_v6  ;;  %v11804_v6 = vld [vmem:[%s18339_s5 + $0x150] sm:$0xff]  }
 0x424   :  { %v10569_v14 = vpop.f32.mrf.mxu1  ;;  %v16865_v13 = vsel %vm585_vm0, %v6639_v45, %v6671_v24  ;;  %10722 = vmatpush3.bf16.msra.mxu0 %v11796_v4  ;;  %v6772_v63 = vrot.slane %v16793_v46, 1  ;;  %v6773_v9 = vrot.slane %v6718_v57, 1  ;;  %10787 = vmatprep.subr.bf16.mxu1 %v11809_v62  ;;  %v16885_v36 = vsel %vm819_vm2, %v6825_v25, %v6826_v47  ;;  %v11806_v33 = vld [vmem:[%s18339_s5 + $0x110] sm:$0xff]   ;;  %v11815_v4 = vld [vmem:[%s18339_s5 + $0x1c8] sm:$0xff]  }
 0x425   :  { %v16874_v38 = vsel %vm6400_vm4, %v6362_v26, %v6416_v51  ;;  %v6365_v17 = vadd.f32 %v10568_v54, %v16651_v60  ;;  %10723 = vmatprep.subr.bf16.mxu0 %v11798_v52  ;;  %v16889_v45 = vpack.c.bf16 %v16885_v36, %v16849_v56  ;;  %v6775_v42 = vrot.slane %v16815_v30, 1 }
 0x426   :  { %v6610_v8 = vrot.slane %v16874_v38, 1  ;;  %v6642_v37 = vrot.slane %v16874_v38, 7  ;;  %v6674_v10 = vrot.slane %v16874_v38, 5  ;;  %v10570_v59 = vpop.f32.mrf.mxu1  ;;  %v16896_v58 = vsel %vm706_vm1, %v6772_v63, %v6773_v9 }
 0x427   :  { %vm6401_vm5 = vcmp.gt.f32.partialorder %v6365_v17, 0.0  ;;  %v6417_v60 = vmul.f32 0.01, %v6365_v17  ;;  %7430 = vmatmul.mubr.bf16.gmra.mxu0 %v16857_v55  ;;  %v10571_v24 = vadd.f32 %v10570_v59, %v10569_v14  ;;  %10788 = vmatpush3.bf16.msra.mxu1 %v11811_v49  ;;  %v6776_v28 = vrot.slane %v16865_v13, 1  ;;  %v11810_v14 = vld [vmem:[%s18339_s5 + $0x148] sm:$0xff]   ;;  %v11819_v59 = vld [vmem:[%s18339_s5 + $0x1c0] sm:$0xff]  }
 0x428   :  { %v6829_v16 = vrot.slane %v6718_v57, 2  ;;  %v10572_v47 = vpop.f32.mrf.mxu1  ;;  %10724 = vmatpush3.bf16.msra.mxu0 %v11800_v11  ;;  %10789 = vmatprep.subr.bf16.mxu1 %v11813_v20  ;;  %v6832_v62 = vrot.slane %v16865_v13, 2  ;;  %v16927_v13 = vsel %vm585_vm0, %v6608_v22, %v18580_v3  ;;  %v11817_v11 = vld [vmem:[%s18339_s5 + $0x188] sm:$0xff]   ;;  %v6831_v9 = vrot.slane %v16815_v30, 2 }
 0x429   :  { %v6433_v26 = vsel %vm6401_vm5, %v6365_v17, %v6417_v60  ;;  %7527 = vmatmul.mubr.bf16.gmra.mxu1 %v16889_v45  ;;  %v6370_v52 = vadd.f32 %v10571_v24, %v16654_v32  ;;  %10725 = vmatprep.subr.bf16.mxu0 %v11804_v6  ;;  %v16913_v49 = vsel %vm706_vm1, %v6775_v42, %v6776_v28  ;;  %v11812_v22 = vld [vmem:[%s18339_s5 + $0x108] sm:$0xff]   ;;  %v11816_v42 = vld [vmem:[%s18339_s5 + $0x140] sm:$0xff]  }
 0x42a   :  { %v6609_v21 = vrot.slane %v6433_v26, 1  ;;  %v6641_v51 = vrot.slane %v6433_v26, 7  ;;  %v6673_v54 = vrot.slane %v6433_v26, 5  ;;  %v10573_v25 = vpop.f32.mrf.mxu1  ;;  %v16920_v32 = vpack.c.bf16 %v16913_v49, %v16896_v58 }
 0x42b   :  { %vm6402_vm6 = vcmp.gt.f32.partialorder %v6370_v52, 0.0  ;;  %v6418_v57 = vmul.f32 0.01, %v6370_v52  ;;  %10790 = vmatpush3.bf16.msra.mxu1 %v11814_v48  ;;  %v6910_v20 = vpack.c.bf16 %v16927_v13, %v16815_v30  ;;  %v10574_v17 = vadd.f32 %v10573_v25, %v10572_v47 }
 0x42c   :  { %v16937_v63 = vsel %vm819_vm2, %v6828_v27, %v6829_v16  ;;  %v10575_v6 = vpop.f32.mrf.mxu1  ;;  %10726 = vmatpush3.bf16.msra.mxu0 %v11806_v33  ;;  %10791 = vmatprep.subr.bf16.mxu1 %v11815_v4  ;;  %v16951_v27 = vpack.c.bf16 %v16815_v30, %v16793_v46  ;;  %v16954_v24 = vsel %vm585_vm0, %v6609_v21, %v6641_v51  ;;  %v11820_v21 = vld [vmem:[%s18339_s5 + $0x180] sm:$0xff]  }
 0x42d   :  { %v16946_v60 = vsel %vm6402_vm6, %v6370_v52, %v6418_v57  ;;  %7437 = vmatprep.mubr.bf16.mxu0 %v16920_v32  ;;  %v16959_v48 = vsel %vm585_vm0, %v6610_v8, %v6642_v37  ;;  %7534 = vmatprep.mubr.bf16.mxu1 %v6910_v20  ;;  %v6373_v46 = vadd.f32 %v10574_v17, %v16657_v15  ;;  %v11818_v57 = vld [vmem:[%s18339_s5 + $0x100] sm:$0xff]   ;;  %v6778_v17 = vrot.slane %v16954_v24, 1 }
 0x42e   :  { %v6611_v28 = vrot.slane %v16946_v60, 1  ;;  %v6643_v16 = vrot.slane %v16946_v60, 7  ;;  %v6675_v47 = vrot.slane %v16946_v60, 5  ;;  %v10576_v33 = vpop.f32.mrf.mxu1  ;;  %10727 = vmatprep.subr.bf16.mxu0 %v11810_v14  ;;  %v16969_v4 = vsel %vm819_vm2, %v6831_v9, %v6832_v62 }
 0x42f   :  { %7438 = vmatmul.mubr.bf16.gmra.mxu0 %v16951_v27  ;;  %v10577_v8 = vadd.f32 %v10576_v33, %v10575_v6  ;;  %v6837_v26 = vrot.slane %v16959_v48, 2  ;;  %v6919_v52 = vpack.c.bf16 %v16954_v24, %v16959_v48  ;;  %10792 = vmatpush3.bf16.msra.mxu1 %v11817_v11  ;;  %vm6403_vm7 = vcmp.gt.f32.partialorder %v6373_v46, 0.0 }
 0x430   :  { %v6419_v15 = vmul.f32 0.01, %v6373_v46  ;;  %v16980_v25 = vpack.c.bf16 %v16969_v4, %v16937_v63  ;;  %v10578_v62 = vpop.f32.mrf.mxu1  ;;  %v6721_v14 = vsel %vm585_vm0, %v6641_v51, %v6673_v54  ;;  %10728 = vmatpush3.bf16.msra.mxu0 %v11812_v22  ;;  %10793 = vmatprep.subr.bf16.mxu1 %v11819_v59  ;;  %v6722_v20 = vsel %vm585_vm0, %v6642_v37, %v6674_v10  ;;  %v16996_v51 = vld [vmem:[%s18339_s5 + $0x238] sm:$0xff]  }
 0x431   :  { %v6378_v11 = vadd.f32 %v10577_v8, %v16660_v53  ;;  %v6779_v9 = vrot.slane %v6721_v14, 1  ;;  %10729 = vmatprep.subr.bf16.mxu0 %v11816_v42  ;;  %v6781_v6 = vrot.slane %v16959_v48, 1  ;;  %v6782_v22 = vrot.slane %v6722_v20, 1 }
 0x432   :  { %v16998_v54 = vsel %vm6403_vm7, %v6373_v46, %v6419_v15  ;;  %7535 = vmatmul.mubr.bf16.gmra.mxu1 %v16980_v25  ;;  %v10579_v53 = vpop.f32.mrf.mxu1  ;;  %v6835_v38 = vrot.slane %v6721_v14, 2  ;;  %v6838_v14 = vrot.slane %v6722_v20, 2 }
 0x433   :  { %v6612_v37 = vrot.slane %v16998_v54, 1  ;;  %v6644_v10 = vrot.slane %v16998_v54, 7  ;;  %v6676_v59 = vrot.slane %v16998_v54, 5  ;;  %vm6404_vm8 = vcmp.gt.f32.partialorder %v6378_v11, 0.0  ;;  %7542 = vmatprep.mubr.bf16.mxu1 %v6919_v52  ;;  %10794 = vmatpush3.bf16.msra.mxu1 %v11820_v21 }
 0x434   :  { %v6420_v42 = vmul.f32 0.01, %v6378_v11  ;;  %v10580_v33 = vadd.f32 %v10579_v53, %v10578_v62  ;;  %v17006_v46 = vsel %vm706_vm1, %v6778_v17, %v6779_v9  ;;  %v17009_v8 = vsel %vm706_vm1, %v6781_v6, %v6782_v22  ;;  %v10581_v15 = vpop.f32.mrf.mxu1  ;;  %10730 = vmatpush3.bf16.msra.mxu0 %v11818_v57 }
 0x435   :  { %v6917_v7 = vpack.c.bf16 %v17009_v8, %v17006_v46  ;;  %v6834_v52 = vrot.slane %v16954_v24, 2  ;;  %10999 = vmatprep.subr.bf16.mxu0 %v16996_v51  ;;  %v6916_v17 = vpack.c.bf16 %v16959_v48, %v16954_v24  ;;  %v6707_v57 = vsel %vm585_vm0, %v6611_v28, %v6643_v16 }
 0x436   :  { %v6436_v21 = vsel %vm6404_vm8, %v6378_v11, %v6420_v42  ;;  %v6381_v62 = vadd.f32 %v10580_v33, %v16663_v29  ;;  %v10582_v9 = vpop.f32.mrf.mxu1  ;;  %v17027_v11 = vsel %vm819_vm2, %v6837_v26, %v6838_v14  ;;  %v6784_v28 = vrot.slane %v6707_v57, 1 }
 0x437   :  { %v6613_v20 = vrot.slane %v6436_v21, 1  ;;  %v6645_v53 = vrot.slane %v6436_v21, 7  ;;  %v6677_v6 = vrot.slane %v6436_v21, 5  ;;  %7445 = vmatprep.mubr.bf16.mxu0 %v6917_v7  ;;  %v17024_v22 = vsel %vm819_vm2, %v6834_v52, %v6835_v38 }
 0x438   :  { %vm6405_vm9 = vcmp.gt.f32.partialorder %v6381_v62, 0.0  ;;  %v6421_v54 = vmul.f32 0.01, %v6381_v62  ;;  %7446 = vmatmul.mubr.bf16.gmra.mxu0 %v6916_v17  ;;  %v10583_v29 = vadd.f32 %v10582_v9, %v10581_v15  ;;  %v10584_v48 = vpop.f32.mrf.mxu1  ;;  %v6918_v42 = vpack.c.bf16 %v17027_v11, %v17024_v22 }
 0x439   :  { %v6723_v7 = vsel %vm585_vm0, %v6643_v16, %v6675_v47  ;;  %v6708_v38 = vsel %vm585_vm0, %v6612_v37, %v6644_v10 }
 0x43a   :  { %v6437_v33 = vsel %vm6405_vm9, %v6381_v62, %v6421_v54  ;;  %v6386_v52 = vadd.f32 %v10583_v29, %v16665_v2  ;;  %v6785_v26 = vrot.slane %v6723_v7, 1  ;;  %v6841_v14 = vrot.slane %v6723_v7, 2  ;;  %v10585_v21 = vpop.f32.mrf.mxu1  ;;  %7543 = vmatmul.mubr.bf16.gmra.mxu1 %v6918_v42 }
 0x43b   :  { %v6614_v15 = vrot.slane %v6437_v33, 1  ;;  %v6646_v17 = vrot.slane %v6437_v33, 7  ;;  %v6678_v9 = vrot.slane %v6437_v33, 5  ;;  %v6843_v31 = vrot.slane %v6708_v38, 2 }
 0x43c   :  { %vm6406_vm10 = vcmp.gt.f32.partialorder %v6386_v52, 0.0  ;;  %v6422_v39 = vmul.f32 0.01, %v6386_v52  ;;  %v17039_v60 = vsel %vm706_vm1, %v6784_v28, %v6785_v26  ;;  %v6925_v16 = vpack.c.bf16 %v6708_v38, %v6707_v57 }
 0x43d   :  { %v17043_v47 = vpack.c.bf16 %v17039_v60, %v17006_v46  ;;  %v10586_v37 = vadd.f32 %v10585_v21, %v10584_v48  ;;  %v6840_v2 = vrot.slane %v6707_v57, 2  ;;  %v17046_v54 = vpack.c.bf16 %v6707_v57, %v16954_v24 }
 0x43e   :  { %v6438_v62 = vsel %vm6406_vm10, %v6386_v52, %v6422_v39  ;;  %7550 = vmatprep.mubr.bf16.mxu1 %v6925_v16  ;;  %v6709_v29 = vsel %vm585_vm0, %v6613_v20, %v6645_v53  ;;  %v6724_v42 = vsel %vm585_vm0, %v6644_v10, %v6676_v59  ;;  %v6725_v7 = vsel %vm585_vm0, %v6645_v53, %v6677_v6 }
 0x43f   :  { %v6615_v28 = vrot.slane %v6438_v62, 1  ;;  %v6647_v33 = vrot.slane %v6438_v62, 7  ;;  %v6679_v26 = vrot.slane %v6438_v62, 5  ;;  %7453 = vmatprep.mubr.bf16.mxu0 %v17043_v47  ;;  %v6389_v3 = vadd.f32 %v10586_v37, %v16671_v41 }
 0x440   :  { %v17054_v48 = vsel %vm819_vm2, %v6840_v2, %v6841_v14  ;;  %7454 = vmatmul.mubr.bf16.gmra.mxu0 %v17046_v54  ;;  %v6787_v39 = vrot.slane %v6708_v38, 1  ;;  %v6788_v24 = vrot.slane %v6724_v42, 1  ;;  %v6790_v57 = vrot.slane %v6709_v29, 1 }
 0x441   :  { %v17058_v20 = vsel %vm585_vm0, %v6615_v28, %v6647_v33  ;;  %vm6407_vm11 = vcmp.gt.f32.partialorder %v6389_v3, 0.0  ;;  %v6423_v10 = vmul.f32 0.01, %v6389_v3  ;;  %v17062_v59 = vpack.c.bf16 %v17054_v48, %v17024_v22 }
 0x442   :  { %v17065_v53 = vsel %vm706_vm1, %v6787_v39, %v6788_v24  ;;  %v6791_v41 = vrot.slane %v6725_v7, 1  ;;  %v6844_v6 = vrot.slane %v6724_v42, 2  ;;  %v6847_v52 = vrot.slane %v6725_v7, 2 }
 0x443   :  { %v6439_v14 = vsel %vm6407_vm11, %v6389_v3, %v6423_v10  ;;  %7551 = vmatmul.mubr.bf16.gmra.mxu1 %v17062_v59  ;;  %v6710_v16 = vsel %vm585_vm0, %v6614_v15, %v6646_v17  ;;  %v6846_v37 = vrot.slane %v6709_v29, 2  ;;  %v17084_v15 = vpack.c.bf16 %v6709_v29, %v6708_v38 }
 0x444   :  { %v6616_v2 = vrot.slane %v6439_v14, 1  ;;  %v6648_v62 = vrot.slane %v6439_v14, 7  ;;  %v6680_v28 = vrot.slane %v6439_v14, 5  ;;  %v17072_v43 = vsel %vm706_vm1, %v6790_v57, %v6791_v41 }
 0x445   :  { %v17076_v39 = vpack.c.bf16 %v17072_v43, %v17065_v53  ;;  %v6849_v42 = vrot.slane %v6710_v16, 2  ;;  %v6931_v3 = vpack.c.bf16 %v6710_v16, %v6709_v29  ;;  %v17079_v7 = vsel %vm819_vm2, %v6843_v31, %v6844_v6 }
 0x446   :  { %v17082_v24 = vsel %vm819_vm2, %v6846_v37, %v6847_v52  ;;  %v6726_v10 = vsel %vm585_vm0, %v6646_v17, %v6678_v9  ;;  %v6727_v14 = vsel %vm585_vm0, %v6647_v33, %v6679_v26  ;;  %v6793_v41 = vrot.slane %v6710_v16, 1 }
 0x447   :  { %7461 = vmatprep.mubr.bf16.mxu0 %v17076_v39  ;;  %7558 = vmatprep.mubr.bf16.mxu1 %v6931_v3  ;;  %v17091_v57 = vpack.c.bf16 %v17082_v24, %v17079_v7  ;;  %v6794_v21 = vrot.slane %v6726_v10, 1  ;;  %v6796_v31 = vrot.slane %v17058_v20, 1  ;;  %v6797_v6 = vrot.slane %v6727_v14, 1 }
 0x448   :  { %7462 = vmatmul.mubr.bf16.gmra.mxu0 %v17084_v15  ;;  %v6850_v38 = vrot.slane %v6726_v10, 2  ;;  %v6853_v29 = vrot.slane %v6727_v14, 2  ;;  %v17096_v17 = vsel %vm585_vm0, %v6616_v2, %v6648_v62  ;;  %v6852_v26 = vrot.slane %v17058_v20, 2 }
 0x449   :  { %v17099_v9 = vsel %vm706_vm1, %v6793_v41, %v6794_v21  ;;  %v6937_v33 = vpack.c.bf16 %v17096_v17, %v17058_v20  ;;  %v17105_v52 = vpack.c.bf16 %v17058_v20, %v6710_v16  ;;  %v17108_v37 = vsel %vm706_vm1, %v6796_v31, %v6797_v6 }
 0x44a   :  { %v6932_v3 = vpack.c.bf16 %v17099_v9, %v17072_v43  ;;  %v17113_v2 = vsel %vm819_vm2, %v6849_v42, %v6850_v38  ;;  %v6894_v21 = vpack.c.bf16 %v16706_v44, %v16689_v34  ;;  %v17120_v10 = vpack.c.bf16 %v17108_v37, %v17099_v9 }
 0x44b   :  { %7559 = vmatmul.mubr.bf16.gmra.mxu1 %v17091_v57  ;;  %v17123_v16 = vsel %vm819_vm2, %v6852_v26, %v6853_v29  ;;  %v6900_v14 = vpack.c.bf16 %v16849_v56, %v16772_v19  ;;  %v6906_v41 = vpack.c.bf16 %v16937_v63, %v16885_v36  ;;  %v19175_v34 = vrot.slane %v16826_v1, 5 }
 0x44c   :  { %7566 = vmatprep.mubr.bf16.mxu1 %v6937_v33  ;;  %v17131_v42 = vpack.c.bf16 %v17123_v16, %v17113_v2  ;;  %v19176_v44 = vrot.slane %v16826_v1, 7  ;;  %v6873_v6 = vrot.slane %v16927_v13, 1  ;;  %v6881_v38 = vrot.slane %v16927_v13, 2  ;;  %7469 = vmatprep.mubr.bf16.mxu0 %v17120_v10 }
 0x44d   :  { %v6913_v36 = vpack.c.bf16 %v16815_v30, %v16927_v13  ;;  %v6921_v63 = vpack.c.bf16 %v17024_v22, %v17027_v11  ;;  %v6927_v29 = vpack.c.bf16 %v17079_v7, %v17054_v48  ;;  %v6933_v1 = vpack.c.bf16 %v17113_v2, %v17082_v24 }
 0x44e   :  { %v6720_v31 = vsel %vm585_vm0, %v19176_v44, %v19175_v34  ;;  %v6728_v33 = vsel %vm585_vm0, %v6648_v62, %v6680_v28  ;;  %v6876_v26 = vrot.slane %v17096_v17, 1  ;;  %v6884_v30 = vrot.slane %v17096_v17, 2 }
 0x44f   :  { %v6874_v19 = vrot.slane %v6720_v31, 1  ;;  %v6882_v56 = vrot.slane %v6720_v31, 2  ;;  %v6877_v31 = vrot.slane %v6728_v33, 1  ;;  %v6885_v28 = vrot.slane %v6728_v33, 2 }
 0x450   :  { %7470 = vmatmul.mubr.bf16.gmra.mxu0 %v17105_v52  ;;  %v6940_v7 = vpack.c.bf16 %v17058_v20, %v17096_v17  ;;  %v11822_v20 = vld [vmem:[%s18339_s5 + $0x230] sm:$0xff]   ;;  %v19177_v17 = vpack.c.bf16 %v16703_v18, %v16680_v61  ;;  %v19178_v61 = vpack.c.bf16 %v16809_v35, %v16733_v40  ;;  %v11825_v18 = vld [vmem:[%s18339_s5 + $0x218] sm:$0xff]   ;;  %v19179_v40 = vpack.c.bf16 %v16896_v58, %v16818_v12  ;;  %v11827_v35 = vld [vmem:[%s18339_s5 + $0x208] sm:$0xff]  }
 0x451   :  { %v6875_v34 = vsel %vm706_vm1, %v6873_v6, %v6874_v19  ;;  %v17153_v44 = vsel %vm819_vm2, %v6881_v38, %v6882_v56  ;;  %7607 = vmatprep.mubr.bf16.mxu0 %v6894_v21  ;;  %v6878_v62 = vsel %vm706_vm1, %v6876_v26, %v6877_v31  ;;  %v19180_v12 = vpack.c.bf16 %v17006_v46, %v17009_v8 }
 0x452   :  { %v6911_v13 = vpack.c.bf16 %v6875_v34, %v16913_v49  ;;  %v6914_v22 = vpack.c.bf16 %v16913_v49, %v6875_v34  ;;  %v6912_v11 = vpack.c.bf16 %v17153_v44, %v16969_v4  ;;  %v6915_v48 = vpack.c.bf16 %v16969_v4, %v17153_v44 }
 0x453   :  { %v6938_v6 = vpack.c.bf16 %v6878_v62, %v17108_v37  ;;  %v6941_v38 = vpack.c.bf16 %v17108_v37, %v6878_v62  ;;  %7567 = vmatmul.mubr.bf16.gmra.mxu1 %v17131_v42  ;;  %v17170_v49 = vsel %vm819_vm2, %v6884_v30, %v6885_v28  ;;  %v11824_v37 = vld [vmem:[%s18339_s5 + $0x220] sm:$0xff]  }
 0x454   :  { %7704 = vmatprep.mubr.bf16.mxu1 %v16737_v23  ;;  %v6939_v21 = vpack.c.bf16 %v17170_v49, %v17123_v16  ;;  %v6942_v19 = vpack.c.bf16 %v17123_v16, %v17170_v49  ;;  %v11823_v23 = vld [vmem:[%s18339_s5 + $0x228] sm:$0xff]  }
 0x458   :  { %7608 = vmatmul.mubr.bf16.vlgmr.msra.gmra.mxu0 %v19177_v17 }
 0x459   :  { %7615 = vmatprep.mubr.bf16.mxu0 %v6900_v14  ;;  %11000 = vmatpush3.bf16.msra.mxu0 %v16996_v51 }
 0x45a   :  { %11001 = vmatprep.subr.bf16.mxu0 %v11822_v20 }
 0x45b   :  { %7705 = vmatmul.mubr.bf16.vlgmr.msra.gmra.mxu1 %v16748_v5  ;;  %v11826_v5 = vld [vmem:[%s18339_s5 + $0x210] sm:$0xff]  }
 0x45c   :  { %7712 = vmatprep.mubr.bf16.mxu1 %v16831_v0  ;;  %v11828_v0 = vld [vmem:[%s18339_s5 + $0x200] sm:$0xff]   ;;  %s11902_s5 = smov 8  }
 0x45d   :  { %11002 = vmatpush3.bf16.msra.mxu0 %v11822_v20 }
 0x45e   :  { %11003 = vmatprep.subr.bf16.mxu0 %v11823_v23 }
 0x460   :  { %7616 = vmatmul.mubr.bf16.gmra.mxu0 %v19178_v61 }
 0x461   :  { %7623 = vmatprep.mubr.bf16.mxu0 %v6906_v41  ;;  %11004 = vmatpush3.bf16.msra.mxu0 %v11823_v23 }
 0x462   :  { %11005 = vmatprep.subr.bf16.mxu0 %v11824_v37 }
 0x463   :  { %7713 = vmatmul.mubr.bf16.gmra.mxu1 %v16857_v55  ;;  %v19181_v55 = vpack.c.bf16 %v17065_v53, %v17039_v60 }
 0x464   :  { %7720 = vmatprep.mubr.bf16.mxu1 %v16920_v32 }
 0x465   :  { %11006 = vmatpush3.bf16.msra.mxu0 %v11824_v37 }
 0x466   :  { %11007 = vmatprep.subr.bf16.mxu0 %v11825_v18 }
 0x468   :  { %7624 = vmatmul.mubr.bf16.gmra.mxu0 %v19179_v40 }
 0x469   :  { %7631 = vmatprep.mubr.bf16.mxu0 %v6912_v11  ;;  %11008 = vmatpush3.bf16.msra.mxu0 %v11825_v18 }
 0x46a   :  { %11009 = vmatprep.subr.bf16.mxu0 %v11826_v5 }
 0x46b   :  { %7721 = vmatmul.mubr.bf16.gmra.mxu1 %v16951_v27 }
 0x46c   :  { %7728 = vmatprep.mubr.bf16.mxu1 %v6914_v22 }
 0x46d   :  { %11010 = vmatpush3.bf16.msra.mxu0 %v11826_v5 }
 0x46e   :  { %11011 = vmatprep.subr.bf16.mxu0 %v11827_v35 }
 0x470   :  { %7632 = vmatmul.mubr.bf16.gmra.mxu0 %v6911_v13 }
 0x471   :  { %7639 = vmatprep.mubr.bf16.mxu0 %v6921_v63  ;;  %11012 = vmatpush3.bf16.msra.mxu0 %v11827_v35 }
 0x472   :  { %11013 = vmatprep.subr.bf16.mxu0 %v11828_v0 }
 0x473   :  { %7729 = vmatmul.mubr.bf16.gmra.mxu1 %v6913_v36 }
 0x474   :  { %7736 = vmatprep.mubr.bf16.mxu1 %v17043_v47 }
 0x475   :  { %11014 = vmatpush3.bf16.msra.mxu0 %v11828_v0 }
 0x478   :  { %7640 = vmatmul.mubr.bf16.gmra.mxu0 %v19180_v12 }
 0x479   :  { %7647 = vmatprep.mubr.bf16.mxu0 %v6927_v29 }
 0x47b   :  { %7737 = vmatmul.mubr.bf16.gmra.mxu1 %v17046_v54 }
 0x47c   :  { %7744 = vmatprep.mubr.bf16.mxu1 %v17076_v39 }
 0x480   :  { %7648 = vmatmul.mubr.bf16.gmra.mxu0 %v19181_v55 }
 0x481   :  { %7655 = vmatprep.mubr.bf16.mxu0 %v6933_v1 }
 0x483   :  { %7745 = vmatmul.mubr.bf16.gmra.mxu1 %v17084_v15 }
 0x484   :  { %7752 = vmatprep.mubr.bf16.mxu1 %v17120_v10 }
 0x488   :  { %7656 = vmatmul.mubr.bf16.gmra.mxu0 %v6932_v3 }
 0x489   :  { %7663 = vmatprep.mubr.bf16.mxu0 %v6939_v21 }
 0x48b   :  { %7753 = vmatmul.mubr.bf16.gmra.mxu1 %v17105_v52 }
 0x48c   :  { %7760 = vmatprep.mubr.bf16.mxu1 %v6941_v38 }
 0x490   :  { %7664 = vmatmul.mubr.bf16.gmra.mxu0 %v6938_v6 }
 0x491   :  { %11015 = vmatprep.mubr.bf16.mxu0 %v16776_v50 }
 0x493   :  { %7761 = vmatmul.mubr.bf16.gmra.mxu1 %v6940_v7 }
 0x498   :  { %11016 = vmatmul.mubr.bf16.vlgmr.msra.gmra.mxu0 %v16889_v45  ;;  %v17243_v45 = vld [vmem:[%s18340_s6] ss:$0 sm:$0xff]  ;;  %s11904_s6 = smov 32  }
 0x499   :  { %11019 = vmatprep.mubr.bf16.mxu0 %v16980_v25 }
 0x4a0   :  { %11020 = vmatmul.mubr.bf16.gmra.mxu0 %v6915_v48 }
 0x4a1   :  { %11023 = vmatprep.mubr.bf16.mxu0 %v17062_v59 }
 0x4a8   :  { %11024 = vmatmul.mubr.bf16.gmra.mxu0 %v17091_v57 }
 0x4a9   :  { %11027 = vmatprep.mubr.bf16.mxu0 %v17131_v42 }
 0x4b0   :  { %11028 = vmatmul.mubr.bf16.gmra.mxu0 %v6942_v19 }
 0x4d6   :  { %v10667_v43 = vpop.f32.mrf.mxu1 }
 0x4d7   :  { %v10603_v58 = vpop.f32.mrf.mxu0 }
 0x4d8   :  { %v10668_v32 = vpop.f32.mrf.mxu1 }
 0x4d9   :  { %v10669_v50 = vadd.f32 %v10668_v32, %v10667_v43  ;;  %v10604_v27 = vpop.f32.mrf.mxu0 }
 0x4da   :  { %v10605_v25 = vadd.f32 %v10604_v27, %v10603_v58  ;;  %v10670_v4 = vpop.f32.mrf.mxu1 }
 0x4db   :  { %v10606_v51 = vpop.f32.mrf.mxu0 }
 0x4dc   :  { %v7416_v46 = vadd.f32 %v10605_v25, %v17243_v45  ;;  %v10671_v8 = vpop.f32.mrf.mxu1 }
 0x4dd   :  { %v10672_v60 = vadd.f32 %v10671_v8, %v10670_v4  ;;  %v10607_v47 = vpop.f32.mrf.mxu0 }
 0x4de   :  { %v10608_v54 = vadd.f32 %v10607_v47, %v10606_v51  ;;  %v10673_v59 = vpop.f32.mrf.mxu1  ;;  %v17246_v53 = vadd.f32 %v10669_v50, %v7416_v46 }
 0x4df   :  { %v10609_v39 = vpop.f32.mrf.mxu0 }
 0x4e0   :  { %v7419_v24 = vadd.f32 %v10608_v54, %v17243_v45  ;;  %v10674_v15 = vpop.f32.mrf.mxu1 }
 0x4e1   :  { %v10675_v57 = vadd.f32 %v10674_v15, %v10673_v59  ;;  %v10610_v9 = vpop.f32.mrf.mxu0 }
 0x4e2   :  { %v10611_v52 = vadd.f32 %v10610_v9, %v10609_v39  ;;  %v17249_v3 = vpop.f32.mrf.mxu1  ;;  %v17251_v2 = vadd.f32 %v10672_v60, %v7419_v24 }
 0x4e3   :  { %v10612_v10 = vpop.f32.mrf.mxu0 }
 0x4e4   :  { %v7424_v16 = vadd.f32 %v10611_v52, %v17243_v45  ;;  %v17254_v14 = vpop.f32.mrf.mxu1 }
 0x4e5   :  { %v10613_v41 = vpop.f32.mrf.mxu0 }
 0x4e6   :  { %v17256_v42 = vadd.f32 %v10613_v41, %v10612_v10  ;;  %v17258_v56 = vadd.f32 %v10675_v57, %v7424_v16 }
 0x4e7   :  { %v10615_v36 = vpop.f32.mrf.mxu0 }
 0x4e9   :  { %v10679_v63 = vpop.f32.mrf.mxu1  ;;  %v10616_v29 = vpop.f32.mrf.mxu0 }
 0x4ea   :  { %v10617_v1 = vadd.f32 %v10616_v29, %v10615_v36 }
 0x4eb   :  { %v10680_v33 = vpop.f32.mrf.mxu1  ;;  %v10618_v26 = vpop.f32.mrf.mxu0 }
 0x4ec   :  { %v10681_v34 = vadd.f32 %v10680_v33, %v10679_v63  ;;  %v7432_v44 = vadd.f32 %v10617_v1, %v17243_v45 }
 0x4ed   :  { %v10682_v31 = vpop.f32.mrf.mxu1  ;;  %v10619_v30 = vpop.f32.mrf.mxu0 }
 0x4ee   :  { %v10620_v13 = vadd.f32 %v10619_v30, %v10618_v26  ;;  %v17261_v22 = vadd.f32 %v10681_v34, %v7432_v44 }
 0x4ef   :  { %v10683_v11 = vpop.f32.mrf.mxu1  ;;  %v10621_v48 = vpop.f32.mrf.mxu0 }
 0x4f0   :  { %v10684_v62 = vadd.f32 %v10683_v11, %v10682_v31  ;;  %v7435_v28 = vadd.f32 %v10620_v13, %v17243_v45 }
 0x4f1   :  { %v10622_v7 = vpop.f32.mrf.mxu0 }
 0x4f2   :  { %v10685_v6 = vpop.f32.mrf.mxu1  ;;  %v10623_v38 = vadd.f32 %v10622_v7, %v10621_v48  ;;  %v17264_v49 = vadd.f32 %v10684_v62, %v7435_v28 }
 0x4f3   :  { %v10624_v21 = vpop.f32.mrf.mxu0 }
 0x4f4   :  { %v10686_v19 = vpop.f32.mrf.mxu1  ;;  %v7440_v20 = vadd.f32 %v10623_v38, %v17243_v45 }
 0x4f5   :  { %v10687_v17 = vadd.f32 %v10686_v19, %v10685_v6  ;;  %v10625_v23 = vpop.f32.mrf.mxu0 }
 0x4f6   :  { %v10688_v37 = vpop.f32.mrf.mxu1  ;;  %v10626_v61 = vadd.f32 %v10625_v23, %v10624_v21 }
 0x4f7   :  { %v17267_v18 = vadd.f32 %v10687_v17, %v7440_v20 }
 0x4f8   :  { %v10689_v5 = vpop.f32.mrf.mxu1  ;;  %v7443_v40 = vadd.f32 %v10626_v61, %v17243_v45  ;;  %v10627_v35 = vpop.f32.mrf.mxu0 }
 0x4f9   :  { %v10690_v0 = vadd.f32 %v10689_v5, %v10688_v37 }
 0x4fa   :  { %v10628_v12 = vpop.f32.mrf.mxu0  ;;  %v10691_v55 = vpop.f32.mrf.mxu1 }
 0x4fb   :  { %v10629_v43 = vadd.f32 %v10628_v12, %v10627_v35  ;;  %v17270_v58 = vadd.f32 %v10690_v0, %v7443_v40 }
 0x4fc   :  { %v10630_v32 = vpop.f32.mrf.mxu0  ;;  %v10692_v50 = vpop.f32.mrf.mxu1 }
 0x4fd   :  { %v7448_v27 = vadd.f32 %v10629_v43, %v17243_v45  ;;  %v10693_v25 = vadd.f32 %v10692_v50, %v10691_v55 }
 0x4fe   :  { %v10631_v4 = vpop.f32.mrf.mxu0  ;;  %v10694_v51 = vpop.f32.mrf.mxu1 }
 0x4ff   :  { %v10632_v46 = vadd.f32 %v10631_v4, %v10630_v32  ;;  %v17273_v60 = vadd.f32 %v10693_v25, %v7448_v27 }
 0x500   :  { %v10633_v8 = vpop.f32.mrf.mxu0  ;;  %v10695_v47 = vpop.f32.mrf.mxu1 }
 0x501   :  { %v7451_v54 = vadd.f32 %v10632_v46, %v17243_v45  ;;  %v10696_v59 = vadd.f32 %v10695_v47, %v10694_v51 }
 0x502   :  { %v10634_v39 = vpop.f32.mrf.mxu0 }
 0x503   :  { %v10697_v24 = vpop.f32.mrf.mxu1  ;;  %v10635_v15 = vadd.f32 %v10634_v39, %v10633_v8  ;;  %v17276_v9 = vadd.f32 %v10696_v59, %v7451_v54 }
 0x504   :  { %v10636_v57 = vpop.f32.mrf.mxu0 }
 0x505   :  { %v10698_v52 = vpop.f32.mrf.mxu1  ;;  %v7456_v10 = vadd.f32 %v10635_v15, %v17243_v45 }
 0x506   :  { %v10699_v16 = vadd.f32 %v10698_v52, %v10697_v24  ;;  %v10637_v41 = vpop.f32.mrf.mxu0 }
 0x507   :  { %v10700_v36 = vpop.f32.mrf.mxu1  ;;  %v10638_v63 = vadd.f32 %v10637_v41, %v10636_v57 }
 0x508   :  { %v10639_v29 = vpop.f32.mrf.mxu0  ;;  %v17279_v1 = vadd.f32 %v10699_v16, %v7456_v10 }
 0x509   :  { %v10701_v33 = vpop.f32.mrf.mxu1  ;;  %v7459_v26 = vadd.f32 %v10638_v63, %v17243_v45 }
 0x50a   :  { %19182 = vst [vmem:[#allocation38_spill] sm:$0xff] %v17279_v1  ;;  %v10702_v34 = vadd.f32 %v10701_v33, %v10700_v36  ;;  %v10640_v44 = vpop.f32.mrf.mxu0 }
 0x50b   :  { %v10703_v31 = vpop.f32.mrf.mxu1  ;;  %v10641_v30 = vadd.f32 %v10640_v44, %v10639_v29 }
 0x50c   :  { %v10642_v13 = vpop.f32.mrf.mxu0  ;;  %v17282_v11 = vadd.f32 %v10702_v34, %v7459_v26 }
 0x50d   :  { %v10704_v48 = vpop.f32.mrf.mxu1  ;;  %v7464_v62 = vadd.f32 %v10641_v30, %v17243_v45 }
 0x50e   :  { %19183 = vst [vmem:[#allocation35_spill] sm:$0xff] %v17282_v11  ;;  %v10705_v28 = vadd.f32 %v10704_v48, %v10703_v31  ;;  %v10643_v7 = vpop.f32.mrf.mxu0 }
 0x50f   :  { %v10706_v6 = vpop.f32.mrf.mxu1  ;;  %v10644_v38 = vadd.f32 %v10643_v7, %v10642_v13  ;;  %v11829_v13 = vld [vmem:[%s18341_s7 + $0x78] sm:$0xff]   ;;  %v11831_v7 = vld [vmem:[%s18341_s7 + $0x70] sm:$0xff]  }
 0x510   :  { %v10645_v21 = vpop.f32.mrf.mxu0  ;;  %v17285_v19 = vadd.f32 %v10705_v28, %v7464_v62  ;;  %v11830_v62 = vld [vmem:[%s18341_s7 + $0x38] sm:$0xff]   ;;  %10859 = vmatprep.subr.bf16.mxu1 %v11829_v13  ;;  %v11844_v13 = vld [vmem:[%s18341_s7 + $0xf0] sm:$0xff]  }
 0x511   :  { %v10707_v20 = vpop.f32.mrf.mxu1  ;;  %v7467_v17 = vadd.f32 %v10644_v38, %v17243_v45  ;;  %10860 = vmatpush3.bf16.msra.mxu1 %v11830_v62  ;;  %v11832_v38 = vld [vmem:[%s18341_s7 + $0x30] sm:$0xff]  }
 0x512   :  { %19184 = vst [vmem:[#allocation56_spill] sm:$0xff] %v17285_v19  ;;  %v10708_v23 = vadd.f32 %v10707_v20, %v10706_v6  ;;  %v10646_v37 = vpop.f32.mrf.mxu0  ;;  %10861 = vmatprep.subr.bf16.mxu1 %v11831_v7  ;;  %v11833_v20 = vld [vmem:[%s18341_s7 + $0x68] sm:$0xff]   ;;  %v11839_v7 = vld [vmem:[%s18341_s7 + $0x50] sm:$0xff]  }
 0x513   :  { %v10709_v61 = vpop.f32.mrf.mxu1  ;;  %v10647_v5 = vadd.f32 %v10646_v37, %v10645_v21 }
 0x514   :  { %v10648_v40 = vpop.f32.mrf.mxu0  ;;  %v17288_v35 = vadd.f32 %v10708_v23, %v7467_v17 }
 0x515   :  { %v10710_v0 = vpop.f32.mrf.mxu1  ;;  %v7472_v12 = vadd.f32 %v10647_v5, %v17243_v45  ;;  %10862 = vmatpush3.bf16.msra.mxu1 %v11832_v38 }
 0x516   :  { %19185 = vst [vmem:[#allocation63_spill] sm:$0xff] %v17288_v35  ;;  %v10711_v55 = vadd.f32 %v10710_v0, %v10709_v61  ;;  %v10649_v43 = vpop.f32.mrf.mxu0  ;;  %v11834_v61 = vld [vmem:[%s18341_s7 + $0x28] sm:$0xff]   ;;  %10863 = vmatprep.subr.bf16.mxu1 %v11833_v20  ;;  %v11840_v20 = vld [vmem:[%s18341_s7 + $0x10] sm:$0xff]  }
 0x517   :  { %v10712_v32 = vpop.f32.mrf.mxu1  ;;  %v10650_v50 = vadd.f32 %v10649_v43, %v10648_v40  ;;  %v11835_v40 = vld [vmem:[%s18341_s7 + $0x60] sm:$0xff]  }
 0x518   :  { %v10731_v27 = vpop.f32.mrf.mxu0  ;;  %v17291_v25 = vadd.f32 %v10711_v55, %v7472_v12  ;;  %v11836_v55 = vld [vmem:[%s18341_s7 + $0x20] sm:$0xff]  }
 0x519   :  { %v10713_v4 = vpop.f32.mrf.mxu1  ;;  %v7475_v51 = vadd.f32 %v10650_v50, %v17243_v45  ;;  %10864 = vmatpush3.bf16.msra.mxu1 %v11834_v61  ;;  %v11846_v61 = vld [vmem:[%s18341_s7 + $0xb0] sm:$0xff]  }
 0x51a   :  { %19186 = vst [vmem:[#allocation30_spill] sm:$0xff] %v17291_v25  ;;  %v10714_v46 = vadd.f32 %v10713_v4, %v10712_v32  ;;  %v10732_v8 = vpop.f32.mrf.mxu0  ;;  %v11837_v32 = vld [vmem:[%s18341_s7 + $0x58] sm:$0xff]   ;;  %10865 = vmatprep.subr.bf16.mxu1 %v11835_v40 }
 0x51b   :  { %v17294_v47 = vpop.f32.mrf.mxu1  ;;  %v10733_v54 = vadd.f32 %v10732_v8, %v10731_v27  ;;  %v11841_v27 = vld [vmem:[%s18341_s7 + $0xf8] sm:$0xff]  }
 0x51c   :  { %v17296_v59 = vpop.f32.mrf.mxu0  ;;  %v17298_v39 = vadd.f32 %v10714_v46, %v7475_v51  ;;  %v11842_v51 = vld [vmem:[%s18341_s7 + $0xb8] sm:$0xff]   ;;  %10923 = vmatprep.subr.bf16.mxu0 %v11841_v27 }
 0x51d   :  { %v17300_v24 = vpop.f32.mrf.mxu1  ;;  %v17303_v15 = vadd.f32 %v10733_v54, %v17246_v53  ;;  %v11838_v8 = vld [vmem:[%s18341_s7 + $0x18] sm:$0xff]   ;;  %10866 = vmatpush3.bf16.msra.mxu1 %v11836_v55  ;;  %10924 = vmatpush3.bf16.msra.mxu0 %v11842_v51  ;;  %v11843_v55 = vld [vmem:[%s18341_s7 + $0x48] sm:$0xff]  }
 0x51e   :  { %19187 = vst [vmem:[#allocation23_spill] sm:$0xff] %v17298_v39  ;;  %v17305_v57 = vpop.f32.mrf.mxu0  ;;  %10867 = vmatprep.subr.bf16.mxu1 %v11837_v32  ;;  %10925 = vmatprep.subr.bf16.mxu0 %v11844_v13  ;;  %v11847_v32 = vld [vmem:[%s18341_s7 + $0xe8] sm:$0xff]  }
 0x51f   :  { %v17307_v52 = vpop.f32.mrf.mxu1  ;;  %v11845_v39 = vld [vmem:[%s18341_s7 + $0x8] sm:$0xff]   ;;  %v10736_v1 = vadd.f32 %v17305_v57, %v17296_v59 }
 0x520   :  { %v17309_v10 = vpop.f32.mrf.mxu0 }
 0x521   :  { %v17311_v16 = vpop.f32.mrf.mxu1  ;;  %10868 = vmatpush3.bf16.msra.mxu1 %v11838_v8  ;;  %10926 = vmatpush3.bf16.msra.mxu0 %v11846_v61  ;;  %v7613_v59 = vadd.f32 %v10736_v1, %v17251_v2 }
 0x522   :  { %v17313_v41 = vpop.f32.mrf.mxu0  ;;  %10869 = vmatprep.subr.bf16.mxu1 %v11839_v7  ;;  %10927 = vmatprep.subr.bf16.mxu0 %v11847_v32 }
 0x523   :  { %v17315_v36 = vpop.f32.mrf.mxu1 }
 0x524   :  { %v17317_v63 = vpop.f32.mrf.mxu0 }
 0x525   :  { %v17319_v29 = vpop.f32.mrf.mxu1  ;;  %10870 = vmatpush3.bf16.msra.mxu1 %v11840_v20  ;;  %v10739_v20 = vadd.f32 %v17313_v41, %v17309_v10 }
 0x526   :  { %v17321_v33 = vpop.f32.mrf.mxu0  ;;  %10871 = vmatprep.subr.bf16.mxu1 %v11843_v55  ;;  %v7427_v55 = vadd.f32 %v17256_v42, %v17243_v45  ;;  %v10797_v45 = vadd.f32 %v17300_v24, %v17294_v47  ;;  %v10803_v2 = vadd.f32 %v17319_v29, %v17315_v36 }
 0x527   :  { %v17323_v53 = vpop.f32.mrf.mxu1  ;;  %v7618_v57 = vadd.f32 %v10739_v20, %v17258_v56 }
 0x528   :  { %v17325_v26 = vpop.f32.mrf.mxu0 }
 0x529   :  { %v17327_v34 = vpop.f32.mrf.mxu1  ;;  %10872 = vmatpush3.bf16.msra.mxu1 %v11845_v39  ;;  %v10678_v39 = vadd.f32 %v17254_v14, %v17249_v3 }
 0x52a   :  { %v17329_v44 = vpop.f32.mrf.mxu0 }
 0x52b   :  { %v17331_v31 = vpop.f32.mrf.mxu1  ;;  %v10745_v10 = vadd.f32 %v17329_v44, %v17325_v26  ;;  %v7524_v42 = vadd.f32 %v10678_v39, %v7427_v55 }
 0x52c   :  { %v17333_v30 = vpop.f32.mrf.mxu0 }
 0x52d   :  { %v17338_v48 = vpop.f32.mrf.mxu1  ;;  %v7626_v24 = vadd.f32 %v10745_v10, %v17261_v22 }
 0x52e   :  { %v17343_v28 = vpop.f32.mrf.mxu0  ;;  %v10809_v36 = vadd.f32 %v17338_v48, %v17331_v31 }
 0x52f   :  { %v17348_v6 = vpop.f32.mrf.mxu1  ;;  %v10748_v3 = vadd.f32 %v17343_v28, %v17333_v30  ;;  %v7715_v30 = vadd.f32 %v10803_v2, %v7618_v57  ;;  %v7707_v28 = vadd.f32 %v10797_v45, %v17303_v15  ;;  %v19204_v57 = vld [vmem:[#allocation63_spill] sm:$0xff] }
 0x530   :  { %v17353_v21 = vpop.f32.mrf.mxu0 }
 0x531   :  { %v17358_v17 = vpop.f32.mrf.mxu1  ;;  %v7629_v29 = vadd.f32 %v10748_v3, %v17264_v49 }
 0x532   :  { %v17360_v23 = vpop.f32.mrf.mxu0 }
 0x533   :  { %v17362_v37 = vpop.f32.mrf.mxu1  ;;  %v10751_v56 = vadd.f32 %v17360_v23, %v17353_v21 }
 0x534   :  { %v17367_v5 = vpop.f32.mrf.mxu0 }
 0x535   :  { %v17372_v0 = vpop.f32.mrf.mxu1 }
 0x536   :  { %v17374_v12 = vpop.f32.mrf.mxu0  ;;  %v10815_v49 = vadd.f32 %v17372_v0, %v17362_v37 }
 0x537   :  { %v17379_v43 = vpop.f32.mrf.mxu1  ;;  %v10754_v1 = vadd.f32 %v17374_v12, %v17367_v5  ;;  %v7634_v5 = vadd.f32 %v10751_v56, %v17267_v18 }
 0x538   :  { %v17384_v50 = vpop.f32.mrf.mxu0 }
 0x539   :  { %v17389_v4 = vpop.f32.mrf.mxu1  ;;  %v7637_v22 = vadd.f32 %v10754_v1, %v17270_v58  ;;  %v7731_v0 = vadd.f32 %v10815_v49, %v7634_v5  ;;  %v11850_v49 = vld [vmem:[%s18341_s7 + $0xe0] sm:$0xff]  }
 0x53a   :  { %v10756_v46 = vpop.f32.mrf.mxu0  ;;  %v10818_v48 = vadd.f32 %v17389_v4, %v17379_v43 }
 0x53b   :  { %v17397_v54 = vpop.f32.mrf.mxu1  ;;  %v10757_v47 = vadd.f32 %v10756_v46, %v17384_v50  ;;  %v10812_v46 = vadd.f32 %v17358_v17, %v17348_v6 }
 0x53c   :  { %v17402_v62 = vpop.f32.mrf.mxu0 }
 0x53d   :  { %v17407_v38 = vpop.f32.mrf.mxu1  ;;  %v17491_v17 = vadd.f32 %v10812_v46, %v7629_v29 }
 0x53e   :  { %v10759_v40 = vpop.f32.mrf.mxu0  ;;  %v10821_v58 = vadd.f32 %v17407_v38, %v17397_v54  ;;  %v19201_v54 = vld [vmem:[#allocation56_spill] sm:$0xff] }
 0x53f   :  { %v17421_v27 = vpop.f32.mrf.mxu1  ;;  %v10760_v21 = vadd.f32 %v10759_v40, %v17402_v62  ;;  %v7723_v40 = vadd.f32 %v10809_v36, %v7626_v24 }
 0x540   :  { %19188 = vst [vmem:[#allocation81_spill] sm:$0xff] %v17421_v27  ;;  %v10761_v51 = vpop.f32.mrf.mxu0 }
 0x541   :  { %v17423_v13 = vpop.f32.mrf.mxu1 }
 0x542   :  { %19189 = vst [vmem:[#allocation77_spill] sm:$0xff] %v17423_v13  ;;  %v10762_v25 = vpop.f32.mrf.mxu0 }
 0x543   :  { %v17428_v35 = vpop.f32.mrf.mxu1  ;;  %v10763_v12 = vadd.f32 %v10762_v25, %v10761_v51  ;;  %v19196_v51 = vld [vmem:[#allocation35_spill] sm:$0xff] }
 0x544   :  { %19190 = vst [vmem:[#allocation36_spill] sm:$0xff] %v17428_v35  ;;  %v10764_v19 = vpop.f32.mrf.mxu0 }
 0x545   :  { %v17430_v11 = vpop.f32.mrf.mxu1 }
 0x546   :  { %19191 = vst [vmem:[#allocation34_spill] sm:$0xff] %v17430_v11  ;;  %v10765_v27 = vpop.f32.mrf.mxu0 }
 0x547   :  { %v17432_v8 = vpop.f32.mrf.mxu1  ;;  %v10766_v50 = vadd.f32 %v10765_v27, %v10764_v19  ;;  %v7645_v19 = vadd.f32 %v10760_v21, %v17276_v9  ;;  %v19197_v43 = vld [vmem:[#allocation81_spill] sm:$0xff] }
 0x548   :  { %19192 = vst [vmem:[#allocation55_spill] sm:$0xff] %v17432_v8  ;;  %v10767_v7 = vpop.f32.mrf.mxu0 }
 0x549   :  { %v17434_v61 = vpop.f32.mrf.mxu1 }
 0x54a   :  { %19193 = vst [vmem:[#allocation26_spill] sm:$0xff] %v17434_v61  ;;  %v10768_v32 = vpop.f32.mrf.mxu0  ;;  %v10742_v61 = vadd.f32 %v17321_v33, %v17317_v63  ;;  %v10800_v63 = vadd.f32 %v17311_v16, %v17307_v52  ;;  %v10806_v16 = vadd.f32 %v17327_v34, %v17323_v53  ;;  %v7642_v53 = vadd.f32 %v10757_v47, %v17273_v60  ;;  %v19195_v60 = vld [vmem:[#allocation38_spill] sm:$0xff]  ;;  %v11848_v47 = vld [vmem:[%s18341_s7 + $0xa8] sm:$0xff]  }
 0x54b   :  { %v17436_v13 = vpop.f32.mrf.mxu1  ;;  %v10769_v34 = vadd.f32 %v10768_v32, %v10767_v7  ;;  %v7650_v27 = vadd.f32 %v10763_v12, %v19195_v60  ;;  %v7653_v7 = vadd.f32 %v10766_v50, %v19196_v51  ;;  %10928 = vmatpush3.bf16.msra.mxu0 %v11848_v47  ;;  %v19207_v51 = vld [vmem:[#allocation23_spill] sm:$0xff] }
 0x54c   :  { %19194 = vst [vmem:[#allocation46_spill] sm:$0xff] %v17436_v13  ;;  %v10770_v35 = vpop.f32.mrf.mxu0  ;;  %v7621_v26 = vadd.f32 %v10742_v61, %v7524_v42  ;;  %v7710_v52 = vadd.f32 %v10800_v63, %v7613_v59  ;;  %v7734_v61 = vadd.f32 %v10818_v48, %v7637_v22  ;;  %v17500_v9 = vadd.f32 %v10821_v58, %v7642_v53  ;;  %v19206_v53 = vld [vmem:[#allocation30_spill] sm:$0xff] }
 0x54d   :  { %v17444_v11 = vpop.f32.mrf.mxu1  ;;  %v19200_v32 = vld [vmem:[#allocation34_spill] sm:$0xff]  ;;  %v7658_v38 = vadd.f32 %v10769_v34, %v19201_v54  ;;  %10929 = vmatprep.subr.bf16.mxu0 %v11850_v49 }
 0x54e   :  { %v10771_v8 = vpop.f32.mrf.mxu0  ;;  %v7718_v31 = vadd.f32 %v10806_v16, %v7621_v26 }
 0x54f   :  { %v17450_v13 = vpop.f32.mrf.mxu1  ;;  %v10772_v62 = vadd.f32 %v10771_v8, %v10770_v35  ;;  %v19198_v35 = vld [vmem:[#allocation77_spill] sm:$0xff]  ;;  %v19199_v8 = vld [vmem:[#allocation36_spill] sm:$0xff]  ;;  %v19202_v55 = vld [vmem:[#allocation55_spill] sm:$0xff] }
 0x550   :  { %v10773_v41 = vpop.f32.mrf.mxu0  ;;  %v10824_v4 = vadd.f32 %v19198_v35, %v19197_v43  ;;  %v10827_v20 = vadd.f32 %v19200_v32, %v19199_v8 }
 0x551   :  { %v10835_v14 = vpop.f32.mrf.mxu1  ;;  %v19203_v39 = vld [vmem:[#allocation26_spill] sm:$0xff]  ;;  %v7661_v10 = vadd.f32 %v10772_v62, %v19204_v57 }
 0x552   :  { %v10774_v33 = vpop.f32.mrf.mxu0  ;;  %v10830_v59 = vadd.f32 %v19203_v39, %v19202_v55  ;;  %v17507_v26 = vadd.f32 %v10824_v4, %v7645_v19  ;;  %v10836_v24 = vadd.f32 %v10835_v14, %v17450_v13  ;;  %v17513_v36 = vadd.f32 %v10827_v20, %v7650_v27  ;;  %v11851_v19 = vld [vmem:[%s18341_s7] sm:$0xff]  }
 0x553   :  { %v17477_v23 = vpop.f32.mrf.mxu1  ;;  %v19205_v63 = vld [vmem:[#allocation46_spill] sm:$0xff] }
 0x554   :  { %v10776_v44 = vpop.f32.mrf.mxu0  ;;  %v10833_v2 = vadd.f32 %v17444_v11, %v19205_v63  ;;  %v17521_v46 = vadd.f32 %v10836_v24, %v7661_v10 }
 0x555   :  { %v10838_v25 = vpop.f32.mrf.mxu1 }
 0x556   :  { %v10777_v15 = vpop.f32.mrf.mxu0  ;;  %v17517_v21 = vadd.f32 %v10833_v2, %v7658_v38  ;;  %v10839_v60 = vadd.f32 %v10838_v25, %v17477_v23 }
 0x557   :  { %v10840_v56 = vpop.f32.mrf.mxu1  ;;  %v10778_v5 = vadd.f32 %v10777_v15, %v10776_v44  ;;  %v11849_v15 = vld [vmem:[%s18341_s7 + $0x40] sm:$0xff]  }
 0x558   :  { %v11017_v18 = vpop.f32.mrf.mxu0  ;;  %10873 = vmatprep.subr.bf16.mxu1 %v11849_v15 }
 0x559   :  { %v7812_v6 = vadd.f32 %v11017_v18, %v7715_v30  ;;  %v10775_v30 = vadd.f32 %v10774_v33, %v10773_v41  ;;  %v10841_v13 = vpop.f32.mrf.mxu1  ;;  %10874 = vmatpush3.bf16.msra.mxu1 %v11851_v19  ;;  %v11853_v19 = vld [vmem:[%s18341_s7 + $0xd8] sm:$0xff]  }
 0x55a   :  { %v7803_v37 = vpop.f32.mrf.mxu0  ;;  %v10842_v27 = vadd.f32 %v10841_v13, %v10840_v56 }
 0x55b   :  { %v7884_v45 = vmul.f32 0.01, %v7812_v6  ;;  %v7804_v42 = vadd.f32 %v7803_v37, %v7707_v28  ;;  %vm7868_vm12 = vcmp.gt.f32.partialorder %v7812_v6, 0.0  ;;  %v17515_v28 = vadd.f32 %v10830_v59, %v7653_v7 }
 0x55c   :  { %v11018_v3 = vpop.f32.mrf.mxu0  ;;  %v7666_v34 = vadd.f32 %v10775_v30, %v19206_v53  ;;  %v7669_v7 = vadd.f32 %v10778_v5, %v19207_v51 }
 0x55d   :  { %v7815_v1 = vadd.f32 %v11018_v3, %v7718_v31  ;;  %v17519_v22 = vsel %vm7868_vm12, %v7812_v6, %v7884_v45  ;;  %v7882_v12 = vmul.f32 0.01, %v7804_v42  ;;  %vm7866_vm15 = vcmp.gt.f32.partialorder %v7804_v42, 0.0  ;;  %v11852_v6 = vld [vmem:[%s18341_s7 + $0xa0] sm:$0xff]  }
 0x55e   :  { %v7806_v16 = vpop.f32.mrf.mxu0  ;;  %v8005_v48 = vrot.slane %v17519_v22, 1  ;;  %v8037_v62 = vrot.slane %v17519_v22, 7  ;;  %10930 = vmatpush3.bf16.msra.mxu0 %v11852_v6  ;;  %v8069_v59 = vrot.slane %v17519_v22, 5  ;;  %v17569_v10 = vadd.f32 %v10839_v60, %v7666_v34  ;;  %v11854_v6 = vld [vmem:[%s18341_s7 + $0x98] sm:$0xff]  }
 0x55f   :  { %vm7869_vm13 = vcmp.gt.f32.partialorder %v7815_v1, 0.0  ;;  %v7885_v29 = vmul.f32 0.01, %v7815_v1  ;;  %v7807_v11 = vadd.f32 %v7806_v16, %v7710_v52  ;;  %10931 = vmatprep.subr.bf16.mxu0 %v11853_v19 }
 0x560   :  { %v11021_v50 = vpop.f32.mrf.mxu0 }
 0x561   :  { %v17523_v41 = vsel %vm7869_vm13, %v7815_v1, %v7885_v29  ;;  %vm7867_vm14 = vcmp.gt.f32.partialorder %v7807_v11, 0.0  ;;  %v7883_v14 = vmul.f32 0.01, %v7807_v11  ;;  %v7828_v33 = vadd.f32 %v11021_v50, %v7731_v0 }
 0x562   :  { %v8006_v52 = vrot.slane %v17523_v41, 1  ;;  %v8038_v31 = vrot.slane %v17523_v41, 7  ;;  %v7819_v44 = vpop.f32.mrf.mxu0  ;;  %v17547_v0 = vsel %vm7866_vm15, %v7804_v42, %v7882_v12  ;;  %v8070_v42 = vrot.slane %v17523_v41, 5  ;;  %10932 = vmatpush3.bf16.msra.mxu0 %v11854_v6 }
 0x563   :  { %v17536_v18 = vsel %vm7867_vm14, %v7807_v11, %v7883_v14  ;;  %v7820_v58 = vadd.f32 %v7819_v44, %v7723_v40  ;;  %v7888_v40 = vmul.f32 0.01, %v7828_v33  ;;  %vm7872_vm3 = vcmp.gt.f32.partialorder %v7828_v33, 0.0 }
 0x564   :  { %v11022_v37 = vpop.f32.mrf.mxu0  ;;  %v17552_v35 = vsel %vm585_vm0, %v8006_v52, %v8038_v31  ;;  %v8003_v23 = vrot.slane %v17536_v18, 1  ;;  %v8035_v25 = vrot.slane %v17536_v18, 7  ;;  %v8004_v54 = vrot.slane %v17547_v0, 1 }
 0x565   :  { %v7831_v43 = vadd.f32 %v11022_v37, %v7734_v61  ;;  %v7886_v4 = vmul.f32 0.01, %v7820_v58  ;;  %vm7870_vm4 = vcmp.gt.f32.partialorder %v7820_v58, 0.0  ;;  %v17560_v61 = vsel %vm585_vm0, %v8005_v48, %v8037_v62 }
 0x566   :  { %v7822_v8 = vpop.f32.mrf.mxu0  ;;  %v8036_v38 = vrot.slane %v17547_v0, 7  ;;  %v11076_v55 = vpack.i.bf16 %v17552_v35, %v17560_v61  ;;  %v17567_v57 = vsel %vm7872_vm3, %v7828_v33, %v7888_v40  ;;  %v8068_v45 = vrot.slane %v17547_v0, 5  ;;  %v11855_v40 = vld [vmem:[%s18341_s7 + $0xd0] sm:$0xff]  }
 0x567   :  { %v7889_v32 = vmul.f32 0.01, %v7831_v43  ;;  %v7823_v20 = vadd.f32 %v7822_v8, %v17491_v17  ;;  %vm7873_vm5 = vcmp.gt.f32.partialorder %v7831_v43, 0.0  ;;  %v17571_v17 = vadd.f32 %v10842_v27, %v7669_v7  ;;  %v11857_v8 = vld [vmem:[%s18341_s7 + $0x90] sm:$0xff]   ;;  %10933 = vmatprep.subr.bf16.mxu0 %v11855_v40 }
 0x568   :  { %v11025_v39 = vpop.f32.mrf.mxu0  ;;  %v17575_v3 = vsel %vm7870_vm4, %v7820_v58, %v7886_v4  ;;  %11077 = vrot.lane.b32.xlu1 %v11076_v55, %s11897_s1  ;;  %v17579_v63 = vsel %vm585_vm0, %v8003_v23, %v8035_v25  ;;  %v8207_v47 = vrot.slane %v17560_v61, 2  ;;  %v8067_v30 = vrot.slane %v17536_v18, 5  ;;  %10934 = vmatpush3.bf16.msra.mxu0 %v11857_v8 }
 0x569   :  { %v17581_v56 = vsel %vm7873_vm5, %v7831_v43, %v7889_v32  ;;  %v7887_v1 = vmul.f32 0.01, %v7823_v20  ;;  %v7844_v24 = vadd.f32 %v11025_v39, %v17513_v36  ;;  %v8009_v16 = vrot.slane %v17567_v57, 1  ;;  %v17637_v43 = vld [vmem:[%s18341_s7 + $0x118] sm:$0xff]  }
 0x56a   :  { %v7835_v2 = vpop.f32.mrf.mxu0  ;;  %vm7871_vm6 = vcmp.gt.f32.partialorder %v7823_v20, 0.0  ;;  %v17588_v29 = vsel %vm585_vm0, %v8004_v54, %v8036_v38  ;;  %v8041_v5 = vrot.slane %v17567_v57, 7  ;;  %v8007_v12 = vrot.slane %v17575_v3, 1  ;;  %11031 = vmatprep.subr.bf16.mxu1 %v17637_v43 }
 0x56b   :  { %v8039_v50 = vrot.slane %v17575_v3, 7  ;;  %v11066_v13 = vpack.i.bf16 %v17579_v63, %v17588_v29  ;;  %v8073_v36 = vrot.slane %v17567_v57, 5  ;;  %v8071_v14 = vrot.slane %v17575_v3, 5 }
 0x56c   :  { %v11026_v11 = vpop.f32.mrf.mxu0  ;;  %v8010_v33 = vrot.slane %v17581_v56, 1  ;;  %v8210_v53 = vrot.slane %v17552_v35, 2  ;;  %v8042_v52 = vrot.slane %v17581_v56, 7  ;;  %v17600_v44 = vsel %vm7871_vm6, %v7823_v20, %v7887_v1 }
 0x56d   :  { %vm7876_vm7 = vcmp.gt.f32.partialorder %v7844_v24, 0.0  ;;  %v7892_v15 = vmul.f32 0.01, %v7844_v24  ;;  %11067 = vrot.lane.b32.xlu0 %v11066_v13, %s11897_s1  ;;  %v7836_v49 = vadd.f32 %v7835_v2, %v17500_v9  ;;  %v17607_v48 = vsel %vm585_vm0, %v8037_v62, %v8069_v59 }
 0x56e   :  { %v7838_v34 = vpop.f32.mrf.mxu0  ;;  %v8165_v18 = vrot.slane %v17560_v61, 1  ;;  %v17611_v58 = vsel %vm585_vm0, %v8035_v25, %v8067_v30  ;;  %v17620_v9 = vsel %vm585_vm0, %v8007_v12, %v8039_v50  ;;  %v8166_v22 = vrot.slane %v17607_v48, 1 }
 0x56f   :  { %v17624_v62 = vsel %vm585_vm0, %v8036_v38, %v8068_v45  ;;  %v8159_v60 = vrot.slane %v17579_v63, 1  ;;  %v8074_v27 = vrot.slane %v17581_v56, 5  ;;  %v8008_v51 = vrot.slane %v17600_v44, 1 }
 0x570   :  { %v8040_v7 = vrot.slane %v17600_v44, 7  ;;  %v7847_v37 = vadd.f32 %v11026_v11, %v17515_v28  ;;  %v11029_v0 = vpop.f32.mrf.mxu0  ;;  %v8072_v23 = vrot.slane %v17600_v44, 5  ;;  %v17641_v25 = vsel %vm7876_vm7, %v7844_v24, %v7892_v15 }
 0x571   :  { %v17644_v4 = vsel %vm706_vm1, %v8165_v18, %v8166_v22  ;;  %v8160_v28 = vrot.slane %v17611_v58, 1  ;;  %v7890_v32 = vmul.f32 0.01, %v7836_v49  ;;  %v8162_v54 = vrot.slane %v17588_v29, 1 }
 0x572   :  { %v11081_v20 = vpack.i.bf16 %v17620_v9, %v17644_v4  ;;  %v8163_v38 = vrot.slane %v17624_v62, 1  ;;  %v8201_v55 = vrot.slane %v17579_v63, 2  ;;  %vm7874_vm8 = vcmp.gt.f32.partialorder %v7836_v49, 0.0  ;;  %v7851_v1 = vpop.f32.mrf.mxu0 }
 0x573   :  { %v17657_v39 = vsel %vm706_vm1, %v8159_v60, %v8160_v28  ;;  %v7839_v59 = vadd.f32 %v7838_v34, %v17507_v26  ;;  %v8013_v45 = vrot.slane %v17641_v25, 1  ;;  %vm7877_vm9 = vcmp.gt.f32.partialorder %v7847_v37, 0.0 }
 0x574   :  { %11082 = vrot.lane.b32.xlu1 %v11081_v20, %s11897_s1  ;;  %v17663_v3 = vsel %vm706_vm1, %v8162_v54, %v8163_v38  ;;  %v17666_v2 = vsel %vm585_vm0, %v8039_v50, %v8071_v14  ;;  %v7893_v24 = vmul.f32 0.01, %v7847_v37  ;;  %v7860_v11 = vadd.f32 %v11029_v0, %v17569_v10  ;;  %v11030_v22 = vpop.f32.mrf.mxu0 }
 0x575   :  { %v11071_v30 = vpack.i.bf16 %v17663_v3, %v17657_v39  ;;  %v8171_v26 = vrot.slane %v17620_v9, 1  ;;  %v17672_v12 = vsel %vm7874_vm8, %v7836_v49, %v7890_v32  ;;  %v7891_v13 = vmul.f32 0.01, %v7839_v59 }
 0x576   :  { %v8172_v34 = vrot.slane %v17666_v2, 1  ;;  %v17680_v50 = vsel %vm585_vm0, %v8038_v31, %v8070_v42  ;;  %vm7875_vm10 = vcmp.gt.f32.partialorder %v7839_v59, 0.0  ;;  %v8168_v10 = vrot.slane %v17552_v35, 1  ;;  %v11859_v42 = vld [vmem:[%s18341_s7 + $0x88] sm:$0xff]  }
 0x577   :  { %11072 = vrot.lane.b32.xlu0 %v11071_v30, %s11897_s1  ;;  %v8169_v14 = vrot.slane %v17680_v50, 1  ;;  %v7852_v15 = vadd.f32 %v7851_v1, %v17517_v21  ;;  %v8045_v49 = vrot.slane %v17641_v25, 7  ;;  %v8077_v18 = vrot.slane %v17641_v25, 5  ;;  %v11858_v21 = vld [vmem:[%s18341_s7 + $0xc8] sm:$0xff]  }
 0x578   :  { %v17693_v41 = vsel %vm585_vm0, %v8009_v16, %v8041_v5  ;;  %v17698_v31 = vsel %vm585_vm0, %v8008_v51, %v8040_v7  ;;  %v8012_v19 = vrot.slane %v17672_v12, 1  ;;  %v17708_v6 = vsel %vm7877_vm9, %v7847_v37, %v7893_v24  ;;  %10935 = vmatprep.subr.bf16.mxu0 %v11858_v21 }
 0x579   :  { %vm7880_vm11 = vcmp.gt.f32.partialorder %v7860_v11, 0.0  ;;  %v17711_v16 = vsel %vm706_vm1, %v8171_v26, %v8172_v34  ;;  %v7907_v60 = vsel %vm7875_vm10, %v7839_v59, %v7891_v13  ;;  %v7896_v51 = vmul.f32 0.01, %v7860_v11  ;;  %10936 = vmatpush3.bf16.msra.mxu0 %v11859_v42 }
 0x57a   :  { %v11091_v0 = vpack.i.bf16 %v17693_v41, %v17711_v16  ;;  %v17716_v40 = vsel %vm706_vm1, %v8168_v10, %v8169_v14  ;;  %v7894_v8 = vmul.f32 0.01, %v7852_v15  ;;  %v17725_v37 = vsel %vm585_vm0, %v8041_v5, %v8073_v36  ;;  %v7854_v5 = vpop.f32.mrf.mxu0  ;;  %v11860_v10 = vld [vmem:[%s18341_s7 + $0xc0] sm:$0xff]  }
 0x57b   :  { %v11086_v28 = vpack.i.bf16 %v17716_v40, %v17698_v31  ;;  %v8177_v32 = vrot.slane %v17693_v41, 1  ;;  %vm7878_vm12 = vcmp.gt.f32.partialorder %v7852_v15, 0.0  ;;  %v8178_v20 = vrot.slane %v17725_v37, 1  ;;  %v11861_v14 = vld [vmem:[%s18341_s7 + $0x80] sm:$0xff]   ;;  %10937 = vmatprep.subr.bf16.mxu0 %v11860_v10 }
 0x57c   :  { %11092 = vrot.lane.b32.xlu1 %v11091_v0, %s11897_s1  ;;  %v8204_v54 = vrot.slane %v17588_v29, 2  ;;  %v8205_v38 = vrot.slane %v17624_v62, 2  ;;  %v8044_v59 = vrot.slane %v17672_v12, 7  ;;  %v8076_v1 = vrot.slane %v17672_v12, 5 }
 0x57d   :  { %v8011_v57 = vrot.slane %v7907_v60, 1  ;;  %v8043_v24 = vrot.slane %v7907_v60, 7  ;;  %11087 = vrot.lane.b32.xlu0 %v11086_v28, %s11897_s1  ;;  %v8075_v36 = vrot.slane %v7907_v60, 5  ;;  %v17736_v30 = vsel %vm7880_vm11, %v7860_v11, %v7896_v51  ;;  %10938 = vmatpush3.bf16.msra.mxu0 %v11861_v14 }
 0x57e   :  { %v17739_v26 = vsel %vm706_vm1, %v8177_v32, %v8178_v20  ;;  %v17742_v13 = vsel %vm819_vm2, %v8204_v54, %v8205_v38  ;;  %v17744_v62 = vsel %vm7878_vm12, %v7852_v15, %v7894_v8  ;;  %v17753_v34 = vsel %vm585_vm0, %v8040_v7, %v8072_v23 }
 0x57f   :  { %v11101_v12 = vpack.i.bf16 %v17742_v13, %v17739_v26  ;;  %v8174_v11 = vrot.slane %v17698_v31, 1  ;;  %v8014_v15 = vrot.slane %v17708_v6, 1  ;;  %v8046_v21 = vrot.slane %v17708_v6, 7 }
 0x580   :  { %v8175_v42 = vrot.slane %v17753_v34, 1  ;;  %v7855_v44 = vadd.f32 %v7854_v5, %v17521_v46  ;;  %v8078_v7 = vrot.slane %v17708_v6, 5  ;;  %v8202_v23 = vrot.slane %v17611_v58, 2 }
 0x581   :  { %v8017_v60 = vrot.slane %v17736_v30, 1  ;;  %v17770_v51 = vadd.f32 %v11030_v22, %v17571_v17  ;;  %11102 = vrot.lane.b32.xlu1 %v11101_v12, %s11897_s1  ;;  %v8015_v0 = vrot.slane %v17744_v62, 1  ;;  %v17779_v46 = vsel %vm585_vm0, %v8010_v33, %v8042_v52 }
 0x582   :  { %v17782_v6 = vsel %vm706_vm1, %v8174_v11, %v8175_v42  ;;  %v17785_v58 = vsel %vm585_vm0, %v8012_v19, %v8044_v59  ;;  %v17790_v22 = vsel %vm585_vm0, %v8011_v57, %v8043_v24  ;;  %v17793_v28 = vsel %vm585_vm0, %v8043_v24, %v8075_v36 }
 0x583   :  { %v11096_v17 = vpack.i.bf16 %v17782_v6, %v17779_v46  ;;  %v17796_v8 = vsel %vm585_vm0, %v8044_v59, %v8076_v1  ;;  %v8047_v33 = vrot.slane %v17744_v62, 7  ;;  %v7895_v32 = vmul.f32 0.01, %v7855_v44 }
 0x584   :  { %v8180_v20 = vrot.slane %v17790_v22, 1  ;;  %v8181_v19 = vrot.slane %v17793_v28, 1  ;;  %v8079_v54 = vrot.slane %v17744_v62, 5  ;;  %v7897_v38 = vmul.f32 0.01, %v17770_v51 }
 0x585   :  { %11097 = vrot.lane.b32.xlu0 %v11096_v17, %s11897_s1  ;;  %vm7879_vm13 = vcmp.gt.f32.partialorder %v7855_v44, 0.0  ;;  %v17807_v57 = vsel %vm819_vm2, %v8201_v55, %v8202_v23  ;;  %vm7881_vm14 = vcmp.gt.f32.partialorder %v17770_v51, 0.0  ;;  %v8183_v1 = vrot.slane %v17785_v58, 1 }
 0x586   :  { %v17811_v59 = vsel %vm706_vm1, %v8180_v20, %v8181_v19  ;;  %v8184_v24 = vrot.slane %v17796_v8, 1  ;;  %v8208_v5 = vrot.slane %v17607_v48, 2  ;;  %v11106_v36 = vpack.i.bf16 %v17785_v58, %v17807_v57 }
 0x587   :  { %v11111_v62 = vpack.i.bf16 %v17811_v59, %v17790_v22  ;;  %v17825_v55 = vsel %vm585_vm0, %v8013_v45, %v8045_v49  ;;  %v8211_v12 = vrot.slane %v17680_v50, 2  ;;  %v7911_v11 = vsel %vm7879_vm13, %v7855_v44, %v7895_v32 }
 0x588   :  { %v17829_v10 = vsel %vm706_vm1, %v8183_v1, %v8184_v24  ;;  %v17836_v48 = vsel %vm585_vm0, %v8045_v49, %v8077_v18  ;;  %v8186_v14 = vrot.slane %v17825_v55, 1  ;;  %v17844_v45 = vsel %vm819_vm2, %v8207_v47, %v8208_v5 }
 0x589   :  { %11107 = vrot.lane.b32.xlu0 %v11106_v36, %s11897_s1  ;;  %11112 = vrot.lane.b32.xlu1 %v11111_v62, %s11897_s1  ;;  %v17847_v50 = vsel %vm585_vm0, %v8014_v15, %v8046_v21  ;;  %v8187_v42 = vrot.slane %v17836_v48, 1  ;;  %v8213_v25 = vrot.slane %v17620_v9, 2  ;;  %v17854_v49 = vsel %vm819_vm2, %v8210_v53, %v8211_v12 }
 0x58a   :  { %v8214_v18 = vrot.slane %v17666_v2, 2  ;;  %v8216_v44 = vrot.slane %v17698_v31, 2  ;;  %v8217_v23 = vrot.slane %v17753_v34, 2  ;;  %v11116_v47 = vpack.i.bf16 %v17844_v45, %v17829_v10 }
 0x58b   :  { %v11121_v15 = vpack.i.bf16 %v17825_v55, %v17854_v49  ;;  %v17864_v17 = vsel %vm585_vm0, %v8015_v0, %v8047_v33  ;;  %v17867_v32 = vsel %vm585_vm0, %v8046_v21, %v8078_v7  ;;  %v8016_v53 = vrot.slane %v7911_v11, 1 }
 0x58c   :  { %v8048_v20 = vrot.slane %v7911_v11, 7  ;;  %v17870_v2 = vsel %vm706_vm1, %v8186_v14, %v8187_v42  ;;  %v17873_v19 = vsel %vm819_vm2, %v8216_v44, %v8217_v23  ;;  %v8080_v34 = vrot.slane %v7911_v11, 5 }
 0x58d   :  { %11117 = vrot.lane.b32.xlu0 %v11116_v47, %s11897_s1  ;;  %11122 = vrot.lane.b32.xlu1 %v11121_v15, %s11897_s1  ;;  %v17878_v1 = vsel %vm819_vm2, %v8213_v25, %v8214_v18  ;;  %v17881_v0 = vsel %vm585_vm0, %v8047_v33, %v8079_v54  ;;  %v8189_v21 = vrot.slane %v17847_v50, 1  ;;  %v8190_v7 = vrot.slane %v17867_v32, 1 }
 0x58e   :  { %v8192_v24 = vrot.slane %v17864_v17, 1  ;;  %v8193_v5 = vrot.slane %v17881_v0, 1  ;;  %v8122_v36 = vsel %vm585_vm0, %v8042_v52, %v8074_v27  ;;  %v8049_v62 = vrot.slane %v17736_v30, 7 }
 0x58f   :  { %v8081_v12 = vrot.slane %v17736_v30, 5  ;;  %v11126_v33 = vpack.i.bf16 %v17870_v2, %v17847_v50  ;;  %v11131_v54 = vpack.i.bf16 %v17873_v19, %v17878_v1  ;;  %v17899_v11 = vsel %vm585_vm0, %v8016_v53, %v8048_v20 }
 0x590   :  { %v17902_v14 = vsel %vm706_vm1, %v8192_v24, %v8193_v5  ;;  %v8261_v56 = vrot.slane %v17779_v46, 1  ;;  %v8262_v42 = vrot.slane %v8122_v36, 1  ;;  %v8219_v52 = vrot.slane %v17693_v41, 2 }
 0x591   :  { %v7913_v27 = vsel %vm7881_vm14, %v17770_v51, %v7897_v38  ;;  %v8220_v25 = vrot.slane %v17725_v37, 2  ;;  %11127 = vrot.lane.b32.xlu0 %v11126_v33, %s11897_s1  ;;  %11132 = vrot.lane.b32.xlu1 %v11131_v54, %s11897_s1  ;;  %v17913_v18 = vsel %vm706_vm1, %v8189_v21, %v8190_v7  ;;  %v8283_v44 = vrot.slane %v17779_v46, 2 }
 0x592   :  { %v8284_v23 = vrot.slane %v8122_v36, 2  ;;  %v8128_v47 = vsel %vm585_vm0, %v8048_v20, %v8080_v34  ;;  %v11141_v15 = vpack.i.bf16 %v17899_v11, %v17864_v17  ;;  %v11136_v51 = vpack.i.bf16 %v17902_v14, %v17913_v18 }
 0x593   :  { %v17924_v37 = vsel %vm585_vm0, %v8017_v60, %v8049_v62  ;;  %v17927_v38 = vsel %vm706_vm1, %v8261_v56, %v8262_v42  ;;  %v8195_v53 = vrot.slane %v17899_v11, 1  ;;  %v8196_v21 = vrot.slane %v8128_v47, 1 }
 0x594   :  { %v8129_v7 = vsel %vm585_vm0, %v8049_v62, %v8081_v12  ;;  %v8018_v20 = vrot.slane %v7913_v27, 1  ;;  %v8050_v34 = vrot.slane %v7913_v27, 7  ;;  %v8082_v24 = vrot.slane %v7913_v27, 5 }
 0x595   :  { %11142 = vrot.lane.b32.xlu0 %v11141_v15, %s11897_s1  ;;  %11137 = vrot.lane.b32.xlu1 %v11136_v51, %s11897_s1  ;;  %v8222_v30 = vrot.slane %v17790_v22, 2  ;;  %v8223_v60 = vrot.slane %v17793_v28, 2  ;;  %v17936_v5 = vsel %vm819_vm2, %v8219_v52, %v8220_v25  ;;  %v17939_v36 = vsel %vm819_vm2, %v8283_v44, %v8284_v23 }
 0x596   :  { %v11146_v62 = vpack.i.bf16 %v17936_v5, %v17927_v38  ;;  %v11151_v12 = vpack.i.bf16 %v17924_v37, %v17939_v36  ;;  %v8198_v33 = vrot.slane %v17924_v37, 1  ;;  %v8199_v54 = vrot.slane %v8129_v7, 1 }
 0x597   :  { %v17947_v56 = vsel %vm706_vm1, %v8195_v53, %v8196_v21  ;;  %v8231_v28 = vrot.slane %v17847_v50, 2  ;;  %v8232_v42 = vrot.slane %v17867_v32, 2  ;;  %v17954_v52 = vsel %vm585_vm0, %v8018_v20, %v8050_v34 }
 0x598   :  { %v8130_v27 = vsel %vm585_vm0, %v8050_v34, %v8082_v24  ;;  %v8225_v25 = vrot.slane %v17785_v58, 2  ;;  %v8226_v44 = vrot.slane %v17796_v8, 2  ;;  %v8228_v23 = vrot.slane %v17825_v55, 2 }
 0x599   :  { %11147 = vrot.lane.b32.xlu0 %v11146_v62, %s11897_s1  ;;  %11152 = vrot.lane.b32.xlu1 %v11151_v12, %s11897_s1  ;;  %v8229_v15 = vrot.slane %v17836_v48, 2  ;;  %v11156_v32 = vpack.i.bf16 %v17947_v56, %v17954_v52  ;;  %v17964_v51 = vsel %vm706_vm1, %v8198_v33, %v8199_v54  ;;  %v17967_v53 = vsel %vm819_vm2, %v8222_v30, %v8223_v60 }
 0x59a   :  { %v8237_v21 = vrot.slane %v17899_v11, 2  ;;  %v17971_v20 = vsel %vm819_vm2, %v8231_v28, %v8232_v42  ;;  %v8238_v34 = vrot.slane %v8128_v47, 2  ;;  %v8264_v8 = vrot.slane %v17954_v52, 1 }
 0x59b   :  { %v8265_v24 = vrot.slane %v8130_v27, 1  ;;  %v8240_v48 = vrot.slane %v17924_v37, 2  ;;  %v8241_v62 = vrot.slane %v8129_v7, 2  ;;  %v17979_v30 = vsel %vm819_vm2, %v8225_v25, %v8226_v44 }
 0x59c   :  { %v17982_v60 = vsel %vm819_vm2, %v8228_v23, %v8229_v15  ;;  %v8234_v12 = vrot.slane %v17864_v17, 2  ;;  %v8235_v47 = vrot.slane %v17881_v0, 2  ;;  %v11161_v33 = vpack.i.bf16 %v17967_v53, %v17979_v30 }
 0x59d   :  { %11157 = vrot.lane.b32.xlu0 %v11156_v32, %s11897_s1  ;;  %8317 = vrot.lane.b32.xlu1 %v17964_v51, %s11897_s1  ;;  %v11166_v54 = vpack.i.bf16 %v17971_v20, %v17982_v60  ;;  %v17991_v7 = vsel %vm819_vm2, %v8237_v21, %v8238_v34  ;;  %v17994_v28 = vsel %vm706_vm1, %v8264_v8, %v8265_v24  ;;  %v8286_v23 = vrot.slane %v17954_v52, 2 }
 0x59e   :  { %v17999_v42 = vsel %vm819_vm2, %v8234_v12, %v8235_v47  ;;  %v18002_v0 = vsel %vm819_vm2, %v8240_v48, %v8241_v62  ;;  %v8287_v15 = vrot.slane %v8130_v27, 2  ;;  %vm8435_vm0 = vcmask 523264  }
 0x59f   :  { %v11171_v25 = vpack.i.bf16 %v17991_v7, %v17999_v42  ;;  %v11176_v44 = vpack.i.bf16 %v18002_v0, %v17994_v28  ;;  %vm9127_vm1 = vcmask 261120  }
 0x5a0   :  { %v18012_v32 = vsel %vm819_vm2, %v8286_v23, %v8287_v15 }
 0x5a1   :  { %11162 = vrot.lane.b32.xlu0 %v11161_v33, %s11897_s1  ;;  %11167 = vrot.lane.b32.xlu1 %v11166_v54, %s11897_s1  ;;  %19208 = vst [vmem:[#allocation27_spill] sm:$0xff] %v18012_v32 }
 0x5a5   :  { %11172 = vrot.lane.b32.xlu0 %v11171_v25, %s11897_s1  ;;  %11177 = vrot.lane.b32.xlu1 %v11176_v44, %s11897_s1 }
 0x5a9   :  { %8411 = vrot.lane.b32.xlu0 %v18012_v32, %s11897_s1 }
 0x5da   :  { %v11078_v24 = vpop.permute.xlu1 %11077 }
 0x5db   :  { %v11080_v47 = vunpack.i.h.bf16 %v11078_v24  ;;  %v11079_v33 = vunpack.i.l.bf16 %v11078_v24 }
 0x5df   :  { %v11068_v21 = vpop.permute.xlu0 %11067 }
 0x5e0   :  { %v11070_v34 = vunpack.i.h.bf16 %v11068_v21  ;;  %v11069_v8 = vunpack.i.l.bf16 %v11068_v21  ;;  %v8452_v21 = vsel %vm8435_vm0, %v17807_v57, %v11079_v33 }
 0x5e2   :  { %v8450_v48 = vsel %vm8435_vm0, %v17807_v57, %v11069_v8  ;;  %v8451_v27 = vsel %vm8435_vm0, %v17742_v13, %v11070_v34  ;;  %v8453_v8 = vsel %vm8435_vm0, %v17844_v45, %v11080_v47 }
 0x5e3   :  { %v8485_v62 = vpack.c.bf16 %v8451_v27, %v8450_v48  ;;  %v11862_v27 = vld [vmem:[%s18341_s7 + $0x110] sm:$0xff]  }
 0x5e5   :  { %8796 = vmatprep.mubr.bf16.mxu1 %v8485_v62  ;;  %v8489_v62 = vpack.c.bf16 %v8453_v8, %v8452_v21 }
 0x5e6   :  { %v11083_v12 = vpop.permute.xlu1 %11082 }
 0x5e7   :  { %v11084_v54 = vunpack.i.l.bf16 %v11083_v12  ;;  %v11085_v47 = vunpack.i.h.bf16 %v11083_v12 }
 0x5e9   :  { %v11073_v25 = vpop.permute.xlu0 %11072  ;;  %v8438_v15 = vsel %vm8435_vm0, %v17560_v61, %v11084_v54 }
 0x5ea   :  { %v11075_v44 = vunpack.i.h.bf16 %v11073_v25  ;;  %v11074_v23 = vunpack.i.l.bf16 %v11073_v25  ;;  %v8454_v25 = vsel %vm8435_vm0, %v17854_v49, %v11085_v47 }
 0x5ec   :  { %v8437_v13 = vsel %vm8435_vm0, %v17588_v29, %v11075_v44  ;;  %v8436_v34 = vsel %vm8435_vm0, %v17579_v63, %v11074_v23  ;;  %v11863_v63 = vld [vmem:[%s18341_s7 + $0x108] sm:$0xff]   ;;  %v11864_v44 = vld [vmem:[%s18341_s7 + $0x100] sm:$0xff]  }
 0x5ed   :  { %v8484_v24 = vpack.c.bf16 %v8437_v13, %v8436_v34  ;;  %v8487_v48 = vpack.c.bf16 %v8438_v15, %v8436_v34 }
 0x5ee   :  { %v11093_v54 = vpop.permute.xlu1 %11092 }
 0x5ef   :  { %v11088_v61 = vpop.permute.xlu0 %11087  ;;  %8797 = vmatmul.mubr.bf16.vlgmr.msra.gmra.mxu1 %v8484_v24  ;;  %8893 = vmatprep.mubr.bf16.mxu0 %v8487_v48  ;;  %v11095_v13 = vunpack.i.h.bf16 %v11093_v54 }
 0x5f0   :  { %v11089_v33 = vunpack.i.l.bf16 %v11088_v61  ;;  %8804 = vmatprep.mubr.bf16.mxu1 %v8489_v62  ;;  %11032 = vmatpush3.bf16.msra.mxu1 %v17637_v43  ;;  %v11094_v43 = vunpack.i.l.bf16 %v11093_v54  ;;  %v11090_v12 = vunpack.i.h.bf16 %v11088_v61 }
 0x5f1   :  { %11033 = vmatprep.subr.bf16.mxu1 %v11862_v27  ;;  %v8456_v54 = vsel %vm8435_vm0, %v17873_v19, %v11095_v13 }
 0x5f2   :  { %v8455_v29 = vsel %vm8435_vm0, %v17878_v1, %v11089_v33  ;;  %v8439_v24 = vsel %vm8435_vm0, %v17552_v35, %v11090_v12 }
 0x5f3   :  { %v8493_v23 = vpack.c.bf16 %v8455_v29, %v8454_v25  ;;  %v11103_v15 = vpop.permute.xlu1 %11102 }
 0x5f4   :  { %11034 = vmatpush3.bf16.msra.mxu1 %v11862_v27  ;;  %v11105_v34 = vunpack.i.h.bf16 %v11103_v15  ;;  %v8440_v27 = vsel %vm8435_vm0, %v17620_v9, %v11094_v43 }
 0x5f5   :  { %11035 = vmatprep.subr.bf16.mxu1 %v11863_v63  ;;  %v8491_v29 = vpack.c.bf16 %v8440_v27, %v8439_v24 }
 0x5f7   :  { %v11098_v21 = vpop.permute.xlu0 %11097  ;;  %8805 = vmatmul.mubr.bf16.gmra.mxu1 %v8487_v48  ;;  %v11104_v48 = vunpack.i.l.bf16 %v11103_v15 }
 0x5f8   :  { %v11099_v8 = vunpack.i.l.bf16 %v11098_v21  ;;  %8812 = vmatprep.mubr.bf16.mxu1 %v8493_v23  ;;  %11036 = vmatpush3.bf16.msra.mxu1 %v11863_v63  ;;  %v8466_v63 = vsel %vm8435_vm0, %v17663_v3, %v11105_v34  ;;  %v11100_v25 = vunpack.i.h.bf16 %v11098_v21 }
 0x5f9   :  { %11037 = vmatprep.subr.bf16.mxu1 %v11864_v44 }
 0x5fa   :  { %v8457_v61 = vsel %vm8435_vm0, %v17936_v5, %v11099_v8  ;;  %v8441_v3 = vsel %vm8435_vm0, %v17698_v31, %v11100_v25 }
 0x5fb   :  { %v11108_v62 = vpop.permute.xlu0 %11107  ;;  %v11113_v33 = vpop.permute.xlu1 %11112  ;;  %v8497_v9 = vpack.c.bf16 %v8457_v61, %v8456_v54 }
 0x5fc   :  { %v11109_v47 = vunpack.i.l.bf16 %v11108_v62  ;;  %11038 = vmatpush3.bf16.msra.mxu1 %v11864_v44  ;;  %v11114_v12 = vunpack.i.l.bf16 %v11113_v33  ;;  %v11110_v15 = vunpack.i.h.bf16 %v11108_v62 }
 0x5fe   :  { %v8467_v35 = vsel %vm8435_vm0, %v17657_v39, %v11109_v47  ;;  %v8442_v39 = vsel %vm8435_vm0, %v17693_v41, %v11104_v48  ;;  %v8459_v24 = vsel %vm8435_vm0, %v17979_v30, %v11114_v12  ;;  %v11115_v47 = vunpack.i.h.bf16 %v11113_v33 }
 0x5ff   :  { %v8486_v43 = vpack.c.bf16 %v8467_v35, %v8466_v63  ;;  %v11118_v23 = vpop.permute.xlu0 %11117  ;;  %v11123_v32 = vpop.permute.xlu1 %11122  ;;  %8813 = vmatmul.mubr.bf16.gmra.mxu1 %v8491_v29  ;;  %v8495_v61 = vpack.c.bf16 %v8442_v39, %v8441_v3 }
 0x600   :  { %v11120_v8 = vunpack.i.h.bf16 %v11118_v23  ;;  %v11124_v44 = vunpack.i.l.bf16 %v11123_v32  ;;  %8820 = vmatprep.mubr.bf16.mxu1 %v8497_v9  ;;  %v11125_v31 = vunpack.i.h.bf16 %v11123_v32 }
 0x601   :  { %8894 = vmatmul.mubr.bf16.vlgmr.msra.gmra.mxu0 %v8486_v43 }
 0x602   :  { %v8469_v13 = vsel %vm8435_vm0, %v17716_v40, %v11124_v44  ;;  %8901 = vmatprep.mubr.bf16.mxu0 %v8491_v29  ;;  %v8468_v27 = vsel %vm8435_vm0, %v17644_v4, %v11120_v8  ;;  %v8458_v40 = vsel %vm8435_vm0, %v17967_v53, %v11110_v15  ;;  %v11119_v29 = vunpack.i.l.bf16 %v11118_v23 }
 0x603   :  { %v11128_v21 = vpop.permute.xlu0 %11127  ;;  %v11133_v34 = vpop.permute.xlu1 %11132  ;;  %v8490_v62 = vpack.c.bf16 %v8469_v13, %v8468_v27  ;;  %v8502_v54 = vpack.c.bf16 %v8459_v24, %v8458_v40  ;;  %v8443_v4 = vsel %vm8435_vm0, %v17790_v22, %v11115_v47  ;;  %v8460_v33 = vsel %vm8435_vm0, %v17967_v53, %v11125_v31 }
 0x604   :  { %v11129_v63 = vunpack.i.l.bf16 %v11128_v21  ;;  %v11135_v48 = vunpack.i.h.bf16 %v11133_v34  ;;  %v11134_v35 = vunpack.i.l.bf16 %v11133_v34  ;;  %v8444_v30 = vsel %vm8435_vm0, %v17785_v58, %v11119_v29 }
 0x605   :  { %v8501_v8 = vpack.c.bf16 %v8444_v30, %v8443_v4  ;;  %v11130_v44 = vunpack.i.h.bf16 %v11128_v21 }
 0x606   :  { %v8461_v32 = vsel %vm8435_vm0, %v17982_v60, %v11129_v63  ;;  %v8471_v43 = vsel %vm8435_vm0, %v17782_v6, %v11135_v48  ;;  %v8470_v12 = vsel %vm8435_vm0, %v17711_v16, %v11134_v35 }
 0x607   :  { %v11143_v25 = vpop.permute.xlu0 %11142  ;;  %v11138_v41 = vpop.permute.xlu1 %11137  ;;  %8821 = vmatmul.mubr.bf16.gmra.mxu1 %v8495_v61  ;;  %v8506_v15 = vpack.c.bf16 %v8461_v32, %v8460_v33  ;;  %v8494_v13 = vpack.c.bf16 %v8471_v43, %v8470_v12  ;;  %v8445_v16 = vsel %vm8435_vm0, %v17825_v55, %v11130_v44 }
 0x608   :  { %8828 = vmatprep.mubr.bf16.mxu1 %v8502_v54  ;;  %v11145_v3 = vunpack.i.h.bf16 %v11143_v25  ;;  %v11144_v34 = vunpack.i.l.bf16 %v11143_v25  ;;  %v11140_v47 = vunpack.i.h.bf16 %v11138_v41  ;;  %v11139_v29 = vunpack.i.l.bf16 %v11138_v41 }
 0x609   :  { %8902 = vmatmul.mubr.bf16.gmra.mxu0 %v8490_v62 }
 0x60a   :  { %8909 = vmatprep.mubr.bf16.mxu0 %v8495_v61  ;;  %v8462_v21 = vsel %vm8435_vm0, %v17971_v20, %v11144_v34  ;;  %v8447_v41 = vsel %vm8435_vm0, %v17864_v17, %v11140_v47 }
 0x60b   :  { %v11148_v9 = vpop.permute.xlu0 %11147  ;;  %v11153_v22 = vpop.permute.xlu1 %11152 }
 0x60c   :  { %v11149_v23 = vunpack.i.l.bf16 %v11148_v9  ;;  %v11154_v62 = vunpack.i.l.bf16 %v11153_v22  ;;  %v11150_v6 = vunpack.i.h.bf16 %v11148_v9  ;;  %v11155_v63 = vunpack.i.h.bf16 %v11153_v22 }
 0x60e   :  { %v8482_v58 = vsel %vm8435_vm0, %v17779_v46, %v11149_v23  ;;  %v8463_v46 = vsel %vm8435_vm0, %v17999_v42, %v11145_v3  ;;  %v8473_v61 = vsel %vm8435_vm0, %v17927_v38, %v11154_v62  ;;  %v8472_v54 = vsel %vm8435_vm0, %v17739_v26, %v11150_v6 }
 0x60f   :  { %v11158_v24 = vpop.permute.xlu0 %11157  ;;  %v8499_v27 = vpack.c.bf16 %v8442_v39, %v8482_v58  ;;  %8829 = vmatmul.mubr.bf16.gmra.mxu1 %v8501_v8  ;;  %v8504_v39 = vpack.c.bf16 %v8445_v16, %v8443_v4  ;;  %v8510_v31 = vpack.c.bf16 %v8463_v46, %v8462_v21  ;;  %v8498_v25 = vpack.c.bf16 %v8473_v61, %v8472_v54  ;;  %v8318_v48 = vpop.permute.xlu1 %8317 }
 0x610   :  { %8836 = vmatprep.mubr.bf16.mxu1 %v8506_v15  ;;  %v11159_v55 = vunpack.i.l.bf16 %v11158_v24  ;;  %v8446_v38 = vsel %vm8435_vm0, %v17847_v50, %v11139_v29  ;;  %v8464_v26 = vsel %vm8435_vm0, %v17991_v7, %v11155_v63  ;;  %v11160_v12 = vunpack.i.h.bf16 %v11158_v24 }
 0x611   :  { %8910 = vmatmul.mubr.bf16.gmra.mxu0 %v8494_v13  ;;  %v8508_v43 = vpack.c.bf16 %v8447_v41, %v8446_v38  ;;  %v8449_v44 = vsel %vm8435_vm0, %v17924_v37, %v8318_v48  ;;  %v8488_v3 = vpack.c.bf16 %v17844_v45, %v17807_v57  ;;  %v8496_v45 = vpack.c.bf16 %v17936_v5, %v17873_v19 }
 0x612   :  { %8917 = vmatprep.mubr.bf16.mxu0 %v8499_v27  ;;  %v8465_v4 = vsel %vm8435_vm0, %v18002_v0, %v11159_v55  ;;  %v8448_v22 = vsel %vm8435_vm0, %v17899_v11, %v11160_v12  ;;  %v8492_v27 = vpack.c.bf16 %v17878_v1, %v17854_v49  ;;  %v8500_v1 = vpack.c.bf16 %v17936_v5, %v17939_v36  ;;  %v19209_v5 = vld [vmem:[#allocation27_spill] sm:$0xff] }
 0x613   :  { %v11163_v40 = vpop.permute.xlu0 %11162  ;;  %v11168_v32 = vpop.permute.xlu1 %11167  ;;  %v8514_v23 = vpack.c.bf16 %v8465_v4, %v8464_v26  ;;  %v8512_v58 = vpack.c.bf16 %v8449_v44, %v8448_v22  ;;  %v8505_v19 = vpack.c.bf16 %v17982_v60, %v17967_v53  ;;  %v8509_v21 = vpack.c.bf16 %v17999_v42, %v17971_v20 }
 0x614   :  { %v11165_v35 = vunpack.i.h.bf16 %v11163_v40  ;;  %v11164_v30 = vunpack.i.l.bf16 %v11163_v40  ;;  %v11170_v8 = vunpack.i.h.bf16 %v11168_v32  ;;  %v11169_v17 = vunpack.i.l.bf16 %v11168_v32 }
 0x615   :  { %v8517_v36 = vpack.c.bf16 %v18002_v0, %v19209_v5 }
 0x616   :  { %v8475_v9 = vsel %vm8435_vm0, %v17811_v59, %v11165_v35  ;;  %v8474_v33 = vsel %vm8435_vm0, %v17829_v10, %v11164_v30  ;;  %v8477_v59 = vsel %vm8435_vm0, %v17913_v18, %v11170_v8  ;;  %v8476_v10 = vsel %vm8435_vm0, %v17870_v2, %v11169_v17 }
 0x617   :  { %8837 = vmatmul.mubr.bf16.gmra.mxu1 %v8504_v39  ;;  %v8503_v50 = vpack.c.bf16 %v8475_v9, %v8474_v33  ;;  %v11173_v15 = vpop.permute.xlu0 %11172  ;;  %v11178_v13 = vpop.permute.xlu1 %11177  ;;  %v8507_v34 = vpack.c.bf16 %v8477_v59, %v8476_v10 }
 0x618   :  { %8844 = vmatprep.mubr.bf16.mxu1 %v8510_v31  ;;  %v11175_v24 = vunpack.i.h.bf16 %v11173_v15  ;;  %v11174_v11 = vunpack.i.l.bf16 %v11173_v15  ;;  %v11179_v37 = vunpack.i.l.bf16 %v11178_v13  ;;  %v11180_v6 = vunpack.i.h.bf16 %v11178_v13 }
 0x619   :  { %8918 = vmatmul.mubr.bf16.gmra.mxu0 %v8498_v25 }
 0x61a   :  { %8925 = vmatprep.mubr.bf16.mxu0 %v8504_v39  ;;  %v8479_v18 = vsel %vm8435_vm0, %v17947_v56, %v11175_v24  ;;  %v8478_v2 = vsel %vm8435_vm0, %v17902_v14, %v11174_v11  ;;  %v8483_v57 = vsel %vm8435_vm0, %v17954_v52, %v11179_v37  ;;  %v8480_v14 = vsel %vm8435_vm0, %v17964_v51, %v11180_v6 }
 0x61b   :  { %v8511_v62 = vpack.c.bf16 %v8479_v18, %v8478_v2  ;;  %v8516_v16 = vpack.c.bf16 %v8449_v44, %v8483_v57  ;;  %v8412_v56 = vpop.permute.xlu0 %8411  ;;  %v8513_v51 = vpack.c.bf16 %v18002_v0, %v17991_v7 }
 0x61c   :  { %v8481_v49 = vsel %vm8435_vm0, %v17994_v28, %v8412_v56 }
 0x61d   :  { %v8515_v52 = vpack.c.bf16 %v8481_v49, %v8480_v14  ;;  %v18185_v14 = vld [vmem:[%s18342_s8] ss:$0 sm:$0xff] }
 0x61f   :  { %8845 = vmatmul.mubr.bf16.gmra.mxu1 %v8508_v43 }
 0x620   :  { %8852 = vmatprep.mubr.bf16.mxu1 %v8514_v23 }
 0x621   :  { %8926 = vmatmul.mubr.bf16.gmra.mxu0 %v8503_v50 }
 0x622   :  { %8933 = vmatprep.mubr.bf16.mxu0 %v8508_v43 }
 0x627   :  { %8853 = vmatmul.mubr.bf16.gmra.mxu1 %v8512_v58 }
 0x628   :  { %11039 = vmatprep.mubr.msk.bf16.mxu1 %vm8435_vm0, %v8488_v3 }
 0x629   :  { %8934 = vmatmul.mubr.bf16.gmra.mxu0 %v8507_v34 }
 0x62a   :  { %8941 = vmatprep.mubr.bf16.mxu0 %v8512_v58 }
 0x62f   :  { %11040 = vmatmul.mubr.msk.bf16.vlgmr.msra.gmra.mxu1 %vm8435_vm0, %v8492_v27 }
 0x630   :  { %11043 = vmatprep.mubr.msk.bf16.mxu1 %vm8435_vm0, %v8496_v45 }
 0x631   :  { %8942 = vmatmul.mubr.bf16.gmra.mxu0 %v8511_v62 }
 0x632   :  { %8949 = vmatprep.mubr.bf16.mxu0 %v8516_v16 }
 0x637   :  { %11044 = vmatmul.mubr.msk.bf16.gmra.mxu1 %vm8435_vm0, %v8500_v1 }
 0x638   :  { %11047 = vmatprep.mubr.msk.bf16.mxu1 %vm8435_vm0, %v8505_v19 }
 0x639   :  { %8950 = vmatmul.mubr.bf16.gmra.mxu0 %v8515_v52 }
 0x63f   :  { %11048 = vmatmul.mubr.msk.bf16.gmra.mxu1 %vm8435_vm0, %v8509_v21 }
 0x640   :  { %11051 = vmatprep.mubr.msk.bf16.mxu1 %vm8435_vm0, %v8513_v51 }
 0x647   :  { %11052 = vmatmul.mubr.msk.bf16.gmra.mxu1 %vm8435_vm0, %v8517_v36 }
 0x6af   :  { %v10875_v53 = vpop.f32.mrf.mxu1 }
 0x6b1   :  { %v10876_v60 = vpop.f32.mrf.mxu1 }
 0x6b2   :  { %v10877_v6 = vadd.f32 %v10876_v60, %v10875_v53 }
 0x6b3   :  { %v10878_v28 = vpop.f32.mrf.mxu1 }
 0x6b5   :  { %v10879_v46 = vpop.f32.mrf.mxu1 }
 0x6b6   :  { %v10880_v16 = vadd.f32 %v10879_v46, %v10878_v28  ;;  %v8799_v28 = vadd.f32 %v10877_v6, %v18185_v14 }
 0x6b7   :  { %v10881_v61 = vpop.f32.mrf.mxu1 }
 0x6b8   :  { %v8802_v46 = vadd.f32 %v10880_v16, %v18185_v14 }
 0x6b9   :  { %v10882_v40 = vpop.f32.mrf.mxu1 }
 0x6ba   :  { %v10883_v57 = vadd.f32 %v10882_v40, %v10881_v61 }
 0x6bb   :  { %v10884_v39 = vpop.f32.mrf.mxu1 }
 0x6bc   :  { %v8807_v21 = vadd.f32 %v10883_v57, %v18185_v14 }
 0x6bd   :  { %v10885_v20 = vpop.f32.mrf.mxu1 }
 0x6be   :  { %v10886_v49 = vadd.f32 %v10885_v20, %v10884_v39 }
 0x6bf   :  { %v10887_v42 = vpop.f32.mrf.mxu1 }
 0x6c0   :  { %v8810_v20 = vadd.f32 %v10886_v49, %v18185_v14 }
 0x6c1   :  { %v10939_v47 = vpop.f32.mrf.mxu0  ;;  %v10888_v7 = vpop.f32.mrf.mxu1 }
 0x6c2   :  { %v10889_v1 = vadd.f32 %v10888_v7, %v10887_v42 }
 0x6c3   :  { %v10940_v29 = vpop.f32.mrf.mxu0  ;;  %v10890_v54 = vpop.f32.mrf.mxu1 }
 0x6c4   :  { %v10941_v51 = vadd.f32 %v10940_v29, %v10939_v47  ;;  %v8815_v42 = vadd.f32 %v10889_v1, %v18185_v14 }
 0x6c5   :  { %v10942_v31 = vpop.f32.mrf.mxu0  ;;  %v10891_v63 = vpop.f32.mrf.mxu1 }
 0x6c6   :  { %v10892_v36 = vadd.f32 %v10891_v63, %v10890_v54 }
 0x6c7   :  { %v10943_v25 = vpop.f32.mrf.mxu0  ;;  %v10893_v55 = vpop.f32.mrf.mxu1 }
 0x6c8   :  { %v10944_v5 = vadd.f32 %v10943_v25, %v10942_v31  ;;  %v8818_v31 = vadd.f32 %v10892_v36, %v18185_v14  ;;  %v8896_v25 = vadd.f32 %v10941_v51, %v8799_v28 }
 0x6c9   :  { %v10945_v0 = vpop.f32.mrf.mxu0  ;;  %v10894_v48 = vpop.f32.mrf.mxu1 }
 0x6ca   :  { %v10895_v61 = vadd.f32 %v10894_v48, %v10893_v55  ;;  %v8899_v55 = vadd.f32 %v10944_v5, %v8802_v46 }
 0x6cb   :  { %v10946_v35 = vpop.f32.mrf.mxu0  ;;  %v10896_v30 = vpop.f32.mrf.mxu1 }
 0x6cc   :  { %v10947_v56 = vadd.f32 %v10946_v35, %v10945_v0  ;;  %v8823_v0 = vadd.f32 %v10895_v61, %v18185_v14 }
 0x6cd   :  { %v10948_v38 = vpop.f32.mrf.mxu0  ;;  %v10897_v41 = vpop.f32.mrf.mxu1 }
 0x6ce   :  { %v8904_v39 = vadd.f32 %v10947_v56, %v8807_v21  ;;  %v10898_v7 = vadd.f32 %v10897_v41, %v10896_v30 }
 0x6cf   :  { %v10949_v26 = vpop.f32.mrf.mxu0  ;;  %v10899_v4 = vpop.f32.mrf.mxu1 }
 0x6d0   :  { %v10950_v40 = vadd.f32 %v10949_v26, %v10948_v38 }
 0x6d1   :  { %v10951_v9 = vpop.f32.mrf.mxu0  ;;  %v10900_v33 = vpop.f32.mrf.mxu1 }
 0x6d2   :  { %v10901_v47 = vadd.f32 %v10900_v33, %v10899_v4  ;;  %v8907_v41 = vadd.f32 %v10950_v40, %v8810_v20  ;;  %v8826_v4 = vadd.f32 %v10898_v7, %v18185_v14 }
 0x6d3   :  { %v10952_v32 = vpop.f32.mrf.mxu0  ;;  %v10902_v43 = vpop.f32.mrf.mxu1 }
 0x6d4   :  { %v10953_v48 = vadd.f32 %v10952_v32, %v10951_v9  ;;  %v8831_v33 = vadd.f32 %v10901_v47, %v18185_v14  ;;  %v18214_v32 = vld [vmem:[%s18343_s9] ss:$0 sm:$0xff] }
 0x6d5   :  { %v10954_v12 = vpop.f32.mrf.mxu0  ;;  %v10903_v23 = vpop.f32.mrf.mxu1 }
 0x6d6   :  { %v10904_v38 = vadd.f32 %v10903_v23, %v10902_v43 }
 0x6d7   :  { %v10955_v50 = vpop.f32.mrf.mxu0  ;;  %v18146_v8 = vpop.f32.mrf.mxu1 }
 0x6d8   :  { %v10956_v35 = vadd.f32 %v10955_v50, %v10954_v12  ;;  %v8834_v50 = vadd.f32 %v10904_v38, %v18185_v14 }
 0x6d9   :  { %v18148_v17 = vpop.f32.mrf.mxu0  ;;  %v18150_v22 = vpop.f32.mrf.mxu1 }
 0x6da   :  { %v10907_v56 = vadd.f32 %v18150_v22, %v18146_v8  ;;  %v8912_v22 = vadd.f32 %v10953_v48, %v8815_v42 }
 0x6db   :  { %v10958_v44 = vpop.f32.mrf.mxu0  ;;  %v18152_v59 = vpop.f32.mrf.mxu1 }
 0x6dc   :  { %v10959_v16 = vadd.f32 %v10958_v44, %v18148_v17  ;;  %v8915_v44 = vadd.f32 %v10956_v35, %v8818_v31  ;;  %v8839_v36 = vadd.f32 %v10907_v56, %v18185_v14 }
 0x6dd   :  { %v18154_v10 = vpop.f32.mrf.mxu0  ;;  %v18156_v58 = vpop.f32.mrf.mxu1 }
 0x6de   :  { %v10910_v43 = vadd.f32 %v18156_v58, %v18152_v59  ;;  %v8920_v61 = vadd.f32 %v10959_v16, %v8823_v0 }
 0x6df   :  { %v18158_v15 = vpop.f32.mrf.mxu0  ;;  %v18160_v13 = vpop.f32.mrf.mxu1 }
 0x6e0   :  { %v10962_v59 = vadd.f32 %v18158_v15, %v18154_v10  ;;  %v8842_v40 = vadd.f32 %v10910_v43, %v18185_v14 }
 0x6e1   :  { %v18162_v3 = vpop.f32.mrf.mxu0  ;;  %v18164_v34 = vpop.f32.mrf.mxu1 }
 0x6e3   :  { %v18166_v24 = vpop.f32.mrf.mxu0  ;;  %v18168_v11 = vpop.f32.mrf.mxu1 }
 0x6e4   :  { %v10965_v42 = vadd.f32 %v18166_v24, %v18162_v3 }
 0x6e5   :  { %v18170_v37 = vpop.f32.mrf.mxu0  ;;  %v18172_v18 = vpop.f32.mrf.mxu1 }
 0x6e7   :  { %v18174_v2 = vpop.f32.mrf.mxu0  ;;  %v18176_v27 = vpop.f32.mrf.mxu1 }
 0x6e8   :  { %v10968_v3 = vadd.f32 %v18174_v2, %v18170_v37 }
 0x6e9   :  { %v18178_v45 = vpop.f32.mrf.mxu0  ;;  %v18180_v62 = vpop.f32.mrf.mxu1 }
 0x6ea   :  { %v10919_v24 = vadd.f32 %v18180_v62, %v18176_v27  ;;  %v8928_v27 = vadd.f32 %v10965_v42, %v8831_v33 }
 0x6eb   :  { %v18187_v19 = vpop.f32.mrf.mxu0  ;;  %v18189_v52 = vpop.f32.mrf.mxu1 }
 0x6ec   :  { %v10971_v31 = vadd.f32 %v18187_v19, %v18178_v45  ;;  %v8923_v45 = vadd.f32 %v10962_v59, %v8826_v4 }
 0x6ed   :  { %v18192_v53 = vpop.f32.mrf.mxu0  ;;  %v18194_v60 = vpop.f32.mrf.mxu1 }
 0x6ee   :  { %v10922_v16 = vadd.f32 %v18194_v60, %v18189_v52 }
 0x6ef   :  { %v18200_v29 = vpop.f32.mrf.mxu0  ;;  %v11041_v54 = vpop.f32.mrf.mxu1 }
 0x6f0   :  { %v9001_v63 = vadd.f32 %v11041_v54, %v8904_v39  ;;  %v10913_v39 = vadd.f32 %v18164_v34, %v18160_v13  ;;  %v10916_v54 = vadd.f32 %v18172_v18, %v18168_v11  ;;  %v10974_v19 = vadd.f32 %v18200_v29, %v18192_v53 }
 0x6f1   :  { %v18204_v26 = vpop.f32.mrf.mxu0  ;;  %v8992_v57 = vpop.f32.mrf.mxu1  ;;  %v8931_v29 = vadd.f32 %v10968_v3, %v8834_v50 }
 0x6f2   :  { %vm9057_vm2 = vcmp.gt.f32.partialorder %v9001_v63, 0.0  ;;  %v9073_v6 = vmul.f32 0.01, %v9001_v63  ;;  %v8993_v30 = vadd.f32 %v8992_v57, %v8896_v25  ;;  %v8847_v11 = vadd.f32 %v10913_v39, %v18185_v14 }
 0x6f3   :  { %v10976_v49 = vpop.f32.mrf.mxu0  ;;  %v11042_v9 = vpop.f32.mrf.mxu1  ;;  %v18254_v62 = vadd.f32 %v10916_v54, %v18185_v14  ;;  %v8936_v57 = vadd.f32 %v10971_v31, %v8839_v36 }
 0x6f4   :  { %vm9055_vm15 = vcmp.gt.f32.partialorder %v8993_v30, 0.0  ;;  %v9071_v12 = vmul.f32 0.01, %v8993_v30  ;;  %v9004_v23 = vadd.f32 %v11042_v9, %v8907_v41  ;;  %v9089_v8 = vsel %vm9057_vm2, %v9001_v63, %v9073_v6 }
 0x6f5   :  { %v18219_v1 = vpop.f32.mrf.mxu0  ;;  %v8995_v17 = vpop.f32.mrf.mxu1  ;;  %v9113_v5 = vmul.f32 %v18214_v32, %v9089_v8  ;;  %v10977_v41 = vadd.f32 %v10976_v49, %v18204_v26 }
 0x6f6   :  { %vm9058_vm3 = vcmp.gt.f32.partialorder %v9004_v23, 0.0  ;;  %v9074_v21 = vmul.f32 0.01, %v9004_v23  ;;  %v8996_v51 = vadd.f32 %v8995_v17, %v8899_v55  ;;  %v9087_v46 = vsel %vm9055_vm15, %v8993_v30, %v9071_v12 }
 0x6f7   :  { %v18226_v58 = vpop.f32.mrf.mxu0  ;;  %v11045_v28 = vpop.f32.mrf.mxu1  ;;  %v9134_v7 = vsel %vm9127_vm1, %v9113_v5, 0.0  ;;  %v9111_v10 = vmul.f32 %v18214_v32, %v9087_v46  ;;  %v8855_v30 = vadd.f32 %v10919_v24, %v18185_v14  ;;  %v8944_v60 = vadd.f32 %v10977_v41, %v8847_v11 }
 0x6f8   :  { %vm9056_vm4 = vcmp.gt.f32.partialorder %v8996_v51, 0.0  ;;  %v9072_v20 = vmul.f32 0.01, %v8996_v51  ;;  %v9090_v15 = vsel %vm9058_vm3, %v9004_v23, %v9074_v21  ;;  %9135 = vadd.xlane.f32.xlu0 %v9134_v7  ;;  %v9017_v4 = vadd.f32 %v11045_v28, %v8920_v61 }
 0x6f9   :  { %v9008_v47 = vpop.f32.mrf.mxu1  ;;  %v10981_v63 = vpop.f32.mrf.mxu0  ;;  %v9114_v34 = vmul.f32 %v18214_v32, %v9090_v15  ;;  %v9128_v25 = vsel %vm9127_vm1, %v9111_v10, 0.0  ;;  %v8939_v23 = vadd.f32 %v10974_v19, %v8842_v40  ;;  %v10980_v7 = vadd.f32 %v18226_v58, %v18219_v1 }
 0x6fa   :  { %v9009_v13 = vadd.f32 %v9008_v47, %v8912_v22  ;;  %v9088_v0 = vsel %vm9056_vm4, %v8996_v51, %v9072_v20  ;;  %9129 = vadd.xlane.f32.xlu1 %v9128_v25  ;;  %vm9061_vm8 = vcmp.gt.f32.partialorder %v9017_v4, 0.0  ;;  %v9077_v50 = vmul.f32 0.01, %v9017_v4 }
 0x6fb   :  { %v11046_v55 = vpop.f32.mrf.mxu1  ;;  %v9137_v48 = vsel %vm9127_vm1, %v9114_v34, 0.0  ;;  %v9112_v2 = vmul.f32 %v18214_v32, %v9088_v0  ;;  %v10982_v35 = vpop.f32.mrf.mxu0  ;;  %v8858_v19 = vadd.f32 %v10922_v16, %v18185_v14  ;;  %vm9323_vm15 = vcmask 1041409  }
 0x6fc   :  { %vm9059_vm5 = vcmp.gt.f32.partialorder %v9009_v13, 0.0  ;;  %v9075_v18 = vmul.f32 0.01, %v9009_v13  ;;  %9138 = vadd.xlane.f32.xlu0 %v9137_v48  ;;  %v10983_v9 = vadd.f32 %v10982_v35, %v10981_v63  ;;  %v9093_v54 = vsel %vm9061_vm8, %v9017_v4, %v9077_v50 }
 0x6fd   :  { %v9011_v37 = vpop.f32.mrf.mxu1  ;;  %v9131_v43 = vsel %vm9127_vm1, %v9112_v2, 0.0  ;;  %v10984_v8 = vpop.f32.mrf.mxu0  ;;  %vm9325_vm3 = vcmask 1042434   ;;  %vm9327_vm4 = vcmask 1043459   ;;  %vm9335_vm8 = vcmask 1047559  }
 0x6fe   :  { %v9012_v38 = vadd.f32 %v9011_v37, %v8915_v44  ;;  %v9091_v6 = vsel %vm9059_vm5, %v9009_v13, %v9075_v18  ;;  %v9020_v44 = vadd.f32 %v11046_v55, %v8923_v45  ;;  %v8952_v61 = vadd.f32 %v10983_v9, %v8855_v30 }
 0x6ff   :  { %v11049_v53 = vpop.f32.mrf.mxu1  ;;  %v9115_v17 = vmul.f32 %v18214_v32, %v9091_v6  ;;  %v10985_v40 = vpop.f32.mrf.mxu0  ;;  %v8947_v37 = vadd.f32 %v10980_v7, %v18254_v62  ;;  %vm9329_vm5 = vcmask 1044484  }
 0x700   :  { %vm9060_vm6 = vcmp.gt.f32.partialorder %v9012_v38, 0.0  ;;  %v9076_v33 = vmul.f32 0.01, %v9012_v38  ;;  %v9033_v56 = vadd.f32 %v11049_v53, %v8936_v57  ;;  %9132 = vadd.xlane.f32.xlu0 %v9131_v43  ;;  %v9078_v47 = vmul.f32 0.01, %v9020_v44 }
 0x701   :  { %v9024_v12 = vpop.f32.mrf.mxu1  ;;  %v9140_v36 = vsel %vm9127_vm1, %v9115_v17, 0.0  ;;  %v10986_v34 = vadd.f32 %v10985_v40, %v10984_v8  ;;  %vm9062_vm13 = vcmp.gt.f32.partialorder %v9020_v44, 0.0 }
 0x702   :  { %vm9065_vm7 = vcmp.gt.f32.partialorder %v9033_v56, 0.0  ;;  %v9081_v22 = vmul.f32 0.01, %v9033_v56  ;;  %v9025_v26 = vadd.f32 %v9024_v12, %v8928_v27  ;;  %v9092_v49 = vsel %vm9060_vm6, %v9012_v38, %v9076_v33 }
 0x703   :  { %v11050_v52 = vpop.f32.mrf.mxu1  ;;  %v9116_v28 = vmul.f32 %v18214_v32, %v9092_v49  ;;  %v9117_v38 = vmul.f32 %v18214_v32, %v9093_v54  ;;  %v8955_v57 = vadd.f32 %v10986_v34, %v8858_v19  ;;  %v9094_v30 = vsel %vm9062_vm13, %v9020_v44, %v9078_v47 }
 0x704   :  { %vm9063_vm9 = vcmp.gt.f32.partialorder %v9025_v26, 0.0  ;;  %v9079_v21 = vmul.f32 0.01, %v9025_v26  ;;  %v9036_v51 = vadd.f32 %v11050_v52, %v8939_v23  ;;  %v9097_v5 = vsel %vm9065_vm7, %v9033_v56, %v9081_v22  ;;  %9141 = vadd.xlane.f32.xlu0 %v9140_v36 }
 0x705   :  { %v9027_v59 = vpop.f32.mrf.mxu1  ;;  %v9121_v46 = vmul.f32 %v18214_v32, %v9097_v5  ;;  %v9143_v3 = vsel %vm9127_vm1, %v9116_v28, 0.0  ;;  %v9118_v16 = vmul.f32 %v18214_v32, %v9094_v30  ;;  %vm9331_vm6 = vcmask 1045509  }
 0x706   :  { %vm9066_vm10 = vcmp.gt.f32.partialorder %v9036_v51, 0.0  ;;  %v9082_v39 = vmul.f32 0.01, %v9036_v51  ;;  %v9028_v20 = vadd.f32 %v9027_v59, %v8931_v29  ;;  %v9095_v42 = vsel %vm9063_vm9, %v9025_v26, %v9079_v21 }
 0x707   :  { %v11053_v10 = vpop.f32.mrf.mxu1  ;;  %v9158_v15 = vsel %vm9127_vm1, %v9121_v46, 0.0  ;;  %v9119_v25 = vmul.f32 %v18214_v32, %v9095_v42  ;;  %v9146_v29 = vsel %vm9127_vm1, %v9117_v38, 0.0  ;;  %v9149_v12 = vsel %vm9127_vm1, %v9118_v16, 0.0 }
 0x708   :  { %vm9064_vm11 = vcmp.gt.f32.partialorder %v9028_v20, 0.0  ;;  %v9080_v31 = vmul.f32 0.01, %v9028_v20  ;;  %v9049_v63 = vadd.f32 %v11053_v10, %v8952_v61  ;;  %9159 = vadd.xlane.f32.xlu1 %v9158_v15  ;;  %v9098_v13 = vsel %vm9066_vm10, %v9036_v51, %v9082_v39  ;;  %9144 = vadd.xlane.f32.xlu0 %v9143_v3 }
 0x709   :  { %v9040_v24 = vpop.f32.mrf.mxu1  ;;  %v9122_v55 = vmul.f32 %v18214_v32, %v9098_v13  ;;  %v9152_v27 = vsel %vm9127_vm1, %v9119_v25, 0.0  ;;  %v9176_v21 = vstv %s18344_s10  ;;  %vm9333_vm7 = vcmask 1046534   ;;  %s11901_s10 = smov 16  }
 0x70a   :  { %vm9069_vm12 = vcmp.gt.f32.partialorder %v9049_v63, 0.0  ;;  %v9085_v1 = vmul.f32 0.01, %v9049_v63  ;;  %v9041_v58 = vadd.f32 %v9040_v24, %v8944_v60  ;;  %v9096_v0 = vsel %vm9064_vm11, %v9028_v20, %v9080_v31 }
 0x70b   :  { %v11054_v11 = vpop.f32.mrf.mxu1  ;;  %v9161_v18 = vsel %vm9127_vm1, %v9122_v55, 0.0  ;;  %v9120_v45 = vmul.f32 %v18214_v32, %v9096_v0  ;;  %vm9440_vm9 = vcmask 64512   ;;  %vm9442_vm10 = vcmask 130048  }
 0x70c   :  { %v9083_v48 = vmul.f32 0.01, %v9041_v58  ;;  %9162 = vadd.xlane.f32.xlu1 %v9161_v18  ;;  %v9101_v2 = vsel %vm9069_vm12, %v9049_v63, %v9085_v1  ;;  %vm9067_vm14 = vcmp.gt.f32.partialorder %v9041_v58, 0.0  ;;  %9153 = vadd.xlane.f32.xlu0 %v9152_v27  ;;  %v9052_v4 = vadd.f32 %v11054_v11, %v8955_v57  ;;  %v19211_v57 = vld [vmem:[#allocation40_spill] sm:$0xff] }
 0x70d   :  { %v9043_v35 = vpop.f32.mrf.mxu1  ;;  %v9155_v41 = vsel %vm9127_vm1, %v9120_v45, 0.0  ;;  %v9125_v14 = vmul.f32 %v18214_v32, %v9101_v2  ;;  %v19210_v11 = vlaneseq  ;;  %vm9444_vm11 = vcmask 195584  }
 0x70e   :  { %v9044_v6 = vadd.f32 %v9043_v35, %v8947_v37  ;;  %v9099_v62 = vsel %vm9067_vm14, %v9041_v58, %v9083_v48  ;;  %v9086_v9 = vmul.f32 0.01, %v9052_v4  ;;  %vm9070_vm2 = vcmp.gt.f32.partialorder %v9052_v4, 0.0 }
 0x70f   :  { %v9170_v33 = vsel %vm9127_vm1, %v9125_v14, 0.0  ;;  %v9123_v56 = vmul.f32 %v18214_v32, %v9099_v62  ;;  %v9258_v18 = vand.u32 127, %v19210_v11  ;;  %vm9447_vm12 = vcmask 326656  }
 0x710   :  { %v9084_v53 = vmul.f32 0.01, %v9044_v6  ;;  %9156 = vadd.xlane.f32.xlu1 %v9155_v41  ;;  %vm9068_vm0 = vcmp.gt.f32.partialorder %v9044_v6, 0.0  ;;  %9147 = vadd.xlane.f32.xlu0 %v9146_v29  ;;  %v9102_v8 = vsel %vm9070_vm2, %v9052_v4, %v9086_v9  ;;  %vm9449_vm13 = vcmask 392192  }
 0x711   :  { %v9164_v23 = vsel %vm9127_vm1, %v9123_v56, 0.0  ;;  %v9126_v26 = vmul.f32 %v18214_v32, %v9102_v8  ;;  %vm9451_vm14 = vcmask 457728  }
 0x712   :  { %v9100_v43 = vsel %vm9068_vm0, %v9044_v6, %v9084_v53  ;;  %v18296_v6 = vsub.s32 %v9258_v18, %v19211_v57  ;;  %vm9453_vm0 = vcmask 517120  }
 0x713   :  { %v9124_v17 = vmul.f32 %v18214_v32, %v9100_v43  ;;  %v9173_v49 = vsel %vm9127_vm1, %v9126_v26, 0.0 }
 0x714   :  { %9171 = vadd.xlane.f32.xlu1 %v9170_v33  ;;  %9150 = vadd.xlane.f32.xlu0 %v9149_v12 }
 0x715   :  { %v9167_v22 = vsel %vm9127_vm1, %v9124_v17, 0.0 }
 0x718   :  { %9165 = vadd.xlane.f32.xlu1 %v9164_v23 }
 0x71c   :  { %9168 = vadd.xlane.f32.xlu1 %v9167_v22 }
 0x720   :  { %9174 = vadd.xlane.f32.xlu1 %v9173_v49 }
 0x781   :  { %v9136_v50 = vpop.xlane.xlu0 %9135 }
 0x782   :  { %v9179_v28 = vadd.f32 %v9176_v21, %v9136_v50 }
 0x783   :  { %v9130_v60 = vpop.xlane.xlu1 %9129 }
 0x784   :  { %v9177_v59 = vadd.f32 %v9176_v21, %v9130_v60 }
 0x785   :  { %v9139_v44 = vpop.xlane.xlu0 %9138 }
 0x786   :  { %v9180_v32 = vadd.f32 %v9176_v21, %v9139_v44 }
 0x789   :  { %v9133_v52 = vpop.xlane.xlu0 %9132 }
 0x78a   :  { %v9178_v5 = vadd.f32 %v9176_v21, %v9133_v52 }
 0x78c   :  { %11865 = vtanh.f32 %v9178_v5 }
 0x78d   :  { %v9142_v51 = vpop.xlane.xlu0 %9141  ;;  %11867 = vtanh.f32 %v9177_v59 }
 0x78e   :  { %v9181_v40 = vadd.f32 %v9176_v21, %v9142_v51  ;;  %11869 = vtanh.f32 %v9179_v28 }
 0x78f   :  { %11871 = vtanh.f32 %v9180_v32 }
 0x791   :  { %v9160_v36 = vpop.xlane.xlu1 %9159  ;;  %v9145_v61 = vpop.xlane.xlu0 %9144 }
 0x792   :  { %v9187_v42 = vadd.f32 %v9176_v21, %v9160_v36  ;;  %v9182_v47 = vadd.f32 %v9176_v21, %v9145_v61 }
 0x795   :  { %v9163_v46 = vpop.xlane.xlu1 %9162  ;;  %v9154_v39 = vpop.xlane.xlu0 %9153 }
 0x796   :  { %v9185_v20 = vadd.f32 %v9176_v21, %v9154_v39  ;;  %v9188_v54 = vadd.f32 %v9176_v21, %v9163_v46 }
 0x798   :  { %11873 = vtanh.f32 %v9185_v20 }
 0x799   :  { %v9157_v7 = vpop.xlane.xlu1 %9156  ;;  %11875 = vtanh.f32 %v9181_v40  ;;  %v9148_v15 = vpop.xlane.xlu0 %9147 }
 0x79a   :  { %v9186_v10 = vadd.f32 %v9176_v21, %v9157_v7  ;;  %v9183_v31 = vadd.f32 %v9176_v21, %v9148_v15  ;;  %v11866_v24 = vpop.eup %11865  ;;  %v11898_v7 = vmov 1983009808  }
 0x79b   :  { %v11868_v55 = vpop.eup %11867  ;;  %v9210_v58 = vmul.f32 0.5, %v11866_v24 }
 0x79c   :  { %11877 = vtanh.f32 %v9186_v10  ;;  %v11870_v0 = vpop.eup %11869  ;;  %v9209_v48 = vmul.f32 0.5, %v11868_v55 }
 0x79d   :  { %11879 = vtanh.f32 %v9187_v42  ;;  %v9172_v63 = vpop.xlane.xlu1 %9171  ;;  %v9151_v13 = vpop.xlane.xlu0 %9150  ;;  %v9226_v35 = vadd.f32 0.5, %v9210_v58  ;;  %v9211_v30 = vmul.f32 0.5, %v11870_v0 }
 0x79e   :  { %11881 = vtanh.f32 %v9182_v47  ;;  %v9184_v34 = vadd.f32 %v9176_v21, %v9151_v13  ;;  %v9191_v3 = vadd.f32 %v9176_v21, %v9172_v63  ;;  %v11872_v19 = vpop.eup %11871  ;;  %v9225_v4 = vadd.f32 0.5, %v9209_v48 }
 0x79f   :  { %11883 = vtanh.f32 %v9183_v31  ;;  %v9212_v33 = vmul.f32 0.5, %v11872_v19  ;;  %v9266_v9 = vrot.slane %v9226_v35, %v18296_v6  ;;  %v9227_v23 = vadd.f32 0.5, %v9211_v30 }
 0x7a0   :  { %11885 = vtanh.f32 %v9188_v54  ;;  %v9262_v22 = vrot.slane %v9225_v4, %v18296_v6  ;;  %v9348_v47 = vunpack.c.l.s4 %v11898_v7  ;;  %v11899_v35 = vmov 1934713408  }
 0x7a1   :  { %v9166_v25 = vpop.xlane.xlu1 %9165  ;;  %11887 = vtanh.f32 %v9184_v34  ;;  %v9228_v44 = vadd.f32 0.5, %v9212_v33  ;;  %v9270_v59 = vrot.slane %v9227_v23, %v18296_v6 }
 0x7a2   :  { %v9189_v1 = vadd.f32 %v9176_v21, %v9166_v25  ;;  %11889 = vtanh.f32 %v9191_v3  ;;  %v9324_v60 = vsel %vm9323_vm15, %v9266_v9, %v9262_v22 }
 0x7a3   :  { %v9326_v39 = vsel %vm9325_vm3, %v9270_v59, %v9324_v60  ;;  %v9274_v10 = vrot.slane %v9228_v44, %v18296_v6 }
 0x7a4   :  { %11891 = vtanh.f32 %v9189_v1 }
 0x7a5   :  { %v9169_v45 = vpop.xlane.xlu1 %9168  ;;  %v11874_v2 = vpop.eup %11873  ;;  %v9328_v25 = vsel %vm9327_vm4, %v9274_v10, %v9326_v39 }
 0x7a6   :  { %v9190_v37 = vadd.f32 %v9176_v21, %v9169_v45  ;;  %v11876_v27 = vpop.eup %11875  ;;  %v9217_v53 = vmul.f32 0.5, %v11874_v2 }
 0x7a7   :  { %v9213_v17 = vmul.f32 0.5, %v11876_v27  ;;  %v9349_v27 = vunpack.c.0.s8 %v9348_v47 }
 0x7a8   :  { %11893 = vtanh.f32 %v9190_v37  ;;  %v9233_v49 = vadd.f32 0.5, %v9217_v53 }
 0x7a9   :  { %v11878_v38 = vpop.eup %11877  ;;  %v9175_v41 = vpop.xlane.xlu1 %9174  ;;  %v9229_v61 = vadd.f32 0.5, %v9213_v17  ;;  %v9352_v9 = vsub.s32 %v9349_v27, %v19211_v57  ;;  %v11900_v17 = vmov 0.0  }
 0x7aa   :  { %v11880_v14 = vpop.eup %11879  ;;  %v9218_v62 = vmul.f32 0.5, %v11878_v38  ;;  %v9192_v29 = vadd.f32 %v9176_v21, %v9175_v41  ;;  %v9294_v40 = vrot.slane %v9233_v49, %v18296_v6  ;;  %v9379_v38 = vunpack.c.l.s4 %v11899_v35 }
 0x7ab   :  { %v11882_v16 = vpop.eup %11881  ;;  %v9219_v8 = vmul.f32 0.5, %v11880_v14  ;;  %v9278_v13 = vrot.slane %v9229_v61, %v18296_v6 }
 0x7ac   :  { %v11884_v56 = vpop.eup %11883  ;;  %v9234_v43 = vadd.f32 0.5, %v9218_v62  ;;  %11895 = vtanh.f32 %v9192_v29  ;;  %v9214_v26 = vmul.f32 0.5, %v11882_v16 }
 0x7ad   :  { %v11886_v12 = vpop.eup %11885  ;;  %v9215_v52 = vmul.f32 0.5, %v11884_v56  ;;  %v9235_v28 = vadd.f32 0.5, %v9219_v8  ;;  %v9330_v37 = vsel %vm9329_vm5, %v9278_v13, %v9328_v25 }
 0x7ae   :  { %v11888_v50 = vpop.eup %11887  ;;  %v9220_v21 = vmul.f32 0.5, %v11886_v12  ;;  %v9298_v51 = vrot.slane %v9234_v43, %v18296_v6  ;;  %v9230_v46 = vadd.f32 0.5, %v9214_v26  ;;  %v9380_v43 = vunpack.c.0.s8 %v9379_v38 }
 0x7af   :  { %v9216_v5 = vmul.f32 0.5, %v11888_v50  ;;  %v11890_v36 = vpop.eup %11889  ;;  %v9231_v20 = vadd.f32 0.5, %v9215_v52  ;;  %v9302_v34 = vrot.slane %v9235_v28, %v18296_v6 }
 0x7b0   :  { %v9236_v15 = vadd.f32 0.5, %v9220_v21  ;;  %v9337_v54 = vsel %vm9323_vm15, %v9298_v51, %v9294_v40  ;;  %v9223_v3 = vmul.f32 0.5, %v11890_v36  ;;  %v9282_v55 = vrot.slane %v9230_v46, %v18296_v6 }
 0x7b1   :  { %v11892_v32 = vpop.eup %11891  ;;  %v9232_v31 = vadd.f32 0.5, %v9216_v5  ;;  %v9286_v58 = vrot.slane %v9231_v20, %v18296_v6  ;;  %v9338_v0 = vsel %vm9325_vm3, %v9302_v34, %v9337_v54  ;;  %v9383_v50 = vsub.s32 %v9380_v43, %v19211_v57 }
 0x7b2   :  { %v9221_v42 = vmul.f32 0.5, %v11892_v32  ;;  %v9306_v18 = vrot.slane %v9236_v15, %v18296_v6  ;;  %v9239_v2 = vadd.f32 0.5, %v9223_v3  ;;  %v9332_v30 = vsel %vm9331_vm6, %v9282_v55, %v9330_v37 }
 0x7b3   :  { %v9290_v45 = vrot.slane %v9232_v31, %v18296_v6  ;;  %v9334_v62 = vsel %vm9333_vm7, %v9286_v58, %v9332_v30 }
 0x7b4   :  { %v9237_v24 = vadd.f32 0.5, %v9221_v42  ;;  %v9339_v41 = vsel %vm9327_vm4, %v9306_v18, %v9338_v0  ;;  %v9318_v56 = vrot.slane %v9239_v2, %v18296_v6 }
 0x7b5   :  { %v11894_v63 = vpop.eup %11893  ;;  %v9336_v33 = vsel %vm9335_vm8, %v9290_v45, %v9334_v62 }
 0x7b6   :  { %v9222_v1 = vmul.f32 0.5, %v11894_v63  ;;  %v9310_v11 = vrot.slane %v9237_v24, %v18296_v6  ;;  %v9346_v8 = vcombine.high %v9336_v33, %v11900_v17  ;;  %v9353_v26 = vrot.slane %v9336_v33, %v9352_v9 }
 0x7b8   :  { %v9238_v19 = vadd.f32 0.5, %v9222_v1  ;;  %v9340_v53 = vsel %vm9329_vm5, %v9310_v11, %v9339_v41  ;;  %v9360_v21 = vrot.slane %v9346_v8, %v9352_v9 }
 0x7b9   :  { %v11896_v48 = vpop.eup %11895 }
 0x7ba   :  { %v9314_v14 = vrot.slane %v9238_v19, %v18296_v6  ;;  %v9224_v4 = vmul.f32 0.5, %v11896_v48 }
 0x7bc   :  { %v9341_v29 = vsel %vm9331_vm6, %v9314_v14, %v9340_v53  ;;  %v9240_v16 = vadd.f32 0.5, %v9224_v4 }
 0x7bd   :  { %v9342_v23 = vsel %vm9333_vm7, %v9318_v56, %v9341_v29 }
 0x7be   :  { %v9322_v12 = vrot.slane %v9240_v16, %v18296_v6 }
 0x7c0   :  { %v9343_v22 = vsel %vm9335_vm8, %v9322_v12, %v9342_v23 }
 0x7c1   :  { %v9368_v49 = vrot.slane %v9343_v22, %v9352_v9  ;;  %v9361_v44 = vcombine.high %v9343_v22, %v11900_v17 }
 0x7c3   :  { %v9377_v52 = vcombine.high %v9353_v26, %v9368_v49  ;;  %v9376_v60 = vcombine.low %v9353_v26, %v9368_v49  ;;  %v9375_v51 = vrot.slane %v9361_v44, %v9352_v9 }
 0x7c5   :  { %v9391_v5 = vrot.slane %v9377_v52, %v9383_v50  ;;  %v9384_v36 = vrot.slane %v9376_v60, %v9383_v50  ;;  %v9392_v59 = vcombine.low %v9360_v21, %v9375_v51  ;;  %v9393_v32 = vcombine.high %v9360_v21, %v9375_v51 }
 0x7c7   :  { %9417 = vrot.lane.b32.xlu1 %v9391_v5, %s11901_s10  ;;  %v9408_v6 = vcombine.high %v9384_v36, %v11900_v17  ;;  %v9409_v61 = vcombine.high %v9391_v5, %v11900_v17  ;;  %v9400_v28 = vrot.slane %v9392_v59, %v9383_v50  ;;  %v9407_v46 = vrot.slane %v9393_v32, %v9383_v50 }
 0x7c9   :  { %9413 = vrot.lane.b32.xlu0 %v9408_v6, %s11902_s5  ;;  %v9410_v57 = vcombine.high %v9400_v28, %v11900_v17  ;;  %v9411_v40 = vcombine.high %v9407_v46, %v11900_v17 }
 0x7cb   :  { %9421 = vrot.lane.b32.xlu1 %v9409_v61, %s11903_s3 }
 0x7cd   :  { %9425 = vrot.lane.b32.xlu0 %v9400_v28, %s11904_s6 }
 0x7cf   :  { %9429 = vrot.lane.b32.xlu1 %v9410_v57, %s11905_s18 }
 0x7d1   :  { %9433 = vrot.lane.b32.xlu0 %v9407_v46, %s11906_s19 }
 0x7d3   :  { %9437 = vrot.lane.b32.xlu1 %v9411_v40, %s11907_s2 }
 0x839   :  { %v9418_v39 = vpop.permute.xlu1 %9417 }
 0x83b   :  { %v9414_v20 = vpop.permute.xlu0 %9413 }
 0x83c   :  { %v9441_v42 = vsel %vm9440_vm9, %v9384_v36, %v9414_v20 }
 0x83d   :  { %v9422_v7 = vpop.permute.xlu1 %9421  ;;  %v9443_v47 = vsel %vm9442_vm10, %v9441_v42, %v9418_v39 }
 0x83e   :  { %v9445_v10 = vsel %vm9444_vm11, %v9443_v47, %v9422_v7 }
 0x83f   :  { %v9426_v15 = vpop.permute.xlu0 %9425 }
 0x840   :  { %v9446_v54 = vsel %vm9127_vm1, %v9445_v10, %v9426_v15 }
 0x841   :  { %v9430_v31 = vpop.permute.xlu1 %9429 }
 0x842   :  { %v9448_v63 = vsel %vm9447_vm12, %v9446_v54, %v9430_v31 }
 0x843   :  { %v9434_v13 = vpop.permute.xlu0 %9433 }
 0x844   :  { %v9450_v34 = vsel %vm9449_vm13, %v9448_v63, %v9434_v13 }
 0x845   :  { %v9438_v3 = vpop.permute.xlu1 %9437 }
 0x846   :  { %v9452_v24 = vsel %vm9451_vm14, %v9450_v34, %v9438_v3 }
 0x847   :  { %9454 = vst.msk [vmem:[%s18345_s11] sm:$0x3] %vm9453_vm0, %v9452_v24 }

</bundles_post_ra>
